<compile_context>
chip_gen: v7x
topology: tpu7x:2x2x1
jax: 0.10.0
libtpu: 0.0.40
codegen_flags: <defaults>
</compile_context>

<pallas_src>
import functools

import numpy as np
import jax
import jax.numpy as jnp
from jax.experimental import pallas as pl
from jax.experimental.pallas import tpu as pltpu

CHANNELS = 3
IMG_SIZE = 16          # small stand-in for img_size=64  (init_size = IMG_SIZE // 4)
NOISE_DIM = 32         # small stand-in for noise_dim=100
HIDDEN = 128           # fixed by the Generator architecture (BatchNorm2d(128), conv widths)
BATCH = 2
INIT_SIZE = IMG_SIZE // 4      # 4
MID_SIZE = 2 * INIT_SIZE       # 8  (after first upsample)


# ------------------------------ fused Pallas kernel ------------------------------

def _generator_kernel(z_ref, fcw_ref, fcb_ref, g0_ref, b0_ref,
                      w1_ref, g1_ref, b1_ref,
                      w2_ref, g2_ref, b2_ref,
                      u1_ref, s1_ref,
                      w3_hbm, b3_ref, u2_hbm,
                      out_ref,
                      w3_vmem, u2_vmem, dma_sem,
                      *, B, S0, C):
    f32, bf16 = jnp.float32, jnp.bfloat16
    P0 = S0 * S0

    # Prefetch the two largest weights (only needed by the final conv) so their DMA
    # overlaps the fc / residual-block compute below.
    cp_w3 = pltpu.make_async_copy(w3_hbm, w3_vmem, dma_sem.at[0])
    cp_u2 = pltpu.make_async_copy(u2_hbm, u2_vmem, dma_sem.at[1])
    cp_w3.start()
    cp_u2.start()

    def batchnorm(x, g_ref, b_ref, relu=False):
        # PyTorch training-mode BatchNorm2d: per-channel batch stats, biased variance,
        # eps=1e-5, affine gamma/beta.  Two-pass variance, all in f32.
        mean = jnp.mean(x, axis=0, keepdims=True)
        cent = x - mean
        var = jnp.mean(cent * cent, axis=0, keepdims=True)
        y = cent * (g_ref[...] * jax.lax.rsqrt(var + 1e-5)) + b_ref[...]
        return jnp.maximum(y, 0.0) if relu else y

    def conv3x3(x_b16, w_ref, map_ref):
        # 3x3 "same" conv fused with an (optional) 2x nearest-neighbour upsample:
        #     y = sum_t  map[t] @ (x @ w[t])
        # map[t]: precomputed 0/1 upsample+shift matrix (all-zero rows give the conv's
        # zero padding); w[t]: (Cin, Cout) weight slice of tap t = ky*3 + kx.
        acc = None
        for t in range(9):
            v = jnp.dot(x_b16, w_ref[t], preferred_element_type=f32)
            y = jnp.dot(map_ref[t], v.astype(bf16), preferred_element_type=f32)
            acc = y if acc is None else acc + y
        return acc

    # ---------------- fc (Linear) + BatchNorm2d(128) ----------------
    # fc_w columns are pre-permuted so column index = (h*S0 + w)*C + c (NHWC order), so the
    # reshape below yields rows ordered (b, h, w) with channels lane-dense.
    fc = jnp.dot(z_ref[...].astype(bf16), fcw_ref[...],
                 preferred_element_type=f32) + fcb_ref[...]            # (B, P0*C)
    x0 = batchnorm(fc.reshape(B * P0, C), g0_ref, b0_ref)              # (B*P0, C)
    x0b = x0.astype(bf16)

    # ---------------- Upsample x2 + ResidualBlock conv1 (bias=False) -> BN -> ReLU ----------------
    h1 = conv3x3(x0b, w1_ref, u1_ref)                                  # (B*S1*S1, C)
    y1b = batchnorm(h1, g1_ref, b1_ref, relu=True).astype(bf16)

    # Identity (residual) path = plain 2x upsample = centre tap (no shift, no mask).
    x_up = jnp.dot(u1_ref[4], x0b, preferred_element_type=f32)         # (B*S1*S1, C)

    # ---------------- ResidualBlock conv2 (bias=False) -> BN, residual add ----------------
    h2 = conv3x3(y1b, w2_ref, s1_ref)                                  # (B*S1*S1, C)
    x2b = (x_up + batchnorm(h2, g2_ref, b2_ref)).astype(bf16)

    # ---------------- Upsample x2 + Conv2d(128 -> channels, bias) + Tanh ----------------
    cp_w3.wait()
    cp_u2.wait()
    h3 = conv3x3(x2b, w3_vmem, u2_vmem) + b3_ref[...]                  # (B*S2*S2, C)
    out_ref[...] = jnp.tanh(h3)


# ------------------------------ wrapper ------------------------------

def _vmem_full_spec(x):
    shape = tuple(int(d) for d in x.shape)
    return pl.BlockSpec(shape, lambda *_: (0,) * len(shape))


def generator_forward(z, params):
    B = z.shape[0]
    S0, C = INIT_SIZE, HIDDEN
    S2 = 4 * S0
    R2 = B * S2 * S2

    kern = functools.partial(_generator_kernel, B=B, S0=S0, C=C)

    inputs = (z, params["fc_w"], params["fc_b"],
              params["bn0_g"], params["bn0_b"],
              params["rb_w1"], params["rb_bn1_g"], params["rb_bn1_b"],
              params["rb_w2"], params["rb_bn2_g"], params["rb_bn2_b"],
              params["up1_map"], params["shift_map"],
              params["out_w"], params["out_b"], params["up2_map"])

    # out_w (13) and up2_map (15) stay in HBM and are manually DMA'd inside the kernel so
    # their copy overlaps the earlier compute.
    hbm_idx = {13, 15}
    in_specs = [pl.BlockSpec(memory_space=pl.ANY) if i in hbm_idx else _vmem_full_spec(x)
                for i, x in enumerate(inputs)]

    out2d = pl.pallas_call(
        kern,
        out_shape=jax.ShapeDtypeStruct((R2, C), jnp.float32),
        grid=(1,),
        in_specs=in_specs,
        out_specs=pl.BlockSpec((R2, C), lambda *_: (0, 0)),
        scratch_shapes=[
            pltpu.VMEM(tuple(map(int, params["out_w"].shape)), jnp.bfloat16),    # w3 taps
            pltpu.VMEM(tuple(map(int, params["up2_map"].shape)), jnp.bfloat16),  # up2 maps
            pltpu.SemaphoreType.DMA((2,)),
        ],
        compiler_params=pltpu.CompilerParams(
            dimension_semantics=("arbitrary",),
            vmem_limit_bytes=16 * 1024 * 1024,
        ),
    )(*inputs)

    img = out2d.reshape(B, S2, S2, C)[:, :, :, :CHANNELS]   # drop zero-padded Cout lanes
    return jnp.transpose(img, (0, 3, 1, 2))                 # NCHW (B, 3, H, W)


# ------------------------------ parameters ------------------------------

def _conv_taps(w_oihw, cout_pad=None):
    # PyTorch conv weight (Cout, Cin, 3, 3) -> (9, Cin, Cout), tap index t = ky*3 + kx.
    cout, cin = w_oihw.shape[0], w_oihw.shape[1]
    w = jnp.transpose(w_oihw, (2, 3, 1, 0)).reshape(9, cin, cout)
    if cout_pad is not None and cout_pad > cout:
        w = jnp.pad(w, ((0, 0), (0, 0), (0, cout_pad - cout)))
    return w.astype(jnp.bfloat16)


def _shift_upsample_maps(B, Hin, Hout, up):
    # 0/1 matrices (9, B*Hout^2, B*Hin^2) folding the 3x3 zero-padded conv tap shifts with
    # a nearest-neighbour x`up` upsample (up=1 -> plain shift matrices).
    # Row/col index = b*H*H + h*H + w (NHWC rows; channels live on lanes).
    Rout, Rin = B * Hout * Hout, B * Hin * Hin
    m = np.zeros((9, Rout, Rin), np.float32)
    r = np.arange(Rout)
    b = r // (Hout * Hout)
    h = (r // Hout) % Hout
    w = r % Hout
    for ky in range(3):
        for kx in range(3):
            hs, ws = h + ky - 1, w + kx - 1
            ok = (hs >= 0) & (hs < Hout) & (ws >= 0) & (ws < Hout)
            src = b[ok] * (Hin * Hin) + (hs[ok] // up) * Hin + (ws[ok] // up)
            m[ky * 3 + kx, r[ok], src] = 1.0
    return jnp.asarray(m, jnp.bfloat16)


def init_params(key):
    ks = jax.random.split(key, 6)
    s = INIT_SIZE
    fc_out = HIDDEN * s * s

    # raw (PyTorch-layout) parameters; also used by the plain-JAX reference.
    fc_w_pt = jax.random.normal(ks[0], (fc_out, NOISE_DIM), jnp.float32) * 0.05   # (out, in)
    fc_b_pt = jax.random.normal(ks[1], (fc_out,), jnp.float32) * 0.05
    rb_w1 = jax.random.normal(ks[2], (HIDDEN, HIDDEN, 3, 3), jnp.float32) * 0.05
    rb_w2 = jax.random.normal(ks[3], (HIDDEN, HIDDEN, 3, 3), jnp.float32) * 0.05
    out_w = jax.random.normal(ks[4], (CHANNELS, HIDDEN, 3, 3), jnp.float32) * 0.05
    out_b = jax.random.normal(ks[5], (CHANNELS,), jnp.float32) * 0.05

    raw = {"fc_w": fc_w_pt, "fc_b": fc_b_pt, "rb_w1": rb_w1, "rb_w2": rb_w2,
           "out_w": out_w, "out_b": out_b}

    # fc weight/bias columns permuted to NHWC order (column = (h*s + w)*128 + c), so the
    # in-kernel reshape of the fc output directly yields (B*s*s, 128) rows.
    fc_w_nhwc = (fc_w_pt.reshape(HIDDEN, s, s, NOISE_DIM)
                 .transpose(1, 2, 0, 3).reshape(fc_out, NOISE_DIM).T)      # (K, fc_out)
    fc_b_nhwc = fc_b_pt.reshape(HIDDEN, s, s).transpose(1, 2, 0).reshape(1, fc_out)

    ones_c = jnp.ones((1, HIDDEN), jnp.float32)
    zeros_c = jnp.zeros((1, HIDDEN), jnp.float32)
    out_b_pad = jnp.zeros((1, HIDDEN), jnp.float32).at[0, :CHANNELS].set(out_b)

    params = {
        "fc_w": fc_w_nhwc.astype(jnp.bfloat16), "fc_b": fc_b_nhwc,
        "bn0_g": ones_c, "bn0_b": zeros_c,
        "rb_w1": _conv_taps(rb_w1), "rb_bn1_g": ones_c, "rb_bn1_b": zeros_c,
        "rb_w2": _conv_taps(rb_w2), "rb_bn2_g": ones_c, "rb_bn2_b": zeros_c,
        "out_w": _conv_taps(out_w, cout_pad=HIDDEN), "out_b": out_b_pad,
        # precomputed 0/1 MXU operands folding upsample + conv tap shifts:
        "up1_map": _shift_upsample_maps(BATCH, INIT_SIZE, MID_SIZE, 2),    # (9, 128, 32)
        "shift_map": _shift_upsample_maps(BATCH, MID_SIZE, MID_SIZE, 1),   # (9, 128, 128)
        "up2_map": _shift_upsample_maps(BATCH, MID_SIZE, IMG_SIZE, 2),     # (9, 512, 128)
    }
    return params, raw


# ------------------------------ plain-JAX reference ------------------------------

def _ref_bn_nchw(x):
    mean = jnp.mean(x, axis=(0, 2, 3), keepdims=True)
    var = jnp.mean((x - mean) ** 2, axis=(0, 2, 3), keepdims=True)
    return (x - mean) * jax.lax.rsqrt(var + 1e-5)   # gamma=1, beta=0 (fresh module)


def _ref_conv_nchw(x, w, b=None):
    y = jax.lax.conv_general_dilated(
        x, w, window_strides=(1, 1), padding=((1, 1), (1, 1)),
        dimension_numbers=("NCHW", "OIHW", "NCHW"),
        precision=jax.lax.Precision.HIGHEST)
    if b is not None:
        y = y + b.reshape(1, -1, 1, 1)
    return y


def _ref_up2(x):
    return jnp.repeat(jnp.repeat(x, 2, axis=2), 2, axis=3)


def reference_forward(z, raw):
    out = jnp.dot(z, raw["fc_w"].T, precision=jax.lax.Precision.HIGHEST) + raw["fc_b"]
    x = out.reshape(z.shape[0], HIDDEN, INIT_SIZE, INIT_SIZE)
    x = _ref_bn_nchw(x)
    x = _ref_up2(x)
    y = jnp.maximum(_ref_bn_nchw(_ref_conv_nchw(x, raw["rb_w1"])), 0.0)
    y = _ref_bn_nchw(_ref_conv_nchw(y, raw["rb_w2"]))
    x = x + y
    x = _ref_up2(x)
    return jnp.tanh(_ref_conv_nchw(x, raw["out_w"], raw["out_b"]))


# ---------------------------------- main ----------------------------------

if __name__ == "__main__":
    key = jax.random.PRNGKey(0)
    k_params, k_z = jax.random.split(key)

    params, raw = init_params(k_params)
    z = jax.random.normal(k_z, (BATCH, NOISE_DIM), jnp.float32)

    fwd = jax.jit(generator_forward)
    img = fwd(z, params)
    jax.block_until_ready(img)

    assert img.shape == (BATCH, CHANNELS, IMG_SIZE, IMG_SIZE), img.shape
    assert img.dtype == jnp.float32
    assert bool(jnp.all(jnp.isfinite(img)))
    assert bool(jnp.all(jnp.abs(img) <= 1.0 + 1e-6))   # tanh output range

    # numerical check against a plain-JAX f32 reference of the PyTorch module.
    # MXU operands are bf16 (per perf review), so allow bf16-level accumulation error.
    ref = reference_forward(z, raw)
    max_err = float(jnp.max(jnp.abs(img - ref)))
    mean_err = float(jnp.mean(jnp.abs(img - ref)))
    assert max_err < 1e-1, f"mismatch vs reference: max abs err = {max_err}"
    assert mean_err < 2e-2, f"mismatch vs reference: mean abs err = {mean_err}"

    print("KERNEL_OK")
</pallas_src>

<mosaic_0001>
module attributes {stable_mosaic.version = 11 : i64} {
  func.func @_generator_kernel(%arg0: i32, %arg1: memref<2x32xf32, #tpu.memory_space<vmem>>, %arg2: memref<32x2048xbf16, #tpu.memory_space<vmem>>, %arg3: memref<1x2048xf32, #tpu.memory_space<vmem>>, %arg4: memref<1x128xf32, #tpu.memory_space<vmem>>, %arg5: memref<1x128xf32, #tpu.memory_space<vmem>>, %arg6: memref<9x128x128xbf16, #tpu.memory_space<vmem>>, %arg7: memref<1x128xf32, #tpu.memory_space<vmem>>, %arg8: memref<1x128xf32, #tpu.memory_space<vmem>>, %arg9: memref<9x128x128xbf16, #tpu.memory_space<vmem>>, %arg10: memref<1x128xf32, #tpu.memory_space<vmem>>, %arg11: memref<1x128xf32, #tpu.memory_space<vmem>>, %arg12: memref<9x128x32xbf16, #tpu.memory_space<vmem>>, %arg13: memref<9x128x128xbf16, #tpu.memory_space<vmem>>, %arg14: memref<9x128x128xbf16, #tpu.memory_space<any>>, %arg15: memref<1x128xf32, #tpu.memory_space<vmem>>, %arg16: memref<9x512x128xbf16, #tpu.memory_space<any>>, %arg17: memref<512x128xf32, #tpu.memory_space<vmem>>, %arg18: memref<9x128x128xbf16, #tpu.memory_space<vmem>>, %arg19: memref<9x512x128xbf16, #tpu.memory_space<vmem>>, %arg20: memref<2x!tpu.dma_semaphore, #tpu.memory_space<semaphore_mem>>) attributes {dimension_semantics = [#tpu.dimension_semantics<arbitrary>], iteration_bounds = array<i64: 1>, scalar_prefetch = 0 : i64, scratch_operands = 3 : i64, tpu.core_type = #tpu.core_type<tc>, window_params = [{pipeline_mode = #tpu.pipeline_mode<synchronous>, transform_indices = @transform_0, window_bounds = array<i64: 2, 32>}, {pipeline_mode = #tpu.pipeline_mode<synchronous>, transform_indices = @transform_1, window_bounds = array<i64: 32, 2048>}, {pipeline_mode = #tpu.pipeline_mode<synchronous>, transform_indices = @transform_2, window_bounds = array<i64: 1, 2048>}, {pipeline_mode = #tpu.pipeline_mode<synchronous>, transform_indices = @transform_3, window_bounds = array<i64: 1, 128>}, {pipeline_mode = #tpu.pipeline_mode<synchronous>, transform_indices = @transform_4, window_bounds = array<i64: 1, 128>}, {pipeline_mode = #tpu.pipeline_mode<synchronous>, transform_indices = @transform_5, window_bounds = array<i64: 9, 128, 128>}, {pipeline_mode = #tpu.pipeline_mode<synchronous>, transform_indices = @transform_6, window_bounds = array<i64: 1, 128>}, {pipeline_mode = #tpu.pipeline_mode<synchronous>, transform_indices = @transform_7, window_bounds = array<i64: 1, 128>}, {pipeline_mode = #tpu.pipeline_mode<synchronous>, transform_indices = @transform_8, window_bounds = array<i64: 9, 128, 128>}, {pipeline_mode = #tpu.pipeline_mode<synchronous>, transform_indices = @transform_9, window_bounds = array<i64: 1, 128>}, {pipeline_mode = #tpu.pipeline_mode<synchronous>, transform_indices = @transform_10, window_bounds = array<i64: 1, 128>}, {pipeline_mode = #tpu.pipeline_mode<synchronous>, transform_indices = @transform_11, window_bounds = array<i64: 9, 128, 32>}, {pipeline_mode = #tpu.pipeline_mode<synchronous>, transform_indices = @transform_12, window_bounds = array<i64: 9, 128, 128>}, {}, {pipeline_mode = #tpu.pipeline_mode<synchronous>, transform_indices = @transform_14, window_bounds = array<i64: 1, 128>}, {}, {pipeline_mode = #tpu.pipeline_mode<synchronous>, transform_indices = @transform_16, window_bounds = array<i64: 512, 128>}]} {
    %c0_i32 = arith.constant 0 : i32
    %0 = tpu.memref_slice %arg20[%c0_i32] : memref<2x!tpu.dma_semaphore, #tpu.memory_space<semaphore_mem>> -> memref<1x!tpu.dma_semaphore, #tpu.memory_space<semaphore_mem>>
    %1 = tpu.memref_squeeze %0 : memref<1x!tpu.dma_semaphore, #tpu.memory_space<semaphore_mem>> -> memref<!tpu.dma_semaphore, #tpu.memory_space<semaphore_mem>>
    tpu.enqueue_dma source(%arg14 : memref<9x128x128xbf16, #tpu.memory_space<any>>) target(%arg18 : memref<9x128x128xbf16, #tpu.memory_space<vmem>>) target_semaphore(%1 : memref<!tpu.dma_semaphore, #tpu.memory_space<semaphore_mem>>)
    %c1_i32 = arith.constant 1 : i32
    %2 = tpu.memref_slice %arg20[%c1_i32] : memref<2x!tpu.dma_semaphore, #tpu.memory_space<semaphore_mem>> -> memref<1x!tpu.dma_semaphore, #tpu.memory_space<semaphore_mem>>
    %3 = tpu.memref_squeeze %2 : memref<1x!tpu.dma_semaphore, #tpu.memory_space<semaphore_mem>> -> memref<!tpu.dma_semaphore, #tpu.memory_space<semaphore_mem>>
    tpu.enqueue_dma source(%arg16 : memref<9x512x128xbf16, #tpu.memory_space<any>>) target(%arg19 : memref<9x512x128xbf16, #tpu.memory_space<vmem>>) target_semaphore(%3 : memref<!tpu.dma_semaphore, #tpu.memory_space<semaphore_mem>>)
    %c0 = arith.constant 0 : index
    %c0_0 = arith.constant 0 : index
    %4 = vector.load %arg1[%c0, %c0_0] : memref<2x32xf32, #tpu.memory_space<vmem>>, vector<2x32xf32>
    %5 = arith.truncf %4 : vector<2x32xf32> to vector<2x32xbf16>
    %c0_1 = arith.constant 0 : index
    %c0_2 = arith.constant 0 : index
    %6 = vector.load %arg2[%c0_1, %c0_2] : memref<32x2048xbf16, #tpu.memory_space<vmem>>, vector<32x2048xbf16>
    %cst = arith.constant dense<0.000000e+00> : vector<2x2048xf32>
    %7 = tpu.matmul %5, %6, %cst {dimension_numbers = #tpu.dot_dimension_numbers<[1], [0], [0], [1], [0, 0, 1, 1], [], []>} : vector<2x32xbf16>, vector<32x2048xbf16>, vector<2x2048xf32> -> vector<2x2048xf32>
    %c0_3 = arith.constant 0 : index
    %c0_4 = arith.constant 0 : index
    %8 = vector.load %arg3[%c0_3, %c0_4] : memref<1x2048xf32, #tpu.memory_space<vmem>>, vector<1x2048xf32>
    %9 = vector.broadcast %8 : vector<1x2048xf32> to vector<2x2048xf32>
    %10 = arith.addf %7, %9 : vector<2x2048xf32>
    %11 = vector.shape_cast %10 : vector<2x2048xf32> to vector<32x128xf32>
    %cst_5 = arith.constant dense<0.000000e+00> : vector<128xf32>
    %12 = vector.multi_reduction <add>, %11, %cst_5 [0] : vector<32x128xf32> to vector<128xf32>
    %13 = vector.shape_cast %12 : vector<128xf32> to vector<1x128xf32>
    %cst_6 = arith.constant 3.200000e+01 : f32
    %14 = vector.broadcast %cst_6 : f32 to vector<1x128xf32>
    %15 = arith.divf %13, %14 : vector<1x128xf32>
    %16 = vector.broadcast %15 : vector<1x128xf32> to vector<32x128xf32>
    %17 = arith.subf %11, %16 : vector<32x128xf32>
    %18 = arith.mulf %17, %17 : vector<32x128xf32>
    %cst_7 = arith.constant dense<0.000000e+00> : vector<128xf32>
    %19 = vector.multi_reduction <add>, %18, %cst_7 [0] : vector<32x128xf32> to vector<128xf32>
    %20 = vector.shape_cast %19 : vector<128xf32> to vector<1x128xf32>
    %cst_8 = arith.constant 3.200000e+01 : f32
    %21 = vector.broadcast %cst_8 : f32 to vector<1x128xf32>
    %22 = arith.divf %20, %21 : vector<1x128xf32>
    %c0_9 = arith.constant 0 : index
    %c0_10 = arith.constant 0 : index
    %23 = vector.load %arg4[%c0_9, %c0_10] : memref<1x128xf32, #tpu.memory_space<vmem>>, vector<1x128xf32>
    %cst_11 = arith.constant 9.99999974E-6 : f32
    %24 = vector.broadcast %cst_11 : f32 to vector<1x128xf32>
    %25 = arith.addf %22, %24 : vector<1x128xf32>
    %26 = math.rsqrt %25 : vector<1x128xf32>
    %27 = arith.mulf %23, %26 : vector<1x128xf32>
    %28 = vector.broadcast %27 : vector<1x128xf32> to vector<32x128xf32>
    %29 = arith.mulf %17, %28 : vector<32x128xf32>
    %c0_12 = arith.constant 0 : index
    %c0_13 = arith.constant 0 : index
    %30 = vector.load %arg5[%c0_12, %c0_13] : memref<1x128xf32, #tpu.memory_space<vmem>>, vector<1x128xf32>
    %31 = vector.broadcast %30 : vector<1x128xf32> to vector<32x128xf32>
    %32 = arith.addf %29, %31 : vector<32x128xf32>
    %33 = arith.truncf %32 : vector<32x128xf32> to vector<32x128xbf16>
    %c0_14 = arith.constant 0 : index
    %c0_15 = arith.constant 0 : index
    %c0_16 = arith.constant 0 : index
    %34 = vector.load %arg6[%c0_14, %c0_15, %c0_16] : memref<9x128x128xbf16, #tpu.memory_space<vmem>>, vector<1x128x128xbf16>
    %35 = vector.shape_cast %34 : vector<1x128x128xbf16> to vector<128x128xbf16>
    %cst_17 = arith.constant dense<0.000000e+00> : vector<32x128xf32>
    %36 = tpu.matmul %33, %35, %cst_17 {dimension_numbers = #tpu.dot_dimension_numbers<[1], [0], [0], [1], [0, 0, 1, 1], [], []>} : vector<32x128xbf16>, vector<128x128xbf16>, vector<32x128xf32> -> vector<32x128xf32>
    %c0_18 = arith.constant 0 : index
    %c0_19 = arith.constant 0 : index
    %c0_20 = arith.constant 0 : index
    %37 = vector.load %arg12[%c0_18, %c0_19, %c0_20] : memref<9x128x32xbf16, #tpu.memory_space<vmem>>, vector<1x128x32xbf16>
    %38 = vector.shape_cast %37 : vector<1x128x32xbf16> to vector<128x32xbf16>
    %39 = arith.truncf %36 : vector<32x128xf32> to vector<32x128xbf16>
    %cst_21 = arith.constant dense<0.000000e+00> : vector<128x128xf32>
    %40 = tpu.matmul %38, %39, %cst_21 {dimension_numbers = #tpu.dot_dimension_numbers<[1], [0], [0], [1], [0, 0, 1, 1], [], []>} : vector<128x32xbf16>, vector<32x128xbf16>, vector<128x128xf32> -> vector<128x128xf32>
    %c1 = arith.constant 1 : index
    %c0_22 = arith.constant 0 : index
    %c0_23 = arith.constant 0 : index
    %41 = vector.load %arg6[%c1, %c0_22, %c0_23] : memref<9x128x128xbf16, #tpu.memory_space<vmem>>, vector<1x128x128xbf16>
    %42 = vector.shape_cast %41 : vector<1x128x128xbf16> to vector<128x128xbf16>
    %cst_24 = arith.constant dense<0.000000e+00> : vector<32x128xf32>
    %43 = tpu.matmul %33, %42, %cst_24 {dimension_numbers = #tpu.dot_dimension_numbers<[1], [0], [0], [1], [0, 0, 1, 1], [], []>} : vector<32x128xbf16>, vector<128x128xbf16>, vector<32x128xf32> -> vector<32x128xf32>
    %c1_25 = arith.constant 1 : index
    %c0_26 = arith.constant 0 : index
    %c0_27 = arith.constant 0 : index
    %44 = vector.load %arg12[%c1_25, %c0_26, %c0_27] : memref<9x128x32xbf16, #tpu.memory_space<vmem>>, vector<1x128x32xbf16>
    %45 = vector.shape_cast %44 : vector<1x128x32xbf16> to vector<128x32xbf16>
    %46 = arith.truncf %43 : vector<32x128xf32> to vector<32x128xbf16>
    %cst_28 = arith.constant dense<0.000000e+00> : vector<128x128xf32>
    %47 = tpu.matmul %45, %46, %cst_28 {dimension_numbers = #tpu.dot_dimension_numbers<[1], [0], [0], [1], [0, 0, 1, 1], [], []>} : vector<128x32xbf16>, vector<32x128xbf16>, vector<128x128xf32> -> vector<128x128xf32>
    %48 = arith.addf %40, %47 : vector<128x128xf32>
    %c2 = arith.constant 2 : index
    %c0_29 = arith.constant 0 : index
    %c0_30 = arith.constant 0 : index
    %49 = vector.load %arg6[%c2, %c0_29, %c0_30] : memref<9x128x128xbf16, #tpu.memory_space<vmem>>, vector<1x128x128xbf16>
    %50 = vector.shape_cast %49 : vector<1x128x128xbf16> to vector<128x128xbf16>
    %cst_31 = arith.constant dense<0.000000e+00> : vector<32x128xf32>
    %51 = tpu.matmul %33, %50, %cst_31 {dimension_numbers = #tpu.dot_dimension_numbers<[1], [0], [0], [1], [0, 0, 1, 1], [], []>} : vector<32x128xbf16>, vector<128x128xbf16>, vector<32x128xf32> -> vector<32x128xf32>
    %c2_32 = arith.constant 2 : index
    %c0_33 = arith.constant 0 : index
    %c0_34 = arith.constant 0 : index
    %52 = vector.load %arg12[%c2_32, %c0_33, %c0_34] : memref<9x128x32xbf16, #tpu.memory_space<vmem>>, vector<1x128x32xbf16>
    %53 = vector.shape_cast %52 : vector<1x128x32xbf16> to vector<128x32xbf16>
    %54 = arith.truncf %51 : vector<32x128xf32> to vector<32x128xbf16>
    %cst_35 = arith.constant dense<0.000000e+00> : vector<128x128xf32>
    %55 = tpu.matmul %53, %54, %cst_35 {dimension_numbers = #tpu.dot_dimension_numbers<[1], [0], [0], [1], [0, 0, 1, 1], [], []>} : vector<128x32xbf16>, vector<32x128xbf16>, vector<128x128xf32> -> vector<128x128xf32>
    %56 = arith.addf %48, %55 : vector<128x128xf32>
    %c3 = arith.constant 3 : index
    %c0_36 = arith.constant 0 : index
    %c0_37 = arith.constant 0 : index
    %57 = vector.load %arg6[%c3, %c0_36, %c0_37] : memref<9x128x128xbf16, #tpu.memory_space<vmem>>, vector<1x128x128xbf16>
    %58 = vector.shape_cast %57 : vector<1x128x128xbf16> to vector<128x128xbf16>
    %cst_38 = arith.constant dense<0.000000e+00> : vector<32x128xf32>
    %59 = tpu.matmul %33, %58, %cst_38 {dimension_numbers = #tpu.dot_dimension_numbers<[1], [0], [0], [1], [0, 0, 1, 1], [], []>} : vector<32x128xbf16>, vector<128x128xbf16>, vector<32x128xf32> -> vector<32x128xf32>
    %c3_39 = arith.constant 3 : index
    %c0_40 = arith.constant 0 : index
    %c0_41 = arith.constant 0 : index
    %60 = vector.load %arg12[%c3_39, %c0_40, %c0_41] : memref<9x128x32xbf16, #tpu.memory_space<vmem>>, vector<1x128x32xbf16>
    %61 = vector.shape_cast %60 : vector<1x128x32xbf16> to vector<128x32xbf16>
    %62 = arith.truncf %59 : vector<32x128xf32> to vector<32x128xbf16>
    %cst_42 = arith.constant dense<0.000000e+00> : vector<128x128xf32>
    %63 = tpu.matmul %61, %62, %cst_42 {dimension_numbers = #tpu.dot_dimension_numbers<[1], [0], [0], [1], [0, 0, 1, 1], [], []>} : vector<128x32xbf16>, vector<32x128xbf16>, vector<128x128xf32> -> vector<128x128xf32>
    %64 = arith.addf %56, %63 : vector<128x128xf32>
    %c4 = arith.constant 4 : index
    %c0_43 = arith.constant 0 : index
    %c0_44 = arith.constant 0 : index
    %65 = vector.load %arg6[%c4, %c0_43, %c0_44] : memref<9x128x128xbf16, #tpu.memory_space<vmem>>, vector<1x128x128xbf16>
    %66 = vector.shape_cast %65 : vector<1x128x128xbf16> to vector<128x128xbf16>
    %cst_45 = arith.constant dense<0.000000e+00> : vector<32x128xf32>
    %67 = tpu.matmul %33, %66, %cst_45 {dimension_numbers = #tpu.dot_dimension_numbers<[1], [0], [0], [1], [0, 0, 1, 1], [], []>} : vector<32x128xbf16>, vector<128x128xbf16>, vector<32x128xf32> -> vector<32x128xf32>
    %c4_46 = arith.constant 4 : index
    %c0_47 = arith.constant 0 : index
    %c0_48 = arith.constant 0 : index
    %68 = vector.load %arg12[%c4_46, %c0_47, %c0_48] : memref<9x128x32xbf16, #tpu.memory_space<vmem>>, vector<1x128x32xbf16>
    %69 = vector.shape_cast %68 : vector<1x128x32xbf16> to vector<128x32xbf16>
    %70 = arith.truncf %67 : vector<32x128xf32> to vector<32x128xbf16>
    %cst_49 = arith.constant dense<0.000000e+00> : vector<128x128xf32>
    %71 = tpu.matmul %69, %70, %cst_49 {dimension_numbers = #tpu.dot_dimension_numbers<[1], [0], [0], [1], [0, 0, 1, 1], [], []>} : vector<128x32xbf16>, vector<32x128xbf16>, vector<128x128xf32> -> vector<128x128xf32>
    %72 = arith.addf %64, %71 : vector<128x128xf32>
    %c5 = arith.constant 5 : index
    %c0_50 = arith.constant 0 : index
    %c0_51 = arith.constant 0 : index
    %73 = vector.load %arg6[%c5, %c0_50, %c0_51] : memref<9x128x128xbf16, #tpu.memory_space<vmem>>, vector<1x128x128xbf16>
    %74 = vector.shape_cast %73 : vector<1x128x128xbf16> to vector<128x128xbf16>
    %cst_52 = arith.constant dense<0.000000e+00> : vector<32x128xf32>
    %75 = tpu.matmul %33, %74, %cst_52 {dimension_numbers = #tpu.dot_dimension_numbers<[1], [0], [0], [1], [0, 0, 1, 1], [], []>} : vector<32x128xbf16>, vector<128x128xbf16>, vector<32x128xf32> -> vector<32x128xf32>
    %c5_53 = arith.constant 5 : index
    %c0_54 = arith.constant 0 : index
    %c0_55 = arith.constant 0 : index
    %76 = vector.load %arg12[%c5_53, %c0_54, %c0_55] : memref<9x128x32xbf16, #tpu.memory_space<vmem>>, vector<1x128x32xbf16>
    %77 = vector.shape_cast %76 : vector<1x128x32xbf16> to vector<128x32xbf16>
    %78 = arith.truncf %75 : vector<32x128xf32> to vector<32x128xbf16>
    %cst_56 = arith.constant dense<0.000000e+00> : vector<128x128xf32>
    %79 = tpu.matmul %77, %78, %cst_56 {dimension_numbers = #tpu.dot_dimension_numbers<[1], [0], [0], [1], [0, 0, 1, 1], [], []>} : vector<128x32xbf16>, vector<32x128xbf16>, vector<128x128xf32> -> vector<128x128xf32>
    %80 = arith.addf %72, %79 : vector<128x128xf32>
    %c6 = arith.constant 6 : index
    %c0_57 = arith.constant 0 : index
    %c0_58 = arith.constant 0 : index
    %81 = vector.load %arg6[%c6, %c0_57, %c0_58] : memref<9x128x128xbf16, #tpu.memory_space<vmem>>, vector<1x128x128xbf16>
    %82 = vector.shape_cast %81 : vector<1x128x128xbf16> to vector<128x128xbf16>
    %cst_59 = arith.constant dense<0.000000e+00> : vector<32x128xf32>
    %83 = tpu.matmul %33, %82, %cst_59 {dimension_numbers = #tpu.dot_dimension_numbers<[1], [0], [0], [1], [0, 0, 1, 1], [], []>} : vector<32x128xbf16>, vector<128x128xbf16>, vector<32x128xf32> -> vector<32x128xf32>
    %c6_60 = arith.constant 6 : index
    %c0_61 = arith.constant 0 : index
    %c0_62 = arith.constant 0 : index
    %84 = vector.load %arg12[%c6_60, %c0_61, %c0_62] : memref<9x128x32xbf16, #tpu.memory_space<vmem>>, vector<1x128x32xbf16>
    %85 = vector.shape_cast %84 : vector<1x128x32xbf16> to vector<128x32xbf16>
    %86 = arith.truncf %83 : vector<32x128xf32> to vector<32x128xbf16>
    %cst_63 = arith.constant dense<0.000000e+00> : vector<128x128xf32>
    %87 = tpu.matmul %85, %86, %cst_63 {dimension_numbers = #tpu.dot_dimension_numbers<[1], [0], [0], [1], [0, 0, 1, 1], [], []>} : vector<128x32xbf16>, vector<32x128xbf16>, vector<128x128xf32> -> vector<128x128xf32>
    %88 = arith.addf %80, %87 : vector<128x128xf32>
    %c7 = arith.constant 7 : index
    %c0_64 = arith.constant 0 : index
    %c0_65 = arith.constant 0 : index
    %89 = vector.load %arg6[%c7, %c0_64, %c0_65] : memref<9x128x128xbf16, #tpu.memory_space<vmem>>, vector<1x128x128xbf16>
    %90 = vector.shape_cast %89 : vector<1x128x128xbf16> to vector<128x128xbf16>
    %cst_66 = arith.constant dense<0.000000e+00> : vector<32x128xf32>
    %91 = tpu.matmul %33, %90, %cst_66 {dimension_numbers = #tpu.dot_dimension_numbers<[1], [0], [0], [1], [0, 0, 1, 1], [], []>} : vector<32x128xbf16>, vector<128x128xbf16>, vector<32x128xf32> -> vector<32x128xf32>
    %c7_67 = arith.constant 7 : index
    %c0_68 = arith.constant 0 : index
    %c0_69 = arith.constant 0 : index
    %92 = vector.load %arg12[%c7_67, %c0_68, %c0_69] : memref<9x128x32xbf16, #tpu.memory_space<vmem>>, vector<1x128x32xbf16>
    %93 = vector.shape_cast %92 : vector<1x128x32xbf16> to vector<128x32xbf16>
    %94 = arith.truncf %91 : vector<32x128xf32> to vector<32x128xbf16>
    %cst_70 = arith.constant dense<0.000000e+00> : vector<128x128xf32>
    %95 = tpu.matmul %93, %94, %cst_70 {dimension_numbers = #tpu.dot_dimension_numbers<[1], [0], [0], [1], [0, 0, 1, 1], [], []>} : vector<128x32xbf16>, vector<32x128xbf16>, vector<128x128xf32> -> vector<128x128xf32>
    %96 = arith.addf %88, %95 : vector<128x128xf32>
    %c8 = arith.constant 8 : index
    %c0_71 = arith.constant 0 : index
    %c0_72 = arith.constant 0 : index
    %97 = vector.load %arg6[%c8, %c0_71, %c0_72] : memref<9x128x128xbf16, #tpu.memory_space<vmem>>, vector<1x128x128xbf16>
    %98 = vector.shape_cast %97 : vector<1x128x128xbf16> to vector<128x128xbf16>
    %cst_73 = arith.constant dense<0.000000e+00> : vector<32x128xf32>
    %99 = tpu.matmul %33, %98, %cst_73 {dimension_numbers = #tpu.dot_dimension_numbers<[1], [0], [0], [1], [0, 0, 1, 1], [], []>} : vector<32x128xbf16>, vector<128x128xbf16>, vector<32x128xf32> -> vector<32x128xf32>
    %c8_74 = arith.constant 8 : index
    %c0_75 = arith.constant 0 : index
    %c0_76 = arith.constant 0 : index
    %100 = vector.load %arg12[%c8_74, %c0_75, %c0_76] : memref<9x128x32xbf16, #tpu.memory_space<vmem>>, vector<1x128x32xbf16>
    %101 = vector.shape_cast %100 : vector<1x128x32xbf16> to vector<128x32xbf16>
    %102 = arith.truncf %99 : vector<32x128xf32> to vector<32x128xbf16>
    %cst_77 = arith.constant dense<0.000000e+00> : vector<128x128xf32>
    %103 = tpu.matmul %101, %102, %cst_77 {dimension_numbers = #tpu.dot_dimension_numbers<[1], [0], [0], [1], [0, 0, 1, 1], [], []>} : vector<128x32xbf16>, vector<32x128xbf16>, vector<128x128xf32> -> vector<128x128xf32>
    %104 = arith.addf %96, %103 : vector<128x128xf32>
    %cst_78 = arith.constant dense<0.000000e+00> : vector<128xf32>
    %105 = vector.multi_reduction <add>, %104, %cst_78 [0] : vector<128x128xf32> to vector<128xf32>
    %106 = vector.shape_cast %105 : vector<128xf32> to vector<1x128xf32>
    %cst_79 = arith.constant 1.280000e+02 : f32
    %107 = vector.broadcast %cst_79 : f32 to vector<1x128xf32>
    %108 = arith.divf %106, %107 : vector<1x128xf32>
    %109 = vector.broadcast %108 : vector<1x128xf32> to vector<128x128xf32>
    %110 = arith.subf %104, %109 : vector<128x128xf32>
    %111 = arith.mulf %110, %110 : vector<128x128xf32>
    %cst_80 = arith.constant dense<0.000000e+00> : vector<128xf32>
    %112 = vector.multi_reduction <add>, %111, %cst_80 [0] : vector<128x128xf32> to vector<128xf32>
    %113 = vector.shape_cast %112 : vector<128xf32> to vector<1x128xf32>
    %cst_81 = arith.constant 1.280000e+02 : f32
    %114 = vector.broadcast %cst_81 : f32 to vector<1x128xf32>
    %115 = arith.divf %113, %114 : vector<1x128xf32>
    %c0_82 = arith.constant 0 : index
    %c0_83 = arith.constant 0 : index
    %116 = vector.load %arg7[%c0_82, %c0_83] : memref<1x128xf32, #tpu.memory_space<vmem>>, vector<1x128xf32>
    %cst_84 = arith.constant 9.99999974E-6 : f32
    %117 = vector.broadcast %cst_84 : f32 to vector<1x128xf32>
    %118 = arith.addf %115, %117 : vector<1x128xf32>
    %119 = math.rsqrt %118 : vector<1x128xf32>
    %120 = arith.mulf %116, %119 : vector<1x128xf32>
    %121 = vector.broadcast %120 : vector<1x128xf32> to vector<128x128xf32>
    %122 = arith.mulf %110, %121 : vector<128x128xf32>
    %c0_85 = arith.constant 0 : index
    %c0_86 = arith.constant 0 : index
    %123 = vector.load %arg8[%c0_85, %c0_86] : memref<1x128xf32, #tpu.memory_space<vmem>>, vector<1x128xf32>
    %124 = vector.broadcast %123 : vector<1x128xf32> to vector<128x128xf32>
    %125 = arith.addf %122, %124 : vector<128x128xf32>
    %cst_87 = arith.constant 0.000000e+00 : f32
    %126 = vector.broadcast %cst_87 : f32 to vector<128x128xf32>
    %127 = arith.maximumf %125, %126 : vector<128x128xf32>
    %128 = arith.truncf %127 : vector<128x128xf32> to vector<128x128xbf16>
    %c4_88 = arith.constant 4 : index
    %c0_89 = arith.constant 0 : index
    %c0_90 = arith.constant 0 : index
    %129 = vector.load %arg12[%c4_88, %c0_89, %c0_90] : memref<9x128x32xbf16, #tpu.memory_space<vmem>>, vector<1x128x32xbf16>
    %130 = vector.shape_cast %129 : vector<1x128x32xbf16> to vector<128x32xbf16>
    %cst_91 = arith.constant dense<0.000000e+00> : vector<128x128xf32>
    %131 = tpu.matmul %130, %33, %cst_91 {dimension_numbers = #tpu.dot_dimension_numbers<[1], [0], [0], [1], [0, 0, 1, 1], [], []>} : vector<128x32xbf16>, vector<32x128xbf16>, vector<128x128xf32> -> vector<128x128xf32>
    %c0_92 = arith.constant 0 : index
    %c0_93 = arith.constant 0 : index
    %c0_94 = arith.constant 0 : index
    %132 = vector.load %arg9[%c0_92, %c0_93, %c0_94] : memref<9x128x128xbf16, #tpu.memory_space<vmem>>, vector<1x128x128xbf16>
    %133 = vector.shape_cast %132 : vector<1x128x128xbf16> to vector<128x128xbf16>
    %cst_95 = arith.constant dense<0.000000e+00> : vector<128x128xf32>
    %134 = tpu.matmul %128, %133, %cst_95 {dimension_numbers = #tpu.dot_dimension_numbers<[1], [0], [0], [1], [0, 0, 1, 1], [], []>} : vector<128x128xbf16>, vector<128x128xbf16>, vector<128x128xf32> -> vector<128x128xf32>
    %c0_96 = arith.constant 0 : index
    %c0_97 = arith.constant 0 : index
    %c0_98 = arith.constant 0 : index
    %135 = vector.load %arg13[%c0_96, %c0_97, %c0_98] : memref<9x128x128xbf16, #tpu.memory_space<vmem>>, vector<1x128x128xbf16>
    %136 = vector.shape_cast %135 : vector<1x128x128xbf16> to vector<128x128xbf16>
    %137 = arith.truncf %134 : vector<128x128xf32> to vector<128x128xbf16>
    %cst_99 = arith.constant dense<0.000000e+00> : vector<128x128xf32>
    %138 = tpu.matmul %136, %137, %cst_99 {dimension_numbers = #tpu.dot_dimension_numbers<[1], [0], [0], [1], [0, 0, 1, 1], [], []>} : vector<128x128xbf16>, vector<128x128xbf16>, vector<128x128xf32> -> vector<128x128xf32>
    %c1_100 = arith.constant 1 : index
    %c0_101 = arith.constant 0 : index
    %c0_102 = arith.constant 0 : index
    %139 = vector.load %arg9[%c1_100, %c0_101, %c0_102] : memref<9x128x128xbf16, #tpu.memory_space<vmem>>, vector<1x128x128xbf16>
    %140 = vector.shape_cast %139 : vector<1x128x128xbf16> to vector<128x128xbf16>
    %cst_103 = arith.constant dense<0.000000e+00> : vector<128x128xf32>
    %141 = tpu.matmul %128, %140, %cst_103 {dimension_numbers = #tpu.dot_dimension_numbers<[1], [0], [0], [1], [0, 0, 1, 1], [], []>} : vector<128x128xbf16>, vector<128x128xbf16>, vector<128x128xf32> -> vector<128x128xf32>
    %c1_104 = arith.constant 1 : index
    %c0_105 = arith.constant 0 : index
    %c0_106 = arith.constant 0 : index
    %142 = vector.load %arg13[%c1_104, %c0_105, %c0_106] : memref<9x128x128xbf16, #tpu.memory_space<vmem>>, vector<1x128x128xbf16>
    %143 = vector.shape_cast %142 : vector<1x128x128xbf16> to vector<128x128xbf16>
    %144 = arith.truncf %141 : vector<128x128xf32> to vector<128x128xbf16>
    %cst_107 = arith.constant dense<0.000000e+00> : vector<128x128xf32>
    %145 = tpu.matmul %143, %144, %cst_107 {dimension_numbers = #tpu.dot_dimension_numbers<[1], [0], [0], [1], [0, 0, 1, 1], [], []>} : vector<128x128xbf16>, vector<128x128xbf16>, vector<128x128xf32> -> vector<128x128xf32>
    %146 = arith.addf %138, %145 : vector<128x128xf32>
    %c2_108 = arith.constant 2 : index
    %c0_109 = arith.constant 0 : index
    %c0_110 = arith.constant 0 : index
    %147 = vector.load %arg9[%c2_108, %c0_109, %c0_110] : memref<9x128x128xbf16, #tpu.memory_space<vmem>>, vector<1x128x128xbf16>
    %148 = vector.shape_cast %147 : vector<1x128x128xbf16> to vector<128x128xbf16>
    %cst_111 = arith.constant dense<0.000000e+00> : vector<128x128xf32>
    %149 = tpu.matmul %128, %148, %cst_111 {dimension_numbers = #tpu.dot_dimension_numbers<[1], [0], [0], [1], [0, 0, 1, 1], [], []>} : vector<128x128xbf16>, vector<128x128xbf16>, vector<128x128xf32> -> vector<128x128xf32>
    %c2_112 = arith.constant 2 : index
    %c0_113 = arith.constant 0 : index
    %c0_114 = arith.constant 0 : index
    %150 = vector.load %arg13[%c2_112, %c0_113, %c0_114] : memref<9x128x128xbf16, #tpu.memory_space<vmem>>, vector<1x128x128xbf16>
    %151 = vector.shape_cast %150 : vector<1x128x128xbf16> to vector<128x128xbf16>
    %152 = arith.truncf %149 : vector<128x128xf32> to vector<128x128xbf16>
    %cst_115 = arith.constant dense<0.000000e+00> : vector<128x128xf32>
    %153 = tpu.matmul %151, %152, %cst_115 {dimension_numbers = #tpu.dot_dimension_numbers<[1], [0], [0], [1], [0, 0, 1, 1], [], []>} : vector<128x128xbf16>, vector<128x128xbf16>, vector<128x128xf32> -> vector<128x128xf32>
    %154 = arith.addf %146, %153 : vector<128x128xf32>
    %c3_116 = arith.constant 3 : index
    %c0_117 = arith.constant 0 : index
    %c0_118 = arith.constant 0 : index
    %155 = vector.load %arg9[%c3_116, %c0_117, %c0_118] : memref<9x128x128xbf16, #tpu.memory_space<vmem>>, vector<1x128x128xbf16>
    %156 = vector.shape_cast %155 : vector<1x128x128xbf16> to vector<128x128xbf16>
    %cst_119 = arith.constant dense<0.000000e+00> : vector<128x128xf32>
    %157 = tpu.matmul %128, %156, %cst_119 {dimension_numbers = #tpu.dot_dimension_numbers<[1], [0], [0], [1], [0, 0, 1, 1], [], []>} : vector<128x128xbf16>, vector<128x128xbf16>, vector<128x128xf32> -> vector<128x128xf32>
    %c3_120 = arith.constant 3 : index
    %c0_121 = arith.constant 0 : index
    %c0_122 = arith.constant 0 : index
    %158 = vector.load %arg13[%c3_120, %c0_121, %c0_122] : memref<9x128x128xbf16, #tpu.memory_space<vmem>>, vector<1x128x128xbf16>
    %159 = vector.shape_cast %158 : vector<1x128x128xbf16> to vector<128x128xbf16>
    %160 = arith.truncf %157 : vector<128x128xf32> to vector<128x128xbf16>
    %cst_123 = arith.constant dense<0.000000e+00> : vector<128x128xf32>
    %161 = tpu.matmul %159, %160, %cst_123 {dimension_numbers = #tpu.dot_dimension_numbers<[1], [0], [0], [1], [0, 0, 1, 1], [], []>} : vector<128x128xbf16>, vector<128x128xbf16>, vector<128x128xf32> -> vector<128x128xf32>
    %162 = arith.addf %154, %161 : vector<128x128xf32>
    %c4_124 = arith.constant 4 : index
    %c0_125 = arith.constant 0 : index
    %c0_126 = arith.constant 0 : index
    %163 = vector.load %arg9[%c4_124, %c0_125, %c0_126] : memref<9x128x128xbf16, #tpu.memory_space<vmem>>, vector<1x128x128xbf16>
    %164 = vector.shape_cast %163 : vector<1x128x128xbf16> to vector<128x128xbf16>
    %cst_127 = arith.constant dense<0.000000e+00> : vector<128x128xf32>
    %165 = tpu.matmul %128, %164, %cst_127 {dimension_numbers = #tpu.dot_dimension_numbers<[1], [0], [0], [1], [0, 0, 1, 1], [], []>} : vector<128x128xbf16>, vector<128x128xbf16>, vector<128x128xf32> -> vector<128x128xf32>
    %c4_128 = arith.constant 4 : index
    %c0_129 = arith.constant 0 : index
    %c0_130 = arith.constant 0 : index
    %166 = vector.load %arg13[%c4_128, %c0_129, %c0_130] : memref<9x128x128xbf16, #tpu.memory_space<vmem>>, vector<1x128x128xbf16>
    %167 = vector.shape_cast %166 : vector<1x128x128xbf16> to vector<128x128xbf16>
    %168 = arith.truncf %165 : vector<128x128xf32> to vector<128x128xbf16>
    %cst_131 = arith.constant dense<0.000000e+00> : vector<128x128xf32>
    %169 = tpu.matmul %167, %168, %cst_131 {dimension_numbers = #tpu.dot_dimension_numbers<[1], [0], [0], [1], [0, 0, 1, 1], [], []>} : vector<128x128xbf16>, vector<128x128xbf16>, vector<128x128xf32> -> vector<128x128xf32>
    %170 = arith.addf %162, %169 : vector<128x128xf32>
    %c5_132 = arith.constant 5 : index
    %c0_133 = arith.constant 0 : index
    %c0_134 = arith.constant 0 : index
    %171 = vector.load %arg9[%c5_132, %c0_133, %c0_134] : memref<9x128x128xbf16, #tpu.memory_space<vmem>>, vector<1x128x128xbf16>
    %172 = vector.shape_cast %171 : vector<1x128x128xbf16> to vector<128x128xbf16>
    %cst_135 = arith.constant dense<0.000000e+00> : vector<128x128xf32>
    %173 = tpu.matmul %128, %172, %cst_135 {dimension_numbers = #tpu.dot_dimension_numbers<[1], [0], [0], [1], [0, 0, 1, 1], [], []>} : vector<128x128xbf16>, vector<128x128xbf16>, vector<128x128xf32> -> vector<128x128xf32>
    %c5_136 = arith.constant 5 : index
    %c0_137 = arith.constant 0 : index
    %c0_138 = arith.constant 0 : index
    %174 = vector.load %arg13[%c5_136, %c0_137, %c0_138] : memref<9x128x128xbf16, #tpu.memory_space<vmem>>, vector<1x128x128xbf16>
    %175 = vector.shape_cast %174 : vector<1x128x128xbf16> to vector<128x128xbf16>
    %176 = arith.truncf %173 : vector<128x128xf32> to vector<128x128xbf16>
    %cst_139 = arith.constant dense<0.000000e+00> : vector<128x128xf32>
    %177 = tpu.matmul %175, %176, %cst_139 {dimension_numbers = #tpu.dot_dimension_numbers<[1], [0], [0], [1], [0, 0, 1, 1], [], []>} : vector<128x128xbf16>, vector<128x128xbf16>, vector<128x128xf32> -> vector<128x128xf32>
    %178 = arith.addf %170, %177 : vector<128x128xf32>
    %c6_140 = arith.constant 6 : index
    %c0_141 = arith.constant 0 : index
    %c0_142 = arith.constant 0 : index
    %179 = vector.load %arg9[%c6_140, %c0_141, %c0_142] : memref<9x128x128xbf16, #tpu.memory_space<vmem>>, vector<1x128x128xbf16>
    %180 = vector.shape_cast %179 : vector<1x128x128xbf16> to vector<128x128xbf16>
    %cst_143 = arith.constant dense<0.000000e+00> : vector<128x128xf32>
    %181 = tpu.matmul %128, %180, %cst_143 {dimension_numbers = #tpu.dot_dimension_numbers<[1], [0], [0], [1], [0, 0, 1, 1], [], []>} : vector<128x128xbf16>, vector<128x128xbf16>, vector<128x128xf32> -> vector<128x128xf32>
    %c6_144 = arith.constant 6 : index
    %c0_145 = arith.constant 0 : index
    %c0_146 = arith.constant 0 : index
    %182 = vector.load %arg13[%c6_144, %c0_145, %c0_146] : memref<9x128x128xbf16, #tpu.memory_space<vmem>>, vector<1x128x128xbf16>
    %183 = vector.shape_cast %182 : vector<1x128x128xbf16> to vector<128x128xbf16>
    %184 = arith.truncf %181 : vector<128x128xf32> to vector<128x128xbf16>
    %cst_147 = arith.constant dense<0.000000e+00> : vector<128x128xf32>
    %185 = tpu.matmul %183, %184, %cst_147 {dimension_numbers = #tpu.dot_dimension_numbers<[1], [0], [0], [1], [0, 0, 1, 1], [], []>} : vector<128x128xbf16>, vector<128x128xbf16>, vector<128x128xf32> -> vector<128x128xf32>
    %186 = arith.addf %178, %185 : vector<128x128xf32>
    %c7_148 = arith.constant 7 : index
    %c0_149 = arith.constant 0 : index
    %c0_150 = arith.constant 0 : index
    %187 = vector.load %arg9[%c7_148, %c0_149, %c0_150] : memref<9x128x128xbf16, #tpu.memory_space<vmem>>, vector<1x128x128xbf16>
    %188 = vector.shape_cast %187 : vector<1x128x128xbf16> to vector<128x128xbf16>
    %cst_151 = arith.constant dense<0.000000e+00> : vector<128x128xf32>
    %189 = tpu.matmul %128, %188, %cst_151 {dimension_numbers = #tpu.dot_dimension_numbers<[1], [0], [0], [1], [0, 0, 1, 1], [], []>} : vector<128x128xbf16>, vector<128x128xbf16>, vector<128x128xf32> -> vector<128x128xf32>
    %c7_152 = arith.constant 7 : index
    %c0_153 = arith.constant 0 : index
    %c0_154 = arith.constant 0 : index
    %190 = vector.load %arg13[%c7_152, %c0_153, %c0_154] : memref<9x128x128xbf16, #tpu.memory_space<vmem>>, vector<1x128x128xbf16>
    %191 = vector.shape_cast %190 : vector<1x128x128xbf16> to vector<128x128xbf16>
    %192 = arith.truncf %189 : vector<128x128xf32> to vector<128x128xbf16>
    %cst_155 = arith.constant dense<0.000000e+00> : vector<128x128xf32>
    %193 = tpu.matmul %191, %192, %cst_155 {dimension_numbers = #tpu.dot_dimension_numbers<[1], [0], [0], [1], [0, 0, 1, 1], [], []>} : vector<128x128xbf16>, vector<128x128xbf16>, vector<128x128xf32> -> vector<128x128xf32>
    %194 = arith.addf %186, %193 : vector<128x128xf32>
    %c8_156 = arith.constant 8 : index
    %c0_157 = arith.constant 0 : index
    %c0_158 = arith.constant 0 : index
    %195 = vector.load %arg9[%c8_156, %c0_157, %c0_158] : memref<9x128x128xbf16, #tpu.memory_space<vmem>>, vector<1x128x128xbf16>
    %196 = vector.shape_cast %195 : vector<1x128x128xbf16> to vector<128x128xbf16>
    %cst_159 = arith.constant dense<0.000000e+00> : vector<128x128xf32>
    %197 = tpu.matmul %128, %196, %cst_159 {dimension_numbers = #tpu.dot_dimension_numbers<[1], [0], [0], [1], [0, 0, 1, 1], [], []>} : vector<128x128xbf16>, vector<128x128xbf16>, vector<128x128xf32> -> vector<128x128xf32>
    %c8_160 = arith.constant 8 : index
    %c0_161 = arith.constant 0 : index
    %c0_162 = arith.constant 0 : index
    %198 = vector.load %arg13[%c8_160, %c0_161, %c0_162] : memref<9x128x128xbf16, #tpu.memory_space<vmem>>, vector<1x128x128xbf16>
    %199 = vector.shape_cast %198 : vector<1x128x128xbf16> to vector<128x128xbf16>
    %200 = arith.truncf %197 : vector<128x128xf32> to vector<128x128xbf16>
    %cst_163 = arith.constant dense<0.000000e+00> : vector<128x128xf32>
    %201 = tpu.matmul %199, %200, %cst_163 {dimension_numbers = #tpu.dot_dimension_numbers<[1], [0], [0], [1], [0, 0, 1, 1], [], []>} : vector<128x128xbf16>, vector<128x128xbf16>, vector<128x128xf32> -> vector<128x128xf32>
    %202 = arith.addf %194, %201 : vector<128x128xf32>
    %cst_164 = arith.constant dense<0.000000e+00> : vector<128xf32>
    %203 = vector.multi_reduction <add>, %202, %cst_164 [0] : vector<128x128xf32> to vector<128xf32>
    %204 = vector.shape_cast %203 : vector<128xf32> to vector<1x128xf32>
    %cst_165 = arith.constant 1.280000e+02 : f32
    %205 = vector.broadcast %cst_165 : f32 to vector<1x128xf32>
    %206 = arith.divf %204, %205 : vector<1x128xf32>
    %207 = vector.broadcast %206 : vector<1x128xf32> to vector<128x128xf32>
    %208 = arith.subf %202, %207 : vector<128x128xf32>
    %209 = arith.mulf %208, %208 : vector<128x128xf32>
    %cst_166 = arith.constant dense<0.000000e+00> : vector<128xf32>
    %210 = vector.multi_reduction <add>, %209, %cst_166 [0] : vector<128x128xf32> to vector<128xf32>
    %211 = vector.shape_cast %210 : vector<128xf32> to vector<1x128xf32>
    %cst_167 = arith.constant 1.280000e+02 : f32
    %212 = vector.broadcast %cst_167 : f32 to vector<1x128xf32>
    %213 = arith.divf %211, %212 : vector<1x128xf32>
    %c0_168 = arith.constant 0 : index
    %c0_169 = arith.constant 0 : index
    %214 = vector.load %arg10[%c0_168, %c0_169] : memref<1x128xf32, #tpu.memory_space<vmem>>, vector<1x128xf32>
    %cst_170 = arith.constant 9.99999974E-6 : f32
    %215 = vector.broadcast %cst_170 : f32 to vector<1x128xf32>
    %216 = arith.addf %213, %215 : vector<1x128xf32>
    %217 = math.rsqrt %216 : vector<1x128xf32>
    %218 = arith.mulf %214, %217 : vector<1x128xf32>
    %219 = vector.broadcast %218 : vector<1x128xf32> to vector<128x128xf32>
    %220 = arith.mulf %208, %219 : vector<128x128xf32>
    %c0_171 = arith.constant 0 : index
    %c0_172 = arith.constant 0 : index
    %221 = vector.load %arg11[%c0_171, %c0_172] : memref<1x128xf32, #tpu.memory_space<vmem>>, vector<1x128xf32>
    %222 = vector.broadcast %221 : vector<1x128xf32> to vector<128x128xf32>
    %223 = arith.addf %220, %222 : vector<128x128xf32>
    %224 = arith.addf %131, %223 : vector<128x128xf32>
    %225 = arith.truncf %224 : vector<128x128xf32> to vector<128x128xbf16>
    %c0_i32_173 = arith.constant 0 : i32
    %226 = tpu.memref_slice %arg20[%c0_i32_173] : memref<2x!tpu.dma_semaphore, #tpu.memory_space<semaphore_mem>> -> memref<1x!tpu.dma_semaphore, #tpu.memory_space<semaphore_mem>>
    %227 = tpu.memref_squeeze %226 : memref<1x!tpu.dma_semaphore, #tpu.memory_space<semaphore_mem>> -> memref<!tpu.dma_semaphore, #tpu.memory_space<semaphore_mem>>
    tpu.wait_dma2 semaphore(%227 : memref<!tpu.dma_semaphore, #tpu.memory_space<semaphore_mem>>) src(%arg14 : memref<9x128x128xbf16, #tpu.memory_space<any>>) dst(%arg18 : memref<9x128x128xbf16, #tpu.memory_space<vmem>>)
    %c1_i32_174 = arith.constant 1 : i32
    %228 = tpu.memref_slice %arg20[%c1_i32_174] : memref<2x!tpu.dma_semaphore, #tpu.memory_space<semaphore_mem>> -> memref<1x!tpu.dma_semaphore, #tpu.memory_space<semaphore_mem>>
    %229 = tpu.memref_squeeze %228 : memref<1x!tpu.dma_semaphore, #tpu.memory_space<semaphore_mem>> -> memref<!tpu.dma_semaphore, #tpu.memory_space<semaphore_mem>>
    tpu.wait_dma2 semaphore(%229 : memref<!tpu.dma_semaphore, #tpu.memory_space<semaphore_mem>>) src(%arg16 : memref<9x512x128xbf16, #tpu.memory_space<any>>) dst(%arg19 : memref<9x512x128xbf16, #tpu.memory_space<vmem>>)
    %c0_175 = arith.constant 0 : index
    %c0_176 = arith.constant 0 : index
    %c0_177 = arith.constant 0 : index
    %230 = vector.load %arg18[%c0_175, %c0_176, %c0_177] : memref<9x128x128xbf16, #tpu.memory_space<vmem>>, vector<1x128x128xbf16>
    %231 = vector.shape_cast %230 : vector<1x128x128xbf16> to vector<128x128xbf16>
    %cst_178 = arith.constant dense<0.000000e+00> : vector<128x128xf32>
    %232 = tpu.matmul %225, %231, %cst_178 {dimension_numbers = #tpu.dot_dimension_numbers<[1], [0], [0], [1], [0, 0, 1, 1], [], []>} : vector<128x128xbf16>, vector<128x128xbf16>, vector<128x128xf32> -> vector<128x128xf32>
    %c0_179 = arith.constant 0 : index
    %c0_180 = arith.constant 0 : index
    %c0_181 = arith.constant 0 : index
    %233 = vector.load %arg19[%c0_179, %c0_180, %c0_181] : memref<9x512x128xbf16, #tpu.memory_space<vmem>>, vector<1x512x128xbf16>
    %234 = vector.shape_cast %233 : vector<1x512x128xbf16> to vector<512x128xbf16>
    %235 = arith.truncf %232 : vector<128x128xf32> to vector<128x128xbf16>
    %cst_182 = arith.constant dense<0.000000e+00> : vector<512x128xf32>
    %236 = tpu.matmul %234, %235, %cst_182 {dimension_numbers = #tpu.dot_dimension_numbers<[1], [0], [0], [1], [0, 0, 1, 1], [], []>} : vector<512x128xbf16>, vector<128x128xbf16>, vector<512x128xf32> -> vector<512x128xf32>
    %c1_183 = arith.constant 1 : index
    %c0_184 = arith.constant 0 : index
    %c0_185 = arith.constant 0 : index
    %237 = vector.load %arg18[%c1_183, %c0_184, %c0_185] : memref<9x128x128xbf16, #tpu.memory_space<vmem>>, vector<1x128x128xbf16>
    %238 = vector.shape_cast %237 : vector<1x128x128xbf16> to vector<128x128xbf16>
    %cst_186 = arith.constant dense<0.000000e+00> : vector<128x128xf32>
    %239 = tpu.matmul %225, %238, %cst_186 {dimension_numbers = #tpu.dot_dimension_numbers<[1], [0], [0], [1], [0, 0, 1, 1], [], []>} : vector<128x128xbf16>, vector<128x128xbf16>, vector<128x128xf32> -> vector<128x128xf32>
    %c1_187 = arith.constant 1 : index
    %c0_188 = arith.constant 0 : index
    %c0_189 = arith.constant 0 : index
    %240 = vector.load %arg19[%c1_187, %c0_188, %c0_189] : memref<9x512x128xbf16, #tpu.memory_space<vmem>>, vector<1x512x128xbf16>
    %241 = vector.shape_cast %240 : vector<1x512x128xbf16> to vector<512x128xbf16>
    %242 = arith.truncf %239 : vector<128x128xf32> to vector<128x128xbf16>
    %cst_190 = arith.constant dense<0.000000e+00> : vector<512x128xf32>
    %243 = tpu.matmul %241, %242, %cst_190 {dimension_numbers = #tpu.dot_dimension_numbers<[1], [0], [0], [1], [0, 0, 1, 1], [], []>} : vector<512x128xbf16>, vector<128x128xbf16>, vector<512x128xf32> -> vector<512x128xf32>
    %244 = arith.addf %236, %243 : vector<512x128xf32>
    %c2_191 = arith.constant 2 : index
    %c0_192 = arith.constant 0 : index
    %c0_193 = arith.constant 0 : index
    %245 = vector.load %arg18[%c2_191, %c0_192, %c0_193] : memref<9x128x128xbf16, #tpu.memory_space<vmem>>, vector<1x128x128xbf16>
    %246 = vector.shape_cast %245 : vector<1x128x128xbf16> to vector<128x128xbf16>
    %cst_194 = arith.constant dense<0.000000e+00> : vector<128x128xf32>
    %247 = tpu.matmul %225, %246, %cst_194 {dimension_numbers = #tpu.dot_dimension_numbers<[1], [0], [0], [1], [0, 0, 1, 1], [], []>} : vector<128x128xbf16>, vector<128x128xbf16>, vector<128x128xf32> -> vector<128x128xf32>
    %c2_195 = arith.constant 2 : index
    %c0_196 = arith.constant 0 : index
    %c0_197 = arith.constant 0 : index
    %248 = vector.load %arg19[%c2_195, %c0_196, %c0_197] : memref<9x512x128xbf16, #tpu.memory_space<vmem>>, vector<1x512x128xbf16>
    %249 = vector.shape_cast %248 : vector<1x512x128xbf16> to vector<512x128xbf16>
    %250 = arith.truncf %247 : vector<128x128xf32> to vector<128x128xbf16>
    %cst_198 = arith.constant dense<0.000000e+00> : vector<512x128xf32>
    %251 = tpu.matmul %249, %250, %cst_198 {dimension_numbers = #tpu.dot_dimension_numbers<[1], [0], [0], [1], [0, 0, 1, 1], [], []>} : vector<512x128xbf16>, vector<128x128xbf16>, vector<512x128xf32> -> vector<512x128xf32>
    %252 = arith.addf %244, %251 : vector<512x128xf32>
    %c3_199 = arith.constant 3 : index
    %c0_200 = arith.constant 0 : index
    %c0_201 = arith.constant 0 : index
    %253 = vector.load %arg18[%c3_199, %c0_200, %c0_201] : memref<9x128x128xbf16, #tpu.memory_space<vmem>>, vector<1x128x128xbf16>
    %254 = vector.shape_cast %253 : vector<1x128x128xbf16> to vector<128x128xbf16>
    %cst_202 = arith.constant dense<0.000000e+00> : vector<128x128xf32>
    %255 = tpu.matmul %225, %254, %cst_202 {dimension_numbers = #tpu.dot_dimension_numbers<[1], [0], [0], [1], [0, 0, 1, 1], [], []>} : vector<128x128xbf16>, vector<128x128xbf16>, vector<128x128xf32> -> vector<128x128xf32>
    %c3_203 = arith.constant 3 : index
    %c0_204 = arith.constant 0 : index
    %c0_205 = arith.constant 0 : index
    %256 = vector.load %arg19[%c3_203, %c0_204, %c0_205] : memref<9x512x128xbf16, #tpu.memory_space<vmem>>, vector<1x512x128xbf16>
    %257 = vector.shape_cast %256 : vector<1x512x128xbf16> to vector<512x128xbf16>
    %258 = arith.truncf %255 : vector<128x128xf32> to vector<128x128xbf16>
    %cst_206 = arith.constant dense<0.000000e+00> : vector<512x128xf32>
    %259 = tpu.matmul %257, %258, %cst_206 {dimension_numbers = #tpu.dot_dimension_numbers<[1], [0], [0], [1], [0, 0, 1, 1], [], []>} : vector<512x128xbf16>, vector<128x128xbf16>, vector<512x128xf32> -> vector<512x128xf32>
    %260 = arith.addf %252, %259 : vector<512x128xf32>
    %c4_207 = arith.constant 4 : index
    %c0_208 = arith.constant 0 : index
    %c0_209 = arith.constant 0 : index
    %261 = vector.load %arg18[%c4_207, %c0_208, %c0_209] : memref<9x128x128xbf16, #tpu.memory_space<vmem>>, vector<1x128x128xbf16>
    %262 = vector.shape_cast %261 : vector<1x128x128xbf16> to vector<128x128xbf16>
    %cst_210 = arith.constant dense<0.000000e+00> : vector<128x128xf32>
    %263 = tpu.matmul %225, %262, %cst_210 {dimension_numbers = #tpu.dot_dimension_numbers<[1], [0], [0], [1], [0, 0, 1, 1], [], []>} : vector<128x128xbf16>, vector<128x128xbf16>, vector<128x128xf32> -> vector<128x128xf32>
    %c4_211 = arith.constant 4 : index
    %c0_212 = arith.constant 0 : index
    %c0_213 = arith.constant 0 : index
    %264 = vector.load %arg19[%c4_211, %c0_212, %c0_213] : memref<9x512x128xbf16, #tpu.memory_space<vmem>>, vector<1x512x128xbf16>
    %265 = vector.shape_cast %264 : vector<1x512x128xbf16> to vector<512x128xbf16>
    %266 = arith.truncf %263 : vector<128x128xf32> to vector<128x128xbf16>
    %cst_214 = arith.constant dense<0.000000e+00> : vector<512x128xf32>
    %267 = tpu.matmul %265, %266, %cst_214 {dimension_numbers = #tpu.dot_dimension_numbers<[1], [0], [0], [1], [0, 0, 1, 1], [], []>} : vector<512x128xbf16>, vector<128x128xbf16>, vector<512x128xf32> -> vector<512x128xf32>
    %268 = arith.addf %260, %267 : vector<512x128xf32>
    %c5_215 = arith.constant 5 : index
    %c0_216 = arith.constant 0 : index
    %c0_217 = arith.constant 0 : index
    %269 = vector.load %arg18[%c5_215, %c0_216, %c0_217] : memref<9x128x128xbf16, #tpu.memory_space<vmem>>, vector<1x128x128xbf16>
    %270 = vector.shape_cast %269 : vector<1x128x128xbf16> to vector<128x128xbf16>
    %cst_218 = arith.constant dense<0.000000e+00> : vector<128x128xf32>
    %271 = tpu.matmul %225, %270, %cst_218 {dimension_numbers = #tpu.dot_dimension_numbers<[1], [0], [0], [1], [0, 0, 1, 1], [], []>} : vector<128x128xbf16>, vector<128x128xbf16>, vector<128x128xf32> -> vector<128x128xf32>
    %c5_219 = arith.constant 5 : index
    %c0_220 = arith.constant 0 : index
    %c0_221 = arith.constant 0 : index
    %272 = vector.load %arg19[%c5_219, %c0_220, %c0_221] : memref<9x512x128xbf16, #tpu.memory_space<vmem>>, vector<1x512x128xbf16>
    %273 = vector.shape_cast %272 : vector<1x512x128xbf16> to vector<512x128xbf16>
    %274 = arith.truncf %271 : vector<128x128xf32> to vector<128x128xbf16>
    %cst_222 = arith.constant dense<0.000000e+00> : vector<512x128xf32>
    %275 = tpu.matmul %273, %274, %cst_222 {dimension_numbers = #tpu.dot_dimension_numbers<[1], [0], [0], [1], [0, 0, 1, 1], [], []>} : vector<512x128xbf16>, vector<128x128xbf16>, vector<512x128xf32> -> vector<512x128xf32>
    %276 = arith.addf %268, %275 : vector<512x128xf32>
    %c6_223 = arith.constant 6 : index
    %c0_224 = arith.constant 0 : index
    %c0_225 = arith.constant 0 : index
    %277 = vector.load %arg18[%c6_223, %c0_224, %c0_225] : memref<9x128x128xbf16, #tpu.memory_space<vmem>>, vector<1x128x128xbf16>
    %278 = vector.shape_cast %277 : vector<1x128x128xbf16> to vector<128x128xbf16>
    %cst_226 = arith.constant dense<0.000000e+00> : vector<128x128xf32>
    %279 = tpu.matmul %225, %278, %cst_226 {dimension_numbers = #tpu.dot_dimension_numbers<[1], [0], [0], [1], [0, 0, 1, 1], [], []>} : vector<128x128xbf16>, vector<128x128xbf16>, vector<128x128xf32> -> vector<128x128xf32>
    %c6_227 = arith.constant 6 : index
    %c0_228 = arith.constant 0 : index
    %c0_229 = arith.constant 0 : index
    %280 = vector.load %arg19[%c6_227, %c0_228, %c0_229] : memref<9x512x128xbf16, #tpu.memory_space<vmem>>, vector<1x512x128xbf16>
    %281 = vector.shape_cast %280 : vector<1x512x128xbf16> to vector<512x128xbf16>
    %282 = arith.truncf %279 : vector<128x128xf32> to vector<128x128xbf16>
    %cst_230 = arith.constant dense<0.000000e+00> : vector<512x128xf32>
    %283 = tpu.matmul %281, %282, %cst_230 {dimension_numbers = #tpu.dot_dimension_numbers<[1], [0], [0], [1], [0, 0, 1, 1], [], []>} : vector<512x128xbf16>, vector<128x128xbf16>, vector<512x128xf32> -> vector<512x128xf32>
    %284 = arith.addf %276, %283 : vector<512x128xf32>
    %c7_231 = arith.constant 7 : index
    %c0_232 = arith.constant 0 : index
    %c0_233 = arith.constant 0 : index
    %285 = vector.load %arg18[%c7_231, %c0_232, %c0_233] : memref<9x128x128xbf16, #tpu.memory_space<vmem>>, vector<1x128x128xbf16>
    %286 = vector.shape_cast %285 : vector<1x128x128xbf16> to vector<128x128xbf16>
    %cst_234 = arith.constant dense<0.000000e+00> : vector<128x128xf32>
    %287 = tpu.matmul %225, %286, %cst_234 {dimension_numbers = #tpu.dot_dimension_numbers<[1], [0], [0], [1], [0, 0, 1, 1], [], []>} : vector<128x128xbf16>, vector<128x128xbf16>, vector<128x128xf32> -> vector<128x128xf32>
    %c7_235 = arith.constant 7 : index
    %c0_236 = arith.constant 0 : index
    %c0_237 = arith.constant 0 : index
    %288 = vector.load %arg19[%c7_235, %c0_236, %c0_237] : memref<9x512x128xbf16, #tpu.memory_space<vmem>>, vector<1x512x128xbf16>
    %289 = vector.shape_cast %288 : vector<1x512x128xbf16> to vector<512x128xbf16>
    %290 = arith.truncf %287 : vector<128x128xf32> to vector<128x128xbf16>
    %cst_238 = arith.constant dense<0.000000e+00> : vector<512x128xf32>
    %291 = tpu.matmul %289, %290, %cst_238 {dimension_numbers = #tpu.dot_dimension_numbers<[1], [0], [0], [1], [0, 0, 1, 1], [], []>} : vector<512x128xbf16>, vector<128x128xbf16>, vector<512x128xf32> -> vector<512x128xf32>
    %292 = arith.addf %284, %291 : vector<512x128xf32>
    %c8_239 = arith.constant 8 : index
    %c0_240 = arith.constant 0 : index
    %c0_241 = arith.constant 0 : index
    %293 = vector.load %arg18[%c8_239, %c0_240, %c0_241] : memref<9x128x128xbf16, #tpu.memory_space<vmem>>, vector<1x128x128xbf16>
    %294 = vector.shape_cast %293 : vector<1x128x128xbf16> to vector<128x128xbf16>
    %cst_242 = arith.constant dense<0.000000e+00> : vector<128x128xf32>
    %295 = tpu.matmul %225, %294, %cst_242 {dimension_numbers = #tpu.dot_dimension_numbers<[1], [0], [0], [1], [0, 0, 1, 1], [], []>} : vector<128x128xbf16>, vector<128x128xbf16>, vector<128x128xf32> -> vector<128x128xf32>
    %c8_243 = arith.constant 8 : index
    %c0_244 = arith.constant 0 : index
    %c0_245 = arith.constant 0 : index
    %296 = vector.load %arg19[%c8_243, %c0_244, %c0_245] : memref<9x512x128xbf16, #tpu.memory_space<vmem>>, vector<1x512x128xbf16>
    %297 = vector.shape_cast %296 : vector<1x512x128xbf16> to vector<512x128xbf16>
    %298 = arith.truncf %295 : vector<128x128xf32> to vector<128x128xbf16>
    %cst_246 = arith.constant dense<0.000000e+00> : vector<512x128xf32>
    %299 = tpu.matmul %297, %298, %cst_246 {dimension_numbers = #tpu.dot_dimension_numbers<[1], [0], [0], [1], [0, 0, 1, 1], [], []>} : vector<512x128xbf16>, vector<128x128xbf16>, vector<512x128xf32> -> vector<512x128xf32>
    %300 = arith.addf %292, %299 : vector<512x128xf32>
    %c0_247 = arith.constant 0 : index
    %c0_248 = arith.constant 0 : index
    %301 = vector.load %arg15[%c0_247, %c0_248] : memref<1x128xf32, #tpu.memory_space<vmem>>, vector<1x128xf32>
    %302 = vector.broadcast %301 : vector<1x128xf32> to vector<512x128xf32>
    %303 = arith.addf %300, %302 : vector<512x128xf32>
    %304 = math.tanh %303 : vector<512x128xf32>
    %c0_249 = arith.constant 0 : index
    %c0_250 = arith.constant 0 : index
    %305 = vector.load %arg17[%c0_249, %c0_250] : memref<512x128xf32, #tpu.memory_space<vmem>>, vector<512x128xf32>
    tpu.vector_store %arg17[%c0_249, %c0_250], %304 {strides = array<i32>} : memref<512x128xf32, #tpu.memory_space<vmem>>, vector<512x128xf32>,
    return
  }
  func.func @transform_0(%arg0: i32) -> (i32, i32) {
    %c0_i32 = arith.constant 0 : i32
    %c0_i32_0 = arith.constant 0 : i32
    %c0_i32_1 = arith.constant 0 : i32
    return %c0_i32, %c0_i32_0 : i32, i32
  }
  func.func @transform_1(%arg0: i32) -> (i32, i32) {
    %c0_i32 = arith.constant 0 : i32
    %c0_i32_0 = arith.constant 0 : i32
    %c0_i32_1 = arith.constant 0 : i32
    return %c0_i32, %c0_i32_0 : i32, i32
  }
  func.func @transform_2(%arg0: i32) -> (i32, i32) {
    %c0_i32 = arith.constant 0 : i32
    %c0_i32_0 = arith.constant 0 : i32
    %c0_i32_1 = arith.constant 0 : i32
    return %c0_i32, %c0_i32_0 : i32, i32
  }
  func.func @transform_3(%arg0: i32) -> (i32, i32) {
    %c0_i32 = arith.constant 0 : i32
    %c0_i32_0 = arith.constant 0 : i32
    %c0_i32_1 = arith.constant 0 : i32
    return %c0_i32, %c0_i32_0 : i32, i32
  }
  func.func @transform_4(%arg0: i32) -> (i32, i32) {
    %c0_i32 = arith.constant 0 : i32
    %c0_i32_0 = arith.constant 0 : i32
    %c0_i32_1 = arith.constant 0 : i32
    return %c0_i32, %c0_i32_0 : i32, i32
  }
  func.func @transform_5(%arg0: i32) -> (i32, i32, i32) {
    %c0_i32 = arith.constant 0 : i32
    %c0_i32_0 = arith.constant 0 : i32
    %c0_i32_1 = arith.constant 0 : i32
    %c0_i32_2 = arith.constant 0 : i32
    return %c0_i32, %c0_i32_0, %c0_i32_1 : i32, i32, i32
  }
  func.func @transform_6(%arg0: i32) -> (i32, i32) {
    %c0_i32 = arith.constant 0 : i32
    %c0_i32_0 = arith.constant 0 : i32
    %c0_i32_1 = arith.constant 0 : i32
    return %c0_i32, %c0_i32_0 : i32, i32
  }
  func.func @transform_7(%arg0: i32) -> (i32, i32) {
    %c0_i32 = arith.constant 0 : i32
    %c0_i32_0 = arith.constant 0 : i32
    %c0_i32_1 = arith.constant 0 : i32
    return %c0_i32, %c0_i32_0 : i32, i32
  }
  func.func @transform_8(%arg0: i32) -> (i32, i32, i32) {
    %c0_i32 = arith.constant 0 : i32
    %c0_i32_0 = arith.constant 0 : i32
    %c0_i32_1 = arith.constant 0 : i32
    %c0_i32_2 = arith.constant 0 : i32
    return %c0_i32, %c0_i32_0, %c0_i32_1 : i32, i32, i32
  }
  func.func @transform_9(%arg0: i32) -> (i32, i32) {
    %c0_i32 = arith.constant 0 : i32
    %c0_i32_0 = arith.constant 0 : i32
    %c0_i32_1 = arith.constant 0 : i32
    return %c0_i32, %c0_i32_0 : i32, i32
  }
  func.func @transform_10(%arg0: i32) -> (i32, i32) {
    %c0_i32 = arith.constant 0 : i32
    %c0_i32_0 = arith.constant 0 : i32
    %c0_i32_1 = arith.constant 0 : i32
    return %c0_i32, %c0_i32_0 : i32, i32
  }
  func.func @transform_11(%arg0: i32) -> (i32, i32, i32) {
    %c0_i32 = arith.constant 0 : i32
    %c0_i32_0 = arith.constant 0 : i32
    %c0_i32_1 = arith.constant 0 : i32
    %c0_i32_2 = arith.constant 0 : i32
    return %c0_i32, %c0_i32_0, %c0_i32_1 : i32, i32, i32
  }
  func.func @transform_12(%arg0: i32) -> (i32, i32, i32) {
    %c0_i32 = arith.constant 0 : i32
    %c0_i32_0 = arith.constant 0 : i32
    %c0_i32_1 = arith.constant 0 : i32
    %c0_i32_2 = arith.constant 0 : i32
    return %c0_i32, %c0_i32_0, %c0_i32_1 : i32, i32, i32
  }
  func.func @transform_14(%arg0: i32) -> (i32, i32) {
    %c0_i32 = arith.constant 0 : i32
    %c0_i32_0 = arith.constant 0 : i32
    %c0_i32_1 = arith.constant 0 : i32
    return %c0_i32, %c0_i32_0 : i32, i32
  }
  func.func @transform_16(%arg0: i32) -> (i32, i32) {
    %c0_i32 = arith.constant 0 : i32
    %c0_i32_0 = arith.constant 0 : i32
    %c0_i32_1 = arith.constant 0 : i32
    return %c0_i32, %c0_i32_0 : i32, i32
  }
}

</mosaic_0001>

<bundles_post_ra>
// kernel: generator_forward.1
= control target key start
LH: loop header
LB: loop body
LE: loop exit
PB: predicated region body
PF: predicated region fallthrough
CT: control target
= control target key end

     0   :  { %s18614_s0 = inlined_call_operand.hbm [shape: f32[2,32], index: 0, kind: input, shape index: {}]   ;;  %s18615_s1 = inlined_call_operand.hbm [shape: bf16[32,2048], index: 1, kind: input, shape index: {}]   ;;  %s18616_s2 = inlined_call_operand.hbm [shape: f32[1,2048], index: 2, kind: input, shape index: {}]   ;;  %s18617_s3 = inlined_call_operand.hbm [shape: f32[1,128], index: 3, kind: input, shape index: {}]   ;;  %s18618_s4 = inlined_call_operand.hbm [shape: f32[1,128], index: 4, kind: input, shape index: {}]   ;;  %s18619_s5 = inlined_call_operand.hbm [shape: bf16[9,128,128], index: 5, kind: input, shape index: {}]   ;;  %s18620_s6 = inlined_call_operand.hbm [shape: f32[1,128], index: 6, kind: input, shape index: {}]   ;;  %s18621_s7 = inlined_call_operand.hbm [shape: f32[1,128], index: 7, kind: input, shape index: {}]   ;;  %s18622_s8 = inlined_call_operand.hbm [shape: bf16[9,128,128], index: 8, kind: input, shape index: {}]   ;;  %s18623_s9 = inlined_call_operand.hbm [shape: f32[1,128], index: 9, kind: input, shape index: {}]   ;;  %s18624_s10 = inlined_call_operand.hbm [shape: f32[1,128], index: 10, kind: input, shape index: {}]   ;;  %s18625_s11 = inlined_call_operand.vmem [shape: bf16[9,128,32], index: 11, kind: input, shape index: {}]   ;;  %s18626_s12 = inlined_call_operand.hbm [shape: bf16[9,128,128], index: 12, kind: input, shape index: {}]   ;;  %s18627_s13 = inlined_call_operand.hbm [shape: bf16[9,128,128], index: 13, kind: input, shape index: {}]   ;;  %s18628_s14 = inlined_call_operand.hbm [shape: f32[1,128], index: 14, kind: input, shape index: {}]   ;;  %s18629_s15 = inlined_call_operand.hbm [shape: bf16[9,512,128], index: 15, kind: input, shape index: {}]   ;;  %s18630_s16 = inlined_call_operand.vmem [shape: f32[512,128], index: 16, kind: output, shape index: {}]  }
   0x1   :  { %18633 = sst [smem:[#allocation64_spill]] %s18614_s0 }
   0x2   :  { %18634 = sst [smem:[#allocation65_spill]] %s18630_s16 }
   0x3   :  { %21 = vsyncpa [#allocation6], 0 }
   0x4   :  { %22 = vsyncpa [#allocation8], 0 }
   0x5   :  { %23 = vsyncpa [#allocation11], 0 }
   0x6   :  { %24 = vsyncpa [#allocation14], 0 }
   0x7   :  { %25 = vsyncpa [#allocation17], 0 }
   0x8   :  { %26 = vsyncpa [#allocation20], 0 }
   0x9   :  { %27 = vsyncpa [#allocation23], 0  ;;  %s16955_s21 = smov [#allocation7]   ;;  %s16607_s25 = scalar_lea.hbm %s18615_s1, 4096 }
   0xa   :  { %s43_s22 = sshll.u32 %s16955_s21, 4  ;;  %p16608_p0 = scmp.ne.s32.totalorder %s18615_s1, %s16607_s25  ;;  %s44_s22 = int_to_ptr.vmem [resolvable:$true] %s43_s22 }
   0xb   :  { %p16611_p1 = scmp.lt.u32.totalorder %s16607_s25, %s18615_s1 }
   0xd   :  { %p16613_p2 = pnand %p16611_p1, %p16608_p0 }
   0xf   :  { %16616 = shalt.err (!%p16613_p2)
}
  0x10   :  { %s16617_s30 = scalar_lea.vmem %s44_s22, 4096  ;;  %p16622_p4 = scmp.lt.s32.totalorder %s44_s22, %s44_s22 }
  0x11   :  { %p16618_p3 = scmp.ne.s32.totalorder %s44_s22, %s16617_s30  ;;  %p16623_p5 = scmp.lt.s32.totalorder %s16617_s30, %s16617_s30 }
  0x13   :  { %p16624_p6 = por %p16623_p5, %p16622_p4 }
  0x15   :  { %p16625_p7 = pnand %p16624_p6, %p16618_p3 }
  0x17   :  { %16628 = shalt.err (!%p16625_p7)
}
  0x18   :  { %s16956_s0 = smov 1024   ;;  %s16957_s17 = smov 64  }
  0x19   :  { %49 = dma.hbm_to_vmem [thread:$0]  %s18615_s1, 4096, %s44_s22, [#allocation8], %s16956_s0, %s16956_s0, %s16957_s17  }
  0x1a   :  { %s16958_s20 = smov [#allocation10]   ;;  %s16959_s23 = smov [#allocation13]  }
  0x1b   :  { %s66_s21 = sshll.u32 %s16958_s20, 4  ;;  %s85_s24 = sshll.u32 %s16959_s23, 4  ;;  %s67_s21 = int_to_ptr.vmem [resolvable:$true] %s66_s21  ;;  %s86_s24 = int_to_ptr.vmem [resolvable:$true] %s85_s24 }
  0x1c   :  { %s16629_s27 = scalar_lea.hbm %s18617_s3, 16 }
  0x1d   :  { %p16630_p8 = scmp.ne.s32.totalorder %s18617_s3, %s16629_s27  ;;  %p16633_p9 = scmp.lt.u32.totalorder %s16629_s27, %s18617_s3 }
  0x1f   :  { %p16635_p10 = pnand %p16633_p9, %p16630_p8 }
  0x21   :  { %16638 = shalt.err (!%p16635_p10)
}
  0x22   :  { %s16639_s1 = scalar_lea.vmem %s67_s21, 16  ;;  %s16643_s22 = scalar_lea.vmem %s67_s21, 32 }
  0x23   :  { %p16640_p11 = scmp.ne.s32.totalorder %s67_s21, %s16639_s1  ;;  %p16644_p12 = scmp.lt.s32.totalorder %s67_s21, %s67_s21 }
  0x24   :  { %p16645_p13 = scmp.lt.s32.totalorder %s16643_s22, %s16639_s1 }
  0x26   :  { %p16646_p0 = por %p16645_p13, %p16644_p12 }
  0x28   :  { %p16647_p1 = pnand %p16646_p0, %p16640_p11 }
  0x2a   :  { %16650 = shalt.err (!%p16647_p1)
}
  0x2b   :  { %69 = dma.hbm_to_vmem [thread:$0]  %s18617_s3, 16, %s67_s21, [#allocation11]  }
  0x2c   :  { %s16651_s16 = scalar_lea.hbm %s18619_s5, 9216 }
  0x2d   :  { %p16652_p2 = scmp.ne.s32.totalorder %s18619_s5, %s16651_s16  ;;  %p16655_p3 = scmp.lt.u32.totalorder %s16651_s16, %s18619_s5 }
  0x2f   :  { %p16657_p4 = pnand %p16655_p3, %p16652_p2 }
  0x31   :  { %16660 = shalt.err (!%p16657_p4)
}
  0x32   :  { %s16661_s28 = scalar_lea.vmem %s86_s24, 9216  ;;  %p16666_p6 = scmp.lt.s32.totalorder %s86_s24, %s86_s24 }
  0x33   :  { %p16662_p5 = scmp.ne.s32.totalorder %s86_s24, %s16661_s28  ;;  %p16667_p7 = scmp.lt.s32.totalorder %s16661_s28, %s16661_s28 }
  0x35   :  { %p16668_p8 = por %p16667_p7, %p16666_p6 }
  0x37   :  { %p16669_p9 = pnand %p16668_p8, %p16662_p5 }
  0x39   :  { %16672 = shalt.err (!%p16669_p9)
}
  0x3a   :  { %s16960_s3 = smov 4   ;;  %s16961_s30 = smov [#allocation16]  }
  0x3b   :  { %91 = dma.hbm_to_vmem [thread:$0]  %s18619_s5, 9216, %s86_s24, [#allocation14], %s16957_s17, %s16957_s17, %s16960_s3  }
  0x3c   :  { %s108_s1 = sshll.u32 %s16961_s30, 4  ;;  %s16962_s22 = smov [#allocation19]   ;;  %s109_s1 = int_to_ptr.vmem [resolvable:$true] %s108_s1 }
  0x3d   :  { %s130_s0 = sshll.u32 %s16962_s22, 4  ;;  %s16673_s20 = scalar_lea.hbm %s18621_s7, 16  ;;  %s131_s0 = int_to_ptr.vmem [resolvable:$true] %s130_s0 }
  0x3e   :  { %p16674_p10 = scmp.ne.s32.totalorder %s18621_s7, %s16673_s20  ;;  %p16677_p11 = scmp.lt.u32.totalorder %s16673_s20, %s18621_s7 }
  0x40   :  { %p16679_p12 = pnand %p16677_p11, %p16674_p10 }
  0x42   :  { %16682 = shalt.err (!%p16679_p12)
}
  0x43   :  { %s16683_s5 = scalar_lea.vmem %s109_s1, 16  ;;  %s16687_s24 = scalar_lea.vmem %s109_s1, 32 }
  0x44   :  { %p16684_p13 = scmp.ne.s32.totalorder %s109_s1, %s16683_s5  ;;  %p16688_p0 = scmp.lt.s32.totalorder %s109_s1, %s109_s1 }
  0x45   :  { %p16689_p1 = scmp.lt.s32.totalorder %s16687_s24, %s16683_s5 }
  0x47   :  { %p16690_p2 = por %p16689_p1, %p16688_p0 }
  0x49   :  { %p16691_p3 = pnand %p16690_p2, %p16684_p13 }
  0x4b   :  { %16694 = shalt.err (!%p16691_p3)
}
  0x4c   :  { %111 = dma.hbm_to_vmem [thread:$0]  %s18621_s7, 16, %s109_s1, [#allocation17]  }
  0x4d   :  { %s16695_s30 = scalar_lea.hbm %s18623_s9, 16 }
  0x4e   :  { %p16696_p4 = scmp.ne.s32.totalorder %s18623_s9, %s16695_s30  ;;  %p16699_p5 = scmp.lt.u32.totalorder %s16695_s30, %s18623_s9 }
  0x50   :  { %p16701_p6 = pnand %p16699_p5, %p16696_p4 }
  0x52   :  { %16704 = shalt.err (!%p16701_p6)
}
  0x53   :  { %s16705_s16 = scalar_lea.vmem %s131_s0, 16  ;;  %s16709_s23 = scalar_lea.vmem %s131_s0, 32 }
  0x54   :  { %p16706_p7 = scmp.ne.s32.totalorder %s131_s0, %s16705_s16  ;;  %p16710_p8 = scmp.lt.s32.totalorder %s131_s0, %s131_s0 }
  0x55   :  { %p16711_p9 = scmp.lt.s32.totalorder %s16709_s23, %s16705_s16 }
  0x57   :  { %p16712_p10 = por %p16711_p9, %p16710_p8 }
  0x59   :  { %p16713_p11 = pnand %p16712_p10, %p16706_p7 }
  0x5b   :  { %16716 = shalt.err (!%p16713_p11)
}
  0x5c   :  { %133 = dma.hbm_to_vmem [thread:$0]  %s18623_s9, 16, %s131_s0, [#allocation20]  }
  0x5d   :  { %s16963_s25 = smov [#allocation22]   ;;  %s16964_s5 = smov [#allocation5]  }
  0x5e   :  { %s151_s26 = sshll.u32 %s16963_s25, 4  ;;  %s34_s24 = sshll.u32 %s16964_s5, 4  ;;  %s152_s26 = int_to_ptr.vmem [resolvable:$true] %s151_s26  ;;  %s35_s24 = int_to_ptr.vmem [resolvable:$true] %s34_s24 }
  0x5f   :  { %s16717_s21 = scalar_lea.hbm %s18626_s12, 9216 }
  0x60   :  { %p16718_p12 = scmp.ne.s32.totalorder %s18626_s12, %s16717_s21  ;;  %p16721_p13 = scmp.lt.u32.totalorder %s16717_s21, %s18626_s12 }
  0x62   :  { %p16723_p0 = pnand %p16721_p13, %p16718_p12 }
  0x64   :  { %16726 = shalt.err (!%p16723_p0)
}
  0x65   :  { %s16727_s9 = scalar_lea.vmem %s152_s26, 9216  ;;  %p16732_p2 = scmp.lt.s32.totalorder %s152_s26, %s152_s26 }
  0x66   :  { %p16728_p1 = scmp.ne.s32.totalorder %s152_s26, %s16727_s9  ;;  %p16733_p3 = scmp.lt.s32.totalorder %s16727_s9, %s16727_s9 }
  0x68   :  { %p16734_p4 = por %p16733_p3, %p16732_p2 }
  0x6a   :  { %p16735_p5 = pnand %p16734_p4, %p16728_p1 }
  0x6c   :  { %16738 = shalt.err (!%p16735_p5)
}
  0x6d   :  { %157 = dma.hbm_to_vmem [thread:$0]  %s18626_s12, 9216, %s152_s26, [#allocation23], %s16957_s17, %s16957_s17, %s16960_s3  }
  0x6e   :  { %s18635_s23 = sld [smem:[#allocation64_spill]] }
  0x74   :  { %s16739_s7 = scalar_lea.hbm %s18635_s23, 32 }
  0x75   :  { %p16740_p6 = scmp.ne.s32.totalorder %s18635_s23, %s16739_s7  ;;  %p16743_p7 = scmp.lt.u32.totalorder %s16739_s7, %s18635_s23 }
  0x77   :  { %p16745_p8 = pnand %p16743_p7, %p16740_p6 }
  0x79   :  { %16748 = shalt.err (!%p16745_p8)
}
  0x7a   :  { %s16749_s28 = scalar_lea.vmem %s35_s24, 32  ;;  %p16754_p10 = scmp.lt.s32.totalorder %s35_s24, %s35_s24 }
  0x7b   :  { %p16750_p9 = scmp.ne.s32.totalorder %s35_s24, %s16749_s28  ;;  %p16755_p11 = scmp.lt.s32.totalorder %s16749_s28, %s16749_s28 }
  0x7d   :  { %p16756_p12 = por %p16755_p11, %p16754_p10 }
  0x7f   :  { %p16757_p13 = pnand %p16756_p12, %p16750_p9 }
  0x81   :  { %16760 = shalt.err (!%p16757_p13)
}
  0x82   :  { %37 = dma.hbm_to_vmem [thread:$0]  %s18635_s23, 32, %s35_s24, [#allocation6]  }
  0x83   :  { %s16965_s21 = smov [#allocation9]   ;;  %s16966_s30 = smov [#allocation12]  }
  0x84   :  { %s56_s29 = sshll.u32 %s16965_s21, 4  ;;  %s76_s22 = sshll.u32 %s16966_s30, 4  ;;  %s57_s29 = int_to_ptr.vmem [resolvable:$true] %s56_s29  ;;  %s77_s22 = int_to_ptr.vmem [resolvable:$true] %s76_s22 }
  0x85   :  { %s16761_s0 = scalar_lea.hbm %s18616_s2, 256 }
  0x86   :  { %p16762_p0 = scmp.ne.s32.totalorder %s18616_s2, %s16761_s0  ;;  %p16765_p1 = scmp.lt.u32.totalorder %s16761_s0, %s18616_s2 }
  0x88   :  { %p16767_p2 = pnand %p16765_p1, %p16762_p0 }
  0x8a   :  { %16770 = shalt.err (!%p16767_p2)
}
  0x8b   :  { %s16771_s24 = scalar_lea.vmem %s57_s29, 256  ;;  %p16776_p4 = scmp.lt.s32.totalorder %s57_s29, %s57_s29 }
  0x8c   :  { %p16772_p3 = scmp.ne.s32.totalorder %s57_s29, %s16771_s24  ;;  %p16777_p5 = scmp.lt.s32.totalorder %s16771_s24, %s16771_s24 }
  0x8e   :  { %p16778_p6 = por %p16777_p5, %p16776_p4 }
  0x90   :  { %p16779_p7 = pnand %p16778_p6, %p16772_p3 }
  0x92   :  { %16782 = shalt.err (!%p16779_p7)
}
  0x93   :  { %59 = dma.hbm_to_vmem [thread:$0]  %s18616_s2, 256, %s57_s29, [#allocation8]  }
  0x94   :  { %s16783_s27 = scalar_lea.hbm %s18618_s4, 16 }
  0x95   :  { %p16784_p8 = scmp.ne.s32.totalorder %s18618_s4, %s16783_s27  ;;  %p16787_p9 = scmp.lt.u32.totalorder %s16783_s27, %s18618_s4 }
  0x97   :  { %p16789_p10 = pnand %p16787_p9, %p16784_p8 }
  0x99   :  { %16792 = shalt.err (!%p16789_p10)
}
  0x9a   :  { %s16793_s30 = scalar_lea.vmem %s77_s22, 16  ;;  %s16797_s18 = scalar_lea.vmem %s77_s22, 32 }
  0x9b   :  { %p16794_p11 = scmp.ne.s32.totalorder %s77_s22, %s16793_s30  ;;  %p16798_p12 = scmp.lt.s32.totalorder %s77_s22, %s77_s22 }
  0x9c   :  { %p16799_p13 = scmp.lt.s32.totalorder %s16797_s18, %s16793_s30 }
  0x9e   :  { %p16800_p0 = por %p16799_p13, %p16798_p12 }
  0xa0   :  { %p16801_p1 = pnand %p16800_p0, %p16794_p11 }
  0xa2   :  { %16804 = shalt.err (!%p16801_p1)
}
  0xa3   :  { %79 = dma.hbm_to_vmem [thread:$0]  %s18618_s4, 16, %s77_s22, [#allocation11]  }
  0xa4   :  { %s16967_s9 = smov [#allocation15]   ;;  %s16968_s19 = smov [#allocation18]  }
  0xa5   :  { %s98_s0 = sshll.u32 %s16967_s9, 4  ;;  %s117_s20 = sshll.u32 %s16968_s19, 4  ;;  %s99_s0 = int_to_ptr.vmem [resolvable:$true] %s98_s0  ;;  %s17175_s20 = int_to_ptr.vmem [resolvable:$true] %s117_s20 }
  0xa6   :  { %s16805_s24 = scalar_lea.hbm %s18620_s6, 16 }
  0xa7   :  { %p16806_p2 = scmp.ne.s32.totalorder %s18620_s6, %s16805_s24  ;;  %p16809_p3 = scmp.lt.u32.totalorder %s16805_s24, %s18620_s6 }
  0xa9   :  { %p16811_p4 = pnand %p16809_p3, %p16806_p2 }
  0xab   :  { %16814 = shalt.err (!%p16811_p4)
}
  0xac   :  { %s16815_s4 = scalar_lea.vmem %s99_s0, 16  ;;  %s16819_s22 = scalar_lea.vmem %s99_s0, 32 }
  0xad   :  { %p16816_p5 = scmp.ne.s32.totalorder %s99_s0, %s16815_s4  ;;  %p16820_p6 = scmp.lt.s32.totalorder %s99_s0, %s99_s0 }
  0xae   :  { %p16821_p7 = scmp.lt.s32.totalorder %s16819_s22, %s16815_s4 }
  0xb0   :  { %p16822_p8 = por %p16821_p7, %p16820_p6 }
  0xb2   :  { %p16823_p9 = pnand %p16822_p8, %p16816_p5 }
  0xb4   :  { %16826 = shalt.err (!%p16823_p9)
}
  0xb5   :  { %101 = dma.hbm_to_vmem [thread:$0]  %s18620_s6, 16, %s99_s0, [#allocation14]  }
  0xb6   :  { %s16827_s21 = scalar_lea.hbm %s18622_s8, 9216 }
  0xb7   :  { %p16828_p10 = scmp.ne.s32.totalorder %s18622_s8, %s16827_s21  ;;  %p16831_p11 = scmp.lt.u32.totalorder %s16827_s21, %s18622_s8 }
  0xb9   :  { %p16833_p12 = pnand %p16831_p11, %p16828_p10 }
  0xbb   :  { %16836 = shalt.err (!%p16833_p12)
}
  0xbc   :  { %s16837_s9 = scalar_lea.vmem %s17175_s20, 9216  ;;  %p16842_p0 = scmp.lt.s32.totalorder %s17175_s20, %s17175_s20 }
  0xbd   :  { %p16838_p13 = scmp.ne.s32.totalorder %s17175_s20, %s16837_s9  ;;  %p16843_p1 = scmp.lt.s32.totalorder %s16837_s9, %s16837_s9 }
  0xbf   :  { %p16844_p2 = por %p16843_p1, %p16842_p0 }
  0xc1   :  { %p16845_p3 = pnand %p16844_p2, %p16838_p13 }
  0xc3   :  { %16848 = shalt.err (!%p16845_p3)
}
  0xc4   :  { %123 = dma.hbm_to_vmem [thread:$0]  %s18622_s8, 9216, %s17175_s20, [#allocation17], %s16957_s17, %s16957_s17, %s16960_s3  }
  0xc5   :  { %s16969_s19 = smov [#allocation21]   ;;  %s16970_s7 = smov [#allocation24]  }
  0xc6   :  { %s140_s16 = sshll.u32 %s16969_s19, 4  ;;  %s164_s24 = sshll.u32 %s16970_s7, 4  ;;  %s141_s16 = int_to_ptr.vmem [resolvable:$true] %s140_s16  ;;  %s165_s24 = int_to_ptr.vmem [resolvable:$true] %s164_s24 }
  0xc7   :  { %s16849_s25 = scalar_lea.hbm %s18624_s10, 16 }
  0xc8   :  { %p16850_p4 = scmp.ne.s32.totalorder %s18624_s10, %s16849_s25  ;;  %p16853_p5 = scmp.lt.u32.totalorder %s16849_s25, %s18624_s10 }
  0xca   :  { %p16855_p6 = pnand %p16853_p5, %p16850_p4 }
  0xcc   :  { %16858 = shalt.err (!%p16855_p6)
}
  0xcd   :  { %s16859_s8 = scalar_lea.vmem %s141_s16, 16  ;;  %s16863_s17 = scalar_lea.vmem %s141_s16, 32 }
  0xce   :  { %p16860_p7 = scmp.ne.s32.totalorder %s141_s16, %s16859_s8  ;;  %p16864_p8 = scmp.lt.s32.totalorder %s141_s16, %s141_s16 }
  0xcf   :  { %p16865_p9 = scmp.lt.s32.totalorder %s16863_s17, %s16859_s8 }
  0xd1   :  { %p16866_p10 = por %p16865_p9, %p16864_p8 }
  0xd3   :  { %p16867_p11 = pnand %p16866_p10, %p16860_p7 }
  0xd5   :  { %16870 = shalt.err (!%p16867_p11)
}
  0xd6   :  { %143 = dma.hbm_to_vmem [thread:$0]  %s18624_s10, 16, %s141_s16, [#allocation20]  }
  0xd7   :  { %s16871_s26 = scalar_lea.hbm %s18628_s14, 16 }
  0xd8   :  { %p16872_p12 = scmp.ne.s32.totalorder %s18628_s14, %s16871_s26  ;;  %p16875_p13 = scmp.lt.u32.totalorder %s16871_s26, %s18628_s14 }
  0xda   :  { %p16877_p0 = pnand %p16875_p13, %p16872_p12 }
  0xdc   :  { %16880 = shalt.err (!%p16877_p0)
}
  0xdd   :  { %s16881_s29 = scalar_lea.vmem %s165_s24, 16  ;;  %s16885_s9 = scalar_lea.vmem %s165_s24, 32 }
  0xde   :  { %p16882_p1 = scmp.ne.s32.totalorder %s165_s24, %s16881_s29  ;;  %p16886_p2 = scmp.lt.s32.totalorder %s165_s24, %s165_s24 }
  0xdf   :  { %p16887_p3 = scmp.lt.s32.totalorder %s16885_s9, %s16881_s29 }
  0xe1   :  { %p16888_p4 = por %p16887_p3, %p16886_p2 }
  0xe3   :  { %p16889_p5 = pnand %p16888_p4, %p16882_p1 }
  0xe5   :  { %16892 = shalt.err (!%p16889_p5)
}
  0xe6   :  { %167 = dma.hbm_to_vmem [thread:$0]  %s18628_s14, 16, %s165_s24, [#allocation23]  }
  0xe7   :  { %16937 = dma.done.wait [#allocation6], 32  }
  0xe8   :  { %16938 = vsyncadd [#allocation6], 4294967264 }
  0xe9   :  { %16939 = dma.done.wait [#allocation8], 4352  }
  0xea   :  { %16940 = vsyncadd [#allocation8], 4294962944 }
  0xeb   :  { %16941 = dma.done.wait [#allocation11], 32  }
  0xec   :  { %16942 = vsyncadd [#allocation11], 4294967264 }
  0xed   :  { %16943 = dma.done.wait [#allocation14], 9232  }
  0xee   :  { %16944 = vsyncadd [#allocation14], 4294958064 }
  0xef   :  { %16945 = dma.done.wait [#allocation17], 9232  }
  0xf0   :  { %16946 = vsyncadd [#allocation17], 4294958064 }
  0xf1   :  { %16947 = dma.done.wait [#allocation20], 32  }
  0xf2   :  { %16948 = vsyncadd [#allocation20], 4294967264 }
  0xf3   :  { %16949 = dma.done.wait [#allocation23], 9232  }
  0xf4   :  { %16950 = vsyncadd [#allocation23], 4294958064  ;;  %v16971_v0 = vmov 0   ;;  %v233_v1 = vld [vmem:[#allocation7] sm:$0xff]  ;;  %v234_v3 = vld [vmem:[#allocation7 + $0x8] sm:$0xff]  ;;  %vm509_vm0 = vcmask 261120  }
  0xf5   :  { %545 = vmatprep.mubr.bf16.mxu0 %v16971_v0  ;;  %586 = vmatprep.mubr.bf16.mxu1 %v16971_v0  ;;  %v241_v2 = vld [vmem:[#allocation7 + $0x40] sm:$0xff]  ;;  %v242_v5 = vld [vmem:[#allocation7 + $0x48] sm:$0xff]  ;;  %v235_v15 = vld [vmem:[#allocation7 + $0x10] sm:$0xff]  ;;  %s16974_s30 = smov [#allocation3]   ;;  %s16893_s9 = scalar_lea.hbm %s18627_s13, 9216 }
  0xf6   :  { %v11886_v4 = vcombine.high %v233_v1, %v241_v2  ;;  %v11885_v6 = vcombine.low %v233_v1, %v241_v2  ;;  %v249_v7 = vld [vmem:[#allocation7 + $0x80] sm:$0xff]  ;;  %v11888_v9 = vcombine.high %v234_v3, %v242_v5  ;;  %v11887_v10 = vcombine.low %v234_v3, %v242_v5  ;;  %v250_v12 = vld [vmem:[#allocation7 + $0x88] sm:$0xff]  ;;  %v243_v16 = vld [vmem:[#allocation7 + $0x50] sm:$0xff]  ;;  %s227_s18 = sshll.u32 %s16974_s30, 4  ;;  %p16894_p6 = scmp.ne.s32.totalorder %s18627_s13, %s16893_s9  ;;  %s228_s18 = int_to_ptr.vmem [resolvable:$true] %s227_s18 }
  0xf7   :  { %v257_v8 = vld [vmem:[#allocation7 + $0xc0] sm:$0xff]  ;;  %v258_v13 = vld [vmem:[#allocation7 + $0xc8] sm:$0xff]  ;;  %v236_v17 = vld [vmem:[#allocation7 + $0x18] sm:$0xff]  ;;  %v11890_v22 = vcombine.high %v235_v15, %v243_v16  ;;  %v11889_v29 = vcombine.low %v235_v15, %v243_v16  ;;  %p16897_p7 = scmp.lt.u32.totalorder %s16893_s9, %s18627_s13 }
  0xf8   :  { %v11902_v11 = vcombine.high %v249_v7, %v257_v8  ;;  %513 = vmatprep.subr.bf16.mxu0 %v11886_v4  ;;  %v11904_v14 = vcombine.high %v250_v12, %v258_v13  ;;  %554 = vmatprep.subr.bf16.mxu1 %v11888_v9  ;;  %v11901_v18 = vcombine.low %v249_v7, %v257_v8  ;;  %v231_v19 = vld [vmem:[#allocation5] sm:$0x3]  ;;  %v251_v24 = vld [vmem:[#allocation7 + $0x90] sm:$0xff]  ;;  %v237_v33 = vld [vmem:[#allocation7 + $0x20] sm:$0xff] }
  0xf9   :  { %514 = vmatpush1.bf16.msra.mxu0 %v11885_v6  ;;  %v244_v20 = vld [vmem:[#allocation7 + $0x58] sm:$0xff]  ;;  %555 = vmatpush1.bf16.msra.mxu1 %v11887_v10  ;;  %v11903_v21 = vcombine.low %v250_v12, %v258_v13  ;;  %v259_v25 = vld [vmem:[#allocation7 + $0xd0] sm:$0xff]  ;;  %v17235_v26 = vpack.c.bf16 %v231_v19, %v231_v19  ;;  %v245_v34 = vld [vmem:[#allocation7 + $0x60] sm:$0xff]  ;;  %p16899_p8 = pnand %p16897_p7, %p16894_p6 }
  0xfa   :  { %515 = vmatprep.subr.bf16.mxu0 %v11902_v11  ;;  %556 = vmatprep.subr.bf16.mxu1 %v11904_v14  ;;  %v11892_v23 = vcombine.high %v236_v17, %v244_v20  ;;  %v252_v27 = vld [vmem:[#allocation7 + $0x98] sm:$0xff]  ;;  %v11891_v30 = vcombine.low %v236_v17, %v244_v20  ;;  %v11906_v31 = vcombine.high %v251_v24, %v259_v25  ;;  %v238_v35 = vld [vmem:[#allocation7 + $0x28] sm:$0xff]  ;;  %v253_v38 = vld [vmem:[#allocation7 + $0xa0] sm:$0xff]  ;;  %v269_v20 = vlaneseq }
  0xfb   :  { %v260_v28 = vld [vmem:[#allocation7 + $0xd8] sm:$0xff]  ;;  %v246_v36 = vld [vmem:[#allocation7 + $0x68] sm:$0xff]  ;;  %v11905_v37 = vcombine.low %v251_v24, %v259_v25  ;;  %v261_v39 = vld [vmem:[#allocation7 + $0xe0] sm:$0xff]  ;;  %v11894_v41 = vcombine.high %v237_v33, %v245_v34  ;;  %v11893_v45 = vcombine.low %v237_v33, %v245_v34 }
  0xfc   :  { %v11908_v32 = vcombine.high %v252_v27, %v260_v28  ;;  %v11907_v40 = vcombine.low %v252_v27, %v260_v28  ;;  %v254_v42 = vld [vmem:[#allocation7 + $0xa8] sm:$0xff]  ;;  %v11896_v44 = vcombine.high %v238_v35, %v246_v36  ;;  %v239_v46 = vld [vmem:[#allocation7 + $0x30] sm:$0xff]  ;;  %v11895_v48 = vcombine.low %v238_v35, %v246_v36  ;;  %v240_v50 = vld [vmem:[#allocation7 + $0x38] sm:$0xff] }
  0xfd   :  { %516 = vmatpush1.bf16.msra.mxu0 %v11901_v18  ;;  %557 = vmatpush1.bf16.msra.mxu1 %v11903_v21  ;;  %v262_v43 = vld [vmem:[#allocation7 + $0xe8] sm:$0xff]  ;;  %v247_v47 = vld [vmem:[#allocation7 + $0x70] sm:$0xff]  ;;  %v11910_v49 = vcombine.high %v253_v38, %v261_v39  ;;  %v248_v51 = vld [vmem:[#allocation7 + $0x78] sm:$0xff]  ;;  %v11909_v53 = vcombine.low %v253_v38, %v261_v39  ;;  %v17262_v21 = vshrl.u32 %v269_v20, 7 }
  0xfe   :  { %595 = vmatprep.subr.bf16.mxu0 %v11890_v22  ;;  %636 = vmatprep.subr.bf16.mxu1 %v11892_v23  ;;  %v11912_v52 = vcombine.high %v254_v42, %v262_v43  ;;  %v255_v54 = vld [vmem:[#allocation7 + $0xb0] sm:$0xff]  ;;  %v11911_v56 = vcombine.low %v254_v42, %v262_v43  ;;  %v11898_v57 = vcombine.high %v239_v46, %v247_v47  ;;  %v256_v58 = vld [vmem:[#allocation7 + $0xb8] sm:$0xff]  ;;  %v16182_v8 = vld [vmem:[#allocation13 + $0x10] sm:$0xff]   ;;  %v16972_v23 = vmov 1966171168  }
  0xff   :  { %v263_v55 = vld [vmem:[#allocation7 + $0xf0] sm:$0xff]  ;;  %v264_v59 = vld [vmem:[#allocation7 + $0xf8] sm:$0xff]  ;;  %v11900_v60 = vcombine.high %v240_v50, %v248_v51  ;;  %v11897_v61 = vcombine.low %v239_v46, %v247_v47  ;;  %v11899_v62 = vcombine.low %v240_v50, %v248_v51  ;;  %v16189_v15 = vld [vmem:[#allocation13 + $0x70] sm:$0xff]   ;;  %v17265_v22 = vsub.s32 0, %v17262_v21 }
 0x100   :  { %11917 = vmatmul.mubr.msk.bf16.vlgmr.msra.gmra.mrb[0].mxu0 %vm509_vm0, %v17235_v26  ;;  %11918 = vmatmul.mubr.msk.bf16.vlgmr.msra.gmra.mrb[0].mxu1 %vm509_vm0, %v17235_v26  ;;  %v11914_v63 = vcombine.high %v255_v54, %v263_v55  ;;  %v11916_v1 = vcombine.high %v256_v58, %v264_v59  ;;  %v11913_v2 = vcombine.low %v255_v54, %v263_v55  ;;  %v16177_v4 = vld [vmem:[#allocation13 + $0x40] sm:$0xff]   ;;  %v16179_v6 = vld [vmem:[#allocation13 + $0x48] sm:$0xff]   ;;  %v16183_v9 = vld [vmem:[#allocation13 + $0x58] sm:$0xff]   ;;  %v862_v24 = vunpack.c.l.s4 %v16972_v23 }
 0x101   :  { %596 = vmatpush1.bf16.msra.mxu0 %v11889_v29  ;;  %637 = vmatpush1.bf16.msra.mxu1 %v11891_v30  ;;  %v11915_v3 = vcombine.low %v256_v58, %v264_v59  ;;  %v16178_v5 = vld [vmem:[#allocation13] sm:$0xff]   ;;  %v16180_v7 = vld [vmem:[#allocation13 + $0x8] sm:$0xff]   ;;  %v16184_v10 = vld [vmem:[#allocation13 + $0x18] sm:$0xff]   ;;  %v275_v27 = vsub.s32 1, %v17262_v21  ;;  %v283_v28 = vsub.s32 3, %v17262_v21  ;;  %v287_v39 = vsub.s32 4, %v17262_v21 }
 0x102   :  { %597 = vmatprep.subr.bf16.mxu0 %v11906_v31  ;;  %638 = vmatprep.subr.bf16.mxu1 %v11908_v32  ;;  %v16185_v11 = vld [vmem:[#allocation13 + $0x60] sm:$0xff]   ;;  %v16187_v13 = vld [vmem:[#allocation13 + $0x68] sm:$0xff]   ;;  %v16190_v16 = vld [vmem:[#allocation13 + $0x30] sm:$0xff]   ;;  %v863_v30 = vunpack.c.0.s8 %v862_v24 }
 0x103   :  { %627 = vmatprep.mubr.bf16.mxu0 %v16971_v0  ;;  %668 = vmatprep.mubr.bf16.mxu1 %v16971_v0  ;;  %v16186_v12 = vld [vmem:[#allocation13 + $0x20] sm:$0xff]   ;;  %v16188_v14 = vld [vmem:[#allocation13 + $0x28] sm:$0xff]   ;;  %v16191_v17 = vld [vmem:[#allocation13 + $0x78] sm:$0xff]  }
 0x104   :  { %v16192_v18 = vld [vmem:[#allocation13 + $0x38] sm:$0xff]   ;;  %v17259_v19 = vld [vmem:[#allocation13 + $0x80] sm:$0xff]   ;;  %v265_v25 = vld [vmem:[#allocation9] sm:$0xff]  ;;  %v17272_v38 = vsub.s32 %v863_v30, %v17262_v21 }
 0x105   :  { %598 = vmatpush1.bf16.msra.mxu0 %v11905_v37  ;;  %639 = vmatpush1.bf16.msra.mxu1 %v11907_v40  ;;  %v272_v29 = vrot.slane %v265_v25, %v17265_v22  ;;  %v276_v32 = vrot.slane %v265_v25, %v275_v27  ;;  %v284_v33 = vrot.slane %v265_v25, %v283_v28 }
 0x106   :  { %677 = vmatprep.subr.bf16.mxu0 %v11894_v41  ;;  %718 = vmatprep.subr.bf16.mxu1 %v11896_v44  ;;  %v295_v44 = vsub.s32 6, %v17262_v21 }
 0x108   :  { %11919 = vmatmul.mubr.msk.bf16.vlgmr.msra.gmra.mrb[4].mxu0 %vm509_vm0, %v17235_v26  ;;  %11920 = vmatmul.mubr.msk.bf16.vlgmr.msra.gmra.mrb[4].mxu1 %vm509_vm0, %v17235_v26  ;;  %v296_v55 = vrot.slane %v265_v25, %v295_v44 }
 0x109   :  { %678 = vmatpush1.bf16.msra.mxu0 %v11893_v45  ;;  %719 = vmatpush1.bf16.msra.mxu1 %v11895_v48  ;;  %v291_v45 = vsub.s32 5, %v17262_v21 }
 0x10a   :  { %679 = vmatprep.subr.bf16.mxu0 %v11910_v49  ;;  %720 = vmatprep.subr.bf16.mxu1 %v11912_v52  ;;  %v299_v49 = vsub.s32 7, %v17262_v21 }
 0x10b   :  { %709 = vmatprep.mubr.bf16.mxu0 %v16971_v0  ;;  %750 = vmatprep.mubr.bf16.mxu1 %v16971_v0 }
 0x10c   :  { %v300_v58 = vrot.slane %v265_v25, %v299_v49 }
 0x10d   :  { %680 = vmatpush1.bf16.msra.mxu0 %v11909_v53  ;;  %721 = vmatpush1.bf16.msra.mxu1 %v11911_v56  ;;  %v288_v53 = vrot.slane %v265_v25, %v287_v39  ;;  %v292_v56 = vrot.slane %v265_v25, %v291_v45 }
 0x10e   :  { %759 = vmatprep.subr.bf16.mxu0 %v11898_v57  ;;  %800 = vmatprep.subr.bf16.mxu1 %v11900_v60 }
 0x110   :  { %11921 = vmatmul.mubr.msk.bf16.vlgmr.msra.gmra.mrb[8].mxu0 %vm509_vm0, %v17235_v26  ;;  %11922 = vmatmul.mubr.msk.bf16.vlgmr.msra.gmra.mrb[8].mxu1 %vm509_vm0, %v17235_v26 }
 0x111   :  { %760 = vmatpush1.bf16.msra.mxu0 %v11897_v61  ;;  %801 = vmatpush1.bf16.msra.mxu1 %v11899_v62 }
 0x112   :  { %761 = vmatprep.subr.bf16.mxu0 %v11914_v63  ;;  %802 = vmatprep.subr.bf16.mxu1 %v11916_v1 }
 0x113   :  { %791 = vmatprep.mubr.bf16.mxu0 %v16971_v0  ;;  %832 = vmatprep.mubr.bf16.mxu1 %v16971_v0  ;;  %v16181_v0 = vld [vmem:[#allocation13 + $0x50] sm:$0xff]  }
 0x115   :  { %762 = vmatpush1.bf16.msra.mxu0 %v11913_v2  ;;  %803 = vmatpush1.bf16.msra.mxu1 %v11915_v3 }
 0x116   :  { %13429 = vmatprep.subr.bf16.mxu1 %v16177_v4  ;;  %13409 = vmatprep.subr.bf16.mxu0 %v16178_v5 }
 0x118   :  { %11923 = vmatmul.mubr.msk.bf16.vlgmr.msra.gmra.mrb[12].mxu0 %vm509_vm0, %v17235_v26  ;;  %11924 = vmatmul.mubr.msk.bf16.vlgmr.msra.gmra.mrb[12].mxu1 %vm509_vm0, %v17235_v26  ;;  %v279_v26 = vsub.s32 2, %v17262_v21 }
 0x119   :  { %13430 = vmatpush3.bf16.msra.mxu1 %v16177_v4  ;;  %13410 = vmatpush3.bf16.msra.mxu0 %v16178_v5 }
 0x11a   :  { %13431 = vmatprep.subr.bf16.mxu1 %v16179_v6  ;;  %13411 = vmatprep.subr.bf16.mxu0 %v16180_v7  ;;  %v280_v31 = vrot.slane %v265_v25, %v279_v26 }
 0x11d   :  { %13432 = vmatpush3.bf16.msra.mxu1 %v16179_v6  ;;  %13412 = vmatpush3.bf16.msra.mxu0 %v16180_v7  ;;  %v266_v6 = vld [vmem:[#allocation9 + $0x8] sm:$0xff] }
 0x11e   :  { %13433 = vmatprep.subr.bf16.mxu1 %v16181_v0  ;;  %13413 = vmatprep.subr.bf16.mxu0 %v16182_v8 }
 0x121   :  { %13434 = vmatpush3.bf16.msra.mxu1 %v16181_v0  ;;  %13414 = vmatpush3.bf16.msra.mxu0 %v16182_v8 }
 0x122   :  { %13435 = vmatprep.subr.bf16.mxu1 %v16183_v9  ;;  %13415 = vmatprep.subr.bf16.mxu0 %v16184_v10 }
 0x125   :  { %13436 = vmatpush3.bf16.msra.mxu1 %v16183_v9  ;;  %13416 = vmatpush3.bf16.msra.mxu0 %v16184_v10 }
 0x126   :  { %13437 = vmatprep.subr.bf16.mxu1 %v16185_v11  ;;  %13417 = vmatprep.subr.bf16.mxu0 %v16186_v12 }
 0x129   :  { %13438 = vmatpush3.bf16.msra.mxu1 %v16185_v11  ;;  %13418 = vmatpush3.bf16.msra.mxu0 %v16186_v12  ;;  %v304_v12 = vrot.slane %v266_v6, %v17265_v22 }
 0x12a   :  { %13439 = vmatprep.subr.bf16.mxu1 %v16187_v13  ;;  %13419 = vmatprep.subr.bf16.mxu0 %v16188_v14 }
 0x12d   :  { %13440 = vmatpush3.bf16.msra.mxu1 %v16187_v13  ;;  %13420 = vmatpush3.bf16.msra.mxu0 %v16188_v14  ;;  %v312_v14 = vrot.slane %v266_v6, %v279_v26 }
 0x12e   :  { %13441 = vmatprep.subr.bf16.mxu1 %v16189_v15  ;;  %13421 = vmatprep.subr.bf16.mxu0 %v16190_v16 }
 0x131   :  { %13442 = vmatpush3.bf16.msra.mxu1 %v16189_v15  ;;  %13422 = vmatpush3.bf16.msra.mxu0 %v16190_v16  ;;  %v308_v15 = vrot.slane %v266_v6, %v275_v27 }
 0x132   :  { %13443 = vmatprep.subr.bf16.mxu1 %v16191_v17  ;;  %13423 = vmatprep.subr.bf16.mxu0 %v16192_v18 }
 0x135   :  { %13444 = vmatpush3.bf16.msra.mxu1 %v16191_v17  ;;  %13424 = vmatpush3.bf16.msra.mxu0 %v16192_v18  ;;  %v316_v17 = vrot.slane %v266_v6, %v283_v28 }
 0x136   :  { %13489 = vmatprep.subr.bf16.mxu1 %v17259_v19 }
 0x1d3   :  { %v547_v34 = vpop.f32.mrb[0].mxu0  ;;  %v588_v36 = vpop.f32.mrb[0].mxu1 }
 0x1d4   :  { %v548_v35 = vadd.f32 %v547_v34, %v272_v29  ;;  %v549_v37 = vpop.f32.mrb[1].mxu0  ;;  %v589_v40 = vadd.f32 %v588_v36, %v280_v31  ;;  %v590_v42 = vpop.f32.mrb[1].mxu1 }
 0x1d5   :  { %v550_v41 = vadd.f32 %v549_v37, %v276_v32  ;;  %v551_v43 = vpop.f32.mrb[2].mxu0  ;;  %v591_v46 = vadd.f32 %v590_v42, %v284_v33  ;;  %v592_v47 = vpop.f32.mrb[2].mxu1 }
 0x1d6   :  { %v552_v48 = vpop.f32.mrb[3].mxu0  ;;  %v593_v51 = vpop.f32.mrb[3].mxu1  ;;  %v320_v47 = vrot.slane %v266_v6, %v287_v39 }
 0x1d7   :  { %v857_v50 = vcombine.low %v548_v35, %v550_v41  ;;  %v858_v52 = vcombine.low %v589_v40, %v591_v46  ;;  %v324_v51 = vrot.slane %v266_v6, %v291_v45 }
 0x1d9   :  { %v867_v54 = vrot.slane %v857_v50, %v17272_v38  ;;  %v874_v57 = vrot.slane %v858_v52, %v17272_v38  ;;  %v328_v50 = vrot.slane %v266_v6, %v295_v44 }
 0x1db   :  { %v629_v59 = vpop.f32.mrb[4].mxu0  ;;  %v889_v60 = vcombine.low %v867_v54, %v874_v57  ;;  %v890_v61 = vcombine.high %v867_v54, %v874_v57  ;;  %v670_v63 = vpop.f32.mrb[4].mxu1 }
 0x1dc   :  { %v630_v62 = vadd.f32 %v629_v59, %v288_v53  ;;  %v631_v1 = vpop.f32.mrb[5].mxu0  ;;  %v671_v2 = vadd.f32 %v670_v63, %v296_v55  ;;  %v672_v4 = vpop.f32.mrb[5].mxu1  ;;  %v332_v53 = vrot.slane %v266_v6, %v299_v49 }
 0x1dd   :  { %v632_v3 = vadd.f32 %v631_v1, %v292_v56  ;;  %v633_v5 = vpop.f32.mrb[6].mxu0  ;;  %v673_v7 = vadd.f32 %v672_v4, %v300_v58  ;;  %v674_v0 = vpop.f32.mrb[6].mxu1  ;;  %v899_v30 = vrot.slane %v889_v60, %v17272_v38  ;;  %v906_v35 = vrot.slane %v890_v61, %v17272_v38 }
 0x1de   :  { %v634_v8 = vpop.f32.mrb[7].mxu0  ;;  %v675_v10 = vpop.f32.mrb[7].mxu1 }
 0x1df   :  { %v859_v9 = vcombine.low %v630_v62, %v632_v3  ;;  %v860_v11 = vcombine.low %v671_v2, %v673_v7 }
 0x1e1   :  { %v881_v13 = vrot.slane %v859_v9, %v17272_v38  ;;  %v888_v16 = vrot.slane %v860_v11, %v17272_v38 }
 0x1e3   :  { %v711_v18 = vpop.f32.mrb[8].mxu0  ;;  %v891_v20 = vcombine.low %v881_v13, %v888_v16  ;;  %v892_v23 = vcombine.high %v881_v13, %v888_v16  ;;  %v752_v25 = vpop.f32.mrb[8].mxu1 }
 0x1e4   :  { %v712_v24 = vadd.f32 %v711_v18, %v304_v12  ;;  %v713_v29 = vpop.f32.mrb[9].mxu0  ;;  %v753_v31 = vadd.f32 %v752_v25, %v312_v14  ;;  %v754_v33 = vpop.f32.mrb[9].mxu1 }
 0x1e5   :  { %v714_v32 = vadd.f32 %v713_v29, %v308_v15  ;;  %v715_v34 = vpop.f32.mrb[10].mxu0  ;;  %v913_v26 = vrot.slane %v891_v20, %v17272_v38  ;;  %v920_v27 = vrot.slane %v892_v23, %v17272_v38  ;;  %v755_v36 = vadd.f32 %v754_v33, %v316_v17  ;;  %v756_v28 = vpop.f32.mrb[10].mxu1 }
 0x1e6   :  { %v716_v37 = vpop.f32.mrb[11].mxu0  ;;  %v757_v41 = vpop.f32.mrb[11].mxu1 }
 0x1e7   :  { %v923_v40 = vcombine.low %v712_v24, %v714_v32  ;;  %v921_v42 = vcombine.low %v899_v30, %v913_v26  ;;  %v922_v43 = vcombine.low %v906_v35, %v920_v27  ;;  %v924_v46 = vcombine.low %v753_v31, %v755_v36 }
 0x1e9   :  { %v933_v48 = vrot.slane %v923_v40, %v17272_v38  ;;  %v940_v52 = vrot.slane %v924_v46, %v17272_v38 }
 0x1eb   :  { %v793_v54 = vpop.f32.mrb[12].mxu0  ;;  %v955_v55 = vcombine.low %v933_v48, %v940_v52  ;;  %v956_v56 = vcombine.high %v933_v48, %v940_v52  ;;  %v834_v58 = vpop.f32.mrb[12].mxu1 }
 0x1ec   :  { %v794_v57 = vadd.f32 %v793_v54, %v320_v47  ;;  %v795_v59 = vpop.f32.mrb[13].mxu0  ;;  %v835_v60 = vadd.f32 %v834_v58, %v328_v50  ;;  %v836_v62 = vpop.f32.mrb[13].mxu1 }
 0x1ed   :  { %v796_v61 = vadd.f32 %v795_v59, %v324_v51  ;;  %v797_v63 = vpop.f32.mrb[14].mxu0  ;;  %v837_v1 = vadd.f32 %v836_v62, %v332_v53  ;;  %v838_v21 = vpop.f32.mrb[14].mxu1  ;;  %v965_v6 = vrot.slane %v955_v55, %v17272_v38  ;;  %v972_v7 = vrot.slane %v956_v56, %v17272_v38  ;;  %v11925_v51 = vld [vmem:[#allocation12] ss:$0 sm:$0xff]  ;;  %v16194_v62 = vld [vmem:[#allocation13 + $0x88] sm:$0xff]  }
 0x1ee   :  { %v798_v39 = vpop.f32.mrb[15].mxu0  ;;  %v839_v3 = vpop.f32.mrb[15].mxu1  ;;  %v16195_v63 = vld [vmem:[#allocation13 + $0x90] sm:$0xff]   ;;  %v16197_v21 = vld [vmem:[#allocation13 + $0xa0] sm:$0xff]  }
 0x1ef   :  { %v925_v2 = vcombine.low %v794_v57, %v796_v61  ;;  %v926_v44 = vcombine.low %v835_v60, %v837_v1  ;;  %v16196_v1 = vld [vmem:[#allocation13 + $0x98] sm:$0xff]   ;;  %v16198_v39 = vld [vmem:[#allocation13 + $0xa8] sm:$0xff]  }
 0x1f0   :  { %v16200_v3 = vld [vmem:[#allocation13 + $0xb8] sm:$0xff]  }
 0x1f1   :  { %v947_v45 = vrot.slane %v925_v2, %v17272_v38  ;;  %v954_v49 = vrot.slane %v926_v44, %v17272_v38  ;;  %v16199_v2 = vld [vmem:[#allocation13 + $0xb0] sm:$0xff]   ;;  %v16202_v44 = vld [vmem:[#allocation13 + $0xc8] sm:$0xff]  }
 0x1f3   :  { %v957_v4 = vcombine.low %v947_v45, %v954_v49  ;;  %v958_v5 = vcombine.high %v947_v45, %v954_v49  ;;  %v16203_v45 = vld [vmem:[#allocation13 + $0xd0] sm:$0xff]   ;;  %v16204_v49 = vld [vmem:[#allocation13 + $0xd8] sm:$0xff]  }
 0x1f5   :  { %v979_v0 = vrot.slane %v957_v4, %v17272_v38  ;;  %v986_v8 = vrot.slane %v958_v5, %v17272_v38  ;;  %v16205_v4 = vld [vmem:[#allocation13 + $0xe0] sm:$0xff]   ;;  %v16206_v5 = vld [vmem:[#allocation13 + $0xe8] sm:$0xff]  }
 0x1f7   :  { %v987_v9 = vcombine.low %v965_v6, %v979_v0  ;;  %v988_v10 = vcombine.low %v972_v7, %v986_v8  ;;  %v16207_v6 = vld [vmem:[#allocation13 + $0xf0] sm:$0xff]   ;;  %v16208_v7 = vld [vmem:[#allocation13 + $0xf8] sm:$0xff]   ;;  %v16209_v0 = vld [vmem:[#allocation13 + $0x100] sm:$0xff]  }
 0x1f8   :  { %v16210_v8 = vld [vmem:[#allocation13 + $0x108] sm:$0xff]  }
 0x1f9   :  { %v993_v11 = vadd.f32 %v987_v9, %v921_v42 }
 0x1fb   :  { %v994_v12 = vadd.f32 %v993_v11, %v922_v43  ;;  %v16213_v11 = vld [vmem:[#allocation13 + $0x120] sm:$0xff]  }
 0x1fd   :  { %v995_v13 = vadd.f32 %v994_v12, %v988_v10  ;;  %v16214_v12 = vld [vmem:[#allocation13 + $0x128] sm:$0xff]  }
 0x1ff   :  { %v996_v14 = vrot.slane %v995_v13, 4 }
 0x201   :  { %v997_v15 = vadd.f32 %v996_v14, %v995_v13  ;;  %v16215_v13 = vld [vmem:[#allocation13 + $0x130] sm:$0xff]   ;;  %v16216_v14 = vld [vmem:[#allocation13 + $0x138] sm:$0xff]  }
 0x203   :  { %v998_v16 = vrot.slane %v997_v15, 2 }
 0x205   :  { %v999_v17 = vadd.f32 %v998_v16, %v997_v15  ;;  %v16217_v15 = vld [vmem:[#allocation13 + $0x140] sm:$0xff]   ;;  %v16218_v16 = vld [vmem:[#allocation13 + $0x148] sm:$0xff]  }
 0x207   :  { %v1000_v18 = vrot.slane %v999_v17, 1 }
 0x209   :  { %v1001_v20 = vadd.f32 %v1000_v18, %v999_v17  ;;  %v16249_v17 = vld [vmem:[%s18625_s11 + $0x40] sm:$0xff]  }
 0x20a   :  { %v16219_v18 = vld [vmem:[#allocation13 + $0x150] sm:$0xff]  }
 0x20b   :  { %v1003_v23 = vmul.f32 0.03125, %v1001_v20  ;;  %v16220_v20 = vld [vmem:[#allocation13 + $0x158] sm:$0xff]  }
 0x20d   :  { %v1004_v24 = vsub.f32 %v921_v42, %v1003_v23  ;;  %v1005_v25 = vsub.f32 %v987_v9, %v1003_v23  ;;  %v1006_v29 = vsub.f32 %v922_v43, %v1003_v23  ;;  %v1007_v30 = vsub.f32 %v988_v10, %v1003_v23  ;;  %v1022_v42 = vld [vmem:[#allocation10] sm:$0x1]  ;;  %v16211_v9 = vld [vmem:[#allocation13 + $0x110] sm:$0xff]   ;;  %v16221_v23 = vld [vmem:[#allocation13 + $0x160] sm:$0xff]  }
 0x20e   :  { %v16212_v10 = vld [vmem:[#allocation13 + $0x118] sm:$0xff]  }
 0x20f   :  { %v1008_v31 = vmul.f32 %v1004_v24, %v1004_v24  ;;  %v1009_v32 = vmul.f32 %v1005_v25, %v1005_v25  ;;  %v1010_v33 = vmul.f32 %v1006_v29, %v1006_v29  ;;  %v1011_v34 = vmul.f32 %v1007_v30, %v1007_v30 }
 0x211   :  { %v1012_v38 = vadd.f32 %v1009_v32, %v1008_v31  ;;  %v16226_v31 = vld [vmem:[#allocation13 + $0x188] sm:$0xff]   ;;  %v16227_v32 = vld [vmem:[#allocation13 + $0x190] sm:$0xff]  }
 0x213   :  { %v1013_v35 = vadd.f32 %v1012_v38, %v1010_v33  ;;  %v16228_v33 = vld [vmem:[#allocation13 + $0x198] sm:$0xff]   ;;  %v16229_v38 = vld [vmem:[#allocation13 + $0x1a0] sm:$0xff]  }
 0x215   :  { %v1014_v26 = vadd.f32 %v1013_v35, %v1011_v34  ;;  %v16230_v34 = vld [vmem:[#allocation13 + $0x1a8] sm:$0xff]   ;;  %v16231_v35 = vld [vmem:[#allocation13 + $0x1b0] sm:$0xff]  }
 0x217   :  { %v1015_v27 = vrot.slane %v1014_v26, 4 }
 0x219   :  { %v1016_v36 = vadd.f32 %v1015_v27, %v1014_v26  ;;  %v16232_v26 = vld [vmem:[#allocation13 + $0x1b8] sm:$0xff]   ;;  %v16233_v27 = vld [vmem:[#allocation13 + $0x1c0] sm:$0xff]  }
 0x21b   :  { %v1017_v28 = vrot.slane %v1016_v36, 2 }
 0x21d   :  { %v1018_v37 = vadd.f32 %v1017_v28, %v1016_v36  ;;  %v16234_v36 = vld [vmem:[#allocation13 + $0x1c8] sm:$0xff]   ;;  %v16235_v28 = vld [vmem:[#allocation13 + $0x1d0] sm:$0xff]  }
 0x21f   :  { %v1019_v40 = vrot.slane %v1018_v37, 1 }
 0x221   :  { %v1020_v41 = vadd.f32 %v1019_v40, %v1018_v37  ;;  %v16236_v37 = vld [vmem:[#allocation13 + $0x1d8] sm:$0xff]   ;;  %v16237_v40 = vld [vmem:[#allocation13 + $0x1e0] sm:$0xff]  }
 0x223   :  { %v1021_v46 = vmul.f32 0.03125, %v1020_v41  ;;  %v16238_v41 = vld [vmem:[#allocation13 + $0x1e8] sm:$0xff]  }
 0x225   :  { %v1023_v47 = vadd.f32 1e-05, %v1021_v46  ;;  %v16239_v46 = vld [vmem:[#allocation13 + $0x1f0] sm:$0xff]  }
 0x227   :  { %16465 = vrsqrt.f32 %v1023_v47  ;;  %v16240_v47 = vld [vmem:[#allocation13 + $0x1f8] sm:$0xff]  }
 0x231   :  { %v16466_v48 = vpop.eup %16465 }
 0x232   :  { %v1025_v43 = vmul.f32 %v16466_v48, %v1022_v42  ;;  %v16241_v42 = vld [vmem:[#allocation13 + $0x200] sm:$0xff]   ;;  %v16242_v48 = vld [vmem:[#allocation13 + $0x208] sm:$0xff]  }
 0x234   :  { %v1030_v50 = vrot.slane %v1025_v43, %v17265_v22  ;;  %v16243_v43 = vld [vmem:[#allocation13 + $0x210] sm:$0xff]  }
 0x236   :  { %v1032_v52 = vmul.f32 %v1030_v50, %v1004_v24  ;;  %v1033_v53 = vmul.f32 %v1030_v50, %v1005_v25  ;;  %v1034_v54 = vmul.f32 %v1030_v50, %v1006_v29  ;;  %v1035_v55 = vmul.f32 %v1030_v50, %v1007_v30  ;;  %v16222_v24 = vld [vmem:[#allocation13 + $0x168] sm:$0xff]   ;;  %v16223_v25 = vld [vmem:[#allocation13 + $0x170] sm:$0xff]   ;;  %v16224_v29 = vld [vmem:[#allocation13 + $0x178] sm:$0xff]  }
 0x237   :  { %v16225_v30 = vld [vmem:[#allocation13 + $0x180] sm:$0xff]   ;;  %v16244_v50 = vld [vmem:[#allocation13 + $0x218] sm:$0xff]  }
 0x238   :  { %v1043_v56 = vadd.f32 %v11925_v51, %v1032_v52  ;;  %v1044_v57 = vadd.f32 %v11925_v51, %v1033_v53  ;;  %v1045_v58 = vadd.f32 %v11925_v51, %v1034_v54  ;;  %v1046_v59 = vadd.f32 %v11925_v51, %v1035_v55  ;;  %v16245_v51 = vld [vmem:[#allocation13 + $0x220] sm:$0xff]   ;;  %v16246_v52 = vld [vmem:[#allocation13 + $0x228] sm:$0xff]   ;;  %v16247_v53 = vld [vmem:[#allocation13 + $0x230] sm:$0xff]  }
 0x23a   :  { %v17300_v60 = vpack.c.bf16 %v1044_v57, %v1043_v56  ;;  %v17302_v61 = vpack.c.bf16 %v1046_v59, %v1045_v58 }
 0x23c   :  { %13425 = vmatprep.mubr.bf16.mxu0 %v17300_v60  ;;  %13445 = vmatprep.mubr.bf16.mxu1 %v17300_v60 }
 0x23d   :  { %13426 = vmatmul.mubr.bf16.vlgmr.msra.gmra.mrb[16].mxu0 %v17302_v61  ;;  %13446 = vmatmul.mubr.bf16.vlgmr.msra.gmra.mrb[16].mxu1 %v17302_v61 }
 0x23e   :  { %13490 = vmatpush3.bf16.msra.mxu1 %v17259_v19  ;;  %13505 = vmatprep.mubr.bf16.mxu1 %v17300_v60  ;;  %v16201_v19 = vld [vmem:[#allocation13 + $0xc0] sm:$0xff]  }
 0x23f   :  { %13491 = vmatprep.subr.bf16.mxu1 %v16194_v62  ;;  %13453 = vmatprep.mubr.msk.bf16.mxu0 %vm509_vm0, %v16249_v17  ;;  %v16262_v17 = vld [vmem:[%s18625_s11 + $0x28] sm:$0xff]  }
 0x242   :  { %13492 = vmatpush3.bf16.msra.mxu1 %v16194_v62 }
 0x243   :  { %13493 = vmatprep.subr.bf16.mxu1 %v16195_v63 }
 0x246   :  { %13494 = vmatpush3.bf16.msra.mxu1 %v16195_v63 }
 0x247   :  { %13495 = vmatprep.subr.bf16.mxu1 %v16196_v1 }
 0x24a   :  { %13496 = vmatpush3.bf16.msra.mxu1 %v16196_v1 }
 0x24b   :  { %13497 = vmatprep.subr.bf16.mxu1 %v16197_v21 }
 0x24e   :  { %13498 = vmatpush3.bf16.msra.mxu1 %v16197_v21 }
 0x24f   :  { %13499 = vmatprep.subr.bf16.mxu1 %v16198_v39 }
 0x252   :  { %13500 = vmatpush3.bf16.msra.mxu1 %v16198_v39  ;;  %v16248_v39 = vld [vmem:[#allocation13 + $0x238] sm:$0xff]  }
 0x253   :  { %13501 = vmatprep.subr.bf16.mxu1 %v16199_v2 }
 0x256   :  { %13502 = vmatpush3.bf16.msra.mxu1 %v16199_v2 }
 0x257   :  { %13503 = vmatprep.subr.bf16.mxu1 %v16200_v3 }
 0x25a   :  { %13504 = vmatpush3.bf16.msra.mxu1 %v16200_v3 }
 0x25b   :  { %13529 = vmatprep.subr.bf16.mxu1 %v16201_v19 }
 0x25d   :  { %13506 = vmatmul.mubr.bf16.vlgmr.msra.gmra.mrb[20].mxu1 %v17302_v61 }
 0x25e   :  { %13530 = vmatpush3.bf16.msra.mxu1 %v16201_v19  ;;  %13545 = vmatprep.mubr.bf16.mxu1 %v17300_v60  ;;  %v16250_v19 = vld [vmem:[%s18625_s11 + $0x48] sm:$0xff]  }
 0x25f   :  { %13531 = vmatprep.subr.bf16.mxu1 %v16202_v44 }
 0x262   :  { %13532 = vmatpush3.bf16.msra.mxu1 %v16202_v44  ;;  %v16251_v44 = vld [vmem:[%s18625_s11 + $0x50] sm:$0xff]  }
 0x263   :  { %13533 = vmatprep.subr.bf16.mxu1 %v16203_v45 }
 0x266   :  { %13534 = vmatpush3.bf16.msra.mxu1 %v16203_v45  ;;  %v16252_v45 = vld [vmem:[%s18625_s11 + $0x58] sm:$0xff]  }
 0x267   :  { %13535 = vmatprep.subr.bf16.mxu1 %v16204_v49 }
 0x26a   :  { %13536 = vmatpush3.bf16.msra.mxu1 %v16204_v49  ;;  %v16253_v49 = vld [vmem:[%s18625_s11 + $0x60] sm:$0xff]  }
 0x26b   :  { %13537 = vmatprep.subr.bf16.mxu1 %v16205_v4 }
 0x26e   :  { %13538 = vmatpush3.bf16.msra.mxu1 %v16205_v4  ;;  %v16254_v4 = vld [vmem:[%s18625_s11 + $0x68] sm:$0xff]  }
 0x26f   :  { %13539 = vmatprep.subr.bf16.mxu1 %v16206_v5 }
 0x272   :  { %13540 = vmatpush3.bf16.msra.mxu1 %v16206_v5  ;;  %v16255_v5 = vld [vmem:[%s18625_s11 + $0x70] sm:$0xff]  }
 0x273   :  { %13541 = vmatprep.subr.bf16.mxu1 %v16207_v6 }
 0x276   :  { %13542 = vmatpush3.bf16.msra.mxu1 %v16207_v6 }
 0x277   :  { %13543 = vmatprep.subr.bf16.mxu1 %v16208_v7 }
 0x27a   :  { %13544 = vmatpush3.bf16.msra.mxu1 %v16208_v7 }
 0x27b   :  { %13569 = vmatprep.subr.bf16.mxu1 %v16209_v0 }
 0x27d   :  { %13546 = vmatmul.mubr.bf16.vlgmr.msra.gmra.mrb[24].mxu1 %v17302_v61 }
 0x27e   :  { %13570 = vmatpush3.bf16.msra.mxu1 %v16209_v0  ;;  %13585 = vmatprep.mubr.bf16.mxu1 %v17300_v60 }
 0x27f   :  { %13571 = vmatprep.subr.bf16.mxu1 %v16210_v8 }
 0x282   :  { %13572 = vmatpush3.bf16.msra.mxu1 %v16210_v8  ;;  %v16256_v8 = vld [vmem:[%s18625_s11 + $0x78] sm:$0xff]  }
 0x283   :  { %13573 = vmatprep.subr.bf16.mxu1 %v16211_v9 }
 0x286   :  { %13574 = vmatpush3.bf16.msra.mxu1 %v16211_v9 }
 0x287   :  { %13575 = vmatprep.subr.bf16.mxu1 %v16212_v10 }
 0x28a   :  { %13576 = vmatpush3.bf16.msra.mxu1 %v16212_v10 }
 0x28b   :  { %13577 = vmatprep.subr.bf16.mxu1 %v16213_v11 }
 0x28e   :  { %13578 = vmatpush3.bf16.msra.mxu1 %v16213_v11  ;;  %v16257_v11 = vld [vmem:[%s18625_s11] sm:$0xff]  }
 0x28f   :  { %13579 = vmatprep.subr.bf16.mxu1 %v16214_v12 }
 0x292   :  { %13580 = vmatpush3.bf16.msra.mxu1 %v16214_v12 }
 0x293   :  { %13581 = vmatprep.subr.bf16.mxu1 %v16215_v13 }
 0x296   :  { %13582 = vmatpush3.bf16.msra.mxu1 %v16215_v13  ;;  %v16258_v13 = vld [vmem:[%s18625_s11 + $0x8] sm:$0xff]  }
 0x297   :  { %13583 = vmatprep.subr.bf16.mxu1 %v16216_v14 }
 0x29a   :  { %13584 = vmatpush3.bf16.msra.mxu1 %v16216_v14  ;;  %v16259_v14 = vld [vmem:[%s18625_s11 + $0x10] sm:$0xff]  }
 0x29b   :  { %13609 = vmatprep.subr.bf16.mxu1 %v16217_v15 }
 0x29d   :  { %13586 = vmatmul.mubr.bf16.vlgmr.msra.gmra.mrb[28].mxu1 %v17302_v61 }
 0x29e   :  { %13610 = vmatpush3.bf16.msra.mxu1 %v16217_v15  ;;  %13625 = vmatprep.mubr.bf16.mxu1 %v17300_v60  ;;  %v16260_v15 = vld [vmem:[%s18625_s11 + $0x18] sm:$0xff]  }
 0x29f   :  { %13611 = vmatprep.subr.bf16.mxu1 %v16218_v16 }
 0x2a2   :  { %13612 = vmatpush3.bf16.msra.mxu1 %v16218_v16  ;;  %v16261_v16 = vld [vmem:[%s18625_s11 + $0x20] sm:$0xff]  }
 0x2a3   :  { %13613 = vmatprep.subr.bf16.mxu1 %v16219_v18 }
 0x2a6   :  { %13614 = vmatpush3.bf16.msra.mxu1 %v16219_v18  ;;  %v16263_v18 = vld [vmem:[%s18625_s11 + $0x30] sm:$0xff]  }
 0x2a7   :  { %13615 = vmatprep.subr.bf16.mxu1 %v16220_v20 }
 0x2aa   :  { %13616 = vmatpush3.bf16.msra.mxu1 %v16220_v20 }
 0x2ab   :  { %13617 = vmatprep.subr.bf16.mxu1 %v16221_v23 }
 0x2ae   :  { %13618 = vmatpush3.bf16.msra.mxu1 %v16221_v23 }
 0x2af   :  { %13619 = vmatprep.subr.bf16.mxu1 %v16222_v24 }
 0x2b2   :  { %13620 = vmatpush3.bf16.msra.mxu1 %v16222_v24 }
 0x2b3   :  { %13621 = vmatprep.subr.bf16.mxu1 %v16223_v25 }
 0x2b6   :  { %13622 = vmatpush3.bf16.msra.mxu1 %v16223_v25  ;;  %v16264_v25 = vld [vmem:[%s18625_s11 + $0x38] sm:$0xff]  }
 0x2b7   :  { %13623 = vmatprep.subr.bf16.mxu1 %v16224_v29 }
 0x2ba   :  { %13624 = vmatpush3.bf16.msra.mxu1 %v16224_v29 }
 0x2bb   :  { %13649 = vmatprep.subr.bf16.mxu1 %v16225_v30 }
 0x2bd   :  { %13626 = vmatmul.mubr.bf16.vlgmr.msra.gmra.mrb[32].mxu1 %v17302_v61 }
 0x2be   :  { %13650 = vmatpush3.bf16.msra.mxu1 %v16225_v30  ;;  %13665 = vmatprep.mubr.bf16.mxu1 %v17300_v60 }
 0x2bf   :  { %13651 = vmatprep.subr.bf16.mxu1 %v16226_v31 }
 0x2c2   :  { %13652 = vmatpush3.bf16.msra.mxu1 %v16226_v31  ;;  %v16265_v31 = vld [vmem:[%s18625_s11 + $0x80] sm:$0xff]  }
 0x2c3   :  { %13653 = vmatprep.subr.bf16.mxu1 %v16227_v32 }
 0x2c6   :  { %13654 = vmatpush3.bf16.msra.mxu1 %v16227_v32 }
 0x2c7   :  { %13655 = vmatprep.subr.bf16.mxu1 %v16228_v33 }
 0x2ca   :  { %13656 = vmatpush3.bf16.msra.mxu1 %v16228_v33  ;;  %v16266_v33 = vld [vmem:[%s18625_s11 + $0x88] sm:$0xff]  }
 0x2cb   :  { %13657 = vmatprep.subr.bf16.mxu1 %v16229_v38 }
 0x2ce   :  { %13658 = vmatpush3.bf16.msra.mxu1 %v16229_v38  ;;  %v16267_v38 = vld [vmem:[%s18625_s11 + $0x90] sm:$0xff]  }
 0x2cf   :  { %13659 = vmatprep.subr.bf16.mxu1 %v16230_v34 }
 0x2d2   :  { %13660 = vmatpush3.bf16.msra.mxu1 %v16230_v34  ;;  %v16268_v34 = vld [vmem:[%s18625_s11 + $0x98] sm:$0xff]  }
 0x2d3   :  { %13661 = vmatprep.subr.bf16.mxu1 %v16231_v35 }
 0x2d6   :  { %13662 = vmatpush3.bf16.msra.mxu1 %v16231_v35  ;;  %v16269_v35 = vld [vmem:[%s18625_s11 + $0xa0] sm:$0xff]  }
 0x2d7   :  { %13663 = vmatprep.subr.bf16.mxu1 %v16232_v26 }
 0x2da   :  { %13664 = vmatpush3.bf16.msra.mxu1 %v16232_v26  ;;  %v16270_v26 = vld [vmem:[%s18625_s11 + $0xa8] sm:$0xff]  }
 0x2db   :  { %13689 = vmatprep.subr.bf16.mxu1 %v16233_v27 }
 0x2dd   :  { %13666 = vmatmul.mubr.bf16.vlgmr.msra.gmra.mrb[36].mxu1 %v17302_v61 }
 0x2de   :  { %13690 = vmatpush3.bf16.msra.mxu1 %v16233_v27  ;;  %13705 = vmatprep.mubr.bf16.mxu1 %v17300_v60  ;;  %v16271_v27 = vld [vmem:[%s18625_s11 + $0xb0] sm:$0xff]  }
 0x2df   :  { %13691 = vmatprep.subr.bf16.mxu1 %v16234_v36 }
 0x2e2   :  { %13692 = vmatpush3.bf16.msra.mxu1 %v16234_v36 }
 0x2e3   :  { %13693 = vmatprep.subr.bf16.mxu1 %v16235_v28 }
 0x2e6   :  { %13694 = vmatpush3.bf16.msra.mxu1 %v16235_v28 }
 0x2e7   :  { %13695 = vmatprep.subr.bf16.mxu1 %v16236_v37 }
 0x2ea   :  { %13696 = vmatpush3.bf16.msra.mxu1 %v16236_v37 }
 0x2eb   :  { %13697 = vmatprep.subr.bf16.mxu1 %v16237_v40 }
 0x2ee   :  { %13698 = vmatpush3.bf16.msra.mxu1 %v16237_v40  ;;  %v16272_v40 = vld [vmem:[%s18625_s11 + $0xb8] sm:$0xff]  }
 0x2ef   :  { %13699 = vmatprep.subr.bf16.mxu1 %v16238_v41 }
 0x2f2   :  { %13700 = vmatpush3.bf16.msra.mxu1 %v16238_v41 }
 0x2f3   :  { %13701 = vmatprep.subr.bf16.mxu1 %v16239_v46 }
 0x2f6   :  { %13702 = vmatpush3.bf16.msra.mxu1 %v16239_v46 }
 0x2f7   :  { %13703 = vmatprep.subr.bf16.mxu1 %v16240_v47 }
 0x2fa   :  { %13704 = vmatpush3.bf16.msra.mxu1 %v16240_v47  ;;  %v16273_v47 = vld [vmem:[%s18625_s11 + $0xc0] sm:$0xff]  }
 0x2fb   :  { %13729 = vmatprep.subr.bf16.mxu1 %v16241_v42 }
 0x2fd   :  { %13706 = vmatmul.mubr.bf16.vlgmr.msra.gmra.mrb[40].mxu1 %v17302_v61 }
 0x2fe   :  { %13730 = vmatpush3.bf16.msra.mxu1 %v16241_v42  ;;  %13745 = vmatprep.mubr.bf16.mxu1 %v17300_v60 }
 0x2ff   :  { %13731 = vmatprep.subr.bf16.mxu1 %v16242_v48 }
 0x302   :  { %13732 = vmatpush3.bf16.msra.mxu1 %v16242_v48  ;;  %v16274_v48 = vld [vmem:[%s18625_s11 + $0xc8] sm:$0xff]  }
 0x303   :  { %13733 = vmatprep.subr.bf16.mxu1 %v16243_v43 }
 0x306   :  { %13734 = vmatpush3.bf16.msra.mxu1 %v16243_v43  ;;  %v16275_v43 = vld [vmem:[%s18625_s11 + $0xd0] sm:$0xff]  }
 0x307   :  { %13735 = vmatprep.subr.bf16.mxu1 %v16244_v50 }
 0x30a   :  { %13736 = vmatpush3.bf16.msra.mxu1 %v16244_v50  ;;  %v16276_v50 = vld [vmem:[%s18625_s11 + $0xd8] sm:$0xff]  }
 0x30b   :  { %13737 = vmatprep.subr.bf16.mxu1 %v16245_v51 }
 0x30e   :  { %13738 = vmatpush3.bf16.msra.mxu1 %v16245_v51  ;;  %v16277_v51 = vld [vmem:[%s18625_s11 + $0xe0] sm:$0xff]  }
 0x30f   :  { %13739 = vmatprep.subr.bf16.mxu1 %v16246_v52 }
 0x310   :  { %v13427_v54 = vpop.f32.mrb[16].mxu0  ;;  %v13447_v55 = vpop.f32.mrb[16].mxu1 }
 0x311   :  { %v1147_v56 = vpop.f32.mrb[17].mxu0  ;;  %v1279_v57 = vpop.f32.mrb[17].mxu1 }
 0x312   :  { %13740 = vmatpush3.bf16.msra.mxu1 %v16246_v52  ;;  %v13428_v58 = vpop.f32.mrb[18].mxu0  ;;  %v13448_v59 = vpop.f32.mrb[18].mxu1  ;;  %v16278_v52 = vld [vmem:[%s18625_s11 + $0xe8] sm:$0xff]  }
 0x313   :  { %v1179_v62 = vpack.c.bf16 %v13428_v58, %v13427_v54  ;;  %v1312_v63 = vpack.c.bf16 %v13448_v59, %v13447_v55  ;;  %v1150_v1 = vpop.f32.mrb[19].mxu0  ;;  %v1282_v21 = vpop.f32.mrb[19].mxu1  ;;  %13741 = vmatprep.subr.bf16.mxu1 %v16247_v53 }
 0x314   :  { %v1178_v2 = vpack.c.bf16 %v1150_v1, %v1147_v56  ;;  %v1311_v3 = vpack.c.bf16 %v1282_v21, %v1279_v57  ;;  %v16280_v57 = vld [vmem:[%s18625_s11 + $0xf8] sm:$0xff]   ;;  %v16282_v1 = vld [vmem:[%s18625_s11 + $0x108] sm:$0xff]   ;;  %v16283_v21 = vld [vmem:[%s18625_s11 + $0x110] sm:$0xff]  }
 0x316   :  { %13742 = vmatpush3.bf16.msra.mxu1 %v16247_v53  ;;  %13449 = vmatprep.subr.bf16.mxu0 %v1311_v3  ;;  %v16279_v53 = vld [vmem:[%s18625_s11 + $0xf0] sm:$0xff]  }
 0x317   :  { %13450 = vmatpush3.bf16.msra.mxu0 %v1311_v3  ;;  %13743 = vmatprep.subr.bf16.mxu1 %v16248_v39  ;;  %v16286_v3 = vld [vmem:[%s18625_s11 + $0x128] sm:$0xff]  }
 0x318   :  { %13451 = vmatprep.subr.bf16.mxu0 %v1312_v63 }
 0x31a   :  { %13744 = vmatpush3.bf16.msra.mxu1 %v16248_v39  ;;  %v16284_v39 = vld [vmem:[%s18625_s11 + $0x118] sm:$0xff]  }
 0x31b   :  { %13452 = vmatpush3.bf16.msra.mxu0 %v1312_v63 }
 0x31c   :  { %13469 = vmatprep.subr.bf16.mxu0 %v1178_v2 }
 0x31d   :  { %13746 = vmatmul.mubr.bf16.vlgmr.msra.gmra.mrb[44].mxu1 %v17302_v61 }
 0x31e   :  { %13454 = vmatmul.mubr.msk.bf16.vlgmr.msra.gmra.mrb[20].mxu0 %vm509_vm0, %v16250_v19  ;;  %v16287_v19 = vld [vmem:[%s18625_s11 + $0x130] sm:$0xff]  }
 0x31f   :  { %13470 = vmatpush3.bf16.msra.mxu0 %v1178_v2  ;;  %13457 = vmatprep.mubr.msk.bf16.mxu0 %vm509_vm0, %v16251_v44  ;;  %v16285_v2 = vld [vmem:[%s18625_s11 + $0x120] sm:$0xff]  }
 0x320   :  { %13471 = vmatprep.subr.bf16.mxu0 %v1179_v62 }
 0x323   :  { %13472 = vmatpush3.bf16.msra.mxu0 %v1179_v62  ;;  %v16281_v62 = vld [vmem:[%s18625_s11 + $0x100] sm:$0xff]  }
 0x326   :  { %13458 = vmatmul.mubr.msk.bf16.gmra.mrb[24].mxu0 %vm509_vm0, %v16252_v45 }
 0x327   :  { %13461 = vmatprep.mubr.msk.bf16.mxu0 %vm509_vm0, %v16253_v49 }
 0x32e   :  { %13462 = vmatmul.mubr.msk.bf16.gmra.mrb[28].mxu0 %vm509_vm0, %v16254_v4  ;;  %v16288_v4 = vld [vmem:[%s18625_s11 + $0x138] sm:$0xff]  }
 0x32f   :  { %13465 = vmatprep.mubr.msk.bf16.mxu0 %vm509_vm0, %v16255_v5 }
 0x330   :  { %v13507_v6 = vpop.f32.mrb[20].mxu1 }
 0x331   :  { %v1734_v7 = vpop.f32.mrb[21].mxu1 }
 0x332   :  { %v13508_v0 = vpop.f32.mrb[22].mxu1 }
 0x333   :  { %v1767_v9 = vpack.c.bf16 %v13508_v0, %v13507_v6  ;;  %v1737_v10 = vpop.f32.mrb[23].mxu1 }
 0x334   :  { %v1766_v12 = vpack.c.bf16 %v1737_v10, %v1734_v7  ;;  %v16289_v7 = vld [vmem:[%s18625_s11 + $0x140] sm:$0xff]   ;;  %v16292_v10 = vld [vmem:[%s18625_s11 + $0x158] sm:$0xff]  }
 0x336   :  { %13509 = vmatprep.subr.bf16.mxu0 %v1766_v12  ;;  %13466 = vmatmul.mubr.msk.bf16.gmra.mrb[32].mxu0 %vm509_vm0, %v16256_v8  ;;  %v16290_v8 = vld [vmem:[%s18625_s11 + $0x148] sm:$0xff]  }
 0x337   :  { %13473 = vmatprep.mubr.msk.bf16.mxu0 %vm509_vm0, %v16257_v11  ;;  %v16293_v11 = vld [vmem:[%s18625_s11 + $0x160] sm:$0xff]  }
 0x33e   :  { %13474 = vmatmul.mubr.msk.bf16.vlgmr.msra.gmra.mrb[20].mxu0 %vm509_vm0, %v16258_v13  ;;  %v16295_v13 = vld [vmem:[%s18625_s11 + $0x170] sm:$0xff]  }
 0x33f   :  { %13510 = vmatpush3.bf16.msra.mxu0 %v1766_v12  ;;  %13477 = vmatprep.mubr.msk.bf16.mxu0 %vm509_vm0, %v16259_v14  ;;  %v16294_v12 = vld [vmem:[%s18625_s11 + $0x168] sm:$0xff]  }
 0x340   :  { %13511 = vmatprep.subr.bf16.mxu0 %v1767_v9 }
 0x343   :  { %13512 = vmatpush3.bf16.msra.mxu0 %v1767_v9  ;;  %v16291_v9 = vld [vmem:[%s18625_s11 + $0x150] sm:$0xff]  }
 0x346   :  { %13478 = vmatmul.mubr.msk.bf16.gmra.mrb[24].mxu0 %vm509_vm0, %v16260_v15 }
 0x347   :  { %13481 = vmatprep.mubr.msk.bf16.mxu0 %vm509_vm0, %v16261_v16 }
 0x34e   :  { %13482 = vmatmul.mubr.msk.bf16.gmra.mrb[28].mxu0 %vm509_vm0, %v16262_v17  ;;  %v16296_v17 = vld [vmem:[%s18625_s11 + $0x178] sm:$0xff]  }
 0x34f   :  { %13485 = vmatprep.mubr.msk.bf16.mxu0 %vm509_vm0, %v16263_v18 }
 0x350   :  { %v13547_v20 = vpop.f32.mrb[24].mxu1 }
 0x351   :  { %v2044_v23 = vpop.f32.mrb[25].mxu1 }
 0x352   :  { %v13548_v24 = vpop.f32.mrb[26].mxu1 }
 0x353   :  { %v2077_v29 = vpack.c.bf16 %v13548_v24, %v13547_v20  ;;  %v2047_v30 = vpop.f32.mrb[27].mxu1 }
 0x354   :  { %v2076_v32 = vpack.c.bf16 %v2047_v30, %v2044_v23  ;;  %v16297_v23 = vld [vmem:[%s18625_s11 + $0x180] sm:$0xff]   ;;  %v16300_v30 = vld [vmem:[%s18625_s11 + $0x198] sm:$0xff]  }
 0x356   :  { %13549 = vmatprep.subr.bf16.mxu0 %v2076_v32  ;;  %13486 = vmatmul.mubr.msk.bf16.gmra.mrb[32].mxu0 %vm509_vm0, %v16264_v25  ;;  %v16298_v25 = vld [vmem:[%s18625_s11 + $0x188] sm:$0xff]  }
 0x357   :  { %13513 = vmatprep.mubr.msk.bf16.mxu0 %vm509_vm0, %v16265_v31  ;;  %v16301_v31 = vld [vmem:[%s18625_s11 + $0x1a0] sm:$0xff]  }
 0x35e   :  { %13514 = vmatmul.mubr.msk.bf16.vlgmr.msra.gmra.mrb[20].mxu0 %vm509_vm0, %v16266_v33  ;;  %v16303_v33 = vld [vmem:[%s18625_s11 + $0x1b0] sm:$0xff]  }
 0x35f   :  { %13550 = vmatpush3.bf16.msra.mxu0 %v2076_v32  ;;  %13517 = vmatprep.mubr.msk.bf16.mxu0 %vm509_vm0, %v16267_v38  ;;  %v16302_v32 = vld [vmem:[%s18625_s11 + $0x1a8] sm:$0xff]  }
 0x360   :  { %13551 = vmatprep.subr.bf16.mxu0 %v2077_v29 }
 0x363   :  { %13552 = vmatpush3.bf16.msra.mxu0 %v2077_v29  ;;  %v16299_v29 = vld [vmem:[%s18625_s11 + $0x190] sm:$0xff]  }
 0x366   :  { %13518 = vmatmul.mubr.msk.bf16.gmra.mrb[24].mxu0 %vm509_vm0, %v16268_v34 }
 0x367   :  { %13521 = vmatprep.mubr.msk.bf16.mxu0 %vm509_vm0, %v16269_v35 }
 0x36e   :  { %13522 = vmatmul.mubr.msk.bf16.gmra.mrb[28].mxu0 %vm509_vm0, %v16270_v26  ;;  %v16304_v26 = vld [vmem:[%s18625_s11 + $0x1b8] sm:$0xff]  }
 0x36f   :  { %13525 = vmatprep.mubr.msk.bf16.mxu0 %vm509_vm0, %v16271_v27 }
 0x370   :  { %v13587_v36 = vpop.f32.mrb[28].mxu1 }
 0x371   :  { %v2354_v28 = vpop.f32.mrb[29].mxu1 }
 0x372   :  { %v13588_v37 = vpop.f32.mrb[30].mxu1 }
 0x373   :  { %v2387_v41 = vpack.c.bf16 %v13588_v37, %v13587_v36  ;;  %v2357_v46 = vpop.f32.mrb[31].mxu1 }
 0x374   :  { %v2386_v42 = vpack.c.bf16 %v2357_v46, %v2354_v28  ;;  %v16305_v28 = vld [vmem:[%s18625_s11 + $0x1c0] sm:$0xff]   ;;  %v16308_v46 = vld [vmem:[%s18625_s11 + $0x1d8] sm:$0xff]  }
 0x376   :  { %13589 = vmatprep.subr.bf16.mxu0 %v2386_v42  ;;  %13526 = vmatmul.mubr.msk.bf16.gmra.mrb[32].mxu0 %vm509_vm0, %v16272_v40  ;;  %v16306_v40 = vld [vmem:[%s18625_s11 + $0x1c8] sm:$0xff]  }
 0x377   :  { %13553 = vmatprep.mubr.msk.bf16.mxu0 %vm509_vm0, %v16273_v47  ;;  %v16309_v47 = vld [vmem:[%s18625_s11 + $0x1e0] sm:$0xff]  }
 0x37e   :  { %13554 = vmatmul.mubr.msk.bf16.vlgmr.msra.gmra.mrb[20].mxu0 %vm509_vm0, %v16274_v48  ;;  %v16311_v48 = vld [vmem:[%s18625_s11 + $0x1f0] sm:$0xff]  }
 0x37f   :  { %13590 = vmatpush3.bf16.msra.mxu0 %v2386_v42  ;;  %13557 = vmatprep.mubr.msk.bf16.mxu0 %vm509_vm0, %v16275_v43  ;;  %v16310_v42 = vld [vmem:[%s18625_s11 + $0x1e8] sm:$0xff]   ;;  %v16312_v43 = vld [vmem:[%s18625_s11 + $0x1f8] sm:$0xff]  }
 0x380   :  { %13591 = vmatprep.subr.bf16.mxu0 %v2387_v41 }
 0x383   :  { %13592 = vmatpush3.bf16.msra.mxu0 %v2387_v41  ;;  %v16307_v41 = vld [vmem:[%s18625_s11 + $0x1d0] sm:$0xff]  }
 0x386   :  { %13558 = vmatmul.mubr.msk.bf16.gmra.mrb[24].mxu0 %vm509_vm0, %v16276_v50  ;;  %v16313_v50 = vld [vmem:[%s18625_s11 + $0x200] sm:$0xff]  }
 0x387   :  { %13561 = vmatprep.mubr.msk.bf16.mxu0 %vm509_vm0, %v16277_v51  ;;  %v16314_v51 = vld [vmem:[%s18625_s11 + $0x208] sm:$0xff]  }
 0x38e   :  { %13562 = vmatmul.mubr.msk.bf16.gmra.mrb[28].mxu0 %vm509_vm0, %v16278_v52  ;;  %v16315_v52 = vld [vmem:[%s18625_s11 + $0x210] sm:$0xff]  }
 0x38f   :  { %13565 = vmatprep.mubr.msk.bf16.mxu0 %vm509_vm0, %v16279_v53  ;;  %v16316_v53 = vld [vmem:[%s18625_s11 + $0x218] sm:$0xff]  }
 0x390   :  { %v13627_v54 = vpop.f32.mrb[32].mxu1 }
 0x391   :  { %v2664_v55 = vpop.f32.mrb[33].mxu1 }
 0x392   :  { %v13628_v56 = vpop.f32.mrb[34].mxu1 }
 0x393   :  { %v2697_v58 = vpack.c.bf16 %v13628_v56, %v13627_v54  ;;  %v2667_v59 = vpop.f32.mrb[35].mxu1  ;;  %v16317_v54 = vld [vmem:[%s18625_s11 + $0x220] sm:$0xff]   ;;  %v16319_v56 = vld [vmem:[%s18625_s11 + $0x230] sm:$0xff]  }
 0x394   :  { %v2696_v63 = vpack.c.bf16 %v2667_v59, %v2664_v55  ;;  %v16318_v55 = vld [vmem:[%s18625_s11 + $0x228] sm:$0xff]  }
 0x395   :  { %v16322_v59 = vld [vmem:[#allocation18 + $0x8] sm:$0xff]  }
 0x396   :  { %13629 = vmatprep.subr.bf16.mxu0 %v2696_v63  ;;  %13566 = vmatmul.mubr.msk.bf16.gmra.mrb[32].mxu0 %vm509_vm0, %v16280_v57  ;;  %v16320_v57 = vld [vmem:[%s18625_s11 + $0x238] sm:$0xff]  }
 0x397   :  { %13593 = vmatprep.mubr.msk.bf16.mxu0 %vm509_vm0, %v16281_v62  ;;  %v16323_v62 = vld [vmem:[#allocation18 + $0x10] sm:$0xff]  }
 0x39e   :  { %13594 = vmatmul.mubr.msk.bf16.vlgmr.msra.gmra.mrb[20].mxu0 %vm509_vm0, %v16282_v1  ;;  %v16325_v1 = vld [vmem:[#allocation18 + $0x20] sm:$0xff]  }
 0x39f   :  { %13630 = vmatpush3.bf16.msra.mxu0 %v2696_v63  ;;  %13597 = vmatprep.mubr.msk.bf16.mxu0 %vm509_vm0, %v16283_v21  ;;  %v16324_v63 = vld [vmem:[#allocation18 + $0x18] sm:$0xff]   ;;  %v16326_v21 = vld [vmem:[#allocation18 + $0x28] sm:$0xff]  }
 0x3a0   :  { %13631 = vmatprep.subr.bf16.mxu0 %v2697_v58 }
 0x3a3   :  { %13632 = vmatpush3.bf16.msra.mxu0 %v2697_v58  ;;  %v16321_v58 = vld [vmem:[#allocation18] sm:$0xff]  }
 0x3a4   :  { %13769 = vmatprep.subr.bf16.mxu1 %v16321_v58 }
 0x3a5   :  { %13770 = vmatpush3.bf16.msra.mxu1 %v16321_v58 }
 0x3a6   :  { %13598 = vmatmul.mubr.msk.bf16.gmra.mrb[24].mxu0 %vm509_vm0, %v16284_v39  ;;  %13771 = vmatprep.subr.bf16.mxu1 %v16322_v59  ;;  %v16327_v39 = vld [vmem:[#allocation18 + $0x30] sm:$0xff]  }
 0x3a7   :  { %13601 = vmatprep.mubr.msk.bf16.mxu0 %vm509_vm0, %v16285_v2  ;;  %v16328_v2 = vld [vmem:[#allocation18 + $0x38] sm:$0xff]  }
 0x3a9   :  { %13772 = vmatpush3.bf16.msra.mxu1 %v16322_v59 }
 0x3aa   :  { %13773 = vmatprep.subr.bf16.mxu1 %v16323_v62 }
 0x3ad   :  { %13774 = vmatpush3.bf16.msra.mxu1 %v16323_v62 }
 0x3ae   :  { %13602 = vmatmul.mubr.msk.bf16.gmra.mrb[28].mxu0 %vm509_vm0, %v16286_v3  ;;  %13775 = vmatprep.subr.bf16.mxu1 %v16324_v63 }
 0x3af   :  { %13605 = vmatprep.mubr.msk.bf16.mxu0 %vm509_vm0, %v16287_v19 }
 0x3b0   :  { %v13667_v44 = vpop.f32.mrb[36].mxu1 }
 0x3b1   :  { %v2974_v45 = vpop.f32.mrb[37].mxu1  ;;  %13776 = vmatpush3.bf16.msra.mxu1 %v16324_v63 }
 0x3b2   :  { %v13668_v49 = vpop.f32.mrb[38].mxu1  ;;  %13777 = vmatprep.subr.bf16.mxu1 %v16325_v1 }
 0x3b3   :  { %v3007_v5 = vpack.c.bf16 %v13668_v49, %v13667_v44  ;;  %v2977_v6 = vpop.f32.mrb[39].mxu1 }
 0x3b4   :  { %v3006_v0 = vpack.c.bf16 %v2977_v6, %v2974_v45  ;;  %v17611_v45 = vld [vmem:[#allocation18 + $0x40] sm:$0xff]  }
 0x3b5   :  { %13778 = vmatpush3.bf16.msra.mxu1 %v16325_v1 }
 0x3b6   :  { %13669 = vmatprep.subr.bf16.mxu0 %v3006_v0  ;;  %13606 = vmatmul.mubr.msk.bf16.gmra.mrb[32].mxu0 %vm509_vm0, %v16288_v4 }
 0x3b7   :  { %13633 = vmatprep.mubr.msk.bf16.mxu0 %vm509_vm0, %v16289_v7  ;;  %13779 = vmatprep.subr.bf16.mxu1 %v16326_v21 }
 0x3b9   :  { %13780 = vmatpush3.bf16.msra.mxu1 %v16326_v21 }
 0x3ba   :  { %13781 = vmatprep.subr.bf16.mxu1 %v16327_v39 }
 0x3bd   :  { %13782 = vmatpush3.bf16.msra.mxu1 %v16327_v39 }
 0x3be   :  { %13634 = vmatmul.mubr.msk.bf16.vlgmr.msra.gmra.mrb[20].mxu0 %vm509_vm0, %v16290_v8  ;;  %13783 = vmatprep.subr.bf16.mxu1 %v16328_v2 }
 0x3bf   :  { %13670 = vmatpush3.bf16.msra.mxu0 %v3006_v0  ;;  %13637 = vmatprep.mubr.msk.bf16.mxu0 %vm509_vm0, %v16291_v9 }
 0x3c0   :  { %13671 = vmatprep.subr.bf16.mxu0 %v3007_v5 }
 0x3c1   :  { %13784 = vmatpush3.bf16.msra.mxu1 %v16328_v2 }
 0x3c2   :  { %13801 = vmatprep.subr.bf16.mxu1 %v17611_v45 }
 0x3c3   :  { %13672 = vmatpush3.bf16.msra.mxu0 %v3007_v5 }
 0x3c6   :  { %13638 = vmatmul.mubr.msk.bf16.gmra.mrb[24].mxu0 %vm509_vm0, %v16292_v10 }
 0x3c7   :  { %13641 = vmatprep.mubr.msk.bf16.mxu0 %vm509_vm0, %v16293_v11 }
 0x3ce   :  { %13642 = vmatmul.mubr.msk.bf16.gmra.mrb[28].mxu0 %vm509_vm0, %v16294_v12 }
 0x3cf   :  { %13645 = vmatprep.mubr.msk.bf16.mxu0 %vm509_vm0, %v16295_v13 }
 0x3d0   :  { %v13707_v14 = vpop.f32.mrb[40].mxu1 }
 0x3d1   :  { %v3284_v15 = vpop.f32.mrb[41].mxu1 }
 0x3d2   :  { %v13708_v16 = vpop.f32.mrb[42].mxu1 }
 0x3d3   :  { %v3317_v18 = vpack.c.bf16 %v13708_v16, %v13707_v14  ;;  %v3287_v20 = vpop.f32.mrb[43].mxu1 }
 0x3d4   :  { %v3316_v24 = vpack.c.bf16 %v3287_v20, %v3284_v15 }
 0x3d6   :  { %13709 = vmatprep.subr.bf16.mxu0 %v3316_v24  ;;  %13646 = vmatmul.mubr.msk.bf16.gmra.mrb[32].mxu0 %vm509_vm0, %v16296_v17 }
 0x3d7   :  { %13673 = vmatprep.mubr.msk.bf16.mxu0 %vm509_vm0, %v16297_v23 }
 0x3de   :  { %13674 = vmatmul.mubr.msk.bf16.vlgmr.msra.gmra.mrb[20].mxu0 %vm509_vm0, %v16298_v25 }
 0x3df   :  { %13710 = vmatpush3.bf16.msra.mxu0 %v3316_v24  ;;  %13677 = vmatprep.mubr.msk.bf16.mxu0 %vm509_vm0, %v16299_v29 }
 0x3e0   :  { %13711 = vmatprep.subr.bf16.mxu0 %v3317_v18 }
 0x3e3   :  { %13712 = vmatpush3.bf16.msra.mxu0 %v3317_v18 }
 0x3e6   :  { %13678 = vmatmul.mubr.msk.bf16.gmra.mrb[24].mxu0 %vm509_vm0, %v16300_v30 }
 0x3e7   :  { %13681 = vmatprep.mubr.msk.bf16.mxu0 %vm509_vm0, %v16301_v31 }
 0x3ee   :  { %13682 = vmatmul.mubr.msk.bf16.gmra.mrb[28].mxu0 %vm509_vm0, %v16302_v32 }
 0x3ef   :  { %13685 = vmatprep.mubr.msk.bf16.mxu0 %vm509_vm0, %v16303_v33 }
 0x3f0   :  { %v13747_v38 = vpop.f32.mrb[44].mxu1 }
 0x3f1   :  { %v3594_v34 = vpop.f32.mrb[45].mxu1 }
 0x3f2   :  { %v13748_v35 = vpop.f32.mrb[46].mxu1 }
 0x3f3   :  { %v3627_v27 = vpack.c.bf16 %v13748_v35, %v13747_v38  ;;  %v3597_v36 = vpop.f32.mrb[47].mxu1 }
 0x3f4   :  { %v3626_v37 = vpack.c.bf16 %v3597_v36, %v3594_v34 }
 0x3f6   :  { %13749 = vmatprep.subr.bf16.mxu0 %v3626_v37  ;;  %13686 = vmatmul.mubr.msk.bf16.gmra.mrb[32].mxu0 %vm509_vm0, %v16304_v26 }
 0x3f7   :  { %13713 = vmatprep.mubr.msk.bf16.mxu0 %vm509_vm0, %v16305_v28 }
 0x3fe   :  { %13714 = vmatmul.mubr.msk.bf16.vlgmr.msra.gmra.mrb[20].mxu0 %vm509_vm0, %v16306_v40 }
 0x3ff   :  { %13750 = vmatpush3.bf16.msra.mxu0 %v3626_v37  ;;  %13717 = vmatprep.mubr.msk.bf16.mxu0 %vm509_vm0, %v16307_v41 }
 0x400   :  { %13751 = vmatprep.subr.bf16.mxu0 %v3627_v27 }
 0x403   :  { %13752 = vmatpush3.bf16.msra.mxu0 %v3627_v27 }
 0x406   :  { %13718 = vmatmul.mubr.msk.bf16.gmra.mrb[24].mxu0 %vm509_vm0, %v16308_v46 }
 0x407   :  { %13721 = vmatprep.mubr.msk.bf16.mxu0 %vm509_vm0, %v16309_v47 }
 0x40e   :  { %13722 = vmatmul.mubr.msk.bf16.gmra.mrb[28].mxu0 %vm509_vm0, %v16310_v42 }
 0x40f   :  { %13725 = vmatprep.mubr.msk.bf16.mxu0 %vm509_vm0, %v16311_v48 }
 0x416   :  { %13726 = vmatmul.mubr.msk.bf16.gmra.mrb[32].mxu0 %vm509_vm0, %v16312_v43 }
 0x417   :  { %13753 = vmatprep.mubr.msk.bf16.mxu0 %vm509_vm0, %v16313_v50 }
 0x41e   :  { %13754 = vmatmul.mubr.msk.bf16.vlgmr.msra.gmra.mrb[20].mxu0 %vm509_vm0, %v16314_v51 }
 0x41f   :  { %13757 = vmatprep.mubr.msk.bf16.mxu0 %vm509_vm0, %v16315_v52 }
 0x426   :  { %13758 = vmatmul.mubr.msk.bf16.gmra.mrb[24].mxu0 %vm509_vm0, %v16316_v53 }
 0x427   :  { %13761 = vmatprep.mubr.msk.bf16.mxu0 %vm509_vm0, %v16317_v54 }
 0x42e   :  { %13762 = vmatmul.mubr.msk.bf16.gmra.mrb[28].mxu0 %vm509_vm0, %v16318_v55 }
 0x42f   :  { %13765 = vmatprep.mubr.msk.bf16.mxu0 %vm509_vm0, %v16319_v56 }
 0x436   :  { %13766 = vmatmul.mubr.msk.bf16.gmra.mrb[32].mxu0 %vm509_vm0, %v16320_v57 }
 0x4f1   :  { %v13755_v3 = vpop.f32.mrb[20].mxu0 }
 0x4f2   :  { %v3726_v19 = vpop.f32.mrb[21].mxu0 }
 0x4f3   :  { %v13756_v44 = vpop.f32.mrb[22].mxu0 }
 0x4f4   :  { %v3729_v49 = vpop.f32.mrb[23].mxu0 }
 0x4f5   :  { %v3805_v4 = vadd.f32 %v3729_v49, %v3726_v19 }
 0x4f7   :  { %v3806_v5 = vadd.f32 %v13755_v3, %v3805_v4 }
 0x4f9   :  { %v13759_v6 = vpop.f32.mrb[24].mxu0  ;;  %v3807_v7 = vadd.f32 %v13756_v44, %v3806_v5 }
 0x4fa   :  { %v3742_v0 = vpop.f32.mrb[25].mxu0 }
 0x4fb   :  { %v3808_v8 = vadd.f32 %v3807_v7, %v3742_v0  ;;  %v13760_v9 = vpop.f32.mrb[26].mxu0 }
 0x4fc   :  { %v3745_v10 = vpop.f32.mrb[27].mxu0 }
 0x4fd   :  { %v3809_v11 = vadd.f32 %v3808_v8, %v3745_v10 }
 0x4ff   :  { %v3810_v12 = vadd.f32 %v13759_v6, %v3809_v11 }
 0x501   :  { %v13763_v13 = vpop.f32.mrb[28].mxu0  ;;  %v3811_v14 = vadd.f32 %v13760_v9, %v3810_v12 }
 0x502   :  { %v3758_v15 = vpop.f32.mrb[29].mxu0 }
 0x503   :  { %v3812_v16 = vadd.f32 %v3811_v14, %v3758_v15  ;;  %v13764_v17 = vpop.f32.mrb[30].mxu0 }
 0x504   :  { %v3761_v18 = vpop.f32.mrb[31].mxu0 }
 0x505   :  { %v3813_v20 = vadd.f32 %v3812_v16, %v3761_v18 }
 0x507   :  { %v3814_v23 = vadd.f32 %v13763_v13, %v3813_v20 }
 0x509   :  { %v13767_v24 = vpop.f32.mrb[32].mxu0  ;;  %v3815_v25 = vadd.f32 %v13764_v17, %v3814_v23 }
 0x50a   :  { %v3774_v29 = vpop.f32.mrb[33].mxu0 }
 0x50b   :  { %v3816_v30 = vadd.f32 %v3815_v25, %v3774_v29  ;;  %v13768_v31 = vpop.f32.mrb[34].mxu0 }
 0x50c   :  { %v3777_v32 = vpop.f32.mrb[35].mxu0 }
 0x50d   :  { %v3817_v33 = vadd.f32 %v3816_v30, %v3777_v32 }
 0x50f   :  { %v3818_v38 = vadd.f32 %v13767_v24, %v3817_v33 }
 0x511   :  { %v3819_v34 = vadd.f32 %v13768_v31, %v3818_v38 }
 0x513   :  { %v3820_v35 = vrot.slane %v3819_v34, 4 }
 0x515   :  { %v3821_v26 = vadd.f32 %v3820_v35, %v3819_v34 }
 0x517   :  { %v3822_v27 = vrot.slane %v3821_v26, 2 }
 0x519   :  { %v3823_v36 = vadd.f32 %v3822_v27, %v3821_v26  ;;  %v3882_v27 = vld [vmem:[#allocation15] sm:$0x1] }
 0x51b   :  { %v3824_v28 = vrot.slane %v3823_v36, 1 }
 0x51d   :  { %v3825_v37 = vadd.f32 %v3824_v28, %v3823_v36 }
 0x51f   :  { %v3827_v40 = vmul.f32 0.0078125, %v3825_v37 }
 0x521   :  { %v3828_v41 = vsub.f32 %v3726_v19, %v3827_v40  ;;  %v3829_v46 = vsub.f32 %v3729_v49, %v3827_v40  ;;  %v3830_v47 = vsub.f32 %v13755_v3, %v3827_v40  ;;  %v3831_v42 = vsub.f32 %v13756_v44, %v3827_v40 }
 0x522   :  { %v3832_v48 = vsub.f32 %v3742_v0, %v3827_v40  ;;  %v3833_v43 = vsub.f32 %v3745_v10, %v3827_v40  ;;  %v3834_v50 = vsub.f32 %v13759_v6, %v3827_v40  ;;  %v3835_v51 = vsub.f32 %v13760_v9, %v3827_v40 }
 0x523   :  { %v3836_v52 = vsub.f32 %v3758_v15, %v3827_v40  ;;  %v3837_v53 = vsub.f32 %v3761_v18, %v3827_v40  ;;  %v3838_v54 = vsub.f32 %v13763_v13, %v3827_v40  ;;  %v3839_v55 = vsub.f32 %v13764_v17, %v3827_v40 }
 0x524   :  { %v3840_v56 = vsub.f32 %v3774_v29, %v3827_v40  ;;  %v3841_v57 = vsub.f32 %v3777_v32, %v3827_v40  ;;  %v3842_v58 = vsub.f32 %v13767_v24, %v3827_v40  ;;  %v3843_v59 = vsub.f32 %v13768_v31, %v3827_v40 }
 0x525   :  { %v3844_v62 = vmul.f32 %v3828_v41, %v3828_v41  ;;  %v3845_v63 = vmul.f32 %v3829_v46, %v3829_v46  ;;  %v3846_v1 = vmul.f32 %v3830_v47, %v3830_v47  ;;  %v3847_v39 = vmul.f32 %v3831_v42, %v3831_v42 }
 0x526   :  { %v3848_v3 = vmul.f32 %v3832_v48, %v3832_v48  ;;  %v3849_v44 = vmul.f32 %v3833_v43, %v3833_v43  ;;  %v3850_v4 = vmul.f32 %v3834_v50, %v3834_v50  ;;  %v3851_v6 = vmul.f32 %v3835_v51, %v3835_v51 }
 0x527   :  { %v3860_v21 = vadd.f32 %v3845_v63, %v3844_v62  ;;  %v3852_v0 = vmul.f32 %v3836_v52, %v3836_v52  ;;  %v3853_v9 = vmul.f32 %v3837_v53, %v3837_v53  ;;  %v3854_v11 = vmul.f32 %v3838_v54, %v3838_v54 }
 0x528   :  { %v3855_v13 = vmul.f32 %v3839_v55, %v3839_v55  ;;  %v3856_v15 = vmul.f32 %v3840_v56, %v3840_v56  ;;  %v3857_v17 = vmul.f32 %v3841_v57, %v3841_v57  ;;  %v3858_v20 = vmul.f32 %v3842_v58, %v3842_v58 }
 0x529   :  { %v3861_v2 = vadd.f32 %v3860_v21, %v3846_v1  ;;  %v3859_v24 = vmul.f32 %v3843_v59, %v3843_v59 }
 0x52b   :  { %v3862_v19 = vadd.f32 %v3861_v2, %v3847_v39 }
 0x52d   :  { %v3863_v49 = vadd.f32 %v3862_v19, %v3848_v3  ;;  %v12270_v19 = vld [vmem:[#allocation16] ss:$0 sm:$0xff] }
 0x52f   :  { %v3864_v5 = vadd.f32 %v3863_v49, %v3849_v44 }
 0x531   :  { %v3865_v7 = vadd.f32 %v3864_v5, %v3850_v4 }
 0x533   :  { %v3866_v8 = vadd.f32 %v3865_v7, %v3851_v6 }
 0x535   :  { %v3867_v10 = vadd.f32 %v3866_v8, %v3852_v0 }
 0x537   :  { %v3868_v12 = vadd.f32 %v3867_v10, %v3853_v9 }
 0x539   :  { %v3869_v14 = vadd.f32 %v3868_v12, %v3854_v11 }
 0x53b   :  { %v3870_v16 = vadd.f32 %v3869_v14, %v3855_v13 }
 0x53d   :  { %v3871_v18 = vadd.f32 %v3870_v16, %v3856_v15 }
 0x53f   :  { %v3872_v23 = vadd.f32 %v3871_v18, %v3857_v17 }
 0x541   :  { %v3873_v25 = vadd.f32 %v3872_v23, %v3858_v20 }
 0x543   :  { %v3874_v29 = vadd.f32 %v3873_v25, %v3859_v24 }
 0x545   :  { %v3875_v30 = vrot.slane %v3874_v29, 4 }
 0x547   :  { %v3876_v31 = vadd.f32 %v3875_v30, %v3874_v29 }
 0x549   :  { %v3877_v32 = vrot.slane %v3876_v31, 2 }
 0x54b   :  { %v3878_v33 = vadd.f32 %v3877_v32, %v3876_v31 }
 0x54d   :  { %v3879_v38 = vrot.slane %v3878_v33, 1 }
 0x54f   :  { %v3880_v34 = vadd.f32 %v3879_v38, %v3878_v33 }
 0x551   :  { %v3881_v35 = vmul.f32 0.0078125, %v3880_v34 }
 0x553   :  { %v3883_v26 = vadd.f32 1e-05, %v3881_v35 }
 0x555   :  { %16467 = vrsqrt.f32 %v3883_v26 }
 0x55f   :  { %v16468_v36 = vpop.eup %16467 }
 0x560   :  { %v3885_v28 = vmul.f32 %v16468_v36, %v3882_v27  ;;  %v16330_v36 = vld [vmem:[#allocation18 + $0x48] sm:$0xff]  }
 0x562   :  { %v3890_v37 = vrot.slane %v3885_v28, %v17265_v22  ;;  %v16331_v28 = vld [vmem:[#allocation18 + $0x50] sm:$0xff]  }
 0x564   :  { %v3892_v40 = vmul.f32 %v3890_v37, %v3828_v41  ;;  %v3893_v62 = vmul.f32 %v3890_v37, %v3829_v46  ;;  %v3894_v63 = vmul.f32 %v3890_v37, %v3830_v47  ;;  %v3895_v1 = vmul.f32 %v3890_v37, %v3831_v42 }
 0x565   :  { %v3896_v21 = vmul.f32 %v3890_v37, %v3832_v48  ;;  %v3897_v39 = vmul.f32 %v3890_v37, %v3833_v43  ;;  %v3898_v2 = vmul.f32 %v3890_v37, %v3834_v50  ;;  %v3899_v3 = vmul.f32 %v3890_v37, %v3835_v51 }
 0x566   :  { %v3900_v44 = vmul.f32 %v3890_v37, %v3836_v52  ;;  %v3901_v49 = vmul.f32 %v3890_v37, %v3837_v53  ;;  %v3902_v4 = vmul.f32 %v3890_v37, %v3838_v54  ;;  %v3903_v5 = vmul.f32 %v3890_v37, %v3839_v55 }
 0x567   :  { %v3904_v6 = vmul.f32 %v3890_v37, %v3840_v56  ;;  %v3905_v7 = vmul.f32 %v3890_v37, %v3841_v57  ;;  %v3906_v0 = vmul.f32 %v3890_v37, %v3842_v58  ;;  %v3907_v8 = vmul.f32 %v3890_v37, %v3843_v59  ;;  %v16332_v37 = vld [vmem:[#allocation18 + $0x58] sm:$0xff]  }
 0x568   :  { %v3915_v9 = vadd.f32 %v12270_v19, %v3892_v40  ;;  %v3916_v10 = vadd.f32 %v12270_v19, %v3893_v62  ;;  %v3917_v11 = vadd.f32 %v12270_v19, %v3894_v63  ;;  %v3918_v41 = vadd.f32 %v12270_v19, %v3895_v1  ;;  %v16333_v40 = vld [vmem:[#allocation18 + $0x60] sm:$0xff]   ;;  %v16334_v62 = vld [vmem:[#allocation18 + $0x68] sm:$0xff]   ;;  %v16336_v63 = vld [vmem:[#allocation18 + $0x78] sm:$0xff]  }
 0x569   :  { %v3919_v46 = vadd.f32 %v12270_v19, %v3896_v21  ;;  %v3920_v47 = vadd.f32 %v12270_v19, %v3897_v39  ;;  %v3921_v42 = vadd.f32 %v12270_v19, %v3898_v2  ;;  %v3922_v48 = vadd.f32 %v12270_v19, %v3899_v3  ;;  %v16337_v1 = vld [vmem:[#allocation18 + $0x80] sm:$0xff]   ;;  %v16338_v21 = vld [vmem:[#allocation18 + $0x88] sm:$0xff]   ;;  %v16339_v39 = vld [vmem:[#allocation18 + $0x90] sm:$0xff]  }
 0x56a   :  { %v3923_v43 = vadd.f32 %v12270_v19, %v3900_v44  ;;  %v3924_v50 = vadd.f32 %v12270_v19, %v3901_v49  ;;  %v3925_v51 = vadd.f32 %v12270_v19, %v3902_v4  ;;  %v3926_v12 = vadd.f32 %v12270_v19, %v3903_v5  ;;  %v16340_v2 = vld [vmem:[#allocation18 + $0x98] sm:$0xff]   ;;  %v16341_v3 = vld [vmem:[#allocation18 + $0xa0] sm:$0xff]   ;;  %v16343_v44 = vld [vmem:[#allocation18 + $0xb0] sm:$0xff]  }
 0x56b   :  { %v3927_v52 = vadd.f32 %v12270_v19, %v3904_v6  ;;  %v3928_v53 = vadd.f32 %v12270_v19, %v3905_v7  ;;  %v3929_v54 = vadd.f32 %v12270_v19, %v3906_v0  ;;  %v3930_v55 = vadd.f32 %v12270_v19, %v3907_v8  ;;  %v16342_v19 = vld [vmem:[#allocation18 + $0xa8] sm:$0xff]   ;;  %v16344_v49 = vld [vmem:[#allocation18 + $0xb8] sm:$0xff]   ;;  %v16345_v4 = vld [vmem:[#allocation18 + $0xc0] sm:$0xff]  }
 0x56c   :  { %v3931_v56 = vmax.f32 %v3915_v9, 0.0  ;;  %v3932_v57 = vmax.f32 %v3916_v10, 0.0  ;;  %v3933_v58 = vmax.f32 %v3917_v11, 0.0  ;;  %v3934_v59 = vmax.f32 %v3918_v41, 0.0  ;;  %v16346_v5 = vld [vmem:[#allocation18 + $0xc8] sm:$0xff]   ;;  %v16347_v6 = vld [vmem:[#allocation18 + $0xd0] sm:$0xff]  }
 0x56d   :  { %v3935_v13 = vmax.f32 %v3919_v46, 0.0  ;;  %v3936_v14 = vmax.f32 %v3920_v47, 0.0  ;;  %v3937_v15 = vmax.f32 %v3921_v42, 0.0  ;;  %v3938_v16 = vmax.f32 %v3922_v48, 0.0  ;;  %v16348_v7 = vld [vmem:[#allocation18 + $0xd8] sm:$0xff]   ;;  %v16349_v0 = vld [vmem:[#allocation18 + $0xe0] sm:$0xff]  }
 0x56e   :  { %v3939_v17 = vmax.f32 %v3923_v43, 0.0  ;;  %v3940_v18 = vmax.f32 %v3924_v50, 0.0  ;;  %v3941_v20 = vmax.f32 %v3925_v51, 0.0  ;;  %v3942_v23 = vmax.f32 %v3926_v12, 0.0  ;;  %v16350_v8 = vld [vmem:[#allocation18 + $0xe8] sm:$0xff]   ;;  %v16351_v9 = vld [vmem:[#allocation18 + $0xf0] sm:$0xff]  }
 0x56f   :  { %v3943_v24 = vmax.f32 %v3927_v52, 0.0  ;;  %v3944_v25 = vmax.f32 %v3928_v53, 0.0  ;;  %v3945_v29 = vmax.f32 %v3929_v54, 0.0  ;;  %v3946_v30 = vmax.f32 %v3930_v55, 0.0  ;;  %v16352_v10 = vld [vmem:[#allocation18 + $0xf8] sm:$0xff]   ;;  %v16353_v11 = vld [vmem:[#allocation18 + $0x100] sm:$0xff]  }
 0x570   :  { %v17615_v31 = vpack.c.bf16 %v3934_v59, %v3933_v58  ;;  %v17617_v32 = vpack.c.bf16 %v3936_v14, %v3935_v13  ;;  %v17619_v33 = vpack.c.bf16 %v3938_v16, %v3937_v15  ;;  %v17621_v38 = vpack.c.bf16 %v3940_v18, %v3939_v17  ;;  %v16354_v41 = vld [vmem:[#allocation18 + $0x108] sm:$0xff]   ;;  %v16355_v46 = vld [vmem:[#allocation18 + $0x110] sm:$0xff]   ;;  %v16356_v47 = vld [vmem:[#allocation18 + $0x118] sm:$0xff]  }
 0x571   :  { %v17623_v34 = vpack.c.bf16 %v3942_v23, %v3941_v20  ;;  %v17625_v35 = vpack.c.bf16 %v3944_v25, %v3943_v24  ;;  %v17627_v26 = vpack.c.bf16 %v3946_v30, %v3945_v29  ;;  %v17629_v27 = vpack.c.bf16 %v3932_v57, %v3931_v56  ;;  %v16357_v42 = vld [vmem:[#allocation18 + $0x120] sm:$0xff]   ;;  %v16358_v48 = vld [vmem:[#allocation18 + $0x128] sm:$0xff]   ;;  %v16359_v43 = vld [vmem:[#allocation18 + $0x130] sm:$0xff]  }
 0x572   :  { %v16360_v50 = vld [vmem:[#allocation18 + $0x138] sm:$0xff]   ;;  %v16361_v51 = vld [vmem:[#allocation18 + $0x140] sm:$0xff]   ;;  %v16362_v12 = vld [vmem:[#allocation18 + $0x148] sm:$0xff]  }
 0x573   :  { %13785 = vmatprep.mubr.bf16.mxu1 %v17629_v27  ;;  %v16363_v52 = vld [vmem:[#allocation18 + $0x150] sm:$0xff]   ;;  %v16364_v53 = vld [vmem:[#allocation18 + $0x158] sm:$0xff]   ;;  %v16365_v54 = vld [vmem:[#allocation18 + $0x160] sm:$0xff]  }
 0x574   :  { %13786 = vmatmul.mubr.bf16.vlgmr.msra.gmra.mrb[48].mxu1 %v17615_v31  ;;  %v16366_v55 = vld [vmem:[#allocation18 + $0x168] sm:$0xff]   ;;  %v16367_v56 = vld [vmem:[#allocation18 + $0x170] sm:$0xff]   ;;  %v16368_v57 = vld [vmem:[#allocation18 + $0x178] sm:$0xff]  }
 0x575   :  { %13802 = vmatpush3.bf16.msra.mxu1 %v17611_v45  ;;  %13789 = vmatprep.mubr.bf16.mxu1 %v17617_v32  ;;  %v16335_v45 = vld [vmem:[#allocation18 + $0x70] sm:$0xff]   ;;  %v16393_v58 = vld [vmem:[#allocation22 + $0x40] sm:$0xff]   ;;  %v16372_v15 = vld [vmem:[#allocation18 + $0x198] sm:$0xff]  }
 0x576   :  { %13803 = vmatprep.subr.bf16.mxu1 %v16330_v36  ;;  %v16369_v59 = vld [vmem:[#allocation18 + $0x180] sm:$0xff]   ;;  %13849 = vmatprep.mubr.bf16.mxu0 %v16393_v58  ;;  %v16370_v13 = vld [vmem:[#allocation18 + $0x188] sm:$0xff]   ;;  %v16371_v14 = vld [vmem:[#allocation18 + $0x190] sm:$0xff]  }
 0x577   :  { %v16373_v16 = vld [vmem:[#allocation18 + $0x1a0] sm:$0xff]   ;;  %v16374_v17 = vld [vmem:[#allocation18 + $0x1a8] sm:$0xff]   ;;  %v16375_v18 = vld [vmem:[#allocation18 + $0x1b0] sm:$0xff]  }
 0x578   :  { %v16376_v20 = vld [vmem:[#allocation18 + $0x1b8] sm:$0xff]   ;;  %v16377_v23 = vld [vmem:[#allocation18 + $0x1c0] sm:$0xff]   ;;  %v16378_v24 = vld [vmem:[#allocation18 + $0x1c8] sm:$0xff]  }
 0x579   :  { %13804 = vmatpush3.bf16.msra.mxu1 %v16330_v36  ;;  %v16379_v25 = vld [vmem:[#allocation18 + $0x1d0] sm:$0xff]   ;;  %v16380_v29 = vld [vmem:[#allocation18 + $0x1d8] sm:$0xff]   ;;  %v16381_v30 = vld [vmem:[#allocation18 + $0x1e0] sm:$0xff]  }
 0x57a   :  { %13805 = vmatprep.subr.bf16.mxu1 %v16331_v28  ;;  %v16382_v36 = vld [vmem:[#allocation18 + $0x1e8] sm:$0xff]  }
 0x57c   :  { %13790 = vmatmul.mubr.bf16.gmra.mrb[52].mxu1 %v17619_v33 }
 0x57d   :  { %13806 = vmatpush3.bf16.msra.mxu1 %v16331_v28  ;;  %13793 = vmatprep.mubr.bf16.mxu1 %v17621_v38  ;;  %v16383_v28 = vld [vmem:[#allocation18 + $0x1f0] sm:$0xff]  }
 0x57e   :  { %13807 = vmatprep.subr.bf16.mxu1 %v16332_v37 }
 0x581   :  { %13808 = vmatpush3.bf16.msra.mxu1 %v16332_v37 }
 0x582   :  { %13809 = vmatprep.subr.bf16.mxu1 %v16333_v40 }
 0x584   :  { %13794 = vmatmul.mubr.bf16.gmra.mrb[56].mxu1 %v17623_v34 }
 0x585   :  { %13810 = vmatpush3.bf16.msra.mxu1 %v16333_v40  ;;  %13797 = vmatprep.mubr.bf16.mxu1 %v17625_v35 }
 0x586   :  { %13811 = vmatprep.subr.bf16.mxu1 %v16334_v62 }
 0x589   :  { %13812 = vmatpush3.bf16.msra.mxu1 %v16334_v62 }
 0x58a   :  { %13813 = vmatprep.subr.bf16.mxu1 %v16335_v45 }
 0x58c   :  { %13798 = vmatmul.mubr.bf16.gmra.mrb[60].mxu1 %v17627_v26 }
 0x58d   :  { %13814 = vmatpush3.bf16.msra.mxu1 %v16335_v45  ;;  %13817 = vmatprep.mubr.bf16.mxu1 %v17629_v27 }
 0x58e   :  { %13815 = vmatprep.subr.bf16.mxu1 %v16336_v63 }
 0x591   :  { %13816 = vmatpush3.bf16.msra.mxu1 %v16336_v63 }
 0x592   :  { %13897 = vmatprep.subr.bf16.mxu1 %v16337_v1 }
 0x594   :  { %13818 = vmatmul.mubr.bf16.vlgmr.msra.gmra.mrb[64].mxu1 %v17615_v31 }
 0x595   :  { %13898 = vmatpush3.bf16.msra.mxu1 %v16337_v1  ;;  %13821 = vmatprep.mubr.bf16.mxu1 %v17617_v32  ;;  %v16384_v1 = vld [vmem:[#allocation18 + $0x1f8] sm:$0xff]  }
 0x596   :  { %13899 = vmatprep.subr.bf16.mxu1 %v16338_v21 }
 0x599   :  { %13900 = vmatpush3.bf16.msra.mxu1 %v16338_v21 }
 0x59a   :  { %13901 = vmatprep.subr.bf16.mxu1 %v16339_v39 }
 0x59c   :  { %13822 = vmatmul.mubr.bf16.gmra.mrb[68].mxu1 %v17619_v33 }
 0x59d   :  { %13902 = vmatpush3.bf16.msra.mxu1 %v16339_v39  ;;  %13825 = vmatprep.mubr.bf16.mxu1 %v17621_v38  ;;  %v16385_v39 = vld [vmem:[#allocation18 + $0x200] sm:$0xff]  }
 0x59e   :  { %13903 = vmatprep.subr.bf16.mxu1 %v16340_v2 }
 0x5a1   :  { %13904 = vmatpush3.bf16.msra.mxu1 %v16340_v2 }
 0x5a2   :  { %13905 = vmatprep.subr.bf16.mxu1 %v16341_v3 }
 0x5a4   :  { %13826 = vmatmul.mubr.bf16.gmra.mrb[72].mxu1 %v17623_v34 }
 0x5a5   :  { %13906 = vmatpush3.bf16.msra.mxu1 %v16341_v3  ;;  %13829 = vmatprep.mubr.bf16.mxu1 %v17625_v35 }
 0x5a6   :  { %13907 = vmatprep.subr.bf16.mxu1 %v16342_v19 }
 0x5a9   :  { %13908 = vmatpush3.bf16.msra.mxu1 %v16342_v19 }
 0x5aa   :  { %13909 = vmatprep.subr.bf16.mxu1 %v16343_v44 }
 0x5ac   :  { %13830 = vmatmul.mubr.bf16.gmra.mrb[76].mxu1 %v17627_v26 }
 0x5ad   :  { %13910 = vmatpush3.bf16.msra.mxu1 %v16343_v44  ;;  %13913 = vmatprep.mubr.bf16.mxu1 %v17629_v27 }
 0x5ae   :  { %13911 = vmatprep.subr.bf16.mxu1 %v16344_v49 }
 0x5b1   :  { %13912 = vmatpush3.bf16.msra.mxu1 %v16344_v49 }
 0x5b2   :  { %13961 = vmatprep.subr.bf16.mxu1 %v16345_v4 }
 0x5b4   :  { %13914 = vmatmul.mubr.bf16.vlgmr.msra.gmra.mrb[80].mxu1 %v17615_v31 }
 0x5b5   :  { %13962 = vmatpush3.bf16.msra.mxu1 %v16345_v4  ;;  %13917 = vmatprep.mubr.bf16.mxu1 %v17617_v32  ;;  %v16386_v4 = vld [vmem:[#allocation18 + $0x208] sm:$0xff]  }
 0x5b6   :  { %13963 = vmatprep.subr.bf16.mxu1 %v16346_v5 }
 0x5b9   :  { %13964 = vmatpush3.bf16.msra.mxu1 %v16346_v5 }
 0x5ba   :  { %13965 = vmatprep.subr.bf16.mxu1 %v16347_v6 }
 0x5bc   :  { %13918 = vmatmul.mubr.bf16.gmra.mrb[84].mxu1 %v17619_v33 }
 0x5bd   :  { %13966 = vmatpush3.bf16.msra.mxu1 %v16347_v6  ;;  %13921 = vmatprep.mubr.bf16.mxu1 %v17621_v38  ;;  %v16387_v6 = vld [vmem:[#allocation18 + $0x210] sm:$0xff]  }
 0x5be   :  { %13967 = vmatprep.subr.bf16.mxu1 %v16348_v7 }
 0x5c1   :  { %13968 = vmatpush3.bf16.msra.mxu1 %v16348_v7 }
 0x5c2   :  { %13969 = vmatprep.subr.bf16.mxu1 %v16349_v0 }
 0x5c4   :  { %13922 = vmatmul.mubr.bf16.gmra.mrb[88].mxu1 %v17623_v34 }
 0x5c5   :  { %13970 = vmatpush3.bf16.msra.mxu1 %v16349_v0  ;;  %13925 = vmatprep.mubr.bf16.mxu1 %v17625_v35 }
 0x5c6   :  { %13971 = vmatprep.subr.bf16.mxu1 %v16350_v8 }
 0x5c9   :  { %13972 = vmatpush3.bf16.msra.mxu1 %v16350_v8 }
 0x5ca   :  { %13973 = vmatprep.subr.bf16.mxu1 %v16351_v9 }
 0x5cc   :  { %13926 = vmatmul.mubr.bf16.gmra.mrb[92].mxu1 %v17627_v26 }
 0x5cd   :  { %13974 = vmatpush3.bf16.msra.mxu1 %v16351_v9  ;;  %13977 = vmatprep.mubr.bf16.mxu1 %v17629_v27 }
 0x5ce   :  { %13975 = vmatprep.subr.bf16.mxu1 %v16352_v10 }
 0x5d1   :  { %13976 = vmatpush3.bf16.msra.mxu1 %v16352_v10 }
 0x5d2   :  { %14025 = vmatprep.subr.bf16.mxu1 %v16353_v11 }
 0x5d4   :  { %13978 = vmatmul.mubr.bf16.vlgmr.msra.gmra.mrb[96].mxu1 %v17615_v31 }
 0x5d5   :  { %14026 = vmatpush3.bf16.msra.mxu1 %v16353_v11  ;;  %13981 = vmatprep.mubr.bf16.mxu1 %v17617_v32  ;;  %v16388_v11 = vld [vmem:[#allocation18 + $0x218] sm:$0xff]  }
 0x5d6   :  { %14027 = vmatprep.subr.bf16.mxu1 %v16354_v41 }
 0x5d9   :  { %14028 = vmatpush3.bf16.msra.mxu1 %v16354_v41 }
 0x5da   :  { %14029 = vmatprep.subr.bf16.mxu1 %v16355_v46 }
 0x5dc   :  { %13982 = vmatmul.mubr.bf16.gmra.mrb[100].mxu1 %v17619_v33 }
 0x5dd   :  { %14030 = vmatpush3.bf16.msra.mxu1 %v16355_v46  ;;  %13985 = vmatprep.mubr.bf16.mxu1 %v17621_v38  ;;  %v16389_v46 = vld [vmem:[#allocation18 + $0x220] sm:$0xff]  }
 0x5de   :  { %14031 = vmatprep.subr.bf16.mxu1 %v16356_v47 }
 0x5e1   :  { %14032 = vmatpush3.bf16.msra.mxu1 %v16356_v47 }
 0x5e2   :  { %14033 = vmatprep.subr.bf16.mxu1 %v16357_v42 }
 0x5e4   :  { %13986 = vmatmul.mubr.bf16.gmra.mrb[104].mxu1 %v17623_v34 }
 0x5e5   :  { %14034 = vmatpush3.bf16.msra.mxu1 %v16357_v42  ;;  %13989 = vmatprep.mubr.bf16.mxu1 %v17625_v35 }
 0x5e6   :  { %14035 = vmatprep.subr.bf16.mxu1 %v16358_v48 }
 0x5e9   :  { %14036 = vmatpush3.bf16.msra.mxu1 %v16358_v48 }
 0x5ea   :  { %14037 = vmatprep.subr.bf16.mxu1 %v16359_v43 }
 0x5ec   :  { %13990 = vmatmul.mubr.bf16.gmra.mrb[108].mxu1 %v17627_v26 }
 0x5ed   :  { %14038 = vmatpush3.bf16.msra.mxu1 %v16359_v43  ;;  %14041 = vmatprep.mubr.bf16.mxu1 %v17629_v27 }
 0x5ee   :  { %14039 = vmatprep.subr.bf16.mxu1 %v16360_v50 }
 0x5f1   :  { %14040 = vmatpush3.bf16.msra.mxu1 %v16360_v50 }
 0x5f2   :  { %14089 = vmatprep.subr.bf16.mxu1 %v16361_v51 }
 0x5f4   :  { %14042 = vmatmul.mubr.bf16.vlgmr.msra.gmra.mrb[112].mxu1 %v17615_v31 }
 0x5f5   :  { %14090 = vmatpush3.bf16.msra.mxu1 %v16361_v51  ;;  %14045 = vmatprep.mubr.bf16.mxu1 %v17617_v32  ;;  %v16390_v51 = vld [vmem:[#allocation18 + $0x228] sm:$0xff]  }
 0x5f6   :  { %14091 = vmatprep.subr.bf16.mxu1 %v16362_v12 }
 0x5f9   :  { %14092 = vmatpush3.bf16.msra.mxu1 %v16362_v12 }
 0x5fa   :  { %14093 = vmatprep.subr.bf16.mxu1 %v16363_v52 }
 0x5fc   :  { %14046 = vmatmul.mubr.bf16.gmra.mrb[116].mxu1 %v17619_v33 }
 0x5fd   :  { %14094 = vmatpush3.bf16.msra.mxu1 %v16363_v52  ;;  %14049 = vmatprep.mubr.bf16.mxu1 %v17621_v38  ;;  %v16391_v52 = vld [vmem:[#allocation18 + $0x230] sm:$0xff]  }
 0x5fe   :  { %14095 = vmatprep.subr.bf16.mxu1 %v16364_v53 }
 0x601   :  { %14096 = vmatpush3.bf16.msra.mxu1 %v16364_v53 }
 0x602   :  { %14097 = vmatprep.subr.bf16.mxu1 %v16365_v54 }
 0x604   :  { %14050 = vmatmul.mubr.bf16.gmra.mrb[120].mxu1 %v17623_v34 }
 0x605   :  { %14098 = vmatpush3.bf16.msra.mxu1 %v16365_v54  ;;  %14053 = vmatprep.mubr.bf16.mxu1 %v17625_v35 }
 0x606   :  { %14099 = vmatprep.subr.bf16.mxu1 %v16366_v55 }
 0x609   :  { %14100 = vmatpush3.bf16.msra.mxu1 %v16366_v55 }
 0x60a   :  { %14101 = vmatprep.subr.bf16.mxu1 %v16367_v56 }
 0x60c   :  { %14054 = vmatmul.mubr.bf16.gmra.mrb[124].mxu1 %v17627_v26 }
 0x60d   :  { %14102 = vmatpush3.bf16.msra.mxu1 %v16367_v56  ;;  %14105 = vmatprep.mubr.bf16.mxu1 %v17629_v27 }
 0x60e   :  { %14103 = vmatprep.subr.bf16.mxu1 %v16368_v57 }
 0x611   :  { %14104 = vmatpush3.bf16.msra.mxu1 %v16368_v57 }
 0x612   :  { %14153 = vmatprep.subr.bf16.mxu1 %v16369_v59 }
 0x614   :  { %14106 = vmatmul.mubr.bf16.vlgmr.msra.gmra.mrb[128].mxu1 %v17615_v31 }
 0x615   :  { %14154 = vmatpush3.bf16.msra.mxu1 %v16369_v59  ;;  %14109 = vmatprep.mubr.bf16.mxu1 %v17617_v32  ;;  %v16392_v59 = vld [vmem:[#allocation18 + $0x238] sm:$0xff]  }
 0x616   :  { %14155 = vmatprep.subr.bf16.mxu1 %v16370_v13 }
 0x619   :  { %14156 = vmatpush3.bf16.msra.mxu1 %v16370_v13 }
 0x61a   :  { %14157 = vmatprep.subr.bf16.mxu1 %v16371_v14 }
 0x61c   :  { %14110 = vmatmul.mubr.bf16.gmra.mrb[132].mxu1 %v17619_v33 }
 0x61d   :  { %14158 = vmatpush3.bf16.msra.mxu1 %v16371_v14  ;;  %14113 = vmatprep.mubr.bf16.mxu1 %v17621_v38 }
 0x61e   :  { %14159 = vmatprep.subr.bf16.mxu1 %v16372_v15 }
 0x621   :  { %14160 = vmatpush3.bf16.msra.mxu1 %v16372_v15 }
 0x622   :  { %14161 = vmatprep.subr.bf16.mxu1 %v16373_v16 }
 0x624   :  { %14114 = vmatmul.mubr.bf16.gmra.mrb[136].mxu1 %v17623_v34 }
 0x625   :  { %14162 = vmatpush3.bf16.msra.mxu1 %v16373_v16  ;;  %14117 = vmatprep.mubr.bf16.mxu1 %v17625_v35 }
 0x626   :  { %14163 = vmatprep.subr.bf16.mxu1 %v16374_v17 }
 0x629   :  { %14164 = vmatpush3.bf16.msra.mxu1 %v16374_v17 }
 0x62a   :  { %14165 = vmatprep.subr.bf16.mxu1 %v16375_v18 }
 0x62c   :  { %14118 = vmatmul.mubr.bf16.gmra.mrb[140].mxu1 %v17627_v26 }
 0x62d   :  { %14166 = vmatpush3.bf16.msra.mxu1 %v16375_v18  ;;  %14169 = vmatprep.mubr.bf16.mxu1 %v17629_v27 }
 0x62e   :  { %14167 = vmatprep.subr.bf16.mxu1 %v16376_v20 }
 0x631   :  { %14168 = vmatpush3.bf16.msra.mxu1 %v16376_v20 }
 0x632   :  { %14217 = vmatprep.subr.bf16.mxu1 %v16377_v23 }
 0x634   :  { %14170 = vmatmul.mubr.bf16.vlgmr.msra.gmra.mrb[144].mxu1 %v17615_v31 }
 0x635   :  { %14218 = vmatpush3.bf16.msra.mxu1 %v16377_v23  ;;  %14173 = vmatprep.mubr.bf16.mxu1 %v17617_v32 }
 0x636   :  { %14219 = vmatprep.subr.bf16.mxu1 %v16378_v24 }
 0x639   :  { %14220 = vmatpush3.bf16.msra.mxu1 %v16378_v24 }
 0x63a   :  { %14221 = vmatprep.subr.bf16.mxu1 %v16379_v25 }
 0x63c   :  { %14174 = vmatmul.mubr.bf16.gmra.mrb[148].mxu1 %v17619_v33 }
 0x63d   :  { %14222 = vmatpush3.bf16.msra.mxu1 %v16379_v25  ;;  %14177 = vmatprep.mubr.bf16.mxu1 %v17621_v38 }
 0x63e   :  { %14223 = vmatprep.subr.bf16.mxu1 %v16380_v29 }
 0x641   :  { %14224 = vmatpush3.bf16.msra.mxu1 %v16380_v29 }
 0x642   :  { %14225 = vmatprep.subr.bf16.mxu1 %v16381_v30 }
 0x644   :  { %14178 = vmatmul.mubr.bf16.gmra.mrb[152].mxu1 %v17623_v34 }
 0x645   :  { %14226 = vmatpush3.bf16.msra.mxu1 %v16381_v30  ;;  %14181 = vmatprep.mubr.bf16.mxu1 %v17625_v35 }
 0x646   :  { %14227 = vmatprep.subr.bf16.mxu1 %v16382_v36 }
 0x647   :  { %v13787_v37 = vpop.f32.mrb[48].mxu1 }
 0x648   :  { %v4053_v40 = vpop.f32.mrb[49].mxu1 }
 0x649   :  { %14228 = vmatpush3.bf16.msra.mxu1 %v16382_v36  ;;  %v13788_v62 = vpop.f32.mrb[50].mxu1 }
 0x64a   :  { %v17687_v45 = vpack.c.bf16 %v13788_v62, %v13787_v37  ;;  %v4056_v63 = vpop.f32.mrb[51].mxu1  ;;  %14229 = vmatprep.subr.bf16.mxu1 %v16383_v28  ;;  %v16394_v62 = vld [vmem:[#allocation22 + $0x48] sm:$0xff]  }
 0x64b   :  { %v17689_v21 = vpack.c.bf16 %v4056_v63, %v4053_v40 }
 0x64c   :  { %14182 = vmatmul.mubr.bf16.gmra.mrb[156].mxu1 %v17627_v26 }
 0x64d   :  { %14230 = vmatpush3.bf16.msra.mxu1 %v16383_v28  ;;  %14233 = vmatprep.mubr.bf16.mxu1 %v17629_v27 }
 0x64e   :  { %14231 = vmatprep.subr.bf16.mxu1 %v16384_v1 }
 0x64f   :  { %v13791_v2 = vpop.f32.mrb[52].mxu1 }
 0x650   :  { %v4069_v3 = vpop.f32.mrb[53].mxu1 }
 0x651   :  { %14232 = vmatpush3.bf16.msra.mxu1 %v16384_v1  ;;  %v13792_v19 = vpop.f32.mrb[54].mxu1  ;;  %v16395_v1 = vld [vmem:[#allocation22 + $0x50] sm:$0xff]  }
 0x652   :  { %v17693_v44 = vpack.c.bf16 %v13792_v19, %v13791_v2  ;;  %v4072_v49 = vpop.f32.mrb[55].mxu1  ;;  %14281 = vmatprep.subr.bf16.mxu1 %v16385_v39 }
 0x653   :  { %v17695_v5 = vpack.c.bf16 %v4072_v49, %v4069_v3  ;;  %v16396_v49 = vld [vmem:[#allocation22 + $0x58] sm:$0xff]  }
 0x654   :  { %14234 = vmatmul.mubr.bf16.vlgmr.msra.gmra.mrb[160].mxu1 %v17615_v31 }
 0x655   :  { %14282 = vmatpush3.bf16.msra.mxu1 %v16385_v39  ;;  %14237 = vmatprep.mubr.bf16.mxu1 %v17617_v32 }
 0x656   :  { %14283 = vmatprep.subr.bf16.mxu1 %v16386_v4 }
 0x657   :  { %v13795_v7 = vpop.f32.mrb[56].mxu1 }
 0x658   :  { %v4085_v0 = vpop.f32.mrb[57].mxu1 }
 0x659   :  { %14284 = vmatpush3.bf16.msra.mxu1 %v16386_v4  ;;  %v13796_v8 = vpop.f32.mrb[58].mxu1  ;;  %v16397_v4 = vld [vmem:[#allocation22 + $0x60] sm:$0xff]  }
 0x65a   :  { %v17699_v9 = vpack.c.bf16 %v13796_v8, %v13795_v7  ;;  %v4088_v10 = vpop.f32.mrb[59].mxu1  ;;  %14285 = vmatprep.subr.bf16.mxu1 %v16387_v6 }
 0x65b   :  { %v17701_v41 = vpack.c.bf16 %v4088_v10, %v4085_v0 }
 0x65c   :  { %14238 = vmatmul.mubr.bf16.gmra.mrb[164].mxu1 %v17619_v33 }
 0x65d   :  { %14286 = vmatpush3.bf16.msra.mxu1 %v16387_v6  ;;  %14241 = vmatprep.mubr.bf16.mxu1 %v17621_v38  ;;  %v16473_v6 = vld [vmem:[%s18625_s11 + $0x110] sm:$0xff]  }
 0x65e   :  { %14287 = vmatprep.subr.bf16.mxu1 %v16388_v11 }
 0x65f   :  { %v13799_v47 = vpop.f32.mrb[60].mxu1 }
 0x660   :  { %v4101_v42 = vpop.f32.mrb[61].mxu1 }
 0x661   :  { %14288 = vmatpush3.bf16.msra.mxu1 %v16388_v11  ;;  %v13800_v48 = vpop.f32.mrb[62].mxu1  ;;  %v16398_v11 = vld [vmem:[#allocation22 + $0x68] sm:$0xff]  }
 0x662   :  { %v17705_v43 = vpack.c.bf16 %v13800_v48, %v13799_v47  ;;  %v4104_v50 = vpop.f32.mrb[63].mxu1  ;;  %14289 = vmatprep.subr.bf16.mxu1 %v16389_v46  ;;  %v16399_v47 = vld [vmem:[#allocation22 + $0x70] sm:$0xff]  }
 0x663   :  { %v17707_v12 = vpack.c.bf16 %v4104_v50, %v4101_v42  ;;  %v16475_v42 = vld [vmem:[%s18625_s11 + $0x120] sm:$0xff]  }
 0x664   :  { %14242 = vmatmul.mubr.bf16.gmra.mrb[168].mxu1 %v17623_v34 }
 0x665   :  { %14290 = vmatpush3.bf16.msra.mxu1 %v16389_v46  ;;  %14245 = vmatprep.mubr.bf16.mxu1 %v17625_v35 }
 0x666   :  { %14291 = vmatprep.subr.bf16.mxu1 %v16390_v51 }
 0x667   :  { %v13819_v53 = vpop.f32.mrb[64].mxu1 }
 0x668   :  { %v4239_v54 = vpop.f32.mrb[65].mxu1 }
 0x669   :  { %14292 = vmatpush3.bf16.msra.mxu1 %v16390_v51  ;;  %v13820_v55 = vpop.f32.mrb[66].mxu1 }
 0x66a   :  { %v4320_v56 = vpack.c.bf16 %v13820_v55, %v13819_v53  ;;  %v4242_v57 = vpop.f32.mrb[67].mxu1  ;;  %14293 = vmatprep.subr.bf16.mxu1 %v16391_v52  ;;  %v16400_v53 = vld [vmem:[#allocation22 + $0x78] sm:$0xff]   ;;  %v16401_v55 = vld [vmem:[#allocation22] sm:$0xff]  }
 0x66b   :  { %v4319_v58 = vpack.c.bf16 %v4242_v57, %v4239_v54 }
 0x66c   :  { %14246 = vmatmul.mubr.bf16.gmra.mrb[172].mxu1 %v17627_v26 }
 0x66d   :  { %14294 = vmatpush3.bf16.msra.mxu1 %v16391_v52  ;;  %13833 = vmatprep.subr.bf16.mxu0 %v4319_v58 }
 0x66e   :  { %14297 = vmatprep.mubr.bf16.mxu1 %v17629_v27  ;;  %13834 = vmatpush3.bf16.msra.mxu0 %v4319_v58 }
 0x66f   :  { %v13823_v13 = vpop.f32.mrb[68].mxu1  ;;  %13835 = vmatprep.subr.bf16.mxu0 %v4320_v56  ;;  %14295 = vmatprep.subr.bf16.mxu1 %v16392_v59 }
 0x670   :  { %v4255_v14 = vpop.f32.mrb[69].mxu1 }
 0x671   :  { %14296 = vmatpush3.bf16.msra.mxu1 %v16392_v59  ;;  %v13824_v15 = vpop.f32.mrb[70].mxu1 }
 0x672   :  { %v4322_v16 = vpack.c.bf16 %v13824_v15, %v13823_v13  ;;  %14345 = vmatprep.subr.bf16.mxu1 %v17300_v60  ;;  %v4258_v17 = vpop.f32.mrb[71].mxu1  ;;  %13836 = vmatpush3.bf16.msra.mxu0 %v4320_v56  ;;  %v16477_v56 = vld [vmem:[%s18625_s11 + $0x130] sm:$0xff]  }
 0x673   :  { %v4321_v18 = vpack.c.bf16 %v4258_v17, %v4255_v14  ;;  %v16402_v14 = vld [vmem:[#allocation22 + $0x8] sm:$0xff]  }
 0x674   :  { %14298 = vmatmul.mubr.bf16.vlgmr.msra.gmra.mrb[176].mxu1 %v17615_v31 }
 0x675   :  { %14346 = vmatpush3.bf16.msra.mxu1 %v17300_v60  ;;  %13837 = vmatprep.subr.bf16.mxu0 %v4321_v18 }
 0x676   :  { %14301 = vmatprep.mubr.bf16.mxu1 %v17617_v32  ;;  %14347 = vmatprep.subr.bf16.mxu1 %v17302_v61 }
 0x677   :  { %13838 = vmatpush3.bf16.msra.mxu0 %v4321_v18  ;;  %v13827_v27 = vpop.f32.mrb[72].mxu1 }
 0x678   :  { %13839 = vmatprep.subr.bf16.mxu0 %v4322_v16  ;;  %v4271_v20 = vpop.f32.mrb[73].mxu1 }
 0x679   :  { %14348 = vmatpush3.bf16.msra.mxu1 %v17302_v61  ;;  %v13828_v23 = vpop.f32.mrb[74].mxu1 }
 0x67a   :  { %v4324_v24 = vpack.c.bf16 %v13828_v23, %v13827_v27  ;;  %v4274_v25 = vpop.f32.mrb[75].mxu1  ;;  %v16404_v23 = vld [vmem:[#allocation22 + $0x18] sm:$0xff]  }
 0x67b   :  { %v4323_v29 = vpack.c.bf16 %v4274_v25, %v4271_v20  ;;  %13840 = vmatpush3.bf16.msra.mxu0 %v4322_v16  ;;  %v16403_v16 = vld [vmem:[#allocation22 + $0x10] sm:$0xff]   ;;  %v16405_v25 = vld [vmem:[#allocation22 + $0x20] sm:$0xff]  }
 0x67c   :  { %14302 = vmatmul.mubr.bf16.gmra.mrb[180].mxu1 %v17619_v33 }
 0x67d   :  { %13841 = vmatprep.subr.bf16.mxu0 %v4323_v29  ;;  %14305 = vmatprep.mubr.bf16.mxu1 %v17621_v38 }
 0x67f   :  { %13842 = vmatpush3.bf16.msra.mxu0 %v4323_v29  ;;  %v13831_v60 = vpop.f32.mrb[76].mxu1 }
 0x680   :  { %13843 = vmatprep.subr.bf16.mxu0 %v4324_v24  ;;  %v4287_v31 = vpop.f32.mrb[77].mxu1 }
 0x681   :  { %v13832_v32 = vpop.f32.mrb[78].mxu1 }
 0x682   :  { %v4326_v30 = vpack.c.bf16 %v13832_v32, %v13831_v60  ;;  %v4290_v36 = vpop.f32.mrb[79].mxu1 }
 0x683   :  { %v4325_v28 = vpack.c.bf16 %v4290_v36, %v4287_v31  ;;  %13844 = vmatpush3.bf16.msra.mxu0 %v4324_v24  ;;  %v16406_v36 = vld [vmem:[#allocation22 + $0x28] sm:$0xff]  }
 0x684   :  { %14306 = vmatmul.mubr.bf16.gmra.mrb[184].mxu1 %v17623_v34  ;;  %v16471_v34 = vld [vmem:[%s18625_s11 + $0x100] sm:$0xff]  }
 0x685   :  { %13845 = vmatprep.subr.bf16.mxu0 %v4325_v28  ;;  %14309 = vmatprep.mubr.bf16.mxu1 %v17625_v35 }
 0x687   :  { %13846 = vmatpush3.bf16.msra.mxu0 %v4325_v28  ;;  %v13915_v61 = vpop.f32.mrb[80].mxu1 }
 0x688   :  { %13847 = vmatprep.subr.bf16.mxu0 %v4326_v30  ;;  %v4716_v33 = vpop.f32.mrb[81].mxu1 }
 0x689   :  { %v13916_v37 = vpop.f32.mrb[82].mxu1 }
 0x68a   :  { %v17723_v38 = vpack.c.bf16 %v13916_v37, %v13915_v61  ;;  %v4719_v40 = vpop.f32.mrb[83].mxu1  ;;  %v16407_v61 = vld [vmem:[#allocation22 + $0x30] sm:$0xff]  }
 0x68b   :  { %13848 = vmatpush3.bf16.msra.mxu0 %v4326_v30  ;;  %v17725_v63 = vpack.c.bf16 %v4719_v40, %v4716_v33 }
 0x68c   :  { %13865 = vmatprep.subr.bf16.mxu0 %v17689_v21  ;;  %14310 = vmatmul.mubr.bf16.gmra.mrb[188].mxu1 %v17627_v26 }
 0x68d   :  { %14349 = vmatprep.mubr.msk.bf16.mxu1 %vm509_vm0, %v16471_v34  ;;  %v16409_v34 = vld [vmem:[#allocation22 + $0x80] sm:$0xff]  }
 0x68e   :  { %13850 = vmatmul.mubr.bf16.vlgmr.msra.gmra.mrb[36].mxu0 %v16394_v62 }
 0x68f   :  { %13866 = vmatpush3.bf16.msra.mxu0 %v17689_v21  ;;  %v13919_v35 = vpop.f32.mrb[84].mxu1  ;;  %13853 = vmatprep.mubr.bf16.mxu0 %v16395_v1  ;;  %v16472_v21 = vld [vmem:[%s18625_s11 + $0x108] sm:$0xff]  }
 0x690   :  { %13867 = vmatprep.subr.bf16.mxu0 %v17687_v45  ;;  %v4732_v39 = vpop.f32.mrb[85].mxu1 }
 0x691   :  { %v13920_v2 = vpop.f32.mrb[86].mxu1 }
 0x692   :  { %v17735_v3 = vpack.c.bf16 %v13920_v2, %v13919_v35  ;;  %v4735_v19 = vpop.f32.mrb[87].mxu1 }
 0x693   :  { %13868 = vmatpush3.bf16.msra.mxu0 %v17687_v45  ;;  %v17738_v26 = vpack.c.bf16 %v4735_v19, %v4732_v39 }
 0x694   :  { %13869 = vmatprep.subr.bf16.mxu0 %v17695_v5  ;;  %14350 = vmatmul.mubr.msk.bf16.vlgmr.msra.gmra.mrb[192].mxu1 %vm509_vm0, %v16472_v21 }
 0x695   :  { %14353 = vmatprep.mubr.msk.bf16.mxu1 %vm509_vm0, %v16473_v6 }
 0x696   :  { %13854 = vmatmul.mubr.bf16.gmra.mrb[40].mxu0 %v16396_v49  ;;  %v16410_v49 = vld [vmem:[#allocation22 + $0x88] sm:$0xff]  }
 0x697   :  { %13870 = vmatpush3.bf16.msra.mxu0 %v17695_v5  ;;  %v13923_v45 = vpop.f32.mrb[88].mxu1  ;;  %13857 = vmatprep.mubr.bf16.mxu0 %v16397_v4  ;;  %v16474_v5 = vld [vmem:[%s18625_s11 + $0x118] sm:$0xff]   ;;  %v16411_v4 = vld [vmem:[#allocation22 + $0x90] sm:$0xff]  }
 0x698   :  { %13871 = vmatprep.subr.bf16.mxu0 %v17693_v44  ;;  %v4748_v7 = vpop.f32.mrb[89].mxu1 }
 0x699   :  { %v13924_v0 = vpop.f32.mrb[90].mxu1 }
 0x69a   :  { %v17751_v8 = vpack.c.bf16 %v13924_v0, %v13923_v45  ;;  %v4751_v10 = vpop.f32.mrb[91].mxu1 }
 0x69b   :  { %13872 = vmatpush3.bf16.msra.mxu0 %v17693_v44  ;;  %v17754_v46 = vpack.c.bf16 %v4751_v10, %v4748_v7 }
 0x69c   :  { %13873 = vmatprep.subr.bf16.mxu0 %v17701_v41  ;;  %14354 = vmatmul.mubr.msk.bf16.gmra.mrb[196].mxu1 %vm509_vm0, %v16474_v5 }
 0x69d   :  { %14357 = vmatprep.mubr.msk.bf16.mxu1 %vm509_vm0, %v16475_v42 }
 0x69e   :  { %13858 = vmatmul.mubr.bf16.gmra.mrb[44].mxu0 %v16398_v11  ;;  %v16413_v11 = vld [vmem:[#allocation22 + $0xa0] sm:$0xff]  }
 0x69f   :  { %13874 = vmatpush3.bf16.msra.mxu0 %v17701_v41  ;;  %v13927_v44 = vpop.f32.mrb[92].mxu1  ;;  %13861 = vmatprep.mubr.bf16.mxu0 %v16399_v47  ;;  %v16476_v41 = vld [vmem:[%s18625_s11 + $0x128] sm:$0xff]  }
 0x6a0   :  { %13875 = vmatprep.subr.bf16.mxu0 %v17699_v9  ;;  %v4764_v48 = vpop.f32.mrb[93].mxu1 }
 0x6a1   :  { %v13928_v50 = vpop.f32.mrb[94].mxu1 }
 0x6a2   :  { %v17767_v51 = vpack.c.bf16 %v13928_v50, %v13927_v44  ;;  %v4767_v52 = vpop.f32.mrb[95].mxu1 }
 0x6a3   :  { %13876 = vmatpush3.bf16.msra.mxu0 %v17699_v9  ;;  %v17770_v54 = vpack.c.bf16 %v4767_v52, %v4764_v48  ;;  %v16414_v48 = vld [vmem:[#allocation22 + $0xa8] sm:$0xff]  }
 0x6a4   :  { %13877 = vmatprep.subr.bf16.mxu0 %v17707_v12  ;;  %14358 = vmatmul.mubr.msk.bf16.gmra.mrb[200].mxu1 %vm509_vm0, %v16476_v41 }
 0x6a5   :  { %14361 = vmatprep.mubr.msk.bf16.mxu1 %vm509_vm0, %v16477_v56  ;;  %v16416_v56 = vld [vmem:[#allocation22 + $0xb8] sm:$0xff]  }
 0x6a6   :  { %13862 = vmatmul.mubr.bf16.gmra.mrb[48].mxu0 %v16400_v53 }
 0x6a7   :  { %13878 = vmatpush3.bf16.msra.mxu0 %v17707_v12  ;;  %v13979_v9 = vpop.f32.mrb[96].mxu1  ;;  %13881 = vmatprep.mubr.bf16.mxu0 %v16401_v55  ;;  %v16478_v12 = vld [vmem:[%s18625_s11 + $0x138] sm:$0xff]   ;;  %s16973_s11 = smov [#allocation2]  }
 0x6a8   :  { %13879 = vmatprep.subr.bf16.mxu0 %v17705_v43  ;;  %v5064_v57 = vpop.f32.mrb[97].mxu1  ;;  %s215_s21 = sshll.u32 %s16973_s11, 4  ;;  %s216_s21 = int_to_ptr.vmem [resolvable:$true] %s215_s21 }
 0x6a9   :  { %v13980_v58 = vpop.f32.mrb[98].mxu1 }
 0x6aa   :  { %v17783_v59 = vpack.c.bf16 %v13980_v58, %v13979_v9  ;;  %v5067_v13 = vpop.f32.mrb[99].mxu1 }
 0x6ab   :  { %13880 = vmatpush3.bf16.msra.mxu0 %v17705_v43  ;;  %v5144_v15 = vpack.c.bf16 %v5067_v13, %v5064_v57  ;;  %v16417_v57 = vld [vmem:[#allocation22 + $0xc0] sm:$0xff]  }
 0x6ac   :  { %13929 = vmatprep.subr.bf16.mxu0 %v17725_v63  ;;  %14362 = vmatmul.mubr.msk.bf16.gmra.mrb[204].mxu1 %vm509_vm0, %v16478_v12 }
 0x6ae   :  { %13882 = vmatmul.mubr.bf16.vlgmr.msra.gmra.mrb[36].mxu0 %v16402_v14 }
 0x6af   :  { %13930 = vmatpush3.bf16.msra.mxu0 %v17725_v63  ;;  %v13983_v17 = vpop.f32.mrb[100].mxu1  ;;  %13885 = vmatprep.mubr.bf16.mxu0 %v16403_v16  ;;  %v16408_v63 = vld [vmem:[#allocation22 + $0x38] sm:$0xff]   ;;  %v16418_v16 = vld [vmem:[#allocation22 + $0xc8] sm:$0xff]  }
 0x6b0   :  { %13931 = vmatprep.subr.bf16.mxu0 %v17723_v38  ;;  %v5080_v18 = vpop.f32.mrb[101].mxu1 }
 0x6b1   :  { %v13984_v27 = vpop.f32.mrb[102].mxu1 }
 0x6b2   :  { %v17793_v43 = vpack.c.bf16 %v13984_v27, %v13983_v17  ;;  %v5083_v20 = vpop.f32.mrb[103].mxu1  ;;  %v16419_v17 = vld [vmem:[#allocation22 + $0xd0] sm:$0xff]  }
 0x6b3   :  { %13932 = vmatpush3.bf16.msra.mxu0 %v17723_v38  ;;  %v5146_v24 = vpack.c.bf16 %v5083_v20, %v5080_v18 }
 0x6b4   :  { %13933 = vmatprep.subr.bf16.mxu0 %v17738_v26 }
 0x6b6   :  { %13886 = vmatmul.mubr.bf16.gmra.mrb[40].mxu0 %v16404_v23 }
 0x6b7   :  { %13934 = vmatpush3.bf16.msra.mxu0 %v17738_v26  ;;  %v13987_v29 = vpop.f32.mrb[104].mxu1  ;;  %13889 = vmatprep.mubr.bf16.mxu0 %v16405_v25 }
 0x6b8   :  { %13935 = vmatprep.subr.bf16.mxu0 %v17735_v3  ;;  %v5096_v60 = vpop.f32.mrb[105].mxu1 }
 0x6b9   :  { %v13988_v31 = vpop.f32.mrb[106].mxu1 }
 0x6ba   :  { %v17799_v32 = vpack.c.bf16 %v13988_v31, %v13987_v29  ;;  %v5099_v30 = vpop.f32.mrb[107].mxu1  ;;  %v16421_v29 = vld [vmem:[#allocation22 + $0xe0] sm:$0xff]  }
 0x6bb   :  { %13936 = vmatpush3.bf16.msra.mxu0 %v17735_v3  ;;  %v5148_v28 = vpack.c.bf16 %v5099_v30, %v5096_v60 }
 0x6bc   :  { %13937 = vmatprep.subr.bf16.mxu0 %v17754_v46 }
 0x6be   :  { %13890 = vmatmul.mubr.bf16.gmra.mrb[44].mxu0 %v16406_v36 }
 0x6bf   :  { %13938 = vmatpush3.bf16.msra.mxu0 %v17754_v46  ;;  %v13991_v33 = vpop.f32.mrb[108].mxu1  ;;  %13893 = vmatprep.mubr.bf16.mxu0 %v16407_v61 }
 0x6c0   :  { %13939 = vmatprep.subr.bf16.mxu0 %v17751_v8  ;;  %v5112_v37 = vpop.f32.mrb[109].mxu1 }
 0x6c1   :  { %v13992_v38 = vpop.f32.mrb[110].mxu1 }
 0x6c2   :  { %v17805_v40 = vpack.c.bf16 %v13992_v38, %v13991_v33  ;;  %v5115_v62 = vpop.f32.mrb[111].mxu1  ;;  %v16423_v33 = vld [vmem:[#allocation22 + $0xf0] sm:$0xff]  }
 0x6c3   :  { %13940 = vmatpush3.bf16.msra.mxu0 %v17751_v8  ;;  %v5150_v1 = vpack.c.bf16 %v5115_v62, %v5112_v37  ;;  %v16412_v8 = vld [vmem:[#allocation22 + $0x98] sm:$0xff]  }
 0x6c4   :  { %13941 = vmatprep.subr.bf16.mxu0 %v17770_v54 }
 0x6c6   :  { %13894 = vmatmul.mubr.bf16.gmra.mrb[48].mxu0 %v16408_v63 }
 0x6c7   :  { %13942 = vmatpush3.bf16.msra.mxu0 %v17770_v54  ;;  %v14043_v35 = vpop.f32.mrb[112].mxu1  ;;  %13945 = vmatprep.mubr.bf16.mxu0 %v16409_v34 }
 0x6c8   :  { %13943 = vmatprep.subr.bf16.mxu0 %v17767_v51  ;;  %v5412_v39 = vpop.f32.mrb[113].mxu1 }
 0x6c9   :  { %v14044_v2 = vpop.f32.mrb[114].mxu1 }
 0x6ca   :  { %v17811_v3 = vpack.c.bf16 %v14044_v2, %v14043_v35  ;;  %v5415_v19 = vpop.f32.mrb[115].mxu1  ;;  %v16425_v35 = vld [vmem:[#allocation22 + $0x100] sm:$0xff]  }
 0x6cb   :  { %13944 = vmatpush3.bf16.msra.mxu0 %v17767_v51  ;;  %v5492_v26 = vpack.c.bf16 %v5415_v19, %v5412_v39  ;;  %v16415_v51 = vld [vmem:[#allocation22 + $0xb0] sm:$0xff]  }
 0x6cc   :  { %13993 = vmatprep.subr.bf16.mxu0 %v5144_v15 }
 0x6ce   :  { %13946 = vmatmul.mubr.bf16.vlgmr.msra.gmra.mrb[36].mxu0 %v16410_v49 }
 0x6cf   :  { %13994 = vmatpush3.bf16.msra.mxu0 %v5144_v15  ;;  %v14047_v21 = vpop.f32.mrb[116].mxu1  ;;  %13949 = vmatprep.mubr.bf16.mxu0 %v16411_v4 }
 0x6d0   :  { %13995 = vmatprep.subr.bf16.mxu0 %v17783_v59  ;;  %v5428_v6 = vpop.f32.mrb[117].mxu1 }
 0x6d1   :  { %v14048_v45 = vpop.f32.mrb[118].mxu1 }
 0x6d2   :  { %v17815_v7 = vpack.c.bf16 %v14048_v45, %v14047_v21  ;;  %v5431_v0 = vpop.f32.mrb[119].mxu1  ;;  %v16427_v21 = vld [vmem:[#allocation22 + $0x110] sm:$0xff]  }
 0x6d3   :  { %13996 = vmatpush3.bf16.msra.mxu0 %v17783_v59  ;;  %v5494_v10 = vpack.c.bf16 %v5431_v0, %v5428_v6 }
 0x6d4   :  { %13997 = vmatprep.subr.bf16.mxu0 %v5146_v24 }
 0x6d6   :  { %13950 = vmatmul.mubr.bf16.gmra.mrb[40].mxu0 %v16412_v8 }
 0x6d7   :  { %13998 = vmatpush3.bf16.msra.mxu0 %v5146_v24  ;;  %v14051_v46 = vpop.f32.mrb[120].mxu1  ;;  %13953 = vmatprep.mubr.bf16.mxu0 %v16413_v11  ;;  %v16420_v24 = vld [vmem:[#allocation22 + $0xd8] sm:$0xff]  }
 0x6d8   :  { %13999 = vmatprep.subr.bf16.mxu0 %v17793_v43  ;;  %v5444_v47 = vpop.f32.mrb[121].mxu1 }
 0x6d9   :  { %v14052_v5 = vpop.f32.mrb[122].mxu1 }
 0x6da   :  { %v17819_v42 = vpack.c.bf16 %v14052_v5, %v14051_v46  ;;  %v5447_v44 = vpop.f32.mrb[123].mxu1  ;;  %v16429_v46 = vld [vmem:[#allocation22 + $0x120] sm:$0xff]  }
 0x6db   :  { %14000 = vmatpush3.bf16.msra.mxu0 %v17793_v43  ;;  %v5496_v50 = vpack.c.bf16 %v5447_v44, %v5444_v47 }
 0x6dc   :  { %14001 = vmatprep.subr.bf16.mxu0 %v5148_v28 }
 0x6de   :  { %13954 = vmatmul.mubr.bf16.gmra.mrb[44].mxu0 %v16414_v48 }
 0x6df   :  { %14002 = vmatpush3.bf16.msra.mxu0 %v5148_v28  ;;  %v14055_v52 = vpop.f32.mrb[124].mxu1  ;;  %13957 = vmatprep.mubr.bf16.mxu0 %v16415_v51  ;;  %v16422_v28 = vld [vmem:[#allocation22 + $0xe8] sm:$0xff]  }
 0x6e0   :  { %14003 = vmatprep.subr.bf16.mxu0 %v17799_v32  ;;  %v5460_v53 = vpop.f32.mrb[125].mxu1 }
 0x6e1   :  { %v14056_v54 = vpop.f32.mrb[126].mxu1 }
 0x6e2   :  { %v17823_v55 = vpack.c.bf16 %v14056_v54, %v14055_v52  ;;  %v5463_v41 = vpop.f32.mrb[127].mxu1  ;;  %v16431_v52 = vld [vmem:[#allocation22 + $0x130] sm:$0xff]  }
 0x6e3   :  { %14004 = vmatpush3.bf16.msra.mxu0 %v17799_v32  ;;  %v5498_v9 = vpack.c.bf16 %v5463_v41, %v5460_v53 }
 0x6e4   :  { %14005 = vmatprep.subr.bf16.mxu0 %v5150_v1 }
 0x6e6   :  { %13958 = vmatmul.mubr.bf16.gmra.mrb[48].mxu0 %v16416_v56 }
 0x6e7   :  { %14006 = vmatpush3.bf16.msra.mxu0 %v5150_v1  ;;  %v14107_v58 = vpop.f32.mrb[128].mxu1  ;;  %14009 = vmatprep.mubr.bf16.mxu0 %v16417_v57  ;;  %v16424_v1 = vld [vmem:[#allocation22 + $0xf8] sm:$0xff]  }
 0x6e8   :  { %14007 = vmatprep.subr.bf16.mxu0 %v17805_v40  ;;  %v5760_v59 = vpop.f32.mrb[129].mxu1 }
 0x6e9   :  { %v14108_v13 = vpop.f32.mrb[130].mxu1 }
 0x6ea   :  { %v17827_v14 = vpack.c.bf16 %v14108_v13, %v14107_v58  ;;  %v5763_v15 = vpop.f32.mrb[131].mxu1  ;;  %v16433_v58 = vld [vmem:[#allocation22 + $0x140] sm:$0xff]  }
 0x6eb   :  { %14008 = vmatpush3.bf16.msra.mxu0 %v17805_v40  ;;  %v5840_v12 = vpack.c.bf16 %v5763_v15, %v5760_v59 }
 0x6ec   :  { %14057 = vmatprep.subr.bf16.mxu0 %v5492_v26 }
 0x6ee   :  { %14010 = vmatmul.mubr.bf16.vlgmr.msra.gmra.mrb[36].mxu0 %v16418_v16 }
 0x6ef   :  { %14058 = vmatpush3.bf16.msra.mxu0 %v5492_v26  ;;  %v14111_v18 = vpop.f32.mrb[132].mxu1  ;;  %14013 = vmatprep.mubr.bf16.mxu0 %v16419_v17  ;;  %v16426_v26 = vld [vmem:[#allocation22 + $0x108] sm:$0xff]  }
 0x6f0   :  { %14059 = vmatprep.subr.bf16.mxu0 %v17811_v3  ;;  %v5776_v27 = vpop.f32.mrb[133].mxu1 }
 0x6f1   :  { %v14112_v43 = vpop.f32.mrb[134].mxu1 }
 0x6f2   :  { %v17831_v20 = vpack.c.bf16 %v14112_v43, %v14111_v18  ;;  %v5779_v23 = vpop.f32.mrb[135].mxu1  ;;  %v16435_v18 = vld [vmem:[#allocation22 + $0x150] sm:$0xff]  }
 0x6f3   :  { %14060 = vmatpush3.bf16.msra.mxu0 %v17811_v3  ;;  %v5842_v25 = vpack.c.bf16 %v5779_v23, %v5776_v27 }
 0x6f4   :  { %14061 = vmatprep.subr.bf16.mxu0 %v5494_v10 }
 0x6f6   :  { %14014 = vmatmul.mubr.bf16.gmra.mrb[40].mxu0 %v16420_v24 }
 0x6f7   :  { %14062 = vmatpush3.bf16.msra.mxu0 %v5494_v10  ;;  %v14115_v60 = vpop.f32.mrb[136].mxu1  ;;  %14017 = vmatprep.mubr.bf16.mxu0 %v16421_v29  ;;  %v16428_v10 = vld [vmem:[#allocation22 + $0x118] sm:$0xff]  }
 0x6f8   :  { %14063 = vmatprep.subr.bf16.mxu0 %v17815_v7  ;;  %v5792_v31 = vpop.f32.mrb[137].mxu1 }
 0x6f9   :  { %v14116_v32 = vpop.f32.mrb[138].mxu1 }
 0x6fa   :  { %v17835_v30 = vpack.c.bf16 %v14116_v32, %v14115_v60  ;;  %v5795_v36 = vpop.f32.mrb[139].mxu1  ;;  %v16437_v60 = vld [vmem:[#allocation22 + $0x160] sm:$0xff]  }
 0x6fb   :  { %14064 = vmatpush3.bf16.msra.mxu0 %v17815_v7  ;;  %v5844_v61 = vpack.c.bf16 %v5795_v36, %v5792_v31 }
 0x6fc   :  { %14065 = vmatprep.subr.bf16.mxu0 %v5496_v50 }
 0x6fe   :  { %14018 = vmatmul.mubr.bf16.gmra.mrb[44].mxu0 %v16422_v28 }
 0x6ff   :  { %14066 = vmatpush3.bf16.msra.mxu0 %v5496_v50  ;;  %v14119_v37 = vpop.f32.mrb[140].mxu1  ;;  %14021 = vmatprep.mubr.bf16.mxu0 %v16423_v33  ;;  %v16430_v50 = vld [vmem:[#allocation22 + $0x128] sm:$0xff]  }
 0x700   :  { %14067 = vmatprep.subr.bf16.mxu0 %v17819_v42  ;;  %v5808_v38 = vpop.f32.mrb[141].mxu1 }
 0x701   :  { %v14120_v40 = vpop.f32.mrb[142].mxu1 }
 0x702   :  { %v17839_v62 = vpack.c.bf16 %v14120_v40, %v14119_v37  ;;  %v5811_v63 = vpop.f32.mrb[143].mxu1  ;;  %v16439_v37 = vld [vmem:[#allocation22 + $0x170] sm:$0xff]  }
 0x703   :  { %14068 = vmatpush3.bf16.msra.mxu0 %v17819_v42  ;;  %v5846_v34 = vpack.c.bf16 %v5811_v63, %v5808_v38 }
 0x704   :  { %14069 = vmatprep.subr.bf16.mxu0 %v5498_v9 }
 0x706   :  { %14022 = vmatmul.mubr.bf16.gmra.mrb[48].mxu0 %v16424_v1 }
 0x707   :  { %14070 = vmatpush3.bf16.msra.mxu0 %v5498_v9  ;;  %v14171_v39 = vpop.f32.mrb[144].mxu1  ;;  %14073 = vmatprep.mubr.bf16.mxu0 %v16425_v35  ;;  %v16432_v9 = vld [vmem:[#allocation22 + $0x138] sm:$0xff]  }
 0x708   :  { %14071 = vmatprep.subr.bf16.mxu0 %v17823_v55  ;;  %v6108_v2 = vpop.f32.mrb[145].mxu1 }
 0x709   :  { %v14172_v3 = vpop.f32.mrb[146].mxu1 }
 0x70a   :  { %v17843_v19 = vpack.c.bf16 %v14172_v3, %v14171_v39  ;;  %v6111_v49 = vpop.f32.mrb[147].mxu1  ;;  %v16441_v39 = vld [vmem:[#allocation22 + $0x180] sm:$0xff]  }
 0x70b   :  { %14072 = vmatpush3.bf16.msra.mxu0 %v17823_v55  ;;  %v6188_v4 = vpack.c.bf16 %v6111_v49, %v6108_v2 }
 0x70c   :  { %14121 = vmatprep.subr.bf16.mxu0 %v5840_v12 }
 0x70e   :  { %14074 = vmatmul.mubr.bf16.vlgmr.msra.gmra.mrb[36].mxu0 %v16426_v26 }
 0x70f   :  { %14122 = vmatpush3.bf16.msra.mxu0 %v5840_v12  ;;  %v14175_v6 = vpop.f32.mrb[148].mxu1  ;;  %14077 = vmatprep.mubr.bf16.mxu0 %v16427_v21  ;;  %v16434_v12 = vld [vmem:[#allocation22 + $0x148] sm:$0xff]  }
 0x710   :  { %14123 = vmatprep.subr.bf16.mxu0 %v17827_v14  ;;  %v6124_v45 = vpop.f32.mrb[149].mxu1 }
 0x711   :  { %v14176_v7 = vpop.f32.mrb[150].mxu1 }
 0x712   :  { %v17847_v0 = vpack.c.bf16 %v14176_v7, %v14175_v6  ;;  %v6127_v8 = vpop.f32.mrb[151].mxu1  ;;  %v16443_v6 = vld [vmem:[#allocation22 + $0x190] sm:$0xff]  }
 0x713   :  { %14124 = vmatpush3.bf16.msra.mxu0 %v17827_v14  ;;  %v6190_v11 = vpack.c.bf16 %v6127_v8, %v6124_v45 }
 0x714   :  { %14125 = vmatprep.subr.bf16.mxu0 %v5842_v25 }
 0x716   :  { %14078 = vmatmul.mubr.bf16.gmra.mrb[40].mxu0 %v16428_v10 }
 0x717   :  { %14126 = vmatpush3.bf16.msra.mxu0 %v5842_v25  ;;  %v14179_v47 = vpop.f32.mrb[152].mxu1  ;;  %14081 = vmatprep.mubr.bf16.mxu0 %v16429_v46  ;;  %v16436_v25 = vld [vmem:[#allocation22 + $0x158] sm:$0xff]  }
 0x718   :  { %14127 = vmatprep.subr.bf16.mxu0 %v17831_v20  ;;  %v6140_v5 = vpop.f32.mrb[153].mxu1 }
 0x719   :  { %v14180_v42 = vpop.f32.mrb[154].mxu1 }
 0x71a   :  { %v17851_v44 = vpack.c.bf16 %v14180_v42, %v14179_v47  ;;  %v6143_v48 = vpop.f32.mrb[155].mxu1  ;;  %v16445_v47 = vld [vmem:[#allocation22 + $0x1a0] sm:$0xff]  }
 0x71b   :  { %14128 = vmatpush3.bf16.msra.mxu0 %v17831_v20  ;;  %v6192_v51 = vpack.c.bf16 %v6143_v48, %v6140_v5 }
 0x71c   :  { %14129 = vmatprep.subr.bf16.mxu0 %v5844_v61 }
 0x71e   :  { %14082 = vmatmul.mubr.bf16.gmra.mrb[44].mxu0 %v16430_v50 }
 0x71f   :  { %14130 = vmatpush3.bf16.msra.mxu0 %v5844_v61  ;;  %v14183_v53 = vpop.f32.mrb[156].mxu1  ;;  %14085 = vmatprep.mubr.bf16.mxu0 %v16431_v52  ;;  %v16438_v61 = vld [vmem:[#allocation22 + $0x168] sm:$0xff]  }
 0x720   :  { %14131 = vmatprep.subr.bf16.mxu0 %v17835_v30  ;;  %v6156_v54 = vpop.f32.mrb[157].mxu1 }
 0x721   :  { %v14184_v55 = vpop.f32.mrb[158].mxu1 }
 0x722   :  { %v17855_v41 = vpack.c.bf16 %v14184_v55, %v14183_v53  ;;  %v6159_v56 = vpop.f32.mrb[159].mxu1  ;;  %v16447_v53 = vld [vmem:[#allocation22 + $0x1b0] sm:$0xff]  }
 0x723   :  { %14132 = vmatpush3.bf16.msra.mxu0 %v17835_v30  ;;  %v6194_v57 = vpack.c.bf16 %v6159_v56, %v6156_v54 }
 0x724   :  { %14133 = vmatprep.subr.bf16.mxu0 %v5846_v34 }
 0x726   :  { %14086 = vmatmul.mubr.bf16.gmra.mrb[48].mxu0 %v16432_v9 }
 0x727   :  { %14134 = vmatpush3.bf16.msra.mxu0 %v5846_v34  ;;  %v14235_v59 = vpop.f32.mrb[160].mxu1  ;;  %14137 = vmatprep.mubr.bf16.mxu0 %v16433_v58  ;;  %v16440_v34 = vld [vmem:[#allocation22 + $0x178] sm:$0xff]  }
 0x728   :  { %14135 = vmatprep.subr.bf16.mxu0 %v17839_v62  ;;  %v6456_v13 = vpop.f32.mrb[161].mxu1 }
 0x729   :  { %v14236_v14 = vpop.f32.mrb[162].mxu1 }
 0x72a   :  { %v17859_v15 = vpack.c.bf16 %v14236_v14, %v14235_v59  ;;  %v6459_v16 = vpop.f32.mrb[163].mxu1  ;;  %v16449_v59 = vld [vmem:[#allocation22 + $0x1c0] sm:$0xff]   ;;  %v16451_v14 = vld [vmem:[#allocation22 + $0x1d0] sm:$0xff]  }
 0x72b   :  { %14136 = vmatpush3.bf16.msra.mxu0 %v17839_v62  ;;  %v6536_v17 = vpack.c.bf16 %v6459_v16, %v6456_v13  ;;  %v16450_v13 = vld [vmem:[#allocation22 + $0x1c8] sm:$0xff]   ;;  %v16453_v16 = vld [vmem:[#allocation22 + $0x1e0] sm:$0xff]  }
 0x72c   :  { %14185 = vmatprep.subr.bf16.mxu0 %v6188_v4 }
 0x72e   :  { %14138 = vmatmul.mubr.bf16.vlgmr.msra.gmra.mrb[36].mxu0 %v16434_v12  ;;  %v16454_v12 = vld [vmem:[#allocation22 + $0x1e8] sm:$0xff]  }
 0x72f   :  { %14186 = vmatpush3.bf16.msra.mxu0 %v6188_v4  ;;  %v14239_v27 = vpop.f32.mrb[164].mxu1  ;;  %14141 = vmatprep.mubr.bf16.mxu0 %v16435_v18  ;;  %v16442_v4 = vld [vmem:[#allocation22 + $0x188] sm:$0xff]   ;;  %v16456_v18 = vld [vmem:[#allocation22 + $0x1f8] sm:$0xff]  }
 0x730   :  { %14187 = vmatprep.subr.bf16.mxu0 %v17843_v19  ;;  %v6472_v43 = vpop.f32.mrb[165].mxu1 }
 0x731   :  { %v14240_v20 = vpop.f32.mrb[166].mxu1 }
 0x732   :  { %v17863_v23 = vpack.c.bf16 %v14240_v20, %v14239_v27  ;;  %v6475_v24 = vpop.f32.mrb[167].mxu1  ;;  %v16457_v27 = vld [vmem:[#allocation22 + $0x200] sm:$0xff]   ;;  %v16459_v20 = vld [vmem:[#allocation22 + $0x210] sm:$0xff]  }
 0x733   :  { %14188 = vmatpush3.bf16.msra.mxu0 %v17843_v19  ;;  %v6538_v29 = vpack.c.bf16 %v6475_v24, %v6472_v43  ;;  %v16458_v43 = vld [vmem:[#allocation22 + $0x208] sm:$0xff]   ;;  %v16461_v24 = vld [vmem:[#allocation22 + $0x220] sm:$0xff]  }
 0x734   :  { %14189 = vmatprep.subr.bf16.mxu0 %v6190_v11 }
 0x736   :  { %14142 = vmatmul.mubr.bf16.gmra.mrb[40].mxu0 %v16436_v25  ;;  %v16462_v25 = vld [vmem:[#allocation22 + $0x228] sm:$0xff]  }
 0x737   :  { %14190 = vmatpush3.bf16.msra.mxu0 %v6190_v11  ;;  %v14243_v31 = vpop.f32.mrb[168].mxu1  ;;  %14145 = vmatprep.mubr.bf16.mxu0 %v16437_v60  ;;  %v16444_v11 = vld [vmem:[#allocation22 + $0x198] sm:$0xff]  }
 0x738   :  { %14191 = vmatprep.subr.bf16.mxu0 %v17847_v0  ;;  %v6488_v32 = vpop.f32.mrb[169].mxu1  ;;  %v16464_v60 = vld [vmem:[#allocation22 + $0x238] sm:$0xff]  }
 0x739   :  { %v14244_v30 = vpop.f32.mrb[170].mxu1 }
 0x73a   :  { %v17867_v36 = vpack.c.bf16 %v14244_v30, %v14243_v31  ;;  %v6491_v28 = vpop.f32.mrb[171].mxu1 }
 0x73b   :  { %14192 = vmatpush3.bf16.msra.mxu0 %v17847_v0  ;;  %v6540_v33 = vpack.c.bf16 %v6491_v28, %v6488_v32 }
 0x73c   :  { %14193 = vmatprep.subr.bf16.mxu0 %v6192_v51 }
 0x73e   :  { %14146 = vmatmul.mubr.bf16.gmra.mrb[44].mxu0 %v16438_v61 }
 0x73f   :  { %14194 = vmatpush3.bf16.msra.mxu0 %v6192_v51  ;;  %v14247_v38 = vpop.f32.mrb[172].mxu1  ;;  %14149 = vmatprep.mubr.bf16.mxu0 %v16439_v37  ;;  %v16446_v51 = vld [vmem:[#allocation22 + $0x1a8] sm:$0xff]  }
 0x740   :  { %14195 = vmatprep.subr.bf16.mxu0 %v17851_v44  ;;  %v6504_v40 = vpop.f32.mrb[173].mxu1 }
 0x741   :  { %v14248_v62 = vpop.f32.mrb[174].mxu1 }
 0x742   :  { %v17871_v63 = vpack.c.bf16 %v14248_v62, %v14247_v38  ;;  %v6507_v1 = vpop.f32.mrb[175].mxu1 }
 0x743   :  { %14196 = vmatpush3.bf16.msra.mxu0 %v17851_v44  ;;  %v6542_v35 = vpack.c.bf16 %v6507_v1, %v6504_v40 }
 0x744   :  { %14197 = vmatprep.subr.bf16.mxu0 %v6194_v57 }
 0x746   :  { %14150 = vmatmul.mubr.bf16.gmra.mrb[48].mxu0 %v16440_v34 }
 0x747   :  { %14198 = vmatpush3.bf16.msra.mxu0 %v6194_v57  ;;  %v14299_v2 = vpop.f32.mrb[176].mxu1  ;;  %14201 = vmatprep.mubr.bf16.mxu0 %v16441_v39  ;;  %v16448_v57 = vld [vmem:[#allocation22 + $0x1b8] sm:$0xff]  }
 0x748   :  { %14199 = vmatprep.subr.bf16.mxu0 %v17855_v41  ;;  %v6804_v3 = vpop.f32.mrb[177].mxu1 }
 0x749   :  { %v14300_v19 = vpop.f32.mrb[178].mxu1 }
 0x74a   :  { %v6885_v49 = vpack.c.bf16 %v14300_v19, %v14299_v2  ;;  %v6807_v26 = vpop.f32.mrb[179].mxu1 }
 0x74b   :  { %14200 = vmatpush3.bf16.msra.mxu0 %v17855_v41  ;;  %v6884_v21 = vpack.c.bf16 %v6807_v26, %v6804_v3 }
 0x74c   :  { %14249 = vmatprep.subr.bf16.mxu0 %v6536_v17 }
 0x74e   :  { %14202 = vmatmul.mubr.bf16.vlgmr.msra.gmra.mrb[36].mxu0 %v16442_v4 }
 0x74f   :  { %14250 = vmatpush3.bf16.msra.mxu0 %v6536_v17  ;;  %v14303_v45 = vpop.f32.mrb[180].mxu1  ;;  %14205 = vmatprep.mubr.bf16.mxu0 %v16443_v6  ;;  %v16455_v17 = vld [vmem:[#allocation22 + $0x1f0] sm:$0xff]  }
 0x750   :  { %14251 = vmatprep.subr.bf16.mxu0 %v17859_v15  ;;  %v6820_v7 = vpop.f32.mrb[181].mxu1 }
 0x751   :  { %v14304_v0 = vpop.f32.mrb[182].mxu1 }
 0x752   :  { %v6887_v8 = vpack.c.bf16 %v14304_v0, %v14303_v45  ;;  %v6823_v10 = vpop.f32.mrb[183].mxu1 }
 0x753   :  { %14252 = vmatpush3.bf16.msra.mxu0 %v17859_v15  ;;  %v6886_v46 = vpack.c.bf16 %v6823_v10, %v6820_v7  ;;  %v16452_v15 = vld [vmem:[#allocation22 + $0x1d8] sm:$0xff]  }
 0x754   :  { %14253 = vmatprep.subr.bf16.mxu0 %v6538_v29 }
 0x756   :  { %14206 = vmatmul.mubr.bf16.gmra.mrb[40].mxu0 %v16444_v11 }
 0x757   :  { %14254 = vmatpush3.bf16.msra.mxu0 %v6538_v29  ;;  %v14307_v5 = vpop.f32.mrb[184].mxu1  ;;  %14209 = vmatprep.mubr.bf16.mxu0 %v16445_v47  ;;  %v16463_v29 = vld [vmem:[#allocation22 + $0x230] sm:$0xff]  }
 0x758   :  { %14255 = vmatprep.subr.bf16.mxu0 %v17863_v23  ;;  %v6836_v42 = vpop.f32.mrb[185].mxu1 }
 0x759   :  { %v14308_v44 = vpop.f32.mrb[186].mxu1 }
 0x75a   :  { %v6889_v48 = vpack.c.bf16 %v14308_v44, %v14307_v5  ;;  %v6839_v50 = vpop.f32.mrb[187].mxu1 }
 0x75b   :  { %14256 = vmatpush3.bf16.msra.mxu0 %v17863_v23  ;;  %v6888_v52 = vpack.c.bf16 %v6839_v50, %v6836_v42  ;;  %v16460_v23 = vld [vmem:[#allocation22 + $0x218] sm:$0xff]  }
 0x75c   :  { %14257 = vmatprep.subr.bf16.mxu0 %v6540_v33 }
 0x75e   :  { %14210 = vmatmul.mubr.bf16.gmra.mrb[44].mxu0 %v16446_v51 }
 0x75f   :  { %14258 = vmatpush3.bf16.msra.mxu0 %v6540_v33  ;;  %v14311_v54 = vpop.f32.mrb[188].mxu1  ;;  %14213 = vmatprep.mubr.bf16.mxu0 %v16447_v53 }
 0x760   :  { %14259 = vmatprep.subr.bf16.mxu0 %v17867_v36  ;;  %v6852_v55 = vpop.f32.mrb[189].mxu1 }
 0x761   :  { %v14312_v41 = vpop.f32.mrb[190].mxu1 }
 0x762   :  { %v6891_v56 = vpack.c.bf16 %v14312_v41, %v14311_v54  ;;  %v6855_v9 = vpop.f32.mrb[191].mxu1 }
 0x763   :  { %14260 = vmatpush3.bf16.msra.mxu0 %v17867_v36  ;;  %v6890_v58 = vpack.c.bf16 %v6855_v9, %v6852_v55 }
 0x764   :  { %14261 = vmatprep.subr.bf16.mxu0 %v6542_v35 }
 0x766   :  { %14214 = vmatmul.mubr.bf16.gmra.mrb[48].mxu0 %v16448_v57 }
 0x767   :  { %14262 = vmatpush3.bf16.msra.mxu0 %v6542_v35  ;;  %14265 = vmatprep.mubr.bf16.mxu0 %v16449_v59  ;;  %v17884_v31 = vpop.f32.mrb[192].mxu1 }
 0x768   :  { %14263 = vmatprep.subr.bf16.mxu0 %v17871_v63  ;;  %v17886_v32 = vpop.f32.mrb[193].mxu1 }
 0x769   :  { %v17888_v30 = vpop.f32.mrb[194].mxu1 }
 0x76a   :  { %v17890_v36 = vpop.f32.mrb[195].mxu1 }
 0x76b   :  { %14264 = vmatpush3.bf16.msra.mxu0 %v17871_v63 }
 0x76c   :  { %14313 = vmatprep.subr.bf16.mxu0 %v6884_v21 }
 0x76e   :  { %14266 = vmatmul.mubr.bf16.vlgmr.msra.gmra.mrb[36].mxu0 %v16450_v13 }
 0x76f   :  { %14314 = vmatpush3.bf16.msra.mxu0 %v6884_v21  ;;  %14269 = vmatprep.mubr.bf16.mxu0 %v16451_v14  ;;  %v17892_v28 = vpop.f32.mrb[196].mxu1 }
 0x770   :  { %14315 = vmatprep.subr.bf16.mxu0 %v6885_v49  ;;  %v17894_v61 = vpop.f32.mrb[197].mxu1 }
 0x771   :  { %v17896_v33 = vpop.f32.mrb[198].mxu1 }
 0x772   :  { %v17898_v37 = vpop.f32.mrb[199].mxu1 }
 0x773   :  { %14316 = vmatpush3.bf16.msra.mxu0 %v6885_v49 }
 0x774   :  { %14317 = vmatprep.subr.bf16.mxu0 %v6886_v46 }
 0x776   :  { %14270 = vmatmul.mubr.bf16.gmra.mrb[40].mxu0 %v16452_v15 }
 0x777   :  { %14318 = vmatpush3.bf16.msra.mxu0 %v6886_v46  ;;  %14273 = vmatprep.mubr.bf16.mxu0 %v16453_v16  ;;  %v17900_v38 = vpop.f32.mrb[200].mxu1 }
 0x778   :  { %14319 = vmatprep.subr.bf16.mxu0 %v6887_v8  ;;  %v17902_v40 = vpop.f32.mrb[201].mxu1 }
 0x779   :  { %v17904_v62 = vpop.f32.mrb[202].mxu1 }
 0x77a   :  { %v17906_v63 = vpop.f32.mrb[203].mxu1 }
 0x77b   :  { %14320 = vmatpush3.bf16.msra.mxu0 %v6887_v8 }
 0x77c   :  { %14321 = vmatprep.subr.bf16.mxu0 %v6888_v52 }
 0x77e   :  { %14274 = vmatmul.mubr.bf16.gmra.mrb[44].mxu0 %v16454_v12 }
 0x77f   :  { %14322 = vmatpush3.bf16.msra.mxu0 %v6888_v52  ;;  %14277 = vmatprep.mubr.bf16.mxu0 %v16455_v17  ;;  %v17908_v1 = vpop.f32.mrb[204].mxu1 }
 0x780   :  { %14323 = vmatprep.subr.bf16.mxu0 %v6889_v48  ;;  %v17910_v34 = vpop.f32.mrb[205].mxu1 }
 0x781   :  { %v17912_v35 = vpop.f32.mrb[206].mxu1 }
 0x782   :  { %v17914_v39 = vpop.f32.mrb[207].mxu1 }
 0x783   :  { %14324 = vmatpush3.bf16.msra.mxu0 %v6889_v48 }
 0x784   :  { %14325 = vmatprep.subr.bf16.mxu0 %v6890_v58 }
 0x786   :  { %14278 = vmatmul.mubr.bf16.gmra.mrb[48].mxu0 %v16456_v18 }
 0x787   :  { %14326 = vmatpush3.bf16.msra.mxu0 %v6890_v58  ;;  %14329 = vmatprep.mubr.bf16.mxu0 %v16457_v27 }
 0x788   :  { %14327 = vmatprep.subr.bf16.mxu0 %v6891_v56 }
 0x78b   :  { %14328 = vmatpush3.bf16.msra.mxu0 %v6891_v56 }
 0x78e   :  { %14330 = vmatmul.mubr.bf16.vlgmr.msra.gmra.mrb[36].mxu0 %v16458_v43 }
 0x78f   :  { %14333 = vmatprep.mubr.bf16.mxu0 %v16459_v20 }
 0x796   :  { %14334 = vmatmul.mubr.bf16.gmra.mrb[40].mxu0 %v16460_v23 }
 0x797   :  { %14337 = vmatprep.mubr.bf16.mxu0 %v16461_v24 }
 0x79e   :  { %14338 = vmatmul.mubr.bf16.gmra.mrb[44].mxu0 %v16462_v25 }
 0x79f   :  { %14341 = vmatprep.mubr.bf16.mxu0 %v16463_v29 }
 0x7a6   :  { %14342 = vmatmul.mubr.bf16.gmra.mrb[48].mxu0 %v16464_v60 }
 0x861   :  { %v17916_v2 = vpop.f32.mrb[36].mxu0 }
 0x862   :  { %v17918_v3 = vpop.f32.mrb[37].mxu0 }
 0x863   :  { %v17920_v19 = vpop.f32.mrb[38].mxu0 }
 0x864   :  { %v17922_v49 = vpop.f32.mrb[39].mxu0 }
 0x865   :  { %16902 = shalt.err (!%p16899_p8)  }
 0x866   :  { %s16903_s19 = scalar_lea.vmem %s216_s21, 9216  ;;  %p16908_p10 = scmp.lt.s32.totalorder %s216_s21, %s216_s21 }
 0x867   :  { %p16904_p9 = scmp.ne.s32.totalorder %s216_s21, %s16903_s19  ;;  %p16909_p11 = scmp.lt.s32.totalorder %s16903_s19, %s16903_s19 }
 0x869   :  { %p16910_p12 = por %p16909_p11, %p16908_p10 }
 0x86b   :  { %p16911_p13 = pnand %p16910_p12, %p16904_p9 }
 0x86d   :  { %16914 = shalt.err (!%p16911_p13)  }
 0x86e   :  { %218 = dma.hbm_to_vmem [thread:$0]  %s18627_s13, 9216, %s216_s21, [#allocation4]  ;;  %v7053_v26 = vadd.f32 %v17922_v49, %v17918_v3 }
 0x86f   :  { %s16915_s1 = scalar_lea.hbm %s18629_s15, 36864 }
 0x870   :  { %p16916_p0 = scmp.ne.s32.totalorder %s18629_s15, %s16915_s1  ;;  %p16919_p1 = scmp.lt.u32.totalorder %s16915_s1, %s18629_s15 }
 0x872   :  { %p16921_p2 = pnand %p16919_p1, %p16916_p0 }
 0x874   :  { %16924 = shalt.err (!%p16921_p2)  }
 0x875   :  { %s16925_s27 = scalar_lea.vmem %s228_s18, 36864  ;;  %p16930_p4 = scmp.lt.s32.totalorder %s228_s18, %s228_s18 }
 0x876   :  { %p16926_p3 = scmp.ne.s32.totalorder %s228_s18, %s16925_s27  ;;  %p16931_p5 = scmp.lt.s32.totalorder %s16925_s27, %s16925_s27 }
 0x878   :  { %p16932_p6 = por %p16931_p5, %p16930_p4 }
 0x87a   :  { %p16933_p7 = pnand %p16932_p6, %p16926_p3 }
 0x87c   :  { %16936 = shalt.err (!%p16933_p7)  }
 0x87d   :  { %230 = dma.hbm_to_vmem [thread:$0]  %s18629_s15, 36864, %s228_s18, [#allocation4 + $0x1]  ;;  %v7054_v4 = vadd.f32 %v17916_v2, %v7053_v26  ;;  %v14335_v21 = vpop.f32.mrb[40].mxu0 }
 0x87e   :  { %v6990_v45 = vpop.f32.mrb[41].mxu0 }
 0x87f   :  { %v7055_v6 = vadd.f32 %v17920_v19, %v7054_v4  ;;  %v14336_v0 = vpop.f32.mrb[42].mxu0 }
 0x880   :  { %v6993_v8 = vpop.f32.mrb[43].mxu0 }
 0x881   :  { %v7056_v7 = vadd.f32 %v7055_v6, %v6990_v45  ;;  %v14339_v46 = vpop.f32.mrb[44].mxu0 }
 0x882   :  { %v7006_v5 = vpop.f32.mrb[45].mxu0 }
 0x883   :  { %v7057_v10 = vadd.f32 %v7056_v7, %v6993_v8  ;;  %v14340_v44 = vpop.f32.mrb[46].mxu0 }
 0x884   :  { %v7009_v48 = vpop.f32.mrb[47].mxu0 }
 0x885   :  { %v7058_v11 = vadd.f32 %v14335_v21, %v7057_v10  ;;  %v14343_v52 = vpop.f32.mrb[48].mxu0 }
 0x886   :  { %v7022_v54 = vpop.f32.mrb[49].mxu0 }
 0x887   :  { %v7059_v47 = vadd.f32 %v14336_v0, %v7058_v11  ;;  %v14344_v41 = vpop.f32.mrb[50].mxu0 }
 0x888   :  { %v7025_v56 = vpop.f32.mrb[51].mxu0 }
 0x889   :  { %v7060_v42 = vadd.f32 %v7059_v47, %v7006_v5 }
 0x88b   :  { %v7061_v50 = vadd.f32 %v7060_v42, %v7009_v48 }
 0x88d   :  { %v7062_v51 = vadd.f32 %v14339_v46, %v7061_v50 }
 0x88f   :  { %v7063_v53 = vadd.f32 %v14340_v44, %v7062_v51 }
 0x891   :  { %v7064_v55 = vadd.f32 %v7063_v53, %v7022_v54 }
 0x893   :  { %v7065_v9 = vadd.f32 %v7064_v55, %v7025_v56 }
 0x895   :  { %v7066_v57 = vadd.f32 %v14343_v52, %v7065_v9 }
 0x897   :  { %v7067_v58 = vadd.f32 %v14344_v41, %v7066_v57 }
 0x899   :  { %v7068_v59 = vrot.slane %v7067_v58, 4 }
 0x89b   :  { %v7069_v13 = vadd.f32 %v7068_v59, %v7067_v58 }
 0x89d   :  { %v7070_v14 = vrot.slane %v7069_v13, 2 }
 0x89f   :  { %v7071_v15 = vadd.f32 %v7070_v14, %v7069_v13 }
 0x8a1   :  { %v7072_v16 = vrot.slane %v7071_v15, 1 }
 0x8a3   :  { %v7073_v12 = vadd.f32 %v7072_v16, %v7071_v15 }
 0x8a5   :  { %v7074_v17 = vmul.f32 0.0078125, %v7073_v12 }
 0x8a7   :  { %v17953_v18 = vsub.f32 %v17918_v3, %v7074_v17  ;;  %v17956_v27 = vsub.f32 %v17922_v49, %v7074_v17  ;;  %v7077_v43 = vsub.f32 %v17916_v2, %v7074_v17  ;;  %v7078_v20 = vsub.f32 %v17920_v19, %v7074_v17 }
 0x8a8   :  { %v17960_v23 = vsub.f32 %v6990_v45, %v7074_v17  ;;  %v17962_v24 = vsub.f32 %v6993_v8, %v7074_v17  ;;  %v7081_v25 = vsub.f32 %v14335_v21, %v7074_v17  ;;  %v7082_v29 = vsub.f32 %v14336_v0, %v7074_v17 }
 0x8a9   :  { %v17964_v60 = vsub.f32 %v7006_v5, %v7074_v17  ;;  %v17966_v26 = vsub.f32 %v7009_v48, %v7074_v17  ;;  %v17968_v4 = vsub.f32 %v14339_v46, %v7074_v17  ;;  %v17970_v3 = vsub.f32 %v14340_v44, %v7074_v17 }
 0x8aa   :  { %v17972_v49 = vsub.f32 %v7022_v54, %v7074_v17  ;;  %v7088_v6 = vsub.f32 %v7025_v56, %v7074_v17  ;;  %v17974_v2 = vsub.f32 %v14343_v52, %v7074_v17  ;;  %v17976_v19 = vsub.f32 %v14344_v41, %v7074_v17 }
 0x8ab   :  { %v7091_v45 = vmul.f32 %v17953_v18, %v17953_v18  ;;  %v7092_v21 = vmul.f32 %v17956_v27, %v17956_v27  ;;  %v7093_v7 = vmul.f32 %v7077_v43, %v7077_v43  ;;  %v7094_v8 = vmul.f32 %v7078_v20, %v7078_v20 }
 0x8ac   :  { %v7095_v11 = vmul.f32 %v17960_v23, %v17960_v23  ;;  %v7096_v47 = vmul.f32 %v17962_v24, %v17962_v24  ;;  %v7097_v42 = vmul.f32 %v7081_v25, %v7081_v25  ;;  %v7098_v48 = vmul.f32 %v7082_v29, %v7082_v29 }
 0x8ad   :  { %v7107_v0 = vadd.f32 %v7092_v21, %v7091_v45  ;;  %v7099_v51 = vmul.f32 %v17964_v60, %v17964_v60  ;;  %v7100_v53 = vmul.f32 %v17966_v26, %v17966_v26  ;;  %v7101_v55 = vmul.f32 %v17968_v4, %v17968_v4 }
 0x8ae   :  { %v7102_v56 = vmul.f32 %v17970_v3, %v17970_v3  ;;  %v7103_v57 = vmul.f32 %v17972_v49, %v17972_v49  ;;  %v7104_v59 = vmul.f32 %v7088_v6, %v7088_v6  ;;  %v7105_v14 = vmul.f32 %v17974_v2, %v17974_v2 }
 0x8af   :  { %v7108_v10 = vadd.f32 %v7107_v0, %v7093_v7  ;;  %v7106_v16 = vmul.f32 %v17976_v19, %v17976_v19 }
 0x8b1   :  { %v7109_v46 = vadd.f32 %v7108_v10, %v7094_v8 }
 0x8b3   :  { %v7110_v5 = vadd.f32 %v7109_v46, %v7095_v11 }
 0x8b5   :  { %v7111_v44 = vadd.f32 %v7110_v5, %v7096_v47  ;;  %v7129_v47 = vld [vmem:[#allocation19] sm:$0x1] }
 0x8b7   :  { %v7112_v50 = vadd.f32 %v7111_v44, %v7097_v42 }
 0x8b9   :  { %v7113_v52 = vadd.f32 %v7112_v50, %v7098_v48  ;;  %v12415_v48 = vld [vmem:[#allocation21] ss:$0 sm:$0xff] }
 0x8bb   :  { %v7114_v54 = vadd.f32 %v7113_v52, %v7099_v51 }
 0x8bd   :  { %v7115_v41 = vadd.f32 %v7114_v54, %v7100_v53 }
 0x8bf   :  { %v7116_v9 = vadd.f32 %v7115_v41, %v7101_v55 }
 0x8c1   :  { %v7117_v58 = vadd.f32 %v7116_v9, %v7102_v56 }
 0x8c3   :  { %v7118_v13 = vadd.f32 %v7117_v58, %v7103_v57 }
 0x8c5   :  { %v7119_v15 = vadd.f32 %v7118_v13, %v7104_v59 }
 0x8c7   :  { %v7120_v12 = vadd.f32 %v7119_v15, %v7105_v14 }
 0x8c9   :  { %v7121_v17 = vadd.f32 %v7120_v12, %v7106_v16 }
 0x8cb   :  { %v7122_v45 = vrot.slane %v7121_v17, 4 }
 0x8cd   :  { %v7123_v21 = vadd.f32 %v7122_v45, %v7121_v17 }
 0x8cf   :  { %v7124_v7 = vrot.slane %v7123_v21, 2 }
 0x8d1   :  { %v7125_v0 = vadd.f32 %v7124_v7, %v7123_v21 }
 0x8d3   :  { %v7126_v8 = vrot.slane %v7125_v0, 1 }
 0x8d5   :  { %v7127_v10 = vadd.f32 %v7126_v8, %v7125_v0 }
 0x8d7   :  { %v7128_v11 = vmul.f32 0.0078125, %v7127_v10 }
 0x8d9   :  { %v7130_v46 = vadd.f32 1e-05, %v7128_v11 }
 0x8db   :  { %16469 = vrsqrt.f32 %v7130_v46 }
 0x8e5   :  { %v16470_v5 = vpop.eup %16469 }
 0x8e6   :  { %v7132_v42 = vmul.f32 %v16470_v5, %v7129_v47 }
 0x8e8   :  { %v7137_v44 = vrot.slane %v7132_v42, %v17265_v22 }
 0x8ea   :  { %v7152_v50 = vmul.f32 %v7137_v44, %v7088_v6  ;;  %v7141_v51 = vmul.f32 %v7137_v44, %v7077_v43  ;;  %v7139_v52 = vmul.f32 %v7137_v44, %v17953_v18  ;;  %v7142_v53 = vmul.f32 %v7137_v44, %v7078_v20 }
 0x8eb   :  { %v7140_v54 = vmul.f32 %v7137_v44, %v17956_v27  ;;  %v7145_v55 = vmul.f32 %v7137_v44, %v7081_v25  ;;  %v7143_v41 = vmul.f32 %v7137_v44, %v17960_v23  ;;  %v7146_v56 = vmul.f32 %v7137_v44, %v7082_v29 }
 0x8ec   :  { %v7164_v9 = vadd.f32 %v12415_v48, %v7141_v51  ;;  %v7162_v57 = vadd.f32 %v12415_v48, %v7139_v52  ;;  %v7165_v58 = vadd.f32 %v12415_v48, %v7142_v53  ;;  %v7144_v59 = vmul.f32 %v7137_v44, %v17962_v24 }
 0x8ed   :  { %v7163_v13 = vadd.f32 %v12415_v48, %v7140_v54  ;;  %v7168_v14 = vadd.f32 %v12415_v48, %v7145_v55  ;;  %v7166_v22 = vadd.f32 %v12415_v48, %v7143_v41  ;;  %v7169_v15 = vadd.f32 %v12415_v48, %v7146_v56 }
 0x8ee   :  { %v7221_v43 = vadd.f32 %v17884_v31, %v7164_v9  ;;  %v7213_v18 = vadd.f32 %v17886_v32, %v7162_v57  ;;  %v7224_v20 = vadd.f32 %v17888_v30, %v7165_v58  ;;  %v7167_v27 = vadd.f32 %v12415_v48, %v7144_v59 }
 0x8ef   :  { %v7216_v25 = vadd.f32 %v17890_v36, %v7163_v13  ;;  %v7237_v23 = vadd.f32 %v17892_v28, %v7168_v14  ;;  %v7229_v29 = vadd.f32 %v17894_v61, %v7166_v22  ;;  %v7240_v6 = vadd.f32 %v17896_v33, %v7169_v15 }
 0x8f0   :  { %v18012_v24 = vpack.c.bf16 %v7224_v20, %v7221_v43  ;;  %v7232_v16 = vadd.f32 %v17898_v37, %v7167_v27  ;;  %v7149_v12 = vmul.f32 %v7137_v44, %v17968_v4  ;;  %v7147_v31 = vmul.f32 %v7137_v44, %v17964_v60 }
 0x8f1   :  { %v18017_v32 = vpack.c.bf16 %v7216_v25, %v7213_v18  ;;  %v18019_v30 = vpack.c.bf16 %v7240_v6, %v7237_v23  ;;  %v7150_v36 = vmul.f32 %v7137_v44, %v17970_v3  ;;  %v7148_v28 = vmul.f32 %v7137_v44, %v17966_v26 }
 0x8f2   :  { %v18023_v17 = vpack.c.bf16 %v7232_v16, %v7229_v29  ;;  %v7172_v61 = vadd.f32 %v12415_v48, %v7149_v12  ;;  %v7170_v33 = vadd.f32 %v12415_v48, %v7147_v31  ;;  %v7153_v45 = vmul.f32 %v7137_v44, %v17974_v2 }
 0x8f3   :  { %v7173_v21 = vadd.f32 %v12415_v48, %v7150_v36  ;;  %v7171_v37 = vadd.f32 %v12415_v48, %v7148_v28  ;;  %v7151_v4 = vmul.f32 %v7137_v44, %v17972_v49  ;;  %v7154_v60 = vmul.f32 %v7137_v44, %v17976_v19 }
 0x8f4   :  { %v7253_v7 = vadd.f32 %v17900_v38, %v7172_v61  ;;  %v7245_v0 = vadd.f32 %v17902_v40, %v7170_v33  ;;  %v7176_v8 = vadd.f32 %v12415_v48, %v7153_v45  ;;  %v7175_v3 = vadd.f32 %v12415_v48, %v7152_v50 }
 0x8f5   :  { %v7256_v26 = vadd.f32 %v17904_v62, %v7173_v21  ;;  %v7248_v10 = vadd.f32 %v17906_v63, %v7171_v37  ;;  %v7174_v11 = vadd.f32 %v12415_v48, %v7151_v4  ;;  %v7177_v46 = vadd.f32 %v12415_v48, %v7154_v60 }
 0x8f6   :  { %v7269_v2 = vadd.f32 %v17908_v1, %v7176_v8  ;;  %v7264_v47 = vadd.f32 %v17914_v39, %v7175_v3 }
 0x8f7   :  { %v18034_v5 = vpack.c.bf16 %v7256_v26, %v7253_v7  ;;  %v18036_v49 = vpack.c.bf16 %v7248_v10, %v7245_v0  ;;  %v7261_v38 = vadd.f32 %v17910_v34, %v7174_v11  ;;  %v7272_v40 = vadd.f32 %v17912_v35, %v7177_v46 }
 0x8f9   :  { %v18040_v19 = vpack.c.bf16 %v7272_v40, %v7269_v2  ;;  %v18042_v42 = vpack.c.bf16 %v7264_v47, %v7261_v38 }
 0x8fa   :  { %16951 = dma.done.wait [#allocation4], 9216 }
 0x8fb   :  { %16952 = vsyncadd [#allocation4], 4294958080 }
 0x8fc   :  { %16953 = dma.done.wait [#allocation4 + $0x1], 36864 }
 0x8fd   :  { %16954 = vsyncadd [#allocation4 + $0x1], 4294930432  ;;  %14413 = vmatprep.mubr.bf16.mxu0 %v18017_v32  ;;  %14381 = vmatprep.mubr.bf16.mxu1 %v18017_v32  ;;  %v7438_v62 = vld [vmem:[#allocation2 + $0x40] sm:$0xff]  ;;  %v7439_v63 = vld [vmem:[#allocation2 + $0x48] sm:$0xff]  ;;  %s18660_s3 = sld [smem:[#allocation65_spill]] }
 0x8fe   :  { %14397 = vmatprep.subr.bf16.mxu0 %v7438_v62  ;;  %v7292_v1 = vld [vmem:[#allocation2] sm:$0xff]  ;;  %v7293_v34 = vld [vmem:[#allocation2 + $0x8] sm:$0xff]  ;;  %v7440_v35 = vld [vmem:[#allocation2 + $0x50] sm:$0xff] }
 0x8ff   :  { %14398 = vmatpush3.bf16.msra.mxu0 %v7438_v62  ;;  %14365 = vmatprep.subr.bf16.mxu1 %v7292_v1  ;;  %v7294_v39 = vld [vmem:[#allocation2 + $0x10] sm:$0xff]  ;;  %v7441_v44 = vld [vmem:[#allocation2 + $0x58] sm:$0xff]  ;;  %v7442_v50 = vld [vmem:[#allocation2 + $0x60] sm:$0xff] }
 0x900   :  { %14399 = vmatprep.subr.bf16.mxu0 %v7439_v63  ;;  %14366 = vmatpush3.bf16.msra.mxu1 %v7292_v1  ;;  %v7295_v48 = vld [vmem:[#allocation2 + $0x18] sm:$0xff]  ;;  %v7296_v51 = vld [vmem:[#allocation2 + $0x20] sm:$0xff]  ;;  %v7443_v52 = vld [vmem:[#allocation2 + $0x68] sm:$0xff] }
 0x901   :  { %14367 = vmatprep.subr.bf16.mxu1 %v7293_v34  ;;  %v7297_v53 = vld [vmem:[#allocation2 + $0x28] sm:$0xff]  ;;  %v7444_v54 = vld [vmem:[#allocation2 + $0x70] sm:$0xff]  ;;  %v7445_v41 = vld [vmem:[#allocation2 + $0x78] sm:$0xff] }
 0x902   :  { %v7298_v55 = vld [vmem:[#allocation2 + $0x30] sm:$0xff]  ;;  %v7299_v56 = vld [vmem:[#allocation2 + $0x38] sm:$0xff]  ;;  %v7544_v9 = vld [vmem:[#allocation3 + $0x100] sm:$0xff] }
 0x903   :  { %14400 = vmatpush3.bf16.msra.mxu0 %v7439_v63 }
 0x904   :  { %14401 = vmatprep.subr.bf16.mxu0 %v7440_v35  ;;  %14368 = vmatpush3.bf16.msra.mxu1 %v7293_v34 }
 0x905   :  { %14369 = vmatprep.subr.bf16.mxu1 %v7294_v39 }
 0x907   :  { %14402 = vmatpush3.bf16.msra.mxu0 %v7440_v35 }
 0x908   :  { %14403 = vmatprep.subr.bf16.mxu0 %v7441_v44  ;;  %14370 = vmatpush3.bf16.msra.mxu1 %v7294_v39 }
 0x909   :  { %14371 = vmatprep.subr.bf16.mxu1 %v7295_v48 }
 0x90b   :  { %14404 = vmatpush3.bf16.msra.mxu0 %v7441_v44 }
 0x90c   :  { %14405 = vmatprep.subr.bf16.mxu0 %v7442_v50  ;;  %14372 = vmatpush3.bf16.msra.mxu1 %v7295_v48 }
 0x90d   :  { %14373 = vmatprep.subr.bf16.mxu1 %v7296_v51 }
 0x90f   :  { %14406 = vmatpush3.bf16.msra.mxu0 %v7442_v50 }
 0x910   :  { %14407 = vmatprep.subr.bf16.mxu0 %v7443_v52  ;;  %14374 = vmatpush3.bf16.msra.mxu1 %v7296_v51  ;;  %v7545_v51 = vld [vmem:[#allocation3 + $0x108] sm:$0xff] }
 0x911   :  { %14375 = vmatprep.subr.bf16.mxu1 %v7297_v53 }
 0x913   :  { %14408 = vmatpush3.bf16.msra.mxu0 %v7443_v52  ;;  %v7546_v52 = vld [vmem:[#allocation3 + $0x110] sm:$0xff] }
 0x914   :  { %14409 = vmatprep.subr.bf16.mxu0 %v7444_v54  ;;  %14376 = vmatpush3.bf16.msra.mxu1 %v7297_v53  ;;  %v7547_v53 = vld [vmem:[#allocation3 + $0x118] sm:$0xff] }
 0x915   :  { %14377 = vmatprep.subr.bf16.mxu1 %v7298_v55 }
 0x917   :  { %14410 = vmatpush3.bf16.msra.mxu0 %v7444_v54  ;;  %v7548_v54 = vld [vmem:[#allocation3 + $0x120] sm:$0xff] }
 0x918   :  { %14411 = vmatprep.subr.bf16.mxu0 %v7445_v41  ;;  %14378 = vmatpush3.bf16.msra.mxu1 %v7298_v55  ;;  %v7549_v55 = vld [vmem:[#allocation3 + $0x128] sm:$0xff] }
 0x919   :  { %14379 = vmatprep.subr.bf16.mxu1 %v7299_v56 }
 0x91b   :  { %14412 = vmatpush3.bf16.msra.mxu0 %v7445_v41  ;;  %v7550_v41 = vld [vmem:[#allocation3 + $0x130] sm:$0xff] }
 0x91c   :  { %14380 = vmatpush3.bf16.msra.mxu1 %v7299_v56  ;;  %v7551_v56 = vld [vmem:[#allocation3 + $0x138] sm:$0xff] }
 0x91e   :  { %14414 = vmatmul.mubr.bf16.vlgmr.msra.gmra.mrb[52].mxu0 %v18012_v24 }
 0x91f   :  { %14417 = vmatprep.mubr.bf16.mxu0 %v18023_v17  ;;  %14382 = vmatmul.mubr.bf16.vlgmr.msra.gmra.mrb[208].mxu1 %v18012_v24 }
 0x920   :  { %14385 = vmatprep.mubr.bf16.mxu1 %v18023_v17 }
 0x926   :  { %14418 = vmatmul.mubr.bf16.gmra.mrb[56].mxu0 %v18019_v30 }
 0x927   :  { %14421 = vmatprep.mubr.bf16.mxu0 %v18036_v49  ;;  %14386 = vmatmul.mubr.bf16.gmra.mrb[212].mxu1 %v18019_v30 }
 0x928   :  { %14389 = vmatprep.mubr.bf16.mxu1 %v18036_v49 }
 0x92e   :  { %14422 = vmatmul.mubr.bf16.gmra.mrb[60].mxu0 %v18034_v5 }
 0x92f   :  { %14425 = vmatprep.mubr.bf16.mxu0 %v18042_v42  ;;  %14390 = vmatmul.mubr.bf16.gmra.mrb[216].mxu1 %v18034_v5 }
 0x930   :  { %14393 = vmatprep.mubr.bf16.mxu1 %v18042_v42 }
 0x936   :  { %14426 = vmatmul.mubr.bf16.gmra.mrb[64].mxu0 %v18040_v19 }
 0x937   :  { %14394 = vmatmul.mubr.bf16.gmra.mrb[220].mxu1 %v18040_v19  ;;  %14445 = vmatprep.mubr.bf16.mxu0 %v7544_v9  ;;  %v7552_v9 = vld [vmem:[#allocation3 + $0x140] sm:$0xff] }
 0x9f1   :  { %v14415_v57 = vpop.f32.mrb[52].mxu0 }
 0x9f2   :  { %v7480_v58 = vpop.f32.mrb[53].mxu0  ;;  %v14383_v13 = vpop.f32.mrb[208].mxu1 }
 0x9f3   :  { %v14416_v59 = vpop.f32.mrb[54].mxu0  ;;  %v7334_v15 = vpop.f32.mrb[209].mxu1 }
 0x9f4   :  { %v7577_v14 = vpack.c.bf16 %v14416_v59, %v14415_v57  ;;  %v7483_v22 = vpop.f32.mrb[55].mxu0  ;;  %v14384_v18 = vpop.f32.mrb[210].mxu1  ;;  %v8163_v57 = vld [vmem:[#allocation2 + $0x80] sm:$0xff]  ;;  %v7554_v59 = vld [vmem:[#allocation3 + $0x150] sm:$0xff] }
 0x9f5   :  { %v7576_v43 = vpack.c.bf16 %v7483_v22, %v7480_v58  ;;  %v7430_v20 = vpack.c.bf16 %v14384_v18, %v14383_v13  ;;  %v7337_v27 = vpop.f32.mrb[211].mxu1  ;;  %v7553_v58 = vld [vmem:[#allocation3 + $0x148] sm:$0xff]  ;;  %v7555_v13 = vld [vmem:[#allocation3 + $0x158] sm:$0xff]  ;;  %v7560_v18 = vld [vmem:[#allocation3 + $0x180] sm:$0xff] }
 0x9f6   :  { %v7429_v25 = vpack.c.bf16 %v7337_v27, %v7334_v15  ;;  %v7557_v22 = vld [vmem:[#allocation3 + $0x168] sm:$0xff]  ;;  %v7558_v15 = vld [vmem:[#allocation3 + $0x170] sm:$0xff] }
 0x9f7   :  { %14429 = vmatprep.subr.bf16.mxu0 %v7576_v43  ;;  %v7562_v27 = vld [vmem:[#allocation3 + $0x190] sm:$0xff] }
 0x9f8   :  { %14430 = vmatpush3.bf16.msra.mxu0 %v7576_v43  ;;  %v7559_v43 = vld [vmem:[#allocation3 + $0x178] sm:$0xff] }
 0x9f9   :  { %v14419_v23 = vpop.f32.mrb[56].mxu0  ;;  %14431 = vmatprep.subr.bf16.mxu0 %v7577_v14 }
 0x9fa   :  { %v7496_v29 = vpop.f32.mrb[57].mxu0  ;;  %v14387_v16 = vpop.f32.mrb[212].mxu1 }
 0x9fb   :  { %v14420_v6 = vpop.f32.mrb[58].mxu0  ;;  %v7350_v36 = vpop.f32.mrb[213].mxu1 }
 0x9fc   :  { %v7579_v12 = vpack.c.bf16 %v14420_v6, %v14419_v23  ;;  %v7499_v31 = vpop.f32.mrb[59].mxu0  ;;  %14432 = vmatpush3.bf16.msra.mxu0 %v7577_v14  ;;  %v14388_v61 = vpop.f32.mrb[214].mxu1  ;;  %v7556_v14 = vld [vmem:[#allocation3 + $0x160] sm:$0xff]  ;;  %v7566_v6 = vld [vmem:[#allocation3 + $0x1b0] sm:$0xff] }
 0x9fd   :  { %v7578_v28 = vpack.c.bf16 %v7499_v31, %v7496_v29  ;;  %v7432_v33 = vpack.c.bf16 %v14388_v61, %v14387_v16  ;;  %v7353_v45 = vpop.f32.mrb[215].mxu1  ;;  %v7564_v23 = vld [vmem:[#allocation3 + $0x1a0] sm:$0xff]  ;;  %v7565_v29 = vld [vmem:[#allocation3 + $0x1a8] sm:$0xff]  ;;  %v7567_v16 = vld [vmem:[#allocation3 + $0x1b8] sm:$0xff] }
 0x9fe   :  { %v7431_v21 = vpack.c.bf16 %v7353_v45, %v7350_v36  ;;  %v7569_v31 = vld [vmem:[#allocation3 + $0x1c8] sm:$0xff]  ;;  %v7570_v36 = vld [vmem:[#allocation3 + $0x1d0] sm:$0xff]  ;;  %v7572_v61 = vld [vmem:[#allocation3 + $0x1e0] sm:$0xff] }
 0x9ff   :  { %14433 = vmatprep.subr.bf16.mxu0 %v7578_v28  ;;  %v7574_v45 = vld [vmem:[#allocation3 + $0x1f0] sm:$0xff] }
 0xa00   :  { %14434 = vmatpush3.bf16.msra.mxu0 %v7578_v28  ;;  %v7571_v28 = vld [vmem:[#allocation3 + $0x1d8] sm:$0xff] }
 0xa01   :  { %v14423_v37 = vpop.f32.mrb[60].mxu0  ;;  %14435 = vmatprep.subr.bf16.mxu0 %v7579_v12 }
 0xa02   :  { %v7512_v4 = vpop.f32.mrb[61].mxu0  ;;  %v14391_v7 = vpop.f32.mrb[216].mxu1 }
 0xa03   :  { %v14424_v60 = vpop.f32.mrb[62].mxu0  ;;  %v7366_v3 = vpop.f32.mrb[217].mxu1 }
 0xa04   :  { %v7581_v0 = vpack.c.bf16 %v14424_v60, %v14423_v37  ;;  %v7515_v8 = vpop.f32.mrb[63].mxu0  ;;  %14436 = vmatpush3.bf16.msra.mxu0 %v7579_v12  ;;  %v14392_v10 = vpop.f32.mrb[218].mxu1  ;;  %v7568_v12 = vld [vmem:[#allocation3 + $0x1c0] sm:$0xff]  ;;  %v7399_v60 = vld [vmem:[#allocation3 + $0x10] sm:$0xff] }
 0xa05   :  { %v7580_v26 = vpack.c.bf16 %v7515_v8, %v7512_v4  ;;  %v7434_v11 = vpack.c.bf16 %v14392_v10, %v14391_v7  ;;  %v7369_v46 = vpop.f32.mrb[219].mxu1  ;;  %v7397_v37 = vld [vmem:[#allocation3] sm:$0xff]  ;;  %v7398_v4 = vld [vmem:[#allocation3 + $0x8] sm:$0xff]  ;;  %v7400_v8 = vld [vmem:[#allocation3 + $0x18] sm:$0xff] }
 0xa06   :  { %v7433_v2 = vpack.c.bf16 %v7369_v46, %v7366_v3  ;;  %v8164_v7 = vld [vmem:[#allocation2 + $0x88] sm:$0xff]  ;;  %v7401_v3 = vld [vmem:[#allocation3 + $0x20] sm:$0xff]  ;;  %v7403_v46 = vld [vmem:[#allocation3 + $0x30] sm:$0xff] }
 0xa07   :  { %14437 = vmatprep.subr.bf16.mxu0 %v7580_v26  ;;  %v8167_v10 = vld [vmem:[#allocation2 + $0xa0] sm:$0xff] }
 0xa08   :  { %14438 = vmatpush3.bf16.msra.mxu0 %v7580_v26  ;;  %v8166_v26 = vld [vmem:[#allocation2 + $0x98] sm:$0xff] }
 0xa09   :  { %v14427_v47 = vpop.f32.mrb[64].mxu0  ;;  %14439 = vmatprep.subr.bf16.mxu0 %v7581_v0 }
 0xa0a   :  { %v7528_v38 = vpop.f32.mrb[65].mxu0  ;;  %v14395_v62 = vpop.f32.mrb[220].mxu1 }
 0xa0b   :  { %v14428_v40 = vpop.f32.mrb[66].mxu0  ;;  %v7382_v34 = vpop.f32.mrb[221].mxu1 }
 0xa0c   :  { %v7583_v63 = vpack.c.bf16 %v14428_v40, %v14427_v47  ;;  %v7531_v1 = vpop.f32.mrb[67].mxu0  ;;  %14440 = vmatpush3.bf16.msra.mxu0 %v7581_v0  ;;  %v14396_v39 = vpop.f32.mrb[222].mxu1  ;;  %v8165_v0 = vld [vmem:[#allocation2 + $0x90] sm:$0xff]  ;;  %v7405_v40 = vld [vmem:[#allocation3 + $0x40] sm:$0xff] }
 0xa0d   :  { %v7582_v35 = vpack.c.bf16 %v7531_v1, %v7528_v38  ;;  %v7436_v44 = vpack.c.bf16 %v14396_v39, %v14395_v62  ;;  %v7385_v48 = vpop.f32.mrb[223].mxu1  ;;  %v8169_v47 = vld [vmem:[#allocation2 + $0xb0] sm:$0xff]  ;;  %v7404_v38 = vld [vmem:[#allocation3 + $0x38] sm:$0xff]  ;;  %v7410_v39 = vld [vmem:[#allocation3 + $0x68] sm:$0xff] }
 0xa0e   :  { %v7435_v50 = vpack.c.bf16 %v7385_v48, %v7382_v34  ;;  %v8170_v62 = vld [vmem:[#allocation2 + $0xb8] sm:$0xff]  ;;  %v7407_v1 = vld [vmem:[#allocation3 + $0x50] sm:$0xff] }
 0xa0f   :  { %14441 = vmatprep.subr.bf16.mxu0 %v7582_v35  ;;  %v7408_v34 = vld [vmem:[#allocation3 + $0x58] sm:$0xff] }
 0xa10   :  { %14442 = vmatpush3.bf16.msra.mxu0 %v7582_v35  ;;  %v7409_v35 = vld [vmem:[#allocation3 + $0x60] sm:$0xff]  ;;  %v7412_v48 = vld [vmem:[#allocation3 + $0x78] sm:$0xff] }
 0xa11   :  { %14443 = vmatprep.subr.bf16.mxu0 %v7583_v63 }
 0xa14   :  { %14444 = vmatpush3.bf16.msra.mxu0 %v7583_v63  ;;  %v7406_v63 = vld [vmem:[#allocation3 + $0x48] sm:$0xff] }
 0xa15   :  { %14509 = vmatprep.subr.bf16.mxu0 %v7429_v25 }
 0xa17   :  { %14446 = vmatmul.mubr.bf16.vlgmr.msra.gmra.mrb[68].mxu0 %v7545_v51  ;;  %v7414_v51 = vld [vmem:[#allocation3 + $0x88] sm:$0xff] }
 0xa18   :  { %14449 = vmatprep.mubr.bf16.mxu0 %v7546_v52  ;;  %14510 = vmatpush3.bf16.msra.mxu0 %v7429_v25  ;;  %v7563_v25 = vld [vmem:[#allocation3 + $0x198] sm:$0xff]  ;;  %v7415_v52 = vld [vmem:[#allocation3 + $0x90] sm:$0xff] }
 0xa19   :  { %14511 = vmatprep.subr.bf16.mxu0 %v7430_v20 }
 0xa1c   :  { %14512 = vmatpush3.bf16.msra.mxu0 %v7430_v20  ;;  %v7561_v20 = vld [vmem:[#allocation3 + $0x188] sm:$0xff] }
 0xa1d   :  { %14513 = vmatprep.subr.bf16.mxu0 %v7431_v21 }
 0xa1f   :  { %14450 = vmatmul.mubr.bf16.gmra.mrb[72].mxu0 %v7547_v53  ;;  %v7416_v53 = vld [vmem:[#allocation3 + $0x98] sm:$0xff] }
 0xa20   :  { %14453 = vmatprep.mubr.bf16.mxu0 %v7548_v54  ;;  %14514 = vmatpush3.bf16.msra.mxu0 %v7431_v21  ;;  %v7575_v21 = vld [vmem:[#allocation3 + $0x1f8] sm:$0xff]  ;;  %v7417_v54 = vld [vmem:[#allocation3 + $0xa0] sm:$0xff] }
 0xa21   :  { %14515 = vmatprep.subr.bf16.mxu0 %v7432_v33 }
 0xa24   :  { %14516 = vmatpush3.bf16.msra.mxu0 %v7432_v33  ;;  %v7573_v33 = vld [vmem:[#allocation3 + $0x1e8] sm:$0xff] }
 0xa25   :  { %14517 = vmatprep.subr.bf16.mxu0 %v7433_v2 }
 0xa27   :  { %14454 = vmatmul.mubr.bf16.gmra.mrb[76].mxu0 %v7549_v55  ;;  %v7418_v55 = vld [vmem:[#allocation3 + $0xa8] sm:$0xff] }
 0xa28   :  { %14457 = vmatprep.mubr.bf16.mxu0 %v7550_v41  ;;  %14518 = vmatpush3.bf16.msra.mxu0 %v7433_v2  ;;  %v8168_v2 = vld [vmem:[#allocation2 + $0xa8] sm:$0xff]  ;;  %v7419_v41 = vld [vmem:[#allocation3 + $0xb0] sm:$0xff] }
 0xa29   :  { %14519 = vmatprep.subr.bf16.mxu0 %v7434_v11 }
 0xa2c   :  { %14520 = vmatpush3.bf16.msra.mxu0 %v7434_v11  ;;  %v7402_v11 = vld [vmem:[#allocation3 + $0x28] sm:$0xff] }
 0xa2d   :  { %14521 = vmatprep.subr.bf16.mxu0 %v7435_v50 }
 0xa2f   :  { %14458 = vmatmul.mubr.bf16.gmra.mrb[80].mxu0 %v7551_v56  ;;  %v7420_v56 = vld [vmem:[#allocation3 + $0xb8] sm:$0xff] }
 0xa30   :  { %14461 = vmatprep.mubr.bf16.mxu0 %v7552_v9  ;;  %14522 = vmatpush3.bf16.msra.mxu0 %v7435_v50  ;;  %v7413_v50 = vld [vmem:[#allocation3 + $0x80] sm:$0xff] }
 0xa31   :  { %14523 = vmatprep.subr.bf16.mxu0 %v7436_v44  ;;  %v7421_v9 = vld [vmem:[#allocation3 + $0xc0] sm:$0xff] }
 0xa34   :  { %14524 = vmatpush3.bf16.msra.mxu0 %v7436_v44  ;;  %v7411_v44 = vld [vmem:[#allocation3 + $0x70] sm:$0xff] }
 0xa35   :  { %14589 = vmatprep.subr.bf16.mxu0 %v8163_v57 }
 0xa37   :  { %14462 = vmatmul.mubr.bf16.gmra.mrb[84].mxu0 %v7553_v58  ;;  %v7423_v58 = vld [vmem:[#allocation3 + $0xd0] sm:$0xff] }
 0xa38   :  { %14465 = vmatprep.mubr.bf16.mxu0 %v7554_v59  ;;  %v7424_v59 = vld [vmem:[#allocation3 + $0xd8] sm:$0xff] }
 0xa3f   :  { %14466 = vmatmul.mubr.bf16.gmra.mrb[88].mxu0 %v7555_v13  ;;  %v7425_v13 = vld [vmem:[#allocation3 + $0xe0] sm:$0xff] }
 0xa40   :  { %14469 = vmatprep.mubr.bf16.mxu0 %v7556_v14  ;;  %v7426_v14 = vld [vmem:[#allocation3 + $0xe8] sm:$0xff] }
 0xa47   :  { %14470 = vmatmul.mubr.bf16.gmra.mrb[92].mxu0 %v7557_v22  ;;  %v7427_v22 = vld [vmem:[#allocation3 + $0xf0] sm:$0xff] }
 0xa48   :  { %14473 = vmatprep.mubr.bf16.mxu0 %v7558_v15  ;;  %v7428_v15 = vld [vmem:[#allocation3 + $0xf8] sm:$0xff] }
 0xa4f   :  { %14474 = vmatmul.mubr.bf16.gmra.mrb[96].mxu0 %v7559_v43  ;;  %v8269_v43 = vld [vmem:[#allocation3 + $0x200] sm:$0xff] }
 0xa50   :  { %14477 = vmatprep.mubr.bf16.mxu0 %v7560_v18 }
 0xa57   :  { %14478 = vmatmul.mubr.bf16.gmra.mrb[100].mxu0 %v7561_v20 }
 0xa58   :  { %14481 = vmatprep.mubr.bf16.mxu0 %v7562_v27 }
 0xa5f   :  { %14482 = vmatmul.mubr.bf16.gmra.mrb[104].mxu0 %v7563_v25 }
 0xa60   :  { %14485 = vmatprep.mubr.bf16.mxu0 %v7564_v23 }
 0xa67   :  { %14486 = vmatmul.mubr.bf16.gmra.mrb[108].mxu0 %v7565_v29 }
 0xa68   :  { %14489 = vmatprep.mubr.bf16.mxu0 %v7566_v6 }
 0xa6f   :  { %14490 = vmatmul.mubr.bf16.gmra.mrb[112].mxu0 %v7567_v16 }
 0xa70   :  { %14493 = vmatprep.mubr.bf16.mxu0 %v7568_v12 }
 0xa77   :  { %14494 = vmatmul.mubr.bf16.gmra.mrb[116].mxu0 %v7569_v31 }
 0xa78   :  { %14497 = vmatprep.mubr.bf16.mxu0 %v7570_v36 }
 0xa7f   :  { %14498 = vmatmul.mubr.bf16.gmra.mrb[120].mxu0 %v7571_v28 }
 0xa80   :  { %14501 = vmatprep.mubr.bf16.mxu0 %v7572_v61 }
 0xa87   :  { %14502 = vmatmul.mubr.bf16.gmra.mrb[124].mxu0 %v7573_v33 }
 0xa88   :  { %14505 = vmatprep.mubr.bf16.mxu0 %v7574_v45 }
 0xa8f   :  { %14506 = vmatmul.mubr.bf16.gmra.mrb[128].mxu0 %v7575_v21 }
 0xa90   :  { %14525 = vmatprep.mubr.bf16.mxu0 %v7397_v37 }
 0xa97   :  { %14526 = vmatmul.mubr.bf16.vlgmr.msra.gmra.mrb[68].mxu0 %v7398_v4 }
 0xa98   :  { %14529 = vmatprep.mubr.bf16.mxu0 %v7399_v60  ;;  %14590 = vmatpush3.bf16.msra.mxu0 %v8163_v57  ;;  %v7422_v57 = vld [vmem:[#allocation3 + $0xc8] sm:$0xff] }
 0xa99   :  { %14591 = vmatprep.subr.bf16.mxu0 %v8164_v7 }
 0xa9c   :  { %14592 = vmatpush3.bf16.msra.mxu0 %v8164_v7 }
 0xa9d   :  { %14593 = vmatprep.subr.bf16.mxu0 %v8165_v0 }
 0xa9f   :  { %14530 = vmatmul.mubr.bf16.gmra.mrb[72].mxu0 %v7400_v8 }
 0xaa0   :  { %14533 = vmatprep.mubr.bf16.mxu0 %v7401_v3  ;;  %14594 = vmatpush3.bf16.msra.mxu0 %v8165_v0 }
 0xaa1   :  { %14595 = vmatprep.subr.bf16.mxu0 %v8166_v26 }
 0xaa4   :  { %14596 = vmatpush3.bf16.msra.mxu0 %v8166_v26 }
 0xaa5   :  { %14597 = vmatprep.subr.bf16.mxu0 %v8167_v10 }
 0xaa7   :  { %14534 = vmatmul.mubr.bf16.gmra.mrb[76].mxu0 %v7402_v11  ;;  %v8270_v11 = vld [vmem:[#allocation3 + $0x208] sm:$0xff] }
 0xaa8   :  { %14537 = vmatprep.mubr.bf16.mxu0 %v7403_v46  ;;  %14598 = vmatpush3.bf16.msra.mxu0 %v8167_v10  ;;  %v8663_v10 = vld [vmem:[#allocation2 + $0xc0] sm:$0xff]  ;;  %v8271_v46 = vld [vmem:[#allocation3 + $0x210] sm:$0xff] }
 0xaa9   :  { %14599 = vmatprep.subr.bf16.mxu0 %v8168_v2 }
 0xaac   :  { %14600 = vmatpush3.bf16.msra.mxu0 %v8168_v2  ;;  %v8664_v2 = vld [vmem:[#allocation2 + $0xc8] sm:$0xff] }
 0xaad   :  { %14601 = vmatprep.subr.bf16.mxu0 %v8169_v47 }
 0xaaf   :  { %14538 = vmatmul.mubr.bf16.gmra.mrb[80].mxu0 %v7404_v38  ;;  %v8272_v38 = vld [vmem:[#allocation3 + $0x218] sm:$0xff] }
 0xab0   :  { %14541 = vmatprep.mubr.bf16.mxu0 %v7405_v40  ;;  %14602 = vmatpush3.bf16.msra.mxu0 %v8169_v47  ;;  %v8665_v47 = vld [vmem:[#allocation2 + $0xd0] sm:$0xff]  ;;  %v8273_v40 = vld [vmem:[#allocation3 + $0x220] sm:$0xff] }
 0xab1   :  { %14603 = vmatprep.subr.bf16.mxu0 %v8170_v62 }
 0xab4   :  { %14604 = vmatpush3.bf16.msra.mxu0 %v8170_v62  ;;  %v8666_v62 = vld [vmem:[#allocation2 + $0xd8] sm:$0xff] }
 0xab7   :  { %14542 = vmatmul.mubr.bf16.gmra.mrb[84].mxu0 %v7406_v63  ;;  %v8667_v63 = vld [vmem:[#allocation2 + $0xe0] sm:$0xff] }
 0xab8   :  { %14545 = vmatprep.mubr.bf16.mxu0 %v7407_v1  ;;  %v8274_v1 = vld [vmem:[#allocation3 + $0x228] sm:$0xff] }
 0xabf   :  { %14546 = vmatmul.mubr.bf16.gmra.mrb[88].mxu0 %v7408_v34  ;;  %v8275_v34 = vld [vmem:[#allocation3 + $0x230] sm:$0xff] }
 0xac0   :  { %14549 = vmatprep.mubr.bf16.mxu0 %v7409_v35  ;;  %v8668_v35 = vld [vmem:[#allocation2 + $0xe8] sm:$0xff] }
 0xac7   :  { %14550 = vmatmul.mubr.bf16.gmra.mrb[92].mxu0 %v7410_v39  ;;  %v8669_v39 = vld [vmem:[#allocation2 + $0xf0] sm:$0xff] }
 0xac8   :  { %14553 = vmatprep.mubr.bf16.mxu0 %v7411_v44  ;;  %v8276_v44 = vld [vmem:[#allocation3 + $0x238] sm:$0xff] }
 0xacf   :  { %14554 = vmatmul.mubr.bf16.gmra.mrb[96].mxu0 %v7412_v48  ;;  %v8277_v48 = vld [vmem:[#allocation3 + $0x240] sm:$0xff] }
 0xad0   :  { %14557 = vmatprep.mubr.bf16.mxu0 %v7413_v50  ;;  %v8670_v50 = vld [vmem:[#allocation2 + $0xf8] sm:$0xff] }
 0xad7   :  { %14558 = vmatmul.mubr.bf16.gmra.mrb[100].mxu0 %v7414_v51  ;;  %v8278_v51 = vld [vmem:[#allocation3 + $0x248] sm:$0xff] }
 0xad8   :  { %14561 = vmatprep.mubr.bf16.mxu0 %v7415_v52  ;;  %v8279_v52 = vld [vmem:[#allocation3 + $0x250] sm:$0xff] }
 0xadf   :  { %14562 = vmatmul.mubr.bf16.gmra.mrb[104].mxu0 %v7416_v53  ;;  %v8280_v53 = vld [vmem:[#allocation3 + $0x258] sm:$0xff] }
 0xae0   :  { %14565 = vmatprep.mubr.bf16.mxu0 %v7417_v54  ;;  %v8281_v54 = vld [vmem:[#allocation3 + $0x260] sm:$0xff] }
 0xae7   :  { %14566 = vmatmul.mubr.bf16.gmra.mrb[108].mxu0 %v7418_v55  ;;  %v8282_v55 = vld [vmem:[#allocation3 + $0x268] sm:$0xff] }
 0xae8   :  { %14569 = vmatprep.mubr.bf16.mxu0 %v7419_v41  ;;  %v8283_v41 = vld [vmem:[#allocation3 + $0x270] sm:$0xff] }
 0xaef   :  { %14570 = vmatmul.mubr.bf16.gmra.mrb[112].mxu0 %v7420_v56  ;;  %v8284_v56 = vld [vmem:[#allocation3 + $0x278] sm:$0xff] }
 0xaf0   :  { %14573 = vmatprep.mubr.bf16.mxu0 %v7421_v9  ;;  %v8285_v9 = vld [vmem:[#allocation3 + $0x280] sm:$0xff] }
 0xaf7   :  { %14574 = vmatmul.mubr.bf16.gmra.mrb[116].mxu0 %v7422_v57  ;;  %v8286_v57 = vld [vmem:[#allocation3 + $0x288] sm:$0xff] }
 0xaf8   :  { %14577 = vmatprep.mubr.bf16.mxu0 %v7423_v58  ;;  %v8287_v58 = vld [vmem:[#allocation3 + $0x290] sm:$0xff] }
 0xaff   :  { %14578 = vmatmul.mubr.bf16.gmra.mrb[120].mxu0 %v7424_v59  ;;  %v8288_v59 = vld [vmem:[#allocation3 + $0x298] sm:$0xff] }
 0xb00   :  { %14581 = vmatprep.mubr.bf16.mxu0 %v7425_v13  ;;  %v8289_v13 = vld [vmem:[#allocation3 + $0x2a0] sm:$0xff] }
 0xb07   :  { %14582 = vmatmul.mubr.bf16.gmra.mrb[124].mxu0 %v7426_v14  ;;  %v8290_v14 = vld [vmem:[#allocation3 + $0x2a8] sm:$0xff] }
 0xb08   :  { %14585 = vmatprep.mubr.bf16.mxu0 %v7427_v22  ;;  %v8291_v22 = vld [vmem:[#allocation3 + $0x2b0] sm:$0xff] }
 0xb0f   :  { %14586 = vmatmul.mubr.bf16.gmra.mrb[128].mxu0 %v7428_v15  ;;  %v8292_v15 = vld [vmem:[#allocation3 + $0x2b8] sm:$0xff] }
 0xb10   :  { %14605 = vmatprep.mubr.bf16.mxu0 %v18017_v32 }
 0xb17   :  { %14606 = vmatmul.mubr.bf16.vlgmr.msra.gmra.mrb[132].mxu0 %v18012_v24 }
 0xb18   :  { %14609 = vmatprep.mubr.bf16.mxu0 %v18023_v17 }
 0xb1f   :  { %14610 = vmatmul.mubr.bf16.gmra.mrb[136].mxu0 %v18019_v30 }
 0xb20   :  { %14613 = vmatprep.mubr.bf16.mxu0 %v18036_v49 }
 0xb27   :  { %14614 = vmatmul.mubr.bf16.gmra.mrb[140].mxu0 %v18034_v5 }
 0xb28   :  { %14617 = vmatprep.mubr.bf16.mxu0 %v18042_v42 }
 0xb2f   :  { %14618 = vmatmul.mubr.bf16.gmra.mrb[144].mxu0 %v18040_v19 }
 0xb30   :  { %14637 = vmatprep.mubr.bf16.mxu0 %v8269_v43  ;;  %v8293_v43 = vld [vmem:[#allocation3 + $0x2c0] sm:$0xff] }
 0xbea   :  { %v14607_v18 = vpop.f32.mrb[132].mxu0 }
 0xbeb   :  { %v8205_v20 = vpop.f32.mrb[133].mxu0 }
 0xbec   :  { %v14608_v27 = vpop.f32.mrb[134].mxu0 }
 0xbed   :  { %v8302_v25 = vpack.c.bf16 %v14608_v27, %v14607_v18  ;;  %v8208_v23 = vpop.f32.mrb[135].mxu0  ;;  %v8294_v18 = vld [vmem:[#allocation3 + $0x2c8] sm:$0xff]  ;;  %v8296_v27 = vld [vmem:[#allocation3 + $0x2d8] sm:$0xff] }
 0xbee   :  { %v8301_v29 = vpack.c.bf16 %v8208_v23, %v8205_v20  ;;  %v8295_v20 = vld [vmem:[#allocation3 + $0x2d0] sm:$0xff]  ;;  %v8298_v23 = vld [vmem:[#allocation3 + $0x2e8] sm:$0xff] }
 0xbf0   :  { %14621 = vmatprep.subr.bf16.mxu0 %v8301_v29 }
 0xbf1   :  { %14622 = vmatpush3.bf16.msra.mxu0 %v8301_v29  ;;  %v8299_v29 = vld [vmem:[#allocation3 + $0x2f0] sm:$0xff] }
 0xbf2   :  { %v14611_v6 = vpop.f32.mrb[136].mxu0  ;;  %14623 = vmatprep.subr.bf16.mxu0 %v8302_v25 }
 0xbf3   :  { %v8221_v16 = vpop.f32.mrb[137].mxu0 }
 0xbf4   :  { %v14612_v12 = vpop.f32.mrb[138].mxu0 }
 0xbf5   :  { %v8304_v31 = vpack.c.bf16 %v14612_v12, %v14611_v6  ;;  %v8224_v36 = vpop.f32.mrb[139].mxu0  ;;  %14624 = vmatpush3.bf16.msra.mxu0 %v8302_v25  ;;  %v8297_v25 = vld [vmem:[#allocation3 + $0x2e0] sm:$0xff]  ;;  %v8300_v6 = vld [vmem:[#allocation3 + $0x2f8] sm:$0xff] }
 0xbf6   :  { %v8303_v28 = vpack.c.bf16 %v8224_v36, %v8221_v16  ;;  %v8769_v16 = vld [vmem:[#allocation3 + $0x300] sm:$0xff] }
 0xbf8   :  { %14625 = vmatprep.subr.bf16.mxu0 %v8303_v28 }
 0xbf9   :  { %14626 = vmatpush3.bf16.msra.mxu0 %v8303_v28 }
 0xbfa   :  { %v14615_v61 = vpop.f32.mrb[140].mxu0  ;;  %14627 = vmatprep.subr.bf16.mxu0 %v8304_v31 }
 0xbfb   :  { %v8237_v33 = vpop.f32.mrb[141].mxu0 }
 0xbfc   :  { %v14616_v45 = vpop.f32.mrb[142].mxu0 }
 0xbfd   :  { %v8306_v21 = vpack.c.bf16 %v14616_v45, %v14615_v61  ;;  %v8240_v37 = vpop.f32.mrb[143].mxu0  ;;  %14628 = vmatpush3.bf16.msra.mxu0 %v8304_v31 }
 0xbfe   :  { %v8305_v4 = vpack.c.bf16 %v8240_v37, %v8237_v33 }
 0xc00   :  { %14629 = vmatprep.subr.bf16.mxu0 %v8305_v4 }
 0xc01   :  { %14630 = vmatpush3.bf16.msra.mxu0 %v8305_v4 }
 0xc02   :  { %v14619_v60 = vpop.f32.mrb[144].mxu0  ;;  %14631 = vmatprep.subr.bf16.mxu0 %v8306_v21 }
 0xc03   :  { %v8253_v7 = vpop.f32.mrb[145].mxu0 }
 0xc04   :  { %v14620_v0 = vpop.f32.mrb[146].mxu0 }
 0xc05   :  { %v8308_v8 = vpack.c.bf16 %v14620_v0, %v14619_v60  ;;  %v8256_v3 = vpop.f32.mrb[147].mxu0  ;;  %14632 = vmatpush3.bf16.msra.mxu0 %v8306_v21 }
 0xc06   :  { %v8307_v26 = vpack.c.bf16 %v8256_v3, %v8253_v7 }
 0xc08   :  { %14633 = vmatprep.subr.bf16.mxu0 %v8307_v26 }
 0xc09   :  { %14634 = vmatpush3.bf16.msra.mxu0 %v8307_v26 }
 0xc0a   :  { %14635 = vmatprep.subr.bf16.mxu0 %v8308_v8 }
 0xc0d   :  { %14636 = vmatpush3.bf16.msra.mxu0 %v8308_v8 }
 0xc0e   :  { %14701 = vmatprep.subr.bf16.mxu0 %v8663_v10 }
 0xc10   :  { %14638 = vmatmul.mubr.bf16.vlgmr.msra.gmra.mrb[68].mxu0 %v8270_v11 }
 0xc11   :  { %14641 = vmatprep.mubr.bf16.mxu0 %v8271_v46  ;;  %14702 = vmatpush3.bf16.msra.mxu0 %v8663_v10 }
 0xc12   :  { %14703 = vmatprep.subr.bf16.mxu0 %v8664_v2 }
 0xc15   :  { %14704 = vmatpush3.bf16.msra.mxu0 %v8664_v2 }
 0xc16   :  { %14705 = vmatprep.subr.bf16.mxu0 %v8665_v47 }
 0xc18   :  { %14642 = vmatmul.mubr.bf16.gmra.mrb[72].mxu0 %v8272_v38 }
 0xc19   :  { %14645 = vmatprep.mubr.bf16.mxu0 %v8273_v40  ;;  %14706 = vmatpush3.bf16.msra.mxu0 %v8665_v47 }
 0xc1a   :  { %14707 = vmatprep.subr.bf16.mxu0 %v8666_v62 }
 0xc1d   :  { %14708 = vmatpush3.bf16.msra.mxu0 %v8666_v62 }
 0xc1e   :  { %14709 = vmatprep.subr.bf16.mxu0 %v8667_v63 }
 0xc20   :  { %14646 = vmatmul.mubr.bf16.gmra.mrb[76].mxu0 %v8274_v1 }
 0xc21   :  { %14649 = vmatprep.mubr.bf16.mxu0 %v8275_v34  ;;  %14710 = vmatpush3.bf16.msra.mxu0 %v8667_v63 }
 0xc22   :  { %14711 = vmatprep.subr.bf16.mxu0 %v8668_v35 }
 0xc25   :  { %14712 = vmatpush3.bf16.msra.mxu0 %v8668_v35 }
 0xc26   :  { %14713 = vmatprep.subr.bf16.mxu0 %v8669_v39 }
 0xc28   :  { %14650 = vmatmul.mubr.bf16.gmra.mrb[80].mxu0 %v8276_v44 }
 0xc29   :  { %14653 = vmatprep.mubr.bf16.mxu0 %v8277_v48  ;;  %14714 = vmatpush3.bf16.msra.mxu0 %v8669_v39 }
 0xc2a   :  { %14715 = vmatprep.subr.bf16.mxu0 %v8670_v50 }
 0xc2d   :  { %14716 = vmatpush3.bf16.msra.mxu0 %v8670_v50 }
 0xc30   :  { %14654 = vmatmul.mubr.bf16.gmra.mrb[84].mxu0 %v8278_v51 }
 0xc31   :  { %14657 = vmatprep.mubr.bf16.mxu0 %v8279_v52 }
 0xc38   :  { %14658 = vmatmul.mubr.bf16.gmra.mrb[88].mxu0 %v8280_v53 }
 0xc39   :  { %14661 = vmatprep.mubr.bf16.mxu0 %v8281_v54 }
 0xc40   :  { %14662 = vmatmul.mubr.bf16.gmra.mrb[92].mxu0 %v8282_v55 }
 0xc41   :  { %14665 = vmatprep.mubr.bf16.mxu0 %v8283_v41 }
 0xc48   :  { %14666 = vmatmul.mubr.bf16.gmra.mrb[96].mxu0 %v8284_v56 }
 0xc49   :  { %14669 = vmatprep.mubr.bf16.mxu0 %v8285_v9 }
 0xc50   :  { %14670 = vmatmul.mubr.bf16.gmra.mrb[100].mxu0 %v8286_v57 }
 0xc51   :  { %14673 = vmatprep.mubr.bf16.mxu0 %v8287_v58 }
 0xc58   :  { %14674 = vmatmul.mubr.bf16.gmra.mrb[104].mxu0 %v8288_v59 }
 0xc59   :  { %14677 = vmatprep.mubr.bf16.mxu0 %v8289_v13 }
 0xc60   :  { %14678 = vmatmul.mubr.bf16.gmra.mrb[108].mxu0 %v8290_v14 }
 0xc61   :  { %14681 = vmatprep.mubr.bf16.mxu0 %v8291_v22 }
 0xc68   :  { %14682 = vmatmul.mubr.bf16.gmra.mrb[112].mxu0 %v8292_v15 }
 0xc69   :  { %14685 = vmatprep.mubr.bf16.mxu0 %v8293_v43 }
 0xc70   :  { %14686 = vmatmul.mubr.bf16.gmra.mrb[116].mxu0 %v8294_v18 }
 0xc71   :  { %14689 = vmatprep.mubr.bf16.mxu0 %v8295_v20 }
 0xc78   :  { %14690 = vmatmul.mubr.bf16.gmra.mrb[120].mxu0 %v8296_v27 }
 0xc79   :  { %14693 = vmatprep.mubr.bf16.mxu0 %v8297_v25 }
 0xc80   :  { %14694 = vmatmul.mubr.bf16.gmra.mrb[124].mxu0 %v8298_v23  ;;  %v9163_v23 = vld [vmem:[#allocation2 + $0x100] sm:$0xff] }
 0xc81   :  { %14697 = vmatprep.mubr.bf16.mxu0 %v8299_v29  ;;  %v8770_v29 = vld [vmem:[#allocation3 + $0x308] sm:$0xff] }
 0xc88   :  { %14698 = vmatmul.mubr.bf16.gmra.mrb[128].mxu0 %v8300_v6  ;;  %v8771_v6 = vld [vmem:[#allocation3 + $0x310] sm:$0xff] }
 0xc89   :  { %14717 = vmatprep.mubr.bf16.mxu0 %v18017_v32 }
 0xc90   :  { %14718 = vmatmul.mubr.bf16.vlgmr.msra.gmra.mrb[148].mxu0 %v18012_v24 }
 0xc91   :  { %14721 = vmatprep.mubr.bf16.mxu0 %v18023_v17 }
 0xc98   :  { %14722 = vmatmul.mubr.bf16.gmra.mrb[152].mxu0 %v18019_v30 }
 0xc99   :  { %14725 = vmatprep.mubr.bf16.mxu0 %v18036_v49 }
 0xca0   :  { %14726 = vmatmul.mubr.bf16.gmra.mrb[156].mxu0 %v18034_v5 }
 0xca1   :  { %14729 = vmatprep.mubr.bf16.mxu0 %v18042_v42 }
 0xca8   :  { %14730 = vmatmul.mubr.bf16.gmra.mrb[160].mxu0 %v18040_v19 }
 0xca9   :  { %14749 = vmatprep.mubr.bf16.mxu0 %v8769_v16  ;;  %v9164_v16 = vld [vmem:[#allocation2 + $0x108] sm:$0xff] }
 0xd2b   :  { %v18076_v12 = vpop.f32.mrb[104].mxu0 }
 0xd2c   :  { %v18078_v31 = vpop.f32.mrb[105].mxu0 }
 0xd2d   :  { %v18080_v36 = vpop.f32.mrb[106].mxu0 }
 0xd2e   :  { %v18082_v28 = vpop.f32.mrb[107].mxu0 }
 0xd33   :  { %v18084_v61 = vpop.f32.mrb[108].mxu0 }
 0xd34   :  { %18636 = vst [vmem:[#allocation40_spill] sm:$0xff] %v18084_v61  ;;  %v18086_v33 = vpop.f32.mrb[109].mxu0 }
 0xd35   :  { %18637 = vst [vmem:[#allocation41_spill] sm:$0xff] %v18086_v33  ;;  %v18088_v45 = vpop.f32.mrb[110].mxu0 }
 0xd36   :  { %18638 = vst [vmem:[#allocation42_spill] sm:$0xff] %v18088_v45  ;;  %v18090_v21 = vpop.f32.mrb[111].mxu0 }
 0xd37   :  { %18639 = vst [vmem:[#allocation43_spill] sm:$0xff] %v18090_v21 }
 0xd3b   :  { %v18092_v37 = vpop.f32.mrb[112].mxu0 }
 0xd3c   :  { %18640 = vst [vmem:[#allocation44_spill] sm:$0xff] %v18092_v37  ;;  %v18094_v4 = vpop.f32.mrb[113].mxu0 }
 0xd3d   :  { %18641 = vst [vmem:[#allocation45_spill] sm:$0xff] %v18094_v4  ;;  %v18096_v60 = vpop.f32.mrb[114].mxu0 }
 0xd3e   :  { %18642 = vst [vmem:[#allocation46_spill] sm:$0xff] %v18096_v60  ;;  %v18098_v7 = vpop.f32.mrb[115].mxu0 }
 0xd3f   :  { %18643 = vst [vmem:[#allocation47_spill] sm:$0xff] %v18098_v7 }
 0xd43   :  { %v18100_v0 = vpop.f32.mrb[116].mxu0 }
 0xd44   :  { %18644 = vst [vmem:[#allocation48_spill] sm:$0xff] %v18100_v0  ;;  %v18102_v8 = vpop.f32.mrb[117].mxu0 }
 0xd45   :  { %18645 = vst [vmem:[#allocation49_spill] sm:$0xff] %v18102_v8  ;;  %v18104_v3 = vpop.f32.mrb[118].mxu0 }
 0xd46   :  { %18646 = vst [vmem:[#allocation50_spill] sm:$0xff] %v18104_v3  ;;  %v18106_v26 = vpop.f32.mrb[119].mxu0 }
 0xd47   :  { %18647 = vst [vmem:[#allocation51_spill] sm:$0xff] %v18106_v26 }
 0xd4b   :  { %v18108_v10 = vpop.f32.mrb[120].mxu0 }
 0xd4c   :  { %18648 = vst [vmem:[#allocation52_spill] sm:$0xff] %v18108_v10  ;;  %v18110_v11 = vpop.f32.mrb[121].mxu0 }
 0xd4d   :  { %18649 = vst [vmem:[#allocation53_spill] sm:$0xff] %v18110_v11  ;;  %v18112_v46 = vpop.f32.mrb[122].mxu0 }
 0xd4e   :  { %18650 = vst [vmem:[#allocation54_spill] sm:$0xff] %v18112_v46  ;;  %v18114_v2 = vpop.f32.mrb[123].mxu0 }
 0xd4f   :  { %18651 = vst [vmem:[#allocation55_spill] sm:$0xff] %v18114_v2 }
 0xd53   :  { %v18116_v47 = vpop.f32.mrb[124].mxu0 }
 0xd54   :  { %18652 = vst [vmem:[#allocation56_spill] sm:$0xff] %v18116_v47  ;;  %v18118_v38 = vpop.f32.mrb[125].mxu0 }
 0xd55   :  { %18653 = vst [vmem:[#allocation57_spill] sm:$0xff] %v18118_v38  ;;  %v18120_v40 = vpop.f32.mrb[126].mxu0 }
 0xd56   :  { %18654 = vst [vmem:[#allocation58_spill] sm:$0xff] %v18120_v40  ;;  %v18122_v62 = vpop.f32.mrb[127].mxu0 }
 0xd57   :  { %18655 = vst [vmem:[#allocation59_spill] sm:$0xff] %v18122_v62 }
 0xd5b   :  { %v18124_v63 = vpop.f32.mrb[128].mxu0 }
 0xd5c   :  { %18656 = vst [vmem:[#allocation60_spill] sm:$0xff] %v18124_v63  ;;  %v18126_v1 = vpop.f32.mrb[129].mxu0 }
 0xd5d   :  { %18657 = vst [vmem:[#allocation61_spill] sm:$0xff] %v18126_v1  ;;  %v18128_v34 = vpop.f32.mrb[130].mxu0 }
 0xd5e   :  { %18658 = vst [vmem:[#allocation62_spill] sm:$0xff] %v18128_v34  ;;  %v18130_v35 = vpop.f32.mrb[131].mxu0 }
 0xd5f   :  { %18659 = vst [vmem:[#allocation63_spill] sm:$0xff] %v18130_v35 }
 0xd63   :  { %v14719_v39 = vpop.f32.mrb[148].mxu0 }
 0xd64   :  { %v8705_v44 = vpop.f32.mrb[149].mxu0 }
 0xd65   :  { %v14720_v48 = vpop.f32.mrb[150].mxu0 }
 0xd66   :  { %v8802_v50 = vpack.c.bf16 %v14720_v48, %v14719_v39  ;;  %v8708_v51 = vpop.f32.mrb[151].mxu0  ;;  %v9165_v39 = vld [vmem:[#allocation2 + $0x110] sm:$0xff]  ;;  %v8773_v48 = vld [vmem:[#allocation3 + $0x320] sm:$0xff] }
 0xd67   :  { %v8801_v52 = vpack.c.bf16 %v8708_v51, %v8705_v44  ;;  %v8772_v44 = vld [vmem:[#allocation3 + $0x318] sm:$0xff]  ;;  %v9167_v51 = vld [vmem:[#allocation2 + $0x120] sm:$0xff] }
 0xd69   :  { %14733 = vmatprep.subr.bf16.mxu0 %v8801_v52  ;;  %15373 = vmatprep.subr.bf16.mxu1 %v8801_v52 }
 0xd6a   :  { %14734 = vmatpush3.bf16.msra.mxu0 %v8801_v52  ;;  %15381 = vmatpush3.bf16.msra.mxu1 %v8801_v52  ;;  %v8774_v52 = vld [vmem:[#allocation3 + $0x328] sm:$0xff] }
 0xd6b   :  { %v14723_v53 = vpop.f32.mrb[152].mxu0  ;;  %14735 = vmatprep.subr.bf16.mxu0 %v8802_v50  ;;  %15374 = vmatprep.subr.bf16.mxu1 %v8802_v50 }
 0xd6c   :  { %v8721_v54 = vpop.f32.mrb[153].mxu0 }
 0xd6d   :  { %v14724_v55 = vpop.f32.mrb[154].mxu0 }
 0xd6e   :  { %v8804_v41 = vpack.c.bf16 %v14724_v55, %v14723_v53  ;;  %v8724_v56 = vpop.f32.mrb[155].mxu0  ;;  %14736 = vmatpush3.bf16.msra.mxu0 %v8802_v50  ;;  %15382 = vmatpush3.bf16.msra.mxu1 %v8802_v50  ;;  %v9166_v50 = vld [vmem:[#allocation2 + $0x118] sm:$0xff]  ;;  %v8775_v53 = vld [vmem:[#allocation3 + $0x330] sm:$0xff] }
 0xd6f   :  { %v8803_v9 = vpack.c.bf16 %v8724_v56, %v8721_v54  ;;  %v9168_v54 = vld [vmem:[#allocation2 + $0x128] sm:$0xff]  ;;  %v9169_v55 = vld [vmem:[#allocation2 + $0x130] sm:$0xff]  ;;  %v8777_v56 = vld [vmem:[#allocation3 + $0x340] sm:$0xff] }
 0xd71   :  { %14737 = vmatprep.subr.bf16.mxu0 %v8803_v9  ;;  %15375 = vmatprep.subr.bf16.mxu1 %v8803_v9 }
 0xd72   :  { %14738 = vmatpush3.bf16.msra.mxu0 %v8803_v9  ;;  %15383 = vmatpush3.bf16.msra.mxu1 %v8803_v9  ;;  %v9170_v9 = vld [vmem:[#allocation2 + $0x138] sm:$0xff] }
 0xd73   :  { %v14727_v57 = vpop.f32.mrb[156].mxu0  ;;  %14739 = vmatprep.subr.bf16.mxu0 %v8804_v41  ;;  %15376 = vmatprep.subr.bf16.mxu1 %v8804_v41 }
 0xd74   :  { %v8737_v58 = vpop.f32.mrb[157].mxu0 }
 0xd75   :  { %v14728_v59 = vpop.f32.mrb[158].mxu0 }
 0xd76   :  { %v8806_v13 = vpack.c.bf16 %v14728_v59, %v14727_v57  ;;  %v8740_v14 = vpop.f32.mrb[159].mxu0  ;;  %14740 = vmatpush3.bf16.msra.mxu0 %v8804_v41  ;;  %15384 = vmatpush3.bf16.msra.mxu1 %v8804_v41  ;;  %v8776_v41 = vld [vmem:[#allocation3 + $0x338] sm:$0xff]  ;;  %v9663_v57 = vld [vmem:[#allocation2 + $0x140] sm:$0xff]  ;;  %v8779_v59 = vld [vmem:[#allocation3 + $0x350] sm:$0xff] }
 0xd77   :  { %v8805_v22 = vpack.c.bf16 %v8740_v14, %v8737_v58  ;;  %v8778_v58 = vld [vmem:[#allocation3 + $0x348] sm:$0xff]  ;;  %v8781_v14 = vld [vmem:[#allocation3 + $0x360] sm:$0xff] }
 0xd79   :  { %14741 = vmatprep.subr.bf16.mxu0 %v8805_v22  ;;  %15377 = vmatprep.subr.bf16.mxu1 %v8805_v22 }
 0xd7a   :  { %14742 = vmatpush3.bf16.msra.mxu0 %v8805_v22  ;;  %15385 = vmatpush3.bf16.msra.mxu1 %v8805_v22  ;;  %v8782_v22 = vld [vmem:[#allocation3 + $0x368] sm:$0xff] }
 0xd7b   :  { %v14731_v15 = vpop.f32.mrb[160].mxu0  ;;  %14743 = vmatprep.subr.bf16.mxu0 %v8806_v13  ;;  %15378 = vmatprep.subr.bf16.mxu1 %v8806_v13 }
 0xd7c   :  { %v8753_v43 = vpop.f32.mrb[161].mxu0 }
 0xd7d   :  { %v14732_v18 = vpop.f32.mrb[162].mxu0 }
 0xd7e   :  { %v8808_v20 = vpack.c.bf16 %v14732_v18, %v14731_v15  ;;  %v8756_v27 = vpop.f32.mrb[163].mxu0  ;;  %14744 = vmatpush3.bf16.msra.mxu0 %v8806_v13  ;;  %15386 = vmatpush3.bf16.msra.mxu1 %v8806_v13  ;;  %v8780_v13 = vld [vmem:[#allocation3 + $0x358] sm:$0xff]  ;;  %v8783_v15 = vld [vmem:[#allocation3 + $0x370] sm:$0xff]  ;;  %v8785_v18 = vld [vmem:[#allocation3 + $0x380] sm:$0xff] }
 0xd7f   :  { %v8807_v25 = vpack.c.bf16 %v8756_v27, %v8753_v43  ;;  %v8784_v43 = vld [vmem:[#allocation3 + $0x378] sm:$0xff]  ;;  %v9664_v27 = vld [vmem:[#allocation2 + $0x148] sm:$0xff] }
 0xd81   :  { %14745 = vmatprep.subr.bf16.mxu0 %v8807_v25  ;;  %15379 = vmatprep.subr.bf16.mxu1 %v8807_v25 }
 0xd82   :  { %14746 = vmatpush3.bf16.msra.mxu0 %v8807_v25  ;;  %15387 = vmatpush3.bf16.msra.mxu1 %v8807_v25  ;;  %v9665_v25 = vld [vmem:[#allocation2 + $0x150] sm:$0xff] }
 0xd83   :  { %14747 = vmatprep.subr.bf16.mxu0 %v8808_v20  ;;  %15380 = vmatprep.subr.bf16.mxu1 %v8808_v20 }
 0xd86   :  { %14748 = vmatpush3.bf16.msra.mxu0 %v8808_v20  ;;  %15388 = vmatpush3.bf16.msra.mxu1 %v8808_v20  ;;  %v8786_v20 = vld [vmem:[#allocation3 + $0x388] sm:$0xff] }
 0xd87   :  { %14813 = vmatprep.subr.bf16.mxu0 %v9163_v23 }
 0xd89   :  { %14750 = vmatmul.mubr.bf16.vlgmr.msra.gmra.mrb[68].mxu0 %v8770_v29  ;;  %v9667_v29 = vld [vmem:[#allocation2 + $0x160] sm:$0xff] }
 0xd8a   :  { %14753 = vmatprep.mubr.bf16.mxu0 %v8771_v6  ;;  %14814 = vmatpush3.bf16.msra.mxu0 %v9163_v23  ;;  %v9666_v23 = vld [vmem:[#allocation2 + $0x158] sm:$0xff]  ;;  %v9668_v6 = vld [vmem:[#allocation2 + $0x168] sm:$0xff] }
 0xd8b   :  { %14815 = vmatprep.subr.bf16.mxu0 %v9164_v16 }
 0xd8e   :  { %14816 = vmatpush3.bf16.msra.mxu0 %v9164_v16  ;;  %v9669_v16 = vld [vmem:[#allocation2 + $0x170] sm:$0xff] }
 0xd8f   :  { %14817 = vmatprep.subr.bf16.mxu0 %v9165_v39 }
 0xd91   :  { %14754 = vmatmul.mubr.bf16.gmra.mrb[72].mxu0 %v8772_v44  ;;  %v10163_v44 = vld [vmem:[#allocation2 + $0x180] sm:$0xff] }
 0xd92   :  { %14757 = vmatprep.mubr.bf16.mxu0 %v8773_v48  ;;  %14818 = vmatpush3.bf16.msra.mxu0 %v9165_v39  ;;  %v9670_v39 = vld [vmem:[#allocation2 + $0x178] sm:$0xff]  ;;  %v10164_v48 = vld [vmem:[#allocation2 + $0x188] sm:$0xff] }
 0xd93   :  { %14819 = vmatprep.subr.bf16.mxu0 %v9166_v50 }
 0xd96   :  { %14820 = vmatpush3.bf16.msra.mxu0 %v9166_v50  ;;  %v10165_v50 = vld [vmem:[#allocation2 + $0x190] sm:$0xff] }
 0xd97   :  { %14821 = vmatprep.subr.bf16.mxu0 %v9167_v51 }
 0xd99   :  { %14758 = vmatmul.mubr.bf16.gmra.mrb[76].mxu0 %v8774_v52  ;;  %v10167_v52 = vld [vmem:[#allocation2 + $0x1a0] sm:$0xff] }
 0xd9a   :  { %14761 = vmatprep.mubr.bf16.mxu0 %v8775_v53  ;;  %14822 = vmatpush3.bf16.msra.mxu0 %v9167_v51  ;;  %v10166_v51 = vld [vmem:[#allocation2 + $0x198] sm:$0xff]  ;;  %v10168_v53 = vld [vmem:[#allocation2 + $0x1a8] sm:$0xff] }
 0xd9b   :  { %14823 = vmatprep.subr.bf16.mxu0 %v9168_v54 }
 0xd9e   :  { %14824 = vmatpush3.bf16.msra.mxu0 %v9168_v54  ;;  %v10169_v54 = vld [vmem:[#allocation2 + $0x1b0] sm:$0xff] }
 0xd9f   :  { %14825 = vmatprep.subr.bf16.mxu0 %v9169_v55 }
 0xda1   :  { %14762 = vmatmul.mubr.bf16.gmra.mrb[80].mxu0 %v8776_v41  ;;  %v8787_v41 = vld [vmem:[#allocation3 + $0x390] sm:$0xff] }
 0xda2   :  { %14765 = vmatprep.mubr.bf16.mxu0 %v8777_v56  ;;  %14826 = vmatpush3.bf16.msra.mxu0 %v9169_v55  ;;  %v10170_v55 = vld [vmem:[#allocation2 + $0x1b8] sm:$0xff] }
 0xda3   :  { %14827 = vmatprep.subr.bf16.mxu0 %v9170_v9  ;;  %v8788_v56 = vld [vmem:[#allocation3 + $0x398] sm:$0xff]  ;;  %14785 = vmatprep.mubr.bf16.mxu1 %v8787_v41 }
 0xda4   :  { %14786 = vmatmul.mubr.bf16.vlgmr.msra.gmra.mrb[224].mxu1 %v8788_v56 }
 0xda6   :  { %14828 = vmatpush3.bf16.msra.mxu0 %v9170_v9  ;;  %v8789_v9 = vld [vmem:[#allocation3 + $0x3a0] sm:$0xff] }
 0xda7   :  { %14925 = vmatprep.subr.bf16.mxu0 %v9663_v57  ;;  %14789 = vmatprep.mubr.bf16.mxu1 %v8789_v9 }
 0xda9   :  { %14766 = vmatmul.mubr.bf16.gmra.mrb[84].mxu0 %v8778_v58  ;;  %v8791_v58 = vld [vmem:[#allocation3 + $0x3b0] sm:$0xff] }
 0xdaa   :  { %14769 = vmatprep.mubr.bf16.mxu0 %v8779_v59  ;;  %v8792_v59 = vld [vmem:[#allocation3 + $0x3b8] sm:$0xff] }
 0xdb1   :  { %14770 = vmatmul.mubr.bf16.gmra.mrb[88].mxu0 %v8780_v13  ;;  %v8793_v13 = vld [vmem:[#allocation3 + $0x3c0] sm:$0xff] }
 0xdb2   :  { %14773 = vmatprep.mubr.bf16.mxu0 %v8781_v14  ;;  %v8794_v14 = vld [vmem:[#allocation3 + $0x3c8] sm:$0xff] }
 0xdb9   :  { %14774 = vmatmul.mubr.bf16.gmra.mrb[92].mxu0 %v8782_v22  ;;  %v8795_v22 = vld [vmem:[#allocation3 + $0x3d0] sm:$0xff] }
 0xdba   :  { %14777 = vmatprep.mubr.bf16.mxu0 %v8783_v15  ;;  %v8796_v15 = vld [vmem:[#allocation3 + $0x3d8] sm:$0xff] }
 0xdc1   :  { %14778 = vmatmul.mubr.bf16.gmra.mrb[96].mxu0 %v8784_v43  ;;  %v8797_v43 = vld [vmem:[#allocation3 + $0x3e0] sm:$0xff] }
 0xdc2   :  { %14781 = vmatprep.mubr.bf16.mxu0 %v8785_v18  ;;  %v8798_v18 = vld [vmem:[#allocation3 + $0x3e8] sm:$0xff] }
 0xdc9   :  { %14782 = vmatmul.mubr.bf16.gmra.mrb[100].mxu0 %v8786_v20  ;;  %v8799_v20 = vld [vmem:[#allocation3 + $0x3f0] sm:$0xff] }
 0xdca   :  { %14829 = vmatprep.mubr.bf16.mxu0 %v18017_v32 }
 0xdd1   :  { %14830 = vmatmul.mubr.bf16.vlgmr.msra.gmra.mrb[164].mxu0 %v18012_v24 }
 0xdd2   :  { %14833 = vmatprep.mubr.bf16.mxu0 %v18023_v17  ;;  %14926 = vmatpush3.bf16.msra.mxu0 %v9663_v57  ;;  %v8790_v57 = vld [vmem:[#allocation3 + $0x3a8] sm:$0xff] }
 0xdd3   :  { %14927 = vmatprep.subr.bf16.mxu0 %v9664_v27  ;;  %14790 = vmatmul.mubr.bf16.gmra.mrb[228].mxu1 %v8790_v57 }
 0xdd4   :  { %14793 = vmatprep.mubr.bf16.mxu1 %v8791_v58  ;;  %v10668_v58 = vld [vmem:[#allocation2 + $0x1e8] sm:$0xff] }
 0xdd6   :  { %14928 = vmatpush3.bf16.msra.mxu0 %v9664_v27  ;;  %v8800_v27 = vld [vmem:[#allocation3 + $0x3f8] sm:$0xff] }
 0xdd7   :  { %14929 = vmatprep.subr.bf16.mxu0 %v9665_v25 }
 0xdd9   :  { %14834 = vmatmul.mubr.bf16.gmra.mrb[168].mxu0 %v18019_v30 }
 0xdda   :  { %14837 = vmatprep.mubr.bf16.mxu0 %v18036_v49  ;;  %14930 = vmatpush3.bf16.msra.mxu0 %v9665_v25  ;;  %v9269_v25 = vld [vmem:[#allocation3 + $0x400] sm:$0xff] }
 0xddb   :  { %14931 = vmatprep.subr.bf16.mxu0 %v9666_v23  ;;  %14794 = vmatmul.mubr.bf16.gmra.mrb[232].mxu1 %v8792_v59  ;;  %v10669_v59 = vld [vmem:[#allocation2 + $0x1f0] sm:$0xff] }
 0xddc   :  { %14797 = vmatprep.mubr.bf16.mxu1 %v8793_v13 }
 0xdde   :  { %14932 = vmatpush3.bf16.msra.mxu0 %v9666_v23  ;;  %v10663_v23 = vld [vmem:[#allocation2 + $0x1c0] sm:$0xff] }
 0xddf   :  { %14933 = vmatprep.subr.bf16.mxu0 %v9667_v29 }
 0xde1   :  { %14838 = vmatmul.mubr.bf16.gmra.mrb[172].mxu0 %v18034_v5 }
 0xde2   :  { %14841 = vmatprep.mubr.bf16.mxu0 %v18042_v42  ;;  %14934 = vmatpush3.bf16.msra.mxu0 %v9667_v29 }
 0xde3   :  { %14935 = vmatprep.subr.bf16.mxu0 %v9668_v6  ;;  %14798 = vmatmul.mubr.bf16.gmra.mrb[236].mxu1 %v8794_v14 }
 0xde4   :  { %14801 = vmatprep.mubr.bf16.mxu1 %v8795_v22 }
 0xde6   :  { %14936 = vmatpush3.bf16.msra.mxu0 %v9668_v6 }
 0xde7   :  { %14937 = vmatprep.subr.bf16.mxu0 %v9669_v16 }
 0xde9   :  { %14842 = vmatmul.mubr.bf16.gmra.mrb[176].mxu0 %v18040_v19 }
 0xdea   :  { %14938 = vmatpush3.bf16.msra.mxu0 %v9669_v16  ;;  %14941 = vmatprep.mubr.bf16.mxu0 %v18017_v32 }
 0xdeb   :  { %14939 = vmatprep.subr.bf16.mxu0 %v9670_v39  ;;  %14802 = vmatmul.mubr.bf16.gmra.mrb[240].mxu1 %v8796_v15 }
 0xdec   :  { %14805 = vmatprep.mubr.bf16.mxu1 %v8797_v43  ;;  %v10670_v43 = vld [vmem:[#allocation2 + $0x1f8] sm:$0xff] }
 0xdee   :  { %14940 = vmatpush3.bf16.msra.mxu0 %v9670_v39 }
 0xdef   :  { %15037 = vmatprep.subr.bf16.mxu0 %v10163_v44 }
 0xdf1   :  { %14942 = vmatmul.mubr.bf16.vlgmr.msra.gmra.mrb[180].mxu0 %v18012_v24 }
 0xdf2   :  { %14945 = vmatprep.mubr.bf16.mxu0 %v18023_v17  ;;  %15038 = vmatpush3.bf16.msra.mxu0 %v10163_v44  ;;  %v10664_v44 = vld [vmem:[#allocation2 + $0x1c8] sm:$0xff] }
 0xdf3   :  { %15039 = vmatprep.subr.bf16.mxu0 %v10164_v48  ;;  %14806 = vmatmul.mubr.bf16.gmra.mrb[244].mxu1 %v8798_v18 }
 0xdf4   :  { %14809 = vmatprep.mubr.bf16.mxu1 %v8799_v20 }
 0xdf6   :  { %15040 = vmatpush3.bf16.msra.mxu0 %v10164_v48  ;;  %v10665_v48 = vld [vmem:[#allocation2 + $0x1d0] sm:$0xff] }
 0xdf7   :  { %15041 = vmatprep.subr.bf16.mxu0 %v10165_v50 }
 0xdf9   :  { %14946 = vmatmul.mubr.bf16.gmra.mrb[184].mxu0 %v18019_v30 }
 0xdfa   :  { %14949 = vmatprep.mubr.bf16.mxu0 %v18036_v49  ;;  %15042 = vmatpush3.bf16.msra.mxu0 %v10165_v50 }
 0xdfb   :  { %15043 = vmatprep.subr.bf16.mxu0 %v10166_v51  ;;  %14810 = vmatmul.mubr.bf16.gmra.mrb[248].mxu1 %v8800_v27 }
 0xdfc   :  { %14861 = vmatprep.mubr.bf16.mxu1 %v9269_v25 }
 0xdfe   :  { %15044 = vmatpush3.bf16.msra.mxu0 %v10166_v51 }
 0xdff   :  { %15045 = vmatprep.subr.bf16.mxu0 %v10167_v52 }
 0xe01   :  { %14950 = vmatmul.mubr.bf16.gmra.mrb[188].mxu0 %v18034_v5 }
 0xe02   :  { %14953 = vmatprep.mubr.bf16.mxu0 %v18042_v42  ;;  %15046 = vmatpush3.bf16.msra.mxu0 %v10167_v52 }
 0xe03   :  { %15047 = vmatprep.subr.bf16.mxu0 %v10168_v53 }
 0xe06   :  { %15048 = vmatpush3.bf16.msra.mxu0 %v10168_v53 }
 0xe07   :  { %15049 = vmatprep.subr.bf16.mxu0 %v10169_v54 }
 0xe09   :  { %14954 = vmatmul.mubr.bf16.gmra.mrb[192].mxu0 %v18040_v19 }
 0xe0a   :  { %15050 = vmatpush3.bf16.msra.mxu0 %v10169_v54  ;;  %15053 = vmatprep.mubr.bf16.mxu0 %v18017_v32  ;;  %v10666_v54 = vld [vmem:[#allocation2 + $0x1d8] sm:$0xff] }
 0xe0b   :  { %15051 = vmatprep.subr.bf16.mxu0 %v10170_v55 }
 0xe0e   :  { %15052 = vmatpush3.bf16.msra.mxu0 %v10170_v55  ;;  %v10667_v55 = vld [vmem:[#allocation2 + $0x1e0] sm:$0xff] }
 0xe0f   :  { %15149 = vmatprep.subr.bf16.mxu0 %v10663_v23 }
 0xe11   :  { %15054 = vmatmul.mubr.bf16.vlgmr.msra.gmra.mrb[196].mxu0 %v18012_v24 }
 0xe12   :  { %15057 = vmatprep.mubr.bf16.mxu0 %v18023_v17  ;;  %15150 = vmatpush3.bf16.msra.mxu0 %v10663_v23 }
 0xe13   :  { %15151 = vmatprep.subr.bf16.mxu0 %v10664_v44 }
 0xe16   :  { %15152 = vmatpush3.bf16.msra.mxu0 %v10664_v44 }
 0xe17   :  { %15153 = vmatprep.subr.bf16.mxu0 %v10665_v48 }
 0xe19   :  { %15058 = vmatmul.mubr.bf16.gmra.mrb[200].mxu0 %v18019_v30 }
 0xe1a   :  { %15061 = vmatprep.mubr.bf16.mxu0 %v18036_v49  ;;  %15154 = vmatpush3.bf16.msra.mxu0 %v10665_v48 }
 0xe1b   :  { %15155 = vmatprep.subr.bf16.mxu0 %v10666_v54 }
 0xe1e   :  { %15156 = vmatpush3.bf16.msra.mxu0 %v10666_v54 }
 0xe1f   :  { %15157 = vmatprep.subr.bf16.mxu0 %v10667_v55 }
 0xe21   :  { %15062 = vmatmul.mubr.bf16.gmra.mrb[204].mxu0 %v18034_v5 }
 0xe22   :  { %15065 = vmatprep.mubr.bf16.mxu0 %v18042_v42  ;;  %15158 = vmatpush3.bf16.msra.mxu0 %v10667_v55 }
 0xe23   :  { %15159 = vmatprep.subr.bf16.mxu0 %v10668_v58 }
 0xe26   :  { %15160 = vmatpush3.bf16.msra.mxu0 %v10668_v58 }
 0xe27   :  { %15161 = vmatprep.subr.bf16.mxu0 %v10669_v59 }
 0xe29   :  { %15066 = vmatmul.mubr.bf16.gmra.mrb[208].mxu0 %v18040_v19 }
 0xe2a   :  { %15165 = vmatprep.mubr.bf16.mxu0 %v18017_v32  ;;  %15162 = vmatpush3.bf16.msra.mxu0 %v10669_v59 }
 0xe2b   :  { %15163 = vmatprep.subr.bf16.mxu0 %v10670_v43 }
 0xe2e   :  { %15164 = vmatpush3.bf16.msra.mxu0 %v10670_v43 }
 0xe31   :  { %15166 = vmatmul.mubr.bf16.vlgmr.msra.gmra.mrb[212].mxu0 %v18012_v24 }
 0xe32   :  { %15169 = vmatprep.mubr.bf16.mxu0 %v18023_v17 }
 0xe39   :  { %15170 = vmatmul.mubr.bf16.gmra.mrb[216].mxu0 %v18019_v30 }
 0xe3a   :  { %15173 = vmatprep.mubr.bf16.mxu0 %v18036_v49 }
 0xe41   :  { %15174 = vmatmul.mubr.bf16.gmra.mrb[220].mxu0 %v18034_v5 }
 0xe42   :  { %15177 = vmatprep.mubr.bf16.mxu0 %v18042_v42 }
 0xe49   :  { %15178 = vmatmul.mubr.bf16.gmra.mrb[224].mxu0 %v18040_v19 }
 0xe4a   :  { %15277 = vmatprep.mubr.bf16.mxu0 %v18017_v32 }
 0xe5c   :  { %v18157_v29 = vpop.f32.mrb[68].mxu0 }
 0xe5d   :  { %v18159_v6 = vpop.f32.mrb[69].mxu0 }
 0xe5e   :  { %v18161_v16 = vpop.f32.mrb[70].mxu0 }
 0xe5f   :  { %v18163_v39 = vpop.f32.mrb[71].mxu0 }
 0xe64   :  { %v18165_v50 = vpop.f32.mrb[72].mxu0 }
 0xe65   :  { %v18167_v51 = vpop.f32.mrb[73].mxu0 }
 0xe66   :  { %v18169_v52 = vpop.f32.mrb[74].mxu0 }
 0xe67   :  { %v18171_v53 = vpop.f32.mrb[75].mxu0 }
 0xe6c   :  { %v18173_v41 = vpop.f32.mrb[76].mxu0 }
 0xe6d   :  { %v18175_v56 = vpop.f32.mrb[77].mxu0 }
 0xe6e   :  { %v18177_v9 = vpop.f32.mrb[78].mxu0 }
 0xe6f   :  { %v18179_v57 = vpop.f32.mrb[79].mxu0 }
 0xe74   :  { %v18181_v13 = vpop.f32.mrb[80].mxu0 }
 0xe75   :  { %v18183_v14 = vpop.f32.mrb[81].mxu0 }
 0xe76   :  { %v18185_v22 = vpop.f32.mrb[82].mxu0 }
 0xe77   :  { %v18187_v15 = vpop.f32.mrb[83].mxu0 }
 0xe7c   :  { %v18189_v18 = vpop.f32.mrb[84].mxu0 }
 0xe7d   :  { %v18191_v20 = vpop.f32.mrb[85].mxu0 }
 0xe7e   :  { %v18193_v27 = vpop.f32.mrb[86].mxu0 }
 0xe7f   :  { %v18195_v25 = vpop.f32.mrb[87].mxu0 }
 0xe84   :  { %v18199_v23 = vpop.f32.mrb[88].mxu0 }
 0xe85   :  { %v18201_v44 = vpop.f32.mrb[89].mxu0 }
 0xe86   :  { %v18203_v48 = vpop.f32.mrb[90].mxu0 }
 0xe87   :  { %v18205_v54 = vpop.f32.mrb[91].mxu0 }
 0xe8c   :  { %v18209_v55 = vpop.f32.mrb[92].mxu0 }
 0xe8d   :  { %v18211_v58 = vpop.f32.mrb[93].mxu0 }
 0xe8e   :  { %v18213_v59 = vpop.f32.mrb[94].mxu0 }
 0xe8f   :  { %v18215_v43 = vpop.f32.mrb[95].mxu0 }
 0xe94   :  { %v18219_v35 = vpop.f32.mrb[96].mxu0 }
 0xe95   :  { %v18221_v34 = vpop.f32.mrb[97].mxu0 }
 0xe96   :  { %v18223_v1 = vpop.f32.mrb[98].mxu0 }
 0xe97   :  { %v18225_v63 = vpop.f32.mrb[99].mxu0 }
 0xe9c   :  { %v18229_v62 = vpop.f32.mrb[100].mxu0 }
 0xe9d   :  { %v18231_v40 = vpop.f32.mrb[101].mxu0 }
 0xe9e   :  { %v18233_v38 = vpop.f32.mrb[102].mxu0 }
 0xe9f   :  { %v18235_v47 = vpop.f32.mrb[103].mxu0 }
 0xea4   :  { %v14831_v2 = vpop.f32.mrb[164].mxu0 }
 0xea5   :  { %v9205_v46 = vpop.f32.mrb[165].mxu0 }
 0xea6   :  { %v14832_v11 = vpop.f32.mrb[166].mxu0 }
 0xea7   :  { %v9302_v10 = vpack.c.bf16 %v14832_v11, %v14831_v2  ;;  %v9208_v26 = vpop.f32.mrb[167].mxu0 }
 0xea8   :  { %v9301_v3 = vpack.c.bf16 %v9208_v26, %v9205_v46 }
 0xeaa   :  { %14845 = vmatprep.subr.bf16.mxu1 %v9301_v3 }
 0xeab   :  { %14846 = vmatpush3.bf16.msra.mxu1 %v9301_v3 }
 0xeac   :  { %v14835_v8 = vpop.f32.mrb[168].mxu0  ;;  %14847 = vmatprep.subr.bf16.mxu1 %v9302_v10 }
 0xead   :  { %v9221_v0 = vpop.f32.mrb[169].mxu0 }
 0xeae   :  { %v14836_v32 = vpop.f32.mrb[170].mxu0 }
 0xeaf   :  { %v9304_v7 = vpack.c.bf16 %v14836_v32, %v14835_v8  ;;  %v9224_v60 = vpop.f32.mrb[171].mxu0  ;;  %14848 = vmatpush3.bf16.msra.mxu1 %v9302_v10 }
 0xeb0   :  { %v9303_v4 = vpack.c.bf16 %v9224_v60, %v9221_v0 }
 0xeb2   :  { %14849 = vmatprep.subr.bf16.mxu1 %v9303_v4 }
 0xeb3   :  { %14850 = vmatpush3.bf16.msra.mxu1 %v9303_v4 }
 0xeb4   :  { %v14839_v37 = vpop.f32.mrb[172].mxu0  ;;  %14851 = vmatprep.subr.bf16.mxu1 %v9304_v7 }
 0xeb5   :  { %v9237_v21 = vpop.f32.mrb[173].mxu0 }
 0xeb6   :  { %v14840_v45 = vpop.f32.mrb[174].mxu0 }
 0xeb7   :  { %v9306_v33 = vpack.c.bf16 %v14840_v45, %v14839_v37  ;;  %v9240_v11 = vpop.f32.mrb[175].mxu0  ;;  %14852 = vmatpush3.bf16.msra.mxu1 %v9304_v7  ;;  %v9270_v45 = vld [vmem:[#allocation3 + $0x408] sm:$0xff]  ;;  %v9271_v7 = vld [vmem:[#allocation3 + $0x410] sm:$0xff] }
 0xeb8   :  { %v9305_v26 = vpack.c.bf16 %v9240_v11, %v9237_v21 }
 0xeba   :  { %14853 = vmatprep.subr.bf16.mxu1 %v9305_v26 }
 0xebb   :  { %14854 = vmatpush3.bf16.msra.mxu1 %v9305_v26 }
 0xebc   :  { %v14843_v3 = vpop.f32.mrb[176].mxu0  ;;  %14855 = vmatprep.subr.bf16.mxu1 %v9306_v33 }
 0xebd   :  { %v9253_v46 = vpop.f32.mrb[177].mxu0 }
 0xebe   :  { %v14844_v2 = vpop.f32.mrb[178].mxu0 }
 0xebf   :  { %v9308_v8 = vpack.c.bf16 %v14844_v2, %v14843_v3  ;;  %v9256_v32 = vpop.f32.mrb[179].mxu0  ;;  %14856 = vmatpush3.bf16.msra.mxu1 %v9306_v33 }
 0xec0   :  { %v9307_v60 = vpack.c.bf16 %v9256_v32, %v9253_v46  ;;  %v9272_v46 = vld [vmem:[#allocation3 + $0x418] sm:$0xff] }
 0xec2   :  { %14857 = vmatprep.subr.bf16.mxu1 %v9307_v60 }
 0xec3   :  { %14858 = vmatpush3.bf16.msra.mxu1 %v9307_v60  ;;  %v9273_v60 = vld [vmem:[#allocation3 + $0x420] sm:$0xff] }
 0xec4   :  { %14859 = vmatprep.subr.bf16.mxu1 %v9308_v8  ;;  %v14943_v4 = vpop.f32.mrb[180].mxu0 }
 0xec5   :  { %v9705_v0 = vpop.f32.mrb[181].mxu0 }
 0xec6   :  { %v14944_v10 = vpop.f32.mrb[182].mxu0 }
 0xec7   :  { %14860 = vmatpush3.bf16.msra.mxu1 %v9308_v8  ;;  %v9802_v37 = vpack.c.bf16 %v14944_v10, %v14943_v4  ;;  %v9708_v21 = vpop.f32.mrb[183].mxu0  ;;  %v9274_v10 = vld [vmem:[#allocation3 + $0x428] sm:$0xff] }
 0xec8   :  { %v9801_v11 = vpack.c.bf16 %v9708_v21, %v9705_v0 }
 0xeca   :  { %14862 = vmatmul.mubr.bf16.vlgmr.msra.gmra.mrb[252].mxu1 %v9270_v45  ;;  %14957 = vmatprep.subr.bf16.mxu1 %v9801_v11 }
 0xecb   :  { %14865 = vmatprep.mubr.bf16.mxu1 %v9271_v7  ;;  %14958 = vmatpush3.bf16.msra.mxu1 %v9801_v11  ;;  %v9275_v7 = vld [vmem:[#allocation3 + $0x430] sm:$0xff] }
 0xecc   :  { %14959 = vmatprep.subr.bf16.mxu1 %v9802_v37  ;;  %v14947_v26 = vpop.f32.mrb[184].mxu0 }
 0xecd   :  { %v9721_v33 = vpop.f32.mrb[185].mxu0 }
 0xece   :  { %v14948_v3 = vpop.f32.mrb[186].mxu0 }
 0xecf   :  { %14960 = vmatpush3.bf16.msra.mxu1 %v9802_v37  ;;  %v9804_v2 = vpack.c.bf16 %v14948_v3, %v14947_v26  ;;  %v9724_v32 = vpop.f32.mrb[187].mxu0  ;;  %v11163_v37 = vld [vmem:[#allocation2 + $0x200] sm:$0xff]  ;;  %v9276_v3 = vld [vmem:[#allocation3 + $0x438] sm:$0xff] }
 0xed0   :  { %v9803_v61 = vpack.c.bf16 %v9724_v32, %v9721_v33  ;;  %15261 = vmatprep.subr.bf16.mxu0 %v11163_v37 }
 0xed1   :  { %15262 = vmatpush3.bf16.msra.mxu0 %v11163_v37  ;;  %v9279_v37 = vld [vmem:[#allocation3 + $0x450] sm:$0xff] }
 0xed2   :  { %14866 = vmatmul.mubr.bf16.gmra.mrb[0].mxu1 %v9272_v46  ;;  %14961 = vmatprep.subr.bf16.mxu1 %v9803_v61 }
 0xed3   :  { %14869 = vmatprep.mubr.bf16.mxu1 %v9273_v60  ;;  %14962 = vmatpush3.bf16.msra.mxu1 %v9803_v61 }
 0xed4   :  { %14963 = vmatprep.subr.bf16.mxu1 %v9804_v2  ;;  %v14951_v8 = vpop.f32.mrb[188].mxu0 }
 0xed5   :  { %v9737_v4 = vpop.f32.mrb[189].mxu0 }
 0xed6   :  { %v14952_v0 = vpop.f32.mrb[190].mxu0 }
 0xed7   :  { %14964 = vmatpush3.bf16.msra.mxu1 %v9804_v2  ;;  %v9806_v45 = vpack.c.bf16 %v14952_v0, %v14951_v8  ;;  %v9740_v21 = vpop.f32.mrb[191].mxu0  ;;  %v9277_v2 = vld [vmem:[#allocation3 + $0x440] sm:$0xff]  ;;  %v11164_v8 = vld [vmem:[#allocation2 + $0x208] sm:$0xff] }
 0xed8   :  { %v9805_v11 = vpack.c.bf16 %v9740_v21, %v9737_v4  ;;  %v11165_v4 = vld [vmem:[#allocation2 + $0x210] sm:$0xff]  ;;  %15263 = vmatprep.subr.bf16.mxu0 %v11164_v8 }
 0xed9   :  { %15264 = vmatpush3.bf16.msra.mxu0 %v11164_v8  ;;  %v11169_v8 = vld [vmem:[#allocation2 + $0x230] sm:$0xff] }
 0xeda   :  { %14870 = vmatmul.mubr.bf16.gmra.mrb[4].mxu1 %v9274_v10  ;;  %14965 = vmatprep.subr.bf16.mxu1 %v9805_v11 }
 0xedb   :  { %14873 = vmatprep.mubr.bf16.mxu1 %v9275_v7  ;;  %14966 = vmatpush3.bf16.msra.mxu1 %v9805_v11  ;;  %v9278_v7 = vld [vmem:[#allocation3 + $0x448] sm:$0xff] }
 0xedc   :  { %14967 = vmatprep.subr.bf16.mxu1 %v9806_v45  ;;  %v14955_v26 = vpop.f32.mrb[192].mxu0  ;;  %15265 = vmatprep.subr.bf16.mxu0 %v11165_v4 }
 0xedd   :  { %v9753_v33 = vpop.f32.mrb[193].mxu0  ;;  %15266 = vmatpush3.bf16.msra.mxu0 %v11165_v4 }
 0xede   :  { %v14956_v61 = vpop.f32.mrb[194].mxu0 }
 0xedf   :  { %14968 = vmatpush3.bf16.msra.mxu1 %v9806_v45  ;;  %v9808_v46 = vpack.c.bf16 %v14956_v61, %v14955_v26  ;;  %v9756_v32 = vpop.f32.mrb[195].mxu0  ;;  %v11167_v61 = vld [vmem:[#allocation2 + $0x220] sm:$0xff] }
 0xee0   :  { %v9807_v60 = vpack.c.bf16 %v9756_v32, %v9753_v33  ;;  %v11166_v33 = vld [vmem:[#allocation2 + $0x218] sm:$0xff]  ;;  %v9281_v32 = vld [vmem:[#allocation3 + $0x460] sm:$0xff] }
 0xee1   :  { %15267 = vmatprep.subr.bf16.mxu0 %v11166_v33 }
 0xee2   :  { %14874 = vmatmul.mubr.bf16.gmra.mrb[8].mxu1 %v9276_v3  ;;  %14969 = vmatprep.subr.bf16.mxu1 %v9807_v60  ;;  %v9280_v3 = vld [vmem:[#allocation3 + $0x458] sm:$0xff] }
 0xee3   :  { %14877 = vmatprep.mubr.bf16.mxu1 %v9277_v2  ;;  %14970 = vmatpush3.bf16.msra.mxu1 %v9807_v60  ;;  %v11168_v2 = vld [vmem:[#allocation2 + $0x228] sm:$0xff] }
 0xee4   :  { %14971 = vmatprep.subr.bf16.mxu1 %v9808_v46  ;;  %v15055_v0 = vpop.f32.mrb[196].mxu0  ;;  %15268 = vmatpush3.bf16.msra.mxu0 %v11166_v33  ;;  %v9284_v33 = vld [vmem:[#allocation3 + $0x478] sm:$0xff] }
 0xee5   :  { %v10205_v10 = vpop.f32.mrb[197].mxu0  ;;  %15269 = vmatprep.subr.bf16.mxu0 %v11167_v61 }
 0xee6   :  { %v15056_v21 = vpop.f32.mrb[198].mxu0 }
 0xee7   :  { %14972 = vmatpush3.bf16.msra.mxu1 %v9808_v46  ;;  %v18237_v45 = vpack.c.bf16 %v15056_v21, %v15055_v0  ;;  %v10208_v11 = vpop.f32.mrb[199].mxu0 }
 0xee8   :  { %v18239_v26 = vpack.c.bf16 %v10208_v11, %v10205_v10  ;;  %15270 = vmatpush3.bf16.msra.mxu0 %v11167_v61  ;;  %v9283_v11 = vld [vmem:[#allocation3 + $0x470] sm:$0xff]  ;;  %v9285_v61 = vld [vmem:[#allocation3 + $0x480] sm:$0xff] }
 0xee9   :  { %15271 = vmatprep.subr.bf16.mxu0 %v11168_v2 }
 0xeea   :  { %14878 = vmatmul.mubr.bf16.gmra.mrb[12].mxu1 %v9278_v7  ;;  %15069 = vmatprep.subr.bf16.mxu1 %v18239_v26  ;;  %v9282_v7 = vld [vmem:[#allocation3 + $0x468] sm:$0xff] }
 0xeeb   :  { %14881 = vmatprep.mubr.bf16.mxu1 %v9279_v37  ;;  %v11170_v37 = vld [vmem:[#allocation2 + $0x238] sm:$0xff] }
 0xeec   :  { %v15059_v46 = vpop.f32.mrb[200].mxu0  ;;  %15272 = vmatpush3.bf16.msra.mxu0 %v11168_v2  ;;  %v9289_v2 = vld [vmem:[#allocation3 + $0x4a0] sm:$0xff] }
 0xeed   :  { %v10221_v60 = vpop.f32.mrb[201].mxu0  ;;  %15273 = vmatprep.subr.bf16.mxu0 %v11169_v8 }
 0xeee   :  { %v15060_v4 = vpop.f32.mrb[202].mxu0 }
 0xeef   :  { %v18242_v0 = vpack.c.bf16 %v15060_v4, %v15059_v46  ;;  %v10224_v10 = vpop.f32.mrb[203].mxu0  ;;  %v9288_v46 = vld [vmem:[#allocation3 + $0x498] sm:$0xff] }
 0xef0   :  { %v18244_v21 = vpack.c.bf16 %v10224_v10, %v10221_v60  ;;  %15274 = vmatpush3.bf16.msra.mxu0 %v11169_v8 }
 0xef1   :  { %15275 = vmatprep.subr.bf16.mxu0 %v11170_v37 }
 0xef2   :  { %14882 = vmatmul.mubr.bf16.gmra.mrb[16].mxu1 %v9280_v3  ;;  %v9286_v3 = vld [vmem:[#allocation3 + $0x488] sm:$0xff] }
 0xef3   :  { %14885 = vmatprep.mubr.bf16.mxu1 %v9281_v32  ;;  %v9287_v32 = vld [vmem:[#allocation3 + $0x490] sm:$0xff] }
 0xef4   :  { %15276 = vmatpush3.bf16.msra.mxu0 %v11170_v37  ;;  %v9296_v37 = vld [vmem:[#allocation3 + $0x4d8] sm:$0xff] }
 0xef7   :  { %15278 = vmatmul.mubr.bf16.vlgmr.msra.gmra.mrb[228].mxu0 %v18012_v24  ;;  %v15063_v24 = vpop.f32.mrb[204].mxu0 }
 0xef8   :  { %15281 = vmatprep.mubr.bf16.mxu0 %v18023_v17  ;;  %v10237_v17 = vpop.f32.mrb[205].mxu0 }
 0xef9   :  { %v15064_v60 = vpop.f32.mrb[206].mxu0 }
 0xefa   :  { %14886 = vmatmul.mubr.bf16.gmra.mrb[20].mxu1 %v9282_v7  ;;  %v10306_v8 = vpack.c.bf16 %v15064_v60, %v15063_v24  ;;  %v10240_v4 = vpop.f32.mrb[207].mxu0  ;;  %v9290_v7 = vld [vmem:[#allocation3 + $0x4a8] sm:$0xff]  ;;  %v9300_v60 = vld [vmem:[#allocation3 + $0x4f8] sm:$0xff] }
 0xefb   :  { %14889 = vmatprep.mubr.bf16.mxu1 %v9283_v11  ;;  %v10305_v10 = vpack.c.bf16 %v10240_v4, %v10237_v17  ;;  %v9293_v11 = vld [vmem:[#allocation3 + $0x4c0] sm:$0xff]  ;;  %v9298_v24 = vld [vmem:[#allocation3 + $0x4e8] sm:$0xff]  ;;  %v9299_v17 = vld [vmem:[#allocation3 + $0x4f0] sm:$0xff] }
 0xefc   :  { %v9769_v4 = vld [vmem:[#allocation3 + $0x500] sm:$0xff] }
 0xeff   :  { %15282 = vmatmul.mubr.bf16.gmra.mrb[232].mxu0 %v18019_v30  ;;  %v9291_v30 = vld [vmem:[#allocation3 + $0x4b0] sm:$0xff] }
 0xf00   :  { %15285 = vmatprep.mubr.bf16.mxu0 %v18036_v49  ;;  %v9292_v49 = vld [vmem:[#allocation3 + $0x4b8] sm:$0xff] }
 0xf02   :  { %14890 = vmatmul.mubr.bf16.gmra.mrb[24].mxu1 %v9284_v33  ;;  %v9297_v33 = vld [vmem:[#allocation3 + $0x4e0] sm:$0xff] }
 0xf03   :  { %14893 = vmatprep.mubr.bf16.mxu1 %v9285_v61  ;;  %v15067_v61 = vpop.f32.mrb[208].mxu0 }
 0xf07   :  { %15286 = vmatmul.mubr.bf16.gmra.mrb[236].mxu0 %v18034_v5  ;;  %v9294_v5 = vld [vmem:[#allocation3 + $0x4c8] sm:$0xff] }
 0xf08   :  { %15289 = vmatprep.mubr.bf16.mxu0 %v18042_v42  ;;  %v9295_v42 = vld [vmem:[#allocation3 + $0x4d0] sm:$0xff] }
 0xf0a   :  { %14894 = vmatmul.mubr.bf16.gmra.mrb[28].mxu1 %v9286_v3  ;;  %v10253_v3 = vpop.f32.mrb[209].mxu0 }
 0xf0b   :  { %14897 = vmatprep.mubr.bf16.mxu1 %v9287_v32  ;;  %v15068_v32 = vpop.f32.mrb[210].mxu0 }
 0xf0f   :  { %15290 = vmatmul.mubr.bf16.gmra.mrb[240].mxu0 %v18040_v19 }
 0xf12   :  { %14898 = vmatmul.mubr.bf16.gmra.mrb[224].mxu1 %v9288_v46  ;;  %v10308_v46 = vpack.c.bf16 %v15068_v32, %v15067_v61  ;;  %v9776_v32 = vld [vmem:[#allocation3 + $0x538] sm:$0xff] }
 0xf13   :  { %14901 = vmatprep.mubr.bf16.mxu1 %v9289_v2  ;;  %v10256_v2 = vpop.f32.mrb[211].mxu0 }
 0xf14   :  { %v10307_v19 = vpack.c.bf16 %v10256_v2, %v10253_v3  ;;  %v9774_v3 = vld [vmem:[#allocation3 + $0x528] sm:$0xff] }
 0xf15   :  { %v9778_v2 = vld [vmem:[#allocation3 + $0x548] sm:$0xff] }
 0xf1a   :  { %14902 = vmatmul.mubr.bf16.gmra.mrb[228].mxu1 %v9290_v7  ;;  %v9770_v7 = vld [vmem:[#allocation3 + $0x508] sm:$0xff] }
 0xf1b   :  { %14905 = vmatprep.mubr.bf16.mxu1 %v9291_v30  ;;  %v9771_v30 = vld [vmem:[#allocation3 + $0x510] sm:$0xff] }
 0xf22   :  { %14906 = vmatmul.mubr.bf16.gmra.mrb[232].mxu1 %v9292_v49  ;;  %v9772_v49 = vld [vmem:[#allocation3 + $0x518] sm:$0xff] }
 0xf23   :  { %14909 = vmatprep.mubr.bf16.mxu1 %v9293_v11  ;;  %v9773_v11 = vld [vmem:[#allocation3 + $0x520] sm:$0xff] }
 0xf2a   :  { %14910 = vmatmul.mubr.bf16.gmra.mrb[236].mxu1 %v9294_v5  ;;  %v15167_v5 = vpop.f32.mrb[212].mxu0 }
 0xf2b   :  { %14913 = vmatprep.mubr.bf16.mxu1 %v9295_v42  ;;  %v10705_v42 = vpop.f32.mrb[213].mxu0 }
 0xf32   :  { %14914 = vmatmul.mubr.bf16.gmra.mrb[240].mxu1 %v9296_v37  ;;  %v15168_v37 = vpop.f32.mrb[214].mxu0 }
 0xf33   :  { %14917 = vmatprep.mubr.bf16.mxu1 %v9297_v33  ;;  %v18259_v33 = vpack.c.bf16 %v15168_v37, %v15167_v5  ;;  %v9786_v5 = vld [vmem:[#allocation3 + $0x588] sm:$0xff]  ;;  %v9788_v37 = vld [vmem:[#allocation3 + $0x598] sm:$0xff] }
 0xf3a   :  { %14918 = vmatmul.mubr.bf16.gmra.mrb[244].mxu1 %v9298_v24  ;;  %v9779_v24 = vld [vmem:[#allocation3 + $0x550] sm:$0xff] }
 0xf3b   :  { %14921 = vmatprep.mubr.bf16.mxu1 %v9299_v17  ;;  %v9781_v17 = vld [vmem:[#allocation3 + $0x560] sm:$0xff] }
 0xf42   :  { %14922 = vmatmul.mubr.bf16.gmra.mrb[248].mxu1 %v9300_v60 }
 0xf43   :  { %14973 = vmatprep.mubr.bf16.mxu1 %v9769_v4 }
 0xf4a   :  { %14974 = vmatmul.mubr.bf16.vlgmr.msra.gmra.mrb[252].mxu1 %v9770_v7 }
 0xf4b   :  { %14977 = vmatprep.mubr.bf16.mxu1 %v9771_v30  ;;  %15070 = vmatpush3.bf16.msra.mxu1 %v18239_v26  ;;  %v10708_v26 = vpop.f32.mrb[215].mxu0 }
 0xf4c   :  { %15071 = vmatprep.subr.bf16.mxu1 %v18237_v45  ;;  %v18261_v61 = vpack.c.bf16 %v10708_v26, %v10705_v42  ;;  %v9787_v42 = vld [vmem:[#allocation3 + $0x590] sm:$0xff]  ;;  %v9789_v26 = vld [vmem:[#allocation3 + $0x5a0] sm:$0xff] }
 0xf4f   :  { %15072 = vmatpush3.bf16.msra.mxu1 %v18237_v45  ;;  %v9775_v45 = vld [vmem:[#allocation3 + $0x530] sm:$0xff] }
 0xf50   :  { %15073 = vmatprep.subr.bf16.mxu1 %v18244_v21 }
 0xf52   :  { %14978 = vmatmul.mubr.bf16.gmra.mrb[0].mxu1 %v9772_v49  ;;  %v9783_v49 = vld [vmem:[#allocation3 + $0x570] sm:$0xff] }
 0xf53   :  { %14981 = vmatprep.mubr.bf16.mxu1 %v9773_v11  ;;  %15074 = vmatpush3.bf16.msra.mxu1 %v18244_v21  ;;  %v9777_v21 = vld [vmem:[#allocation3 + $0x540] sm:$0xff] }
 0xf54   :  { %15075 = vmatprep.subr.bf16.mxu1 %v18242_v0  ;;  %v9785_v11 = vld [vmem:[#allocation3 + $0x580] sm:$0xff] }
 0xf57   :  { %15076 = vmatpush3.bf16.msra.mxu1 %v18242_v0  ;;  %v9780_v0 = vld [vmem:[#allocation3 + $0x558] sm:$0xff] }
 0xf58   :  { %15077 = vmatprep.subr.bf16.mxu1 %v10305_v10 }
 0xf5a   :  { %14982 = vmatmul.mubr.bf16.gmra.mrb[4].mxu1 %v9774_v3 }
 0xf5b   :  { %14985 = vmatprep.mubr.bf16.mxu1 %v9775_v45  ;;  %15078 = vmatpush3.bf16.msra.mxu1 %v10305_v10  ;;  %v15171_v10 = vpop.f32.mrb[216].mxu0 }
 0xf5c   :  { %15079 = vmatprep.subr.bf16.mxu1 %v10306_v8  ;;  %v10721_v60 = vpop.f32.mrb[217].mxu0 }
 0xf5f   :  { %15080 = vmatpush3.bf16.msra.mxu1 %v10306_v8  ;;  %v15172_v8 = vpop.f32.mrb[218].mxu0 }
 0xf60   :  { %15081 = vmatprep.subr.bf16.mxu1 %v10307_v19  ;;  %v18265_v4 = vpack.c.bf16 %v15172_v8, %v15171_v10  ;;  %v10724_v7 = vpop.f32.mrb[219].mxu0  ;;  %v9792_v10 = vld [vmem:[#allocation3 + $0x5b8] sm:$0xff]  ;;  %v9794_v8 = vld [vmem:[#allocation3 + $0x5c8] sm:$0xff] }
 0xf61   :  { %v18267_v30 = vpack.c.bf16 %v10724_v7, %v10721_v60  ;;  %v15175_v3 = vpop.f32.mrb[220].mxu0  ;;  %v9793_v60 = vld [vmem:[#allocation3 + $0x5c0] sm:$0xff]  ;;  %v9795_v7 = vld [vmem:[#allocation3 + $0x5d0] sm:$0xff] }
 0xf62   :  { %14986 = vmatmul.mubr.bf16.gmra.mrb[8].mxu1 %v9776_v32  ;;  %v10737_v45 = vpop.f32.mrb[221].mxu0 }
 0xf63   :  { %14989 = vmatprep.mubr.bf16.mxu1 %v9777_v21  ;;  %15082 = vmatpush3.bf16.msra.mxu1 %v10307_v19  ;;  %v9782_v19 = vld [vmem:[#allocation3 + $0x568] sm:$0xff]  ;;  %v15176_v32 = vpop.f32.mrb[222].mxu0 }
 0xf64   :  { %15083 = vmatprep.subr.bf16.mxu1 %v10308_v46  ;;  %v10806_v21 = vpack.c.bf16 %v15176_v32, %v15175_v3  ;;  %v9798_v3 = vld [vmem:[#allocation3 + $0x5e8] sm:$0xff]  ;;  %v9800_v32 = vld [vmem:[#allocation3 + $0x5f8] sm:$0xff] }
 0xf67   :  { %15084 = vmatpush3.bf16.msra.mxu1 %v10308_v46  ;;  %v9784_v46 = vld [vmem:[#allocation3 + $0x578] sm:$0xff] }
 0xf68   :  { %15181 = vmatprep.subr.bf16.mxu1 %v18261_v61 }
 0xf6a   :  { %14990 = vmatmul.mubr.bf16.gmra.mrb[12].mxu1 %v9778_v2  ;;  %v10740_v2 = vpop.f32.mrb[223].mxu0 }
 0xf6b   :  { %14993 = vmatprep.mubr.bf16.mxu1 %v9779_v24  ;;  %v10805_v24 = vpack.c.bf16 %v10740_v2, %v10737_v45  ;;  %v9799_v45 = vld [vmem:[#allocation3 + $0x5f0] sm:$0xff]  ;;  %v10269_v2 = vld [vmem:[#allocation3 + $0x600] sm:$0xff] }
 0xf72   :  { %14994 = vmatmul.mubr.bf16.gmra.mrb[16].mxu1 %v9780_v0  ;;  %v9790_v0 = vld [vmem:[#allocation3 + $0x5a8] sm:$0xff] }
 0xf73   :  { %14997 = vmatprep.mubr.bf16.mxu1 %v9781_v17  ;;  %v9791_v17 = vld [vmem:[#allocation3 + $0x5b0] sm:$0xff] }
 0xf7a   :  { %14998 = vmatmul.mubr.bf16.gmra.mrb[20].mxu1 %v9782_v19  ;;  %v9796_v19 = vld [vmem:[#allocation3 + $0x5d8] sm:$0xff] }
 0xf7b   :  { %15001 = vmatprep.mubr.bf16.mxu1 %v9783_v49  ;;  %v9797_v49 = vld [vmem:[#allocation3 + $0x5e0] sm:$0xff] }
 0xf82   :  { %15002 = vmatmul.mubr.bf16.gmra.mrb[24].mxu1 %v9784_v46  ;;  %v15179_v46 = vpop.f32.mrb[224].mxu0 }
 0xf83   :  { %15005 = vmatprep.mubr.bf16.mxu1 %v9785_v11  ;;  %v10753_v11 = vpop.f32.mrb[225].mxu0 }
 0xf8a   :  { %15006 = vmatmul.mubr.bf16.gmra.mrb[28].mxu1 %v9786_v5  ;;  %v15180_v5 = vpop.f32.mrb[226].mxu0 }
 0xf8b   :  { %15009 = vmatprep.mubr.bf16.mxu1 %v9787_v42  ;;  %v10808_v42 = vpack.c.bf16 %v15180_v5, %v15179_v46  ;;  %v10274_v46 = vld [vmem:[#allocation3 + $0x628] sm:$0xff]  ;;  %v10277_v5 = vld [vmem:[#allocation3 + $0x640] sm:$0xff] }
 0xf92   :  { %15010 = vmatmul.mubr.bf16.gmra.mrb[224].mxu1 %v9788_v37  ;;  %v10756_v37 = vpop.f32.mrb[227].mxu0 }
 0xf93   :  { %15013 = vmatprep.mubr.bf16.mxu1 %v9789_v26  ;;  %v10807_v26 = vpack.c.bf16 %v10756_v37, %v10753_v11  ;;  %v10278_v37 = vld [vmem:[#allocation3 + $0x648] sm:$0xff] }
 0xf9a   :  { %15014 = vmatmul.mubr.bf16.gmra.mrb[228].mxu1 %v9790_v0  ;;  %v10270_v0 = vld [vmem:[#allocation3 + $0x608] sm:$0xff] }
 0xf9b   :  { %15017 = vmatprep.mubr.bf16.mxu1 %v9791_v17  ;;  %v10271_v17 = vld [vmem:[#allocation3 + $0x610] sm:$0xff] }
 0xfa2   :  { %15018 = vmatmul.mubr.bf16.gmra.mrb[232].mxu1 %v9792_v10  ;;  %v10272_v10 = vld [vmem:[#allocation3 + $0x618] sm:$0xff] }
 0xfa3   :  { %15021 = vmatprep.mubr.bf16.mxu1 %v9793_v60  ;;  %v10273_v60 = vld [vmem:[#allocation3 + $0x620] sm:$0xff] }
 0xfaa   :  { %15022 = vmatmul.mubr.bf16.gmra.mrb[236].mxu1 %v9794_v8 }
 0xfab   :  { %15025 = vmatprep.mubr.bf16.mxu1 %v9795_v7 }
 0xfb2   :  { %15026 = vmatmul.mubr.bf16.gmra.mrb[240].mxu1 %v9796_v19 }
 0xfb3   :  { %15029 = vmatprep.mubr.bf16.mxu1 %v9797_v49 }
 0xfba   :  { %15030 = vmatmul.mubr.bf16.gmra.mrb[244].mxu1 %v9798_v3  ;;  %v10279_v3 = vld [vmem:[#allocation3 + $0x650] sm:$0xff] }
 0xfbb   :  { %15033 = vmatprep.mubr.bf16.mxu1 %v9799_v45  ;;  %v10281_v45 = vld [vmem:[#allocation3 + $0x660] sm:$0xff] }
 0xfc2   :  { %15034 = vmatmul.mubr.bf16.gmra.mrb[248].mxu1 %v9800_v32 }
 0xfc3   :  { %15085 = vmatprep.mubr.bf16.mxu1 %v10269_v2 }
 0xfca   :  { %15086 = vmatmul.mubr.bf16.vlgmr.msra.gmra.mrb[252].mxu1 %v10270_v0  ;;  %v15279_v8 = vpop.f32.mrb[228].mxu0 }
 0xfcb   :  { %15089 = vmatprep.mubr.bf16.mxu1 %v10271_v17  ;;  %15182 = vmatpush3.bf16.msra.mxu1 %v18261_v61  ;;  %v11205_v7 = vpop.f32.mrb[229].mxu0 }
 0xfcc   :  { %15183 = vmatprep.subr.bf16.mxu1 %v18259_v33  ;;  %v15280_v19 = vpop.f32.mrb[230].mxu0 }
 0xfcd   :  { %v18275_v49 = vpack.c.bf16 %v15280_v19, %v15279_v8  ;;  %v11208_v61 = vpop.f32.mrb[231].mxu0  ;;  %v10286_v8 = vld [vmem:[#allocation3 + $0x688] sm:$0xff]  ;;  %v10288_v19 = vld [vmem:[#allocation3 + $0x698] sm:$0xff] }
 0xfce   :  { %v18278_v11 = vpack.c.bf16 %v11208_v61, %v11205_v7  ;;  %v10287_v7 = vld [vmem:[#allocation3 + $0x690] sm:$0xff]  ;;  %v10289_v61 = vld [vmem:[#allocation3 + $0x6a0] sm:$0xff] }
 0xfcf   :  { %15184 = vmatpush3.bf16.msra.mxu1 %v18259_v33  ;;  %v10275_v33 = vld [vmem:[#allocation3 + $0x630] sm:$0xff] }
 0xfd0   :  { %15185 = vmatprep.subr.bf16.mxu1 %v18267_v30 }
 0xfd2   :  { %15090 = vmatmul.mubr.bf16.gmra.mrb[0].mxu1 %v10272_v10  ;;  %v10283_v10 = vld [vmem:[#allocation3 + $0x670] sm:$0xff] }
 0xfd3   :  { %15093 = vmatprep.mubr.bf16.mxu1 %v10273_v60  ;;  %15186 = vmatpush3.bf16.msra.mxu1 %v18267_v30  ;;  %v10276_v30 = vld [vmem:[#allocation3 + $0x638] sm:$0xff]  ;;  %v10285_v60 = vld [vmem:[#allocation3 + $0x680] sm:$0xff] }
 0xfd4   :  { %15187 = vmatprep.subr.bf16.mxu1 %v18265_v4 }
 0xfd7   :  { %15188 = vmatpush3.bf16.msra.mxu1 %v18265_v4  ;;  %v10280_v4 = vld [vmem:[#allocation3 + $0x658] sm:$0xff] }
 0xfd8   :  { %15189 = vmatprep.subr.bf16.mxu1 %v10805_v24 }
 0xfda   :  { %15094 = vmatmul.mubr.bf16.gmra.mrb[4].mxu1 %v10274_v46 }
 0xfdb   :  { %15097 = vmatprep.mubr.bf16.mxu1 %v10275_v33  ;;  %15190 = vmatpush3.bf16.msra.mxu1 %v10805_v24  ;;  %v15283_v24 = vpop.f32.mrb[232].mxu0 }
 0xfdc   :  { %15191 = vmatprep.subr.bf16.mxu1 %v10806_v21  ;;  %v11221_v32 = vpop.f32.mrb[233].mxu0 }
 0xfdf   :  { %15192 = vmatpush3.bf16.msra.mxu1 %v10806_v21  ;;  %v15284_v21 = vpop.f32.mrb[234].mxu0 }
 0xfe0   :  { %15193 = vmatprep.subr.bf16.mxu1 %v10807_v26  ;;  %v18281_v2 = vpack.c.bf16 %v15284_v21, %v15283_v24  ;;  %v11224_v0 = vpop.f32.mrb[235].mxu0  ;;  %v10292_v24 = vld [vmem:[#allocation3 + $0x6b8] sm:$0xff]  ;;  %v10294_v21 = vld [vmem:[#allocation3 + $0x6c8] sm:$0xff] }
 0xfe1   :  { %v18283_v17 = vpack.c.bf16 %v11224_v0, %v11221_v32  ;;  %v15287_v46 = vpop.f32.mrb[236].mxu0  ;;  %v10293_v32 = vld [vmem:[#allocation3 + $0x6c0] sm:$0xff]  ;;  %v10295_v0 = vld [vmem:[#allocation3 + $0x6d0] sm:$0xff] }
 0xfe2   :  { %15098 = vmatmul.mubr.bf16.gmra.mrb[8].mxu1 %v10276_v30  ;;  %v11237_v33 = vpop.f32.mrb[237].mxu0 }
 0xfe3   :  { %15101 = vmatprep.mubr.bf16.mxu1 %v10277_v5  ;;  %15194 = vmatpush3.bf16.msra.mxu1 %v10807_v26  ;;  %v10282_v26 = vld [vmem:[#allocation3 + $0x668] sm:$0xff]  ;;  %v15288_v30 = vpop.f32.mrb[238].mxu0 }
 0xfe4   :  { %15195 = vmatprep.subr.bf16.mxu1 %v10808_v42  ;;  %v11306_v5 = vpack.c.bf16 %v15288_v30, %v15287_v46  ;;  %v10298_v46 = vld [vmem:[#allocation3 + $0x6e8] sm:$0xff]  ;;  %v10300_v30 = vld [vmem:[#allocation3 + $0x6f8] sm:$0xff] }
 0xfe7   :  { %15196 = vmatpush3.bf16.msra.mxu1 %v10808_v42  ;;  %v10284_v42 = vld [vmem:[#allocation3 + $0x678] sm:$0xff] }
 0xfe8   :  { %15293 = vmatprep.subr.bf16.mxu1 %v18278_v11 }
 0xfea   :  { %15102 = vmatmul.mubr.bf16.gmra.mrb[12].mxu1 %v10278_v37  ;;  %v11240_v37 = vpop.f32.mrb[239].mxu0 }
 0xfeb   :  { %15105 = vmatprep.mubr.bf16.mxu1 %v10279_v3  ;;  %v11305_v3 = vpack.c.bf16 %v11240_v37, %v11237_v33  ;;  %v10299_v33 = vld [vmem:[#allocation3 + $0x6f0] sm:$0xff]  ;;  %v10769_v37 = vld [vmem:[#allocation3 + $0x700] sm:$0xff] }
 0xff2   :  { %15106 = vmatmul.mubr.bf16.gmra.mrb[16].mxu1 %v10280_v4  ;;  %v10290_v4 = vld [vmem:[#allocation3 + $0x6a8] sm:$0xff] }
 0xff3   :  { %15109 = vmatprep.mubr.bf16.mxu1 %v10281_v45  ;;  %v10291_v45 = vld [vmem:[#allocation3 + $0x6b0] sm:$0xff] }
 0xffa   :  { %15110 = vmatmul.mubr.bf16.gmra.mrb[20].mxu1 %v10282_v26  ;;  %v10296_v26 = vld [vmem:[#allocation3 + $0x6d8] sm:$0xff] }
 0xffb   :  { %15113 = vmatprep.mubr.bf16.mxu1 %v10283_v10  ;;  %v10297_v10 = vld [vmem:[#allocation3 + $0x6e0] sm:$0xff] }
0x1002   :  { %15114 = vmatmul.mubr.bf16.gmra.mrb[24].mxu1 %v10284_v42  ;;  %v15291_v42 = vpop.f32.mrb[240].mxu0 }
0x1003   :  { %15117 = vmatprep.mubr.bf16.mxu1 %v10285_v60  ;;  %v11253_v60 = vpop.f32.mrb[241].mxu0 }
0x100a   :  { %15118 = vmatmul.mubr.bf16.gmra.mrb[28].mxu1 %v10286_v8  ;;  %v15292_v8 = vpop.f32.mrb[242].mxu0 }
0x100b   :  { %15121 = vmatprep.mubr.bf16.mxu1 %v10287_v7  ;;  %v11308_v7 = vpack.c.bf16 %v15292_v8, %v15291_v42  ;;  %v10782_v42 = vld [vmem:[#allocation3 + $0x768] sm:$0xff] }
0x100c   :  { %v10786_v8 = vld [vmem:[#allocation3 + $0x788] sm:$0xff] }
0x1012   :  { %15122 = vmatmul.mubr.bf16.gmra.mrb[224].mxu1 %v10288_v19  ;;  %v11256_v19 = vpop.f32.mrb[243].mxu0 }
0x1013   :  { %15125 = vmatprep.mubr.bf16.mxu1 %v10289_v61  ;;  %v11307_v61 = vpack.c.bf16 %v11256_v19, %v11253_v60  ;;  %v10785_v60 = vld [vmem:[#allocation3 + $0x780] sm:$0xff]  ;;  %v10787_v19 = vld [vmem:[#allocation3 + $0x790] sm:$0xff] }
0x101a   :  { %15126 = vmatmul.mubr.bf16.gmra.mrb[228].mxu1 %v10290_v4  ;;  %v10770_v4 = vld [vmem:[#allocation3 + $0x708] sm:$0xff] }
0x101b   :  { %15129 = vmatprep.mubr.bf16.mxu1 %v10291_v45  ;;  %v10771_v45 = vld [vmem:[#allocation3 + $0x710] sm:$0xff] }
0x1022   :  { %15130 = vmatmul.mubr.bf16.gmra.mrb[232].mxu1 %v10292_v24  ;;  %v10772_v24 = vld [vmem:[#allocation3 + $0x718] sm:$0xff] }
0x1023   :  { %15133 = vmatprep.mubr.bf16.mxu1 %v10293_v32  ;;  %v10773_v32 = vld [vmem:[#allocation3 + $0x720] sm:$0xff] }
0x102a   :  { %15134 = vmatmul.mubr.bf16.gmra.mrb[236].mxu1 %v10294_v21  ;;  %v10774_v21 = vld [vmem:[#allocation3 + $0x728] sm:$0xff] }
0x102b   :  { %15137 = vmatprep.mubr.bf16.mxu1 %v10295_v0  ;;  %v10775_v0 = vld [vmem:[#allocation3 + $0x730] sm:$0xff] }
0x1032   :  { %15138 = vmatmul.mubr.bf16.gmra.mrb[240].mxu1 %v10296_v26  ;;  %v10779_v26 = vld [vmem:[#allocation3 + $0x750] sm:$0xff] }
0x1033   :  { %15141 = vmatprep.mubr.bf16.mxu1 %v10297_v10  ;;  %v10781_v10 = vld [vmem:[#allocation3 + $0x760] sm:$0xff] }
0x103a   :  { %15142 = vmatmul.mubr.bf16.gmra.mrb[244].mxu1 %v10298_v46  ;;  %v10790_v46 = vld [vmem:[#allocation3 + $0x7a8] sm:$0xff] }
0x103b   :  { %15145 = vmatprep.mubr.bf16.mxu1 %v10299_v33  ;;  %v10791_v33 = vld [vmem:[#allocation3 + $0x7b0] sm:$0xff] }
0x1042   :  { %15146 = vmatmul.mubr.bf16.gmra.mrb[248].mxu1 %v10300_v30  ;;  %v10792_v30 = vld [vmem:[#allocation3 + $0x7b8] sm:$0xff] }
0x1043   :  { %15197 = vmatprep.mubr.bf16.mxu1 %v10769_v37  ;;  %v10793_v37 = vld [vmem:[#allocation3 + $0x7c0] sm:$0xff] }
0x104a   :  { %15198 = vmatmul.mubr.bf16.vlgmr.msra.gmra.mrb[252].mxu1 %v10770_v4  ;;  %v10794_v4 = vld [vmem:[#allocation3 + $0x7c8] sm:$0xff] }
0x104b   :  { %15201 = vmatprep.mubr.bf16.mxu1 %v10771_v45  ;;  %15294 = vmatpush3.bf16.msra.mxu1 %v18278_v11  ;;  %v10776_v11 = vld [vmem:[#allocation3 + $0x738] sm:$0xff]  ;;  %v10795_v45 = vld [vmem:[#allocation3 + $0x7d0] sm:$0xff] }
0x104c   :  { %15295 = vmatprep.subr.bf16.mxu1 %v18275_v49 }
0x104f   :  { %15296 = vmatpush3.bf16.msra.mxu1 %v18275_v49  ;;  %v10777_v49 = vld [vmem:[#allocation3 + $0x740] sm:$0xff] }
0x1050   :  { %15297 = vmatprep.subr.bf16.mxu1 %v18283_v17 }
0x1052   :  { %15202 = vmatmul.mubr.bf16.gmra.mrb[0].mxu1 %v10772_v24  ;;  %v10796_v24 = vld [vmem:[#allocation3 + $0x7d8] sm:$0xff] }
0x1053   :  { %15205 = vmatprep.mubr.bf16.mxu1 %v10773_v32  ;;  %15298 = vmatpush3.bf16.msra.mxu1 %v18283_v17  ;;  %v10778_v17 = vld [vmem:[#allocation3 + $0x748] sm:$0xff]  ;;  %v10797_v32 = vld [vmem:[#allocation3 + $0x7e0] sm:$0xff] }
0x1054   :  { %15299 = vmatprep.subr.bf16.mxu1 %v18281_v2 }
0x1057   :  { %15300 = vmatpush3.bf16.msra.mxu1 %v18281_v2  ;;  %v10780_v2 = vld [vmem:[#allocation3 + $0x758] sm:$0xff] }
0x1058   :  { %15301 = vmatprep.subr.bf16.mxu1 %v11305_v3 }
0x105a   :  { %15206 = vmatmul.mubr.bf16.gmra.mrb[4].mxu1 %v10774_v21  ;;  %v10798_v21 = vld [vmem:[#allocation3 + $0x7e8] sm:$0xff] }
0x105b   :  { %15209 = vmatprep.mubr.bf16.mxu1 %v10775_v0  ;;  %15302 = vmatpush3.bf16.msra.mxu1 %v11305_v3  ;;  %v10783_v3 = vld [vmem:[#allocation3 + $0x770] sm:$0xff] }
0x105c   :  { %15303 = vmatprep.subr.bf16.mxu1 %v11306_v5  ;;  %v10799_v0 = vld [vmem:[#allocation3 + $0x7f0] sm:$0xff] }
0x105f   :  { %15304 = vmatpush3.bf16.msra.mxu1 %v11306_v5  ;;  %v10784_v5 = vld [vmem:[#allocation3 + $0x778] sm:$0xff] }
0x1060   :  { %15305 = vmatprep.subr.bf16.mxu1 %v11307_v61 }
0x1062   :  { %15210 = vmatmul.mubr.bf16.gmra.mrb[8].mxu1 %v10776_v11  ;;  %v10800_v11 = vld [vmem:[#allocation3 + $0x7f8] sm:$0xff] }
0x1063   :  { %15213 = vmatprep.mubr.bf16.mxu1 %v10777_v49  ;;  %15306 = vmatpush3.bf16.msra.mxu1 %v11307_v61  ;;  %v10789_v61 = vld [vmem:[#allocation3 + $0x7a0] sm:$0xff] }
0x1064   :  { %15307 = vmatprep.subr.bf16.mxu1 %v11308_v7  ;;  %v11269_v49 = vld [vmem:[#allocation3 + $0x800] sm:$0xff] }
0x1067   :  { %15308 = vmatpush3.bf16.msra.mxu1 %v11308_v7  ;;  %v10788_v7 = vld [vmem:[#allocation3 + $0x798] sm:$0xff] }
0x106a   :  { %15214 = vmatmul.mubr.bf16.gmra.mrb[12].mxu1 %v10778_v17  ;;  %v11270_v17 = vld [vmem:[#allocation3 + $0x808] sm:$0xff] }
0x106b   :  { %15217 = vmatprep.mubr.bf16.mxu1 %v10779_v26  ;;  %v11271_v26 = vld [vmem:[#allocation3 + $0x810] sm:$0xff] }
0x1072   :  { %15218 = vmatmul.mubr.bf16.gmra.mrb[16].mxu1 %v10780_v2  ;;  %v11272_v2 = vld [vmem:[#allocation3 + $0x818] sm:$0xff] }
0x1073   :  { %15221 = vmatprep.mubr.bf16.mxu1 %v10781_v10  ;;  %v11273_v10 = vld [vmem:[#allocation3 + $0x820] sm:$0xff] }
0x107a   :  { %15222 = vmatmul.mubr.bf16.gmra.mrb[20].mxu1 %v10782_v42  ;;  %v11274_v42 = vld [vmem:[#allocation3 + $0x828] sm:$0xff] }
0x107b   :  { %15225 = vmatprep.mubr.bf16.mxu1 %v10783_v3  ;;  %v11275_v3 = vld [vmem:[#allocation3 + $0x830] sm:$0xff] }
0x1082   :  { %15226 = vmatmul.mubr.bf16.gmra.mrb[24].mxu1 %v10784_v5  ;;  %v11276_v5 = vld [vmem:[#allocation3 + $0x838] sm:$0xff] }
0x1083   :  { %15229 = vmatprep.mubr.bf16.mxu1 %v10785_v60  ;;  %v11277_v60 = vld [vmem:[#allocation3 + $0x840] sm:$0xff] }
0x108a   :  { %15230 = vmatmul.mubr.bf16.gmra.mrb[28].mxu1 %v10786_v8  ;;  %v11278_v8 = vld [vmem:[#allocation3 + $0x848] sm:$0xff] }
0x108b   :  { %15233 = vmatprep.mubr.bf16.mxu1 %v10787_v19  ;;  %v11279_v19 = vld [vmem:[#allocation3 + $0x850] sm:$0xff] }
0x1092   :  { %15234 = vmatmul.mubr.bf16.gmra.mrb[224].mxu1 %v10788_v7  ;;  %v11280_v7 = vld [vmem:[#allocation3 + $0x858] sm:$0xff] }
0x1093   :  { %15237 = vmatprep.mubr.bf16.mxu1 %v10789_v61  ;;  %v11281_v61 = vld [vmem:[#allocation3 + $0x860] sm:$0xff] }
0x109a   :  { %15238 = vmatmul.mubr.bf16.gmra.mrb[228].mxu1 %v10790_v46  ;;  %v11282_v46 = vld [vmem:[#allocation3 + $0x868] sm:$0xff] }
0x109b   :  { %15241 = vmatprep.mubr.bf16.mxu1 %v10791_v33  ;;  %v11283_v33 = vld [vmem:[#allocation3 + $0x870] sm:$0xff] }
0x10a2   :  { %15242 = vmatmul.mubr.bf16.gmra.mrb[232].mxu1 %v10792_v30  ;;  %v11284_v30 = vld [vmem:[#allocation3 + $0x878] sm:$0xff] }
0x10a3   :  { %15245 = vmatprep.mubr.bf16.mxu1 %v10793_v37  ;;  %v11285_v37 = vld [vmem:[#allocation3 + $0x880] sm:$0xff] }
0x10aa   :  { %15246 = vmatmul.mubr.bf16.gmra.mrb[236].mxu1 %v10794_v4  ;;  %v11286_v4 = vld [vmem:[#allocation3 + $0x888] sm:$0xff] }
0x10ab   :  { %15249 = vmatprep.mubr.bf16.mxu1 %v10795_v45  ;;  %v11287_v45 = vld [vmem:[#allocation3 + $0x890] sm:$0xff] }
0x10b2   :  { %15250 = vmatmul.mubr.bf16.gmra.mrb[240].mxu1 %v10796_v24  ;;  %v11288_v24 = vld [vmem:[#allocation3 + $0x898] sm:$0xff] }
0x10b3   :  { %15253 = vmatprep.mubr.bf16.mxu1 %v10797_v32  ;;  %v11289_v32 = vld [vmem:[#allocation3 + $0x8a0] sm:$0xff] }
0x10ba   :  { %15254 = vmatmul.mubr.bf16.gmra.mrb[244].mxu1 %v10798_v21  ;;  %v11290_v21 = vld [vmem:[#allocation3 + $0x8a8] sm:$0xff] }
0x10bb   :  { %15257 = vmatprep.mubr.bf16.mxu1 %v10799_v0  ;;  %v11291_v0 = vld [vmem:[#allocation3 + $0x8b0] sm:$0xff] }
0x10c2   :  { %15258 = vmatmul.mubr.bf16.gmra.mrb[248].mxu1 %v10800_v11  ;;  %v11292_v11 = vld [vmem:[#allocation3 + $0x8b8] sm:$0xff] }
0x10c3   :  { %15309 = vmatprep.mubr.bf16.mxu1 %v11269_v49  ;;  %v11293_v49 = vld [vmem:[#allocation3 + $0x8c0] sm:$0xff] }
0x10ca   :  { %15310 = vmatmul.mubr.bf16.vlgmr.msra.gmra.mrb[252].mxu1 %v11270_v17  ;;  %v11294_v17 = vld [vmem:[#allocation3 + $0x8c8] sm:$0xff] }
0x10cb   :  { %15313 = vmatprep.mubr.bf16.mxu1 %v11271_v26  ;;  %v11295_v26 = vld [vmem:[#allocation3 + $0x8d0] sm:$0xff] }
0x10d2   :  { %15314 = vmatmul.mubr.bf16.gmra.mrb[0].mxu1 %v11272_v2  ;;  %v11296_v2 = vld [vmem:[#allocation3 + $0x8d8] sm:$0xff] }
0x10d3   :  { %15317 = vmatprep.mubr.bf16.mxu1 %v11273_v10  ;;  %v11297_v10 = vld [vmem:[#allocation3 + $0x8e0] sm:$0xff] }
0x10da   :  { %15318 = vmatmul.mubr.bf16.gmra.mrb[4].mxu1 %v11274_v42  ;;  %v11298_v42 = vld [vmem:[#allocation3 + $0x8e8] sm:$0xff] }
0x10db   :  { %15321 = vmatprep.mubr.bf16.mxu1 %v11275_v3  ;;  %v11299_v3 = vld [vmem:[#allocation3 + $0x8f0] sm:$0xff] }
0x10e2   :  { %15322 = vmatmul.mubr.bf16.gmra.mrb[8].mxu1 %v11276_v5  ;;  %v11300_v5 = vld [vmem:[#allocation3 + $0x8f8] sm:$0xff] }
0x10e3   :  { %15325 = vmatprep.mubr.bf16.mxu1 %v11277_v60 }
0x10ea   :  { %15326 = vmatmul.mubr.bf16.gmra.mrb[12].mxu1 %v11278_v8  ;;  %v18292_v8 = vld [vmem:[#allocation24] ss:$0 sm:$0xff] }
0x10eb   :  { %15329 = vmatprep.mubr.bf16.mxu1 %v11279_v19 }
0x10f2   :  { %15330 = vmatmul.mubr.bf16.gmra.mrb[16].mxu1 %v11280_v7 }
0x10f3   :  { %15333 = vmatprep.mubr.bf16.mxu1 %v11281_v61 }
0x10fa   :  { %15334 = vmatmul.mubr.bf16.gmra.mrb[20].mxu1 %v11282_v46 }
0x10fb   :  { %15337 = vmatprep.mubr.bf16.mxu1 %v11283_v33 }
0x1102   :  { %15338 = vmatmul.mubr.bf16.gmra.mrb[24].mxu1 %v11284_v30 }
0x1103   :  { %15341 = vmatprep.mubr.bf16.mxu1 %v11285_v37 }
0x110a   :  { %15342 = vmatmul.mubr.bf16.gmra.mrb[28].mxu1 %v11286_v4 }
0x110b   :  { %15345 = vmatprep.mubr.bf16.mxu1 %v11287_v45 }
0x1112   :  { %15346 = vmatmul.mubr.bf16.gmra.mrb[224].mxu1 %v11288_v24 }
0x1113   :  { %15349 = vmatprep.mubr.bf16.mxu1 %v11289_v32 }
0x111a   :  { %15350 = vmatmul.mubr.bf16.gmra.mrb[228].mxu1 %v11290_v21 }
0x111b   :  { %15353 = vmatprep.mubr.bf16.mxu1 %v11291_v0 }
0x1122   :  { %15354 = vmatmul.mubr.bf16.gmra.mrb[232].mxu1 %v11292_v11 }
0x1123   :  { %15357 = vmatprep.mubr.bf16.mxu1 %v11293_v49 }
0x112a   :  { %15358 = vmatmul.mubr.bf16.gmra.mrb[236].mxu1 %v11294_v17 }
0x112b   :  { %15361 = vmatprep.mubr.bf16.mxu1 %v11295_v26 }
0x1132   :  { %15362 = vmatmul.mubr.bf16.gmra.mrb[240].mxu1 %v11296_v2 }
0x1133   :  { %15365 = vmatprep.mubr.bf16.mxu1 %v11297_v10 }
0x113a   :  { %15366 = vmatmul.mubr.bf16.gmra.mrb[244].mxu1 %v11298_v42 }
0x113b   :  { %15369 = vmatprep.mubr.bf16.mxu1 %v11299_v3 }
0x1142   :  { %15370 = vmatmul.mubr.bf16.gmra.mrb[248].mxu1 %v11300_v5 }
0x119d   :  { %v15311_v60 = vpop.f32.mrb[252].mxu1 }
0x119e   :  { %v15389_v19 = vadd.f32 %v15311_v60, %v18157_v29  ;;  %v11343_v7 = vpop.f32.mrb[253].mxu1 }
0x119f   :  { %v15390_v61 = vadd.f32 %v11343_v7, %v18159_v6  ;;  %v15312_v46 = vpop.f32.mrb[254].mxu1 }
0x11a0   :  { %v11671_v33 = vadd.f32 %v15389_v19, %v18292_v8  ;;  %v15391_v30 = vadd.f32 %v15312_v46, %v18161_v16  ;;  %v11346_v37 = vpop.f32.mrb[255].mxu1 }
0x11a1   :  { %v11669_v4 = vadd.f32 %v15390_v61, %v18292_v8  ;;  %v15392_v45 = vadd.f32 %v11346_v37, %v18163_v39 }
0x11a2   :  { %16479 = vtanh.f32 %v11671_v33  ;;  %v11672_v24 = vadd.f32 %v15391_v30, %v18292_v8 }
0x11a3   :  { %16481 = vtanh.f32 %v11669_v4  ;;  %v11670_v32 = vadd.f32 %v15392_v45, %v18292_v8 }
0x11a4   :  { %16483 = vtanh.f32 %v11672_v24 }
0x11a5   :  { %16485 = vtanh.f32 %v11670_v32  ;;  %v15315_v29 = vpop.f32.mrb[0].mxu1 }
0x11a6   :  { %v15393_v6 = vadd.f32 %v15315_v29, %v18165_v50  ;;  %v11359_v21 = vpop.f32.mrb[1].mxu1 }
0x11a7   :  { %v15394_v0 = vadd.f32 %v11359_v21, %v18167_v51  ;;  %v15316_v16 = vpop.f32.mrb[2].mxu1 }
0x11a8   :  { %v11675_v11 = vadd.f32 %v15393_v6, %v18292_v8  ;;  %v15395_v49 = vadd.f32 %v15316_v16, %v18169_v52  ;;  %v11362_v39 = vpop.f32.mrb[3].mxu1 }
0x11a9   :  { %v11673_v17 = vadd.f32 %v15394_v0, %v18292_v8  ;;  %v15396_v26 = vadd.f32 %v11362_v39, %v18171_v53 }
0x11aa   :  { %16487 = vtanh.f32 %v11675_v11  ;;  %v11676_v2 = vadd.f32 %v15395_v49, %v18292_v8 }
0x11ab   :  { %16489 = vtanh.f32 %v11673_v17  ;;  %v11674_v10 = vadd.f32 %v15396_v26, %v18292_v8 }
0x11ac   :  { %v16480_v50 = vpop.eup %16479  ;;  %16491 = vtanh.f32 %v11676_v2 }
0x11ad   :  { %v16482_v42 = vpop.eup %16481  ;;  %11799 = vst [vmem:[%s18660_s3 + $0x10] sm:$0xff] %v16480_v50  ;;  %16493 = vtanh.f32 %v11674_v10  ;;  %v15319_v51 = vpop.f32.mrb[4].mxu1 }
0x11ae   :  { %v16484_v52 = vpop.eup %16483  ;;  %11797 = vst [vmem:[%s18660_s3] sm:$0xff] %v16482_v42  ;;  %v15397_v53 = vadd.f32 %v15319_v51, %v18173_v41  ;;  %v11375_v3 = vpop.f32.mrb[5].mxu1 }
0x11af   :  { %v16486_v5 = vpop.eup %16485  ;;  %11800 = vst [vmem:[%s18660_s3 + $0x18] sm:$0xff] %v16484_v52  ;;  %v15398_v60 = vadd.f32 %v11375_v3, %v18175_v56  ;;  %v15320_v19 = vpop.f32.mrb[6].mxu1 }
0x11b0   :  { %11798 = vst [vmem:[%s18660_s3 + $0x8] sm:$0xff] %v16486_v5  ;;  %v11679_v7 = vadd.f32 %v15397_v53, %v18292_v8  ;;  %v15399_v61 = vadd.f32 %v15320_v19, %v18177_v9  ;;  %v11378_v46 = vpop.f32.mrb[7].mxu1 }
0x11b1   :  { %v11677_v41 = vadd.f32 %v15398_v60, %v18292_v8  ;;  %v15400_v33 = vadd.f32 %v11378_v46, %v18179_v57 }
0x11b2   :  { %16495 = vtanh.f32 %v11679_v7  ;;  %v11680_v30 = vadd.f32 %v15399_v61, %v18292_v8 }
0x11b3   :  { %16497 = vtanh.f32 %v11677_v41  ;;  %v11678_v56 = vadd.f32 %v15400_v33, %v18292_v8 }
0x11b4   :  { %v16488_v37 = vpop.eup %16487  ;;  %16499 = vtanh.f32 %v11680_v30 }
0x11b5   :  { %v16490_v4 = vpop.eup %16489  ;;  %11803 = vst [vmem:[%s18660_s3 + $0x30] sm:$0xff] %v16488_v37  ;;  %16501 = vtanh.f32 %v11678_v56  ;;  %v15323_v9 = vpop.f32.mrb[8].mxu1 }
0x11b6   :  { %v16492_v45 = vpop.eup %16491  ;;  %11801 = vst [vmem:[%s18660_s3 + $0x20] sm:$0xff] %v16490_v4  ;;  %v15401_v57 = vadd.f32 %v15323_v9, %v18181_v13  ;;  %v11391_v24 = vpop.f32.mrb[9].mxu1 }
0x11b7   :  { %v16494_v32 = vpop.eup %16493  ;;  %11804 = vst [vmem:[%s18660_s3 + $0x38] sm:$0xff] %v16492_v45  ;;  %v15402_v29 = vadd.f32 %v11391_v24, %v18183_v14  ;;  %v15324_v6 = vpop.f32.mrb[10].mxu1 }
0x11b8   :  { %11802 = vst [vmem:[%s18660_s3 + $0x28] sm:$0xff] %v16494_v32  ;;  %v11683_v21 = vadd.f32 %v15401_v57, %v18292_v8  ;;  %v15403_v0 = vadd.f32 %v15324_v6, %v18185_v22  ;;  %v11394_v16 = vpop.f32.mrb[11].mxu1 }
0x11b9   :  { %v11681_v13 = vadd.f32 %v15402_v29, %v18292_v8  ;;  %v15404_v11 = vadd.f32 %v11394_v16, %v18187_v15 }
0x11ba   :  { %16503 = vtanh.f32 %v11683_v21  ;;  %v11684_v49 = vadd.f32 %v15403_v0, %v18292_v8 }
0x11bb   :  { %16505 = vtanh.f32 %v11681_v13  ;;  %v11682_v14 = vadd.f32 %v15404_v11, %v18292_v8 }
0x11bc   :  { %v16496_v39 = vpop.eup %16495  ;;  %16507 = vtanh.f32 %v11684_v49 }
0x11bd   :  { %v16498_v17 = vpop.eup %16497  ;;  %11807 = vst [vmem:[%s18660_s3 + $0x50] sm:$0xff] %v16496_v39  ;;  %16509 = vtanh.f32 %v11682_v14  ;;  %v15327_v22 = vpop.f32.mrb[12].mxu1 }
0x11be   :  { %v16500_v26 = vpop.eup %16499  ;;  %11805 = vst [vmem:[%s18660_s3 + $0x40] sm:$0xff] %v16498_v17  ;;  %v15405_v15 = vadd.f32 %v15327_v22, %v18189_v18  ;;  %v11407_v2 = vpop.f32.mrb[13].mxu1 }
0x11bf   :  { %v16502_v10 = vpop.eup %16501  ;;  %11808 = vst [vmem:[%s18660_s3 + $0x58] sm:$0xff] %v16500_v26  ;;  %v15406_v50 = vadd.f32 %v11407_v2, %v18191_v20  ;;  %v15328_v42 = vpop.f32.mrb[14].mxu1 }
0x11c0   :  { %11806 = vst [vmem:[%s18660_s3 + $0x48] sm:$0xff] %v16502_v10  ;;  %v11687_v51 = vadd.f32 %v15405_v15, %v18292_v8  ;;  %v15407_v52 = vadd.f32 %v15328_v42, %v18193_v27  ;;  %v11410_v53 = vpop.f32.mrb[15].mxu1 }
0x11c1   :  { %v11685_v18 = vadd.f32 %v15406_v50, %v18292_v8  ;;  %v15408_v3 = vadd.f32 %v11410_v53, %v18195_v25 }
0x11c2   :  { %16511 = vtanh.f32 %v11687_v51  ;;  %v11688_v5 = vadd.f32 %v15407_v52, %v18292_v8 }
0x11c3   :  { %16513 = vtanh.f32 %v11685_v18  ;;  %v11686_v20 = vadd.f32 %v15408_v3, %v18292_v8 }
0x11c4   :  { %v16504_v60 = vpop.eup %16503  ;;  %16515 = vtanh.f32 %v11688_v5 }
0x11c5   :  { %v16506_v19 = vpop.eup %16505  ;;  %11811 = vst [vmem:[%s18660_s3 + $0x70] sm:$0xff] %v16504_v60  ;;  %16517 = vtanh.f32 %v11686_v20  ;;  %v15331_v27 = vpop.f32.mrb[16].mxu1 }
0x11c6   :  { %v16508_v7 = vpop.eup %16507  ;;  %11809 = vst [vmem:[%s18660_s3 + $0x60] sm:$0xff] %v16506_v19  ;;  %v15409_v25 = vadd.f32 %v15331_v27, %v18199_v23  ;;  %v11423_v61 = vpop.f32.mrb[17].mxu1 }
0x11c7   :  { %v16510_v46 = vpop.eup %16509  ;;  %11812 = vst [vmem:[%s18660_s3 + $0x78] sm:$0xff] %v16508_v7  ;;  %v15410_v41 = vadd.f32 %v11423_v61, %v18201_v44  ;;  %v15332_v33 = vpop.f32.mrb[18].mxu1 }
0x11c8   :  { %11810 = vst [vmem:[%s18660_s3 + $0x68] sm:$0xff] %v16510_v46  ;;  %v11691_v30 = vadd.f32 %v15409_v25, %v18292_v8  ;;  %v15411_v56 = vadd.f32 %v15332_v33, %v18203_v48  ;;  %v11426_v37 = vpop.f32.mrb[19].mxu1 }
0x11c9   :  { %v11689_v23 = vadd.f32 %v15410_v41, %v18292_v8  ;;  %v15412_v4 = vadd.f32 %v11426_v37, %v18205_v54 }
0x11ca   :  { %16519 = vtanh.f32 %v11691_v30  ;;  %v11692_v9 = vadd.f32 %v15411_v56, %v18292_v8 }
0x11cb   :  { %16521 = vtanh.f32 %v11689_v23  ;;  %v11690_v44 = vadd.f32 %v15412_v4, %v18292_v8 }
0x11cc   :  { %v16512_v45 = vpop.eup %16511  ;;  %16523 = vtanh.f32 %v11692_v9 }
0x11cd   :  { %v16514_v57 = vpop.eup %16513  ;;  %11815 = vst [vmem:[%s18660_s3 + $0x90] sm:$0xff] %v16512_v45  ;;  %16525 = vtanh.f32 %v11690_v44  ;;  %v15335_v48 = vpop.f32.mrb[20].mxu1 }
0x11ce   :  { %v16516_v24 = vpop.eup %16515  ;;  %11813 = vst [vmem:[%s18660_s3 + $0x80] sm:$0xff] %v16514_v57  ;;  %v15413_v54 = vadd.f32 %v15335_v48, %v18209_v55  ;;  %v11439_v32 = vpop.f32.mrb[21].mxu1 }
0x11cf   :  { %v16518_v29 = vpop.eup %16517  ;;  %11816 = vst [vmem:[%s18660_s3 + $0x98] sm:$0xff] %v16516_v24  ;;  %v15414_v6 = vadd.f32 %v11439_v32, %v18211_v58  ;;  %v15336_v21 = vpop.f32.mrb[22].mxu1 }
0x11d0   :  { %11814 = vst [vmem:[%s18660_s3 + $0x88] sm:$0xff] %v16518_v29  ;;  %v11695_v0 = vadd.f32 %v15413_v54, %v18292_v8  ;;  %v15415_v16 = vadd.f32 %v15336_v21, %v18213_v59  ;;  %v11442_v13 = vpop.f32.mrb[23].mxu1 }
0x11d1   :  { %v11693_v55 = vadd.f32 %v15414_v6, %v18292_v8  ;;  %v15416_v11 = vadd.f32 %v11442_v13, %v18215_v43 }
0x11d2   :  { %16527 = vtanh.f32 %v11695_v0  ;;  %v11696_v49 = vadd.f32 %v15415_v16, %v18292_v8  ;;  %v18662_v0 = vld [vmem:[#allocation41_spill] sm:$0xff] }
0x11d3   :  { %16529 = vtanh.f32 %v11693_v55  ;;  %v11694_v58 = vadd.f32 %v15416_v11, %v18292_v8  ;;  %v18663_v11 = vld [vmem:[#allocation42_spill] sm:$0xff] }
0x11d4   :  { %v16520_v14 = vpop.eup %16519  ;;  %16531 = vtanh.f32 %v11696_v49 }
0x11d5   :  { %v16522_v39 = vpop.eup %16521  ;;  %11819 = vst [vmem:[%s18660_s3 + $0xb0] sm:$0xff] %v16520_v14  ;;  %16533 = vtanh.f32 %v11694_v58  ;;  %v15339_v59 = vpop.f32.mrb[24].mxu1 }
0x11d6   :  { %v16524_v17 = vpop.eup %16523  ;;  %11817 = vst [vmem:[%s18660_s3 + $0xa0] sm:$0xff] %v16522_v39  ;;  %v15417_v43 = vadd.f32 %v15339_v59, %v18219_v35  ;;  %v11455_v22 = vpop.f32.mrb[25].mxu1  ;;  %v18664_v39 = vld [vmem:[#allocation43_spill] sm:$0xff] }
0x11d7   :  { %v16526_v26 = vpop.eup %16525  ;;  %11820 = vst [vmem:[%s18660_s3 + $0xb8] sm:$0xff] %v16524_v17  ;;  %v15418_v15 = vadd.f32 %v11455_v22, %v18221_v34  ;;  %v15340_v2 = vpop.f32.mrb[26].mxu1 }
0x11d8   :  { %11818 = vst [vmem:[%s18660_s3 + $0xa8] sm:$0xff] %v16526_v26  ;;  %v11699_v10 = vadd.f32 %v15417_v43, %v18292_v8  ;;  %v15419_v50 = vadd.f32 %v15340_v2, %v18223_v1  ;;  %v11458_v42 = vpop.f32.mrb[27].mxu1 }
0x11d9   :  { %v11697_v35 = vadd.f32 %v15418_v15, %v18292_v8  ;;  %v15420_v51 = vadd.f32 %v11458_v42, %v18225_v63 }
0x11da   :  { %16535 = vtanh.f32 %v11699_v10  ;;  %v11700_v52 = vadd.f32 %v15419_v50, %v18292_v8  ;;  %v18665_v10 = vld [vmem:[#allocation44_spill] sm:$0xff] }
0x11db   :  { %16537 = vtanh.f32 %v11697_v35  ;;  %v11698_v34 = vadd.f32 %v15420_v51, %v18292_v8  ;;  %v18666_v51 = vld [vmem:[#allocation45_spill] sm:$0xff] }
0x11dc   :  { %v16528_v53 = vpop.eup %16527  ;;  %16539 = vtanh.f32 %v11700_v52 }
0x11dd   :  { %v16530_v18 = vpop.eup %16529  ;;  %11823 = vst [vmem:[%s18660_s3 + $0xd0] sm:$0xff] %v16528_v53  ;;  %16541 = vtanh.f32 %v11698_v34  ;;  %v15343_v1 = vpop.f32.mrb[28].mxu1 }
0x11de   :  { %v16532_v3 = vpop.eup %16531  ;;  %11821 = vst [vmem:[%s18660_s3 + $0xc0] sm:$0xff] %v16530_v18  ;;  %v15421_v63 = vadd.f32 %v15343_v1, %v18229_v62  ;;  %v11471_v5 = vpop.f32.mrb[29].mxu1  ;;  %v18667_v18 = vld [vmem:[#allocation46_spill] sm:$0xff] }
0x11df   :  { %v16534_v20 = vpop.eup %16533  ;;  %11824 = vst [vmem:[%s18660_s3 + $0xd8] sm:$0xff] %v16532_v3  ;;  %v15422_v60 = vadd.f32 %v11471_v5, %v18231_v40  ;;  %v15344_v19 = vpop.f32.mrb[30].mxu1  ;;  %v18668_v5 = vld [vmem:[#allocation47_spill] sm:$0xff] }
0x11e0   :  { %11822 = vst [vmem:[%s18660_s3 + $0xc8] sm:$0xff] %v16534_v20  ;;  %v11703_v27 = vadd.f32 %v15421_v63, %v18292_v8  ;;  %v15423_v7 = vadd.f32 %v15344_v19, %v18233_v38  ;;  %v11474_v25 = vpop.f32.mrb[31].mxu1 }
0x11e1   :  { %v11701_v62 = vadd.f32 %v15422_v60, %v18292_v8  ;;  %v15424_v61 = vadd.f32 %v11474_v25, %v18235_v47 }
0x11e2   :  { %16543 = vtanh.f32 %v11703_v27  ;;  %v11704_v46 = vadd.f32 %v15423_v7, %v18292_v8 }
0x11e3   :  { %16545 = vtanh.f32 %v11701_v62  ;;  %v11702_v40 = vadd.f32 %v15424_v61, %v18292_v8  ;;  %v18669_v61 = vld [vmem:[#allocation48_spill] sm:$0xff] }
0x11e4   :  { %v16536_v41 = vpop.eup %16535  ;;  %16547 = vtanh.f32 %v11704_v46 }
0x11e5   :  { %v16538_v33 = vpop.eup %16537  ;;  %11827 = vst [vmem:[%s18660_s3 + $0xf0] sm:$0xff] %v16536_v41  ;;  %16549 = vtanh.f32 %v11702_v40  ;;  %v15347_v38 = vpop.f32.mrb[224].mxu1 }
0x11e6   :  { %v16540_v30 = vpop.eup %16539  ;;  %11825 = vst [vmem:[%s18660_s3 + $0xe0] sm:$0xff] %v16538_v33  ;;  %v15425_v47 = vadd.f32 %v15347_v38, %v18076_v12  ;;  %v11487_v56 = vpop.f32.mrb[225].mxu1  ;;  %v18670_v33 = vld [vmem:[#allocation49_spill] sm:$0xff] }
0x11e7   :  { %v16542_v37 = vpop.eup %16541  ;;  %11828 = vst [vmem:[%s18660_s3 + $0xf8] sm:$0xff] %v16540_v30  ;;  %v15426_v23 = vadd.f32 %v11487_v56, %v18078_v31  ;;  %v15348_v4 = vpop.f32.mrb[226].mxu1  ;;  %v18671_v56 = vld [vmem:[#allocation50_spill] sm:$0xff] }
0x11e8   :  { %11826 = vst [vmem:[%s18660_s3 + $0xe8] sm:$0xff] %v16542_v37  ;;  %v11707_v9 = vadd.f32 %v15425_v47, %v18292_v8  ;;  %v15427_v44 = vadd.f32 %v15348_v4, %v18080_v36  ;;  %v11490_v45 = vpop.f32.mrb[227].mxu1 }
0x11e9   :  { %v11705_v12 = vadd.f32 %v15426_v23, %v18292_v8  ;;  %v15428_v57 = vadd.f32 %v11490_v45, %v18082_v28  ;;  %v18661_v28 = vld [vmem:[#allocation40_spill] sm:$0xff] }
0x11ea   :  { %16551 = vtanh.f32 %v11707_v9  ;;  %v11708_v48 = vadd.f32 %v15427_v44, %v18292_v8  ;;  %v18672_v9 = vld [vmem:[#allocation51_spill] sm:$0xff] }
0x11eb   :  { %16553 = vtanh.f32 %v11705_v12  ;;  %v11706_v31 = vadd.f32 %v15428_v57, %v18292_v8 }
0x11ec   :  { %v16544_v24 = vpop.eup %16543  ;;  %16555 = vtanh.f32 %v11708_v48 }
0x11ed   :  { %v16546_v54 = vpop.eup %16545  ;;  %11831 = vst [vmem:[%s18660_s3 + $0x110] sm:$0xff] %v16544_v24  ;;  %16557 = vtanh.f32 %v11706_v31  ;;  %v15351_v36 = vpop.f32.mrb[228].mxu1 }
0x11ee   :  { %v16548_v32 = vpop.eup %16547  ;;  %11829 = vst [vmem:[%s18660_s3 + $0x100] sm:$0xff] %v16546_v54  ;;  %v15429_v29 = vadd.f32 %v15351_v36, %v18661_v28  ;;  %v11503_v6 = vpop.f32.mrb[229].mxu1  ;;  %v18673_v54 = vld [vmem:[#allocation52_spill] sm:$0xff] }
0x11ef   :  { %v16550_v21 = vpop.eup %16549  ;;  %11832 = vst [vmem:[%s18660_s3 + $0x118] sm:$0xff] %v16548_v32  ;;  %v15430_v16 = vadd.f32 %v11503_v6, %v18662_v0  ;;  %v15352_v13 = vpop.f32.mrb[230].mxu1 }
0x11f0   :  { %11830 = vst [vmem:[%s18660_s3 + $0x108] sm:$0xff] %v16550_v21  ;;  %v11711_v55 = vadd.f32 %v15429_v29, %v18292_v8  ;;  %v15431_v49 = vadd.f32 %v15352_v13, %v18663_v11  ;;  %v11506_v58 = vpop.f32.mrb[231].mxu1  ;;  %v18674_v29 = vld [vmem:[#allocation53_spill] sm:$0xff] }
0x11f1   :  { %v11709_v14 = vadd.f32 %v15430_v16, %v18292_v8  ;;  %v15432_v59 = vadd.f32 %v11506_v58, %v18664_v39  ;;  %v18675_v16 = vld [vmem:[#allocation54_spill] sm:$0xff] }
0x11f2   :  { %16559 = vtanh.f32 %v11711_v55  ;;  %v11712_v17 = vadd.f32 %v15431_v49, %v18292_v8  ;;  %v18676_v49 = vld [vmem:[#allocation55_spill] sm:$0xff] }
0x11f3   :  { %16561 = vtanh.f32 %v11709_v14  ;;  %v11710_v43 = vadd.f32 %v15432_v59, %v18292_v8 }
0x11f4   :  { %v16552_v22 = vpop.eup %16551  ;;  %16563 = vtanh.f32 %v11712_v17 }
0x11f5   :  { %v16554_v26 = vpop.eup %16553  ;;  %11835 = vst [vmem:[%s18660_s3 + $0x130] sm:$0xff] %v16552_v22  ;;  %16565 = vtanh.f32 %v11710_v43  ;;  %v15355_v15 = vpop.f32.mrb[232].mxu1 }
0x11f6   :  { %v16556_v2 = vpop.eup %16555  ;;  %11833 = vst [vmem:[%s18660_s3 + $0x120] sm:$0xff] %v16554_v26  ;;  %v15433_v50 = vadd.f32 %v15355_v15, %v18665_v10  ;;  %v11519_v42 = vpop.f32.mrb[233].mxu1  ;;  %v18677_v26 = vld [vmem:[#allocation56_spill] sm:$0xff] }
0x11f7   :  { %v16558_v35 = vpop.eup %16557  ;;  %11836 = vst [vmem:[%s18660_s3 + $0x138] sm:$0xff] %v16556_v2  ;;  %v15434_v52 = vadd.f32 %v11519_v42, %v18666_v51  ;;  %v15356_v34 = vpop.f32.mrb[234].mxu1 }
0x11f8   :  { %11834 = vst [vmem:[%s18660_s3 + $0x128] sm:$0xff] %v16558_v35  ;;  %v11715_v53 = vadd.f32 %v15433_v50, %v18292_v8  ;;  %v15435_v1 = vadd.f32 %v15356_v34, %v18667_v18  ;;  %v11522_v3 = vpop.f32.mrb[235].mxu1  ;;  %v18678_v50 = vld [vmem:[#allocation57_spill] sm:$0xff] }
0x11f9   :  { %v11713_v63 = vadd.f32 %v15434_v52, %v18292_v8  ;;  %v15436_v20 = vadd.f32 %v11522_v3, %v18668_v5  ;;  %v18679_v52 = vld [vmem:[#allocation58_spill] sm:$0xff] }
0x11fa   :  { %16567 = vtanh.f32 %v11715_v53  ;;  %v11716_v60 = vadd.f32 %v15435_v1, %v18292_v8  ;;  %v18680_v1 = vld [vmem:[#allocation59_spill] sm:$0xff] }
0x11fb   :  { %16569 = vtanh.f32 %v11713_v63  ;;  %v11714_v19 = vadd.f32 %v15436_v20, %v18292_v8 }
0x11fc   :  { %v16560_v27 = vpop.eup %16559  ;;  %16571 = vtanh.f32 %v11716_v60 }
0x11fd   :  { %v16562_v7 = vpop.eup %16561  ;;  %11839 = vst [vmem:[%s18660_s3 + $0x150] sm:$0xff] %v16560_v27  ;;  %16573 = vtanh.f32 %v11714_v19  ;;  %v15359_v25 = vpop.f32.mrb[236].mxu1 }
0x11fe   :  { %v16564_v62 = vpop.eup %16563  ;;  %11837 = vst [vmem:[%s18660_s3 + $0x140] sm:$0xff] %v16562_v7  ;;  %v15437_v46 = vadd.f32 %v15359_v25, %v18669_v61  ;;  %v11535_v40 = vpop.f32.mrb[237].mxu1  ;;  %v18681_v7 = vld [vmem:[#allocation60_spill] sm:$0xff] }
0x11ff   :  { %v16566_v41 = vpop.eup %16565  ;;  %11840 = vst [vmem:[%s18660_s3 + $0x158] sm:$0xff] %v16564_v62  ;;  %v15438_v38 = vadd.f32 %v11535_v40, %v18670_v33  ;;  %v15360_v30 = vpop.f32.mrb[238].mxu1 }
0x1200   :  { %11838 = vst [vmem:[%s18660_s3 + $0x148] sm:$0xff] %v16566_v41  ;;  %v11719_v47 = vadd.f32 %v15437_v46, %v18292_v8  ;;  %v15439_v37 = vadd.f32 %v15360_v30, %v18671_v56  ;;  %v11538_v23 = vpop.f32.mrb[239].mxu1  ;;  %v18682_v46 = vld [vmem:[#allocation61_spill] sm:$0xff] }
0x1201   :  { %v11717_v4 = vadd.f32 %v15438_v38, %v18292_v8  ;;  %v15440_v44 = vadd.f32 %v11538_v23, %v18672_v9  ;;  %v18683_v38 = vld [vmem:[#allocation62_spill] sm:$0xff] }
0x1202   :  { %16575 = vtanh.f32 %v11719_v47  ;;  %v11720_v45 = vadd.f32 %v15439_v37, %v18292_v8  ;;  %v18684_v37 = vld [vmem:[#allocation63_spill] sm:$0xff] }
0x1203   :  { %16577 = vtanh.f32 %v11717_v4  ;;  %v11718_v12 = vadd.f32 %v15440_v44, %v18292_v8 }
0x1204   :  { %v16568_v57 = vpop.eup %16567  ;;  %16579 = vtanh.f32 %v11720_v45 }
0x1205   :  { %v16570_v48 = vpop.eup %16569  ;;  %11843 = vst [vmem:[%s18660_s3 + $0x170] sm:$0xff] %v16568_v57  ;;  %16581 = vtanh.f32 %v11718_v12  ;;  %v15363_v31 = vpop.f32.mrb[240].mxu1 }
0x1206   :  { %v16572_v24 = vpop.eup %16571  ;;  %11841 = vst [vmem:[%s18660_s3 + $0x160] sm:$0xff] %v16570_v48  ;;  %v15441_v36 = vadd.f32 %v15363_v31, %v18673_v54  ;;  %v11551_v32 = vpop.f32.mrb[241].mxu1 }
0x1207   :  { %v16574_v28 = vpop.eup %16573  ;;  %11844 = vst [vmem:[%s18660_s3 + $0x178] sm:$0xff] %v16572_v24  ;;  %v15442_v6 = vadd.f32 %v11551_v32, %v18674_v29  ;;  %v15364_v21 = vpop.f32.mrb[242].mxu1 }
0x1208   :  { %11842 = vst [vmem:[%s18660_s3 + $0x168] sm:$0xff] %v16574_v28  ;;  %v11723_v0 = vadd.f32 %v15441_v36, %v18292_v8  ;;  %v15443_v13 = vadd.f32 %v15364_v21, %v18675_v16  ;;  %v11554_v55 = vpop.f32.mrb[243].mxu1 }
0x1209   :  { %v11721_v11 = vadd.f32 %v15442_v6, %v18292_v8  ;;  %v15444_v58 = vadd.f32 %v11554_v55, %v18676_v49 }
0x120a   :  { %16583 = vtanh.f32 %v11723_v0  ;;  %v11724_v14 = vadd.f32 %v15443_v13, %v18292_v8 }
0x120b   :  { %16585 = vtanh.f32 %v11721_v11  ;;  %v11722_v39 = vadd.f32 %v15444_v58, %v18292_v8 }
0x120c   :  { %v16576_v59 = vpop.eup %16575  ;;  %16587 = vtanh.f32 %v11724_v14 }
0x120d   :  { %v16578_v17 = vpop.eup %16577  ;;  %11847 = vst [vmem:[%s18660_s3 + $0x190] sm:$0xff] %v16576_v59  ;;  %16589 = vtanh.f32 %v11722_v39  ;;  %v15367_v43 = vpop.f32.mrb[244].mxu1 }
0x120e   :  { %v16580_v22 = vpop.eup %16579  ;;  %11845 = vst [vmem:[%s18660_s3 + $0x180] sm:$0xff] %v16578_v17  ;;  %v15445_v15 = vadd.f32 %v15367_v43, %v18677_v26  ;;  %v11567_v2 = vpop.f32.mrb[245].mxu1 }
0x120f   :  { %v16582_v10 = vpop.eup %16581  ;;  %11848 = vst [vmem:[%s18660_s3 + $0x198] sm:$0xff] %v16580_v22  ;;  %v15446_v42 = vadd.f32 %v11567_v2, %v18678_v50  ;;  %v15368_v35 = vpop.f32.mrb[246].mxu1 }
0x1210   :  { %11846 = vst [vmem:[%s18660_s3 + $0x188] sm:$0xff] %v16582_v10  ;;  %v11727_v51 = vadd.f32 %v15445_v15, %v18292_v8  ;;  %v15447_v34 = vadd.f32 %v15368_v35, %v18679_v52  ;;  %v11570_v53 = vpop.f32.mrb[247].mxu1 }
0x1211   :  { %v11725_v18 = vadd.f32 %v15446_v42, %v18292_v8  ;;  %v15448_v3 = vadd.f32 %v11570_v53, %v18680_v1 }
0x1212   :  { %16591 = vtanh.f32 %v11727_v51  ;;  %v11728_v63 = vadd.f32 %v15447_v34, %v18292_v8 }
0x1213   :  { %16593 = vtanh.f32 %v11725_v18  ;;  %v11726_v5 = vadd.f32 %v15448_v3, %v18292_v8 }
0x1214   :  { %v16584_v20 = vpop.eup %16583  ;;  %16595 = vtanh.f32 %v11728_v63 }
0x1215   :  { %v16586_v60 = vpop.eup %16585  ;;  %11851 = vst [vmem:[%s18660_s3 + $0x1b0] sm:$0xff] %v16584_v20  ;;  %16597 = vtanh.f32 %v11726_v5  ;;  %v15371_v19 = vpop.f32.mrb[248].mxu1 }
0x1216   :  { %v16588_v27 = vpop.eup %16587  ;;  %11849 = vst [vmem:[%s18660_s3 + $0x1a0] sm:$0xff] %v16586_v60  ;;  %v15449_v25 = vadd.f32 %v15371_v19, %v18681_v7  ;;  %v11583_v62 = vpop.f32.mrb[249].mxu1 }
0x1217   :  { %v16590_v61 = vpop.eup %16589  ;;  %11852 = vst [vmem:[%s18660_s3 + $0x1b8] sm:$0xff] %v16588_v27  ;;  %v15450_v40 = vadd.f32 %v11583_v62, %v18682_v46  ;;  %v15372_v41 = vpop.f32.mrb[250].mxu1 }
0x1218   :  { %11850 = vst [vmem:[%s18660_s3 + $0x1a8] sm:$0xff] %v16590_v61  ;;  %v11731_v33 = vadd.f32 %v15449_v25, %v18292_v8  ;;  %v15451_v30 = vadd.f32 %v15372_v41, %v18683_v38  ;;  %v11586_v47 = vpop.f32.mrb[251].mxu1 }
0x1219   :  { %v11729_v56 = vadd.f32 %v15450_v40, %v18292_v8  ;;  %v15452_v23 = vadd.f32 %v11586_v47, %v18684_v37 }
0x121a   :  { %16599 = vtanh.f32 %v11731_v33  ;;  %v11732_v4 = vadd.f32 %v15451_v30, %v18292_v8 }
0x121b   :  { %16601 = vtanh.f32 %v11729_v56  ;;  %v11730_v9 = vadd.f32 %v15452_v23, %v18292_v8 }
0x121c   :  { %v16592_v44 = vpop.eup %16591  ;;  %16603 = vtanh.f32 %v11732_v4 }
0x121d   :  { %v16594_v45 = vpop.eup %16593  ;;  %11855 = vst [vmem:[%s18660_s3 + $0x1d0] sm:$0xff] %v16592_v44  ;;  %16605 = vtanh.f32 %v11730_v9 }
0x121e   :  { %v16596_v12 = vpop.eup %16595  ;;  %11853 = vst [vmem:[%s18660_s3 + $0x1c0] sm:$0xff] %v16594_v45 }
0x121f   :  { %v16598_v57 = vpop.eup %16597  ;;  %11856 = vst [vmem:[%s18660_s3 + $0x1d8] sm:$0xff] %v16596_v12 }
0x1220   :  { %11854 = vst [vmem:[%s18660_s3 + $0x1c8] sm:$0xff] %v16598_v57 }
0x1224   :  { %v16600_v8 = vpop.eup %16599 }
0x1225   :  { %v16602_v48 = vpop.eup %16601  ;;  %11859 = vst [vmem:[%s18660_s3 + $0x1f0] sm:$0xff] %v16600_v8 }
0x1226   :  { %v16604_v31 = vpop.eup %16603  ;;  %11857 = vst [vmem:[%s18660_s3 + $0x1e0] sm:$0xff] %v16602_v48 }
0x1227   :  { %v16606_v24 = vpop.eup %16605  ;;  %11860 = vst [vmem:[%s18660_s3 + $0x1f8] sm:$0xff] %v16604_v31 }
0x1228   :  { %11858 = vst [vmem:[%s18660_s3 + $0x1e8] sm:$0xff] %v16606_v24 }
0x1229   :  { %11865 = vsyncpa [#allocation6], 1 }
0x122a   :  { %11866 = vsyncpa [#allocation8], 1 }
0x122b   :  { %11867 = vsyncpa [#allocation11], 1 }
0x122c   :  { %11868 = vsyncpa [#allocation14], 1 }
0x122d   :  { %11869 = vsyncpa [#allocation17], 1 }
0x122e   :  { %11870 = vsyncpa [#allocation20], 1 }
0x122f   :  { %11871 = vsyncpa [#allocation23], 1 }
0x1230   :  { %11872 = vsyncmov [#allocation4] }
0x1233   :  { %s11873_s30 = vpop.sfrf %11872 }
0x1234   :  { %p12425_p8 = scmp.ne.s32.totalorder %s11873_s30, 0 }
0x1236   :  { %11877 = shalt.err (%p12425_p8)  }
0x1237   :  { %11879 = vsyncmov [#allocation4 + $0x1] }
0x123a   :  { %s11880_s18 = vpop.sfrf %11879 }
0x123b   :  { %p12426_p9 = scmp.ne.s32.totalorder %s11880_s18, 0 }
0x123d   :  { %11884 = shalt.err (%p12426_p9)  }

</bundles_post_ra>
